<compile_context>
chip_gen: v5e
topology: v5e:2x2
jax: 0.10.0
libtpu: 0.0.40
codegen_flags: <defaults>
</compile_context>

<pallas_src>
import numpy as np

import jax
import jax.numpy as jnp
from jax import lax
from jax.experimental import pallas as pl
from jax.experimental.pallas import tpu as pltpu

_LEAK = 0.1                      # nn.LeakyReLU(0.1)
_VMEM_LIMIT = 32 * 1024 * 1024   # safe scoped limit on v5e/v6e/v7x; working set ~5 MB


def _ceil_to(n, m):
    return ((n + m - 1) // m) * m


def _leaky(x):
    return jnp.where(x >= 0, x, _LEAK * x)


# ----------------------------------------------------------------------------
# In-kernel stride-2 4x4 conv (pad=1) on a flattened (Nin, Cin) bf16 activation.
#   s_ref: (16, Nout, Nin) bf16 0/1 selection matrices (one per kernel tap; rows that would
#          read the zero padding are all-zero)            -> "shift" done on the MXU
#   w_ref: (16, Cin, Cout) bf16 per-tap weights,  b_ref: (1, Cout) f32
#   out = LeakyReLU( sum_t (S_t @ act) @ W_t + b )  ->  (Nout, Cout) bf16
# ----------------------------------------------------------------------------
def _conv4x4s2(act, s_ref, w_ref, b_ref):
    acc = None
    for t in range(16):
        z = jnp.dot(s_ref[t], act, preferred_element_type=jnp.float32)
        z = z.astype(jnp.bfloat16)  # exact: each row is a row of `act` or zeros
        c = jnp.dot(z, w_ref[t], preferred_element_type=jnp.float32)
        acc = c if acc is None else acc + c
    acc = acc + b_ref[...]
    return _leaky(acc).astype(jnp.bfloat16)


# ----------------------------------------------------------------------------
# Fused Discriminator kernel: one grid step == one batch element.
# ----------------------------------------------------------------------------
def _disc_kernel(p1_ref, w1_ref, b1_ref,
                 s2_ref, w2_ref, b2_ref,
                 s3_ref, w3_ref, b3_ref,
                 wq_ref, bq_ref, wk_ref, bk_ref, wv_ref, bv_ref,
                 wl_ref, gamma_ref, bl_ref, o_ref):
    # ---- l1: precomputed im2col (256, 64) @ (64, 64) + bias + LeakyReLU -> 16x16x64 map --
    a = jnp.dot(p1_ref[0], w1_ref[...], preferred_element_type=jnp.float32) + b1_ref[...]
    a = _leaky(a).astype(jnp.bfloat16)                      # (256, 64)

    # ---- l2 / l3: in-VMEM shifted-matmul convs ----
    a = _conv4x4s2(a, s2_ref, w2_ref, b2_ref)               # (64, 128)   8x8 map
    a = _conv4x4s2(a, s3_ref, w3_ref, b3_ref)               # (16, 256)   4x4 map

    # ---- Self_Attn(256) over the 16 spatial positions ----
    af = a.astype(jnp.float32)
    q = jnp.dot(a, wq_ref[...], preferred_element_type=jnp.float32) + bq_ref[...]   # (16, 32)
    k = jnp.dot(a, wk_ref[...], preferred_element_type=jnp.float32) + bk_ref[...]   # (16, 32)
    v = jnp.dot(a, wv_ref[...], preferred_element_type=jnp.float32) + bv_ref[...]   # (16, 256)
    energy = lax.dot_general(q, k, (((1,), (1,)), ((), ())),
                             preferred_element_type=jnp.float32)                    # (16, 16)
    e = jnp.exp(energy - jnp.max(energy, axis=-1, keepdims=True))
    attn = e / jnp.sum(e, axis=-1, keepdims=True)           # exact softmax (f32)
    ctx = jnp.dot(attn, v, preferred_element_type=jnp.float32)                      # (16, 256)
    y = gamma_ref[0] * ctx + af                              # gamma from SMEM scalar

    # ---- last_feature (Conv2d(C, z, 4) on the 4x4 map) fused offline with last_ln ----
    logit = jnp.sum(y * wl_ref[...]) + bl_ref[0]
    o_ref[0] = jnp.full((1, 128), logit, jnp.float32)        # lane-dense output block


# ----------------------------------------------------------------------------
# Wrapper-side glue (plain JAX, tiny tensors): NCHW->NHWC, l1 im2col, final slice.
# ----------------------------------------------------------------------------
def _im2col_l1(x_nhwc):
    """4x4 / stride-2 / pad-1 im2col of the raw input; columns (kh, kw, cin), K padded to 64."""
    B, H, W, C = x_nhwc.shape
    Ho, Wo = H // 2, W // 2
    K = 16 * C
    xp = jnp.pad(x_nhwc, ((0, 0), (1, 1), (1, 1), (0, 0)))
    cols = []
    for ki in range(4):
        for kj in range(4):
            cols.append(xp[:, ki:ki + 2 * Ho:2, kj:kj + 2 * Wo:2, :])
    p = jnp.stack(cols, axis=3).reshape(B, Ho * Wo, K)
    return jnp.pad(p, ((0, 0), (0, 0), (0, _ceil_to(K, 64) - K))).astype(jnp.bfloat16)


def discriminator_forward(x_nchw, params):
    x = jnp.transpose(x_nchw, (0, 2, 3, 1)).astype(jnp.bfloat16)   # one NCHW->NHWC at entry
    p1 = _im2col_l1(x)                                             # (B, 256, 64) bf16
    B = p1.shape[0]
    w1, b1 = params["l1"]
    s2, w2, b2 = params["l2"]
    s3, w3, b3 = params["l3"]
    at = params["attn1"]
    wl, bl = params["last"]

    c2 = lambda b: (0, 0)
    c3 = lambda b: (0, 0, 0)
    out = pl.pallas_call(
        _disc_kernel,
        out_shape=jax.ShapeDtypeStruct((B, 1, 128), jnp.float32),
        grid=(B,),
        in_specs=[
            pl.BlockSpec((1,) + p1.shape[1:], lambda b: (b, 0, 0)),
            pl.BlockSpec(w1.shape, c2),
            pl.BlockSpec(b1.shape, c2),
            pl.BlockSpec(s2.shape, c3),
            pl.BlockSpec(w2.shape, c3),
            pl.BlockSpec(b2.shape, c2),
            pl.BlockSpec(s3.shape, c3),
            pl.BlockSpec(w3.shape, c3),
            pl.BlockSpec(b3.shape, c2),
            pl.BlockSpec(at["wq"].shape, c2),
            pl.BlockSpec(at["bq"].shape, c2),
            pl.BlockSpec(at["wk"].shape, c2),
            pl.BlockSpec(at["bk"].shape, c2),
            pl.BlockSpec(at["wv"].shape, c2),
            pl.BlockSpec(at["bv"].shape, c2),
            pl.BlockSpec(wl.shape, c2),
            pl.BlockSpec(memory_space=pltpu.MemorySpace.SMEM),   # gamma (1,) f32
            pl.BlockSpec(memory_space=pltpu.MemorySpace.SMEM),   # fused last bias (1,) f32
        ],
        out_specs=pl.BlockSpec((1, 1, 128), lambda b: (b, 0, 0)),
        compiler_params=pltpu.CompilerParams(
            dimension_semantics=("parallel",),
            vmem_limit_bytes=_VMEM_LIMIT,
        ),
    )(p1, w1, b1, s2, w2, b2, s3, w3, b3,
      at["wq"], at["bq"], at["wk"], at["bk"], at["wv"], at["bv"],
      wl, at["gamma"], bl)
    return out[:, 0, :1]                                            # (B, 1)


# ----------------------------------------------------------------------------
# Parameter preprocessing (plain JAX / numpy, done once, not the hot path).
# ----------------------------------------------------------------------------
def spectral_normalize(w, key, n_iter=1, eps=1e-12):
    """Single power-iteration spectral norm (matches SAGAN SpectralNorm forward)."""
    # TODO(synk): PyTorch SpectralNorm persists `u` across forward passes; here it is a
    # one-shot parameter preprocessing step (fine for a single inference forward).
    cout = w.shape[0]
    w_mat = w.reshape(cout, -1)
    u = jax.random.normal(key, (cout,), jnp.float32)
    u = u / (jnp.linalg.norm(u) + eps)
    v = None
    for _ in range(n_iter):
        v = w_mat.T @ u
        v = v / (jnp.linalg.norm(v) + eps)
        u = w_mat @ v
        u = u / (jnp.linalg.norm(u) + eps)
    sigma = u @ (w_mat @ v)
    return w / sigma


def _build_shift_mats(H, W, k=4, s=2, p=1):
    """0/1 selection matrices S[t] (Nout, Nin): S_t @ act == activation rows for kernel tap t."""
    Ho = (H + 2 * p - k) // s + 1
    Wo = (W + 2 * p - k) // s + 1
    S = np.zeros((k * k, Ho * Wo, H * W), np.float32)
    for ki in range(k):
        for kj in range(k):
            t = ki * k + kj
            for ho in range(Ho):
                hi = s * ho + ki - p
                if hi < 0 or hi >= H:
                    continue
                for wo in range(Wo):
                    wi = s * wo + kj - p
                    if 0 <= wi < W:
                        S[t, ho * Wo + wo, hi * W + wi] = 1.0
    return jnp.asarray(S, jnp.bfloat16)


def prep_conv_l1(w, b):
    """(Cout, 3, 4, 4) -> ((Kpad, Cout) bf16, (1, Cout) f32), rows in (kh, kw, cin) order."""
    cout, cin, kh, kw = w.shape
    K = kh * kw * cin
    m = jnp.transpose(w, (2, 3, 1, 0)).reshape(K, cout)
    m = jnp.pad(m, ((0, _ceil_to(K, 64) - K), (0, 0)))
    return m.astype(jnp.bfloat16), b.reshape(1, cout).astype(jnp.float32)


def prep_conv_stack(w, b, H, W):
    """(Cout, Cin, 4, 4) -> (S (16, Nout, Nin) bf16, W (16, Cin, Cout) bf16, b (1, Cout) f32)."""
    cout, cin, kh, kw = w.shape
    S = _build_shift_mats(H, W, k=kh, s=2, p=1)
    m = jnp.transpose(w, (2, 3, 1, 0)).reshape(kh * kw, cin, cout).astype(jnp.bfloat16)
    return S, m, b.reshape(1, cout).astype(jnp.float32)


def prep_attn(wq, bq, wk, bk, wv, bv, gamma):
    """1x1-conv weights (Cout, Cin) -> (Cin, Cout) bf16 (no lane padding: kernel-internal)."""
    return {
        "wq": wq.T.astype(jnp.bfloat16), "bq": bq.reshape(1, -1).astype(jnp.float32),
        "wk": wk.T.astype(jnp.bfloat16), "bk": bk.reshape(1, -1).astype(jnp.float32),
        "wv": wv.T.astype(jnp.bfloat16), "bv": bv.reshape(1, -1).astype(jnp.float32),
        "gamma": jnp.asarray([gamma], jnp.float32),          # SMEM scalar
    }


def prep_last(w_conv, b_conv, w_ln, b_ln):
    """Fuse last_feature (Conv2d(C, z, 4) over the full 4x4 map) with last_ln (Linear z->1)."""
    z, C, kh, kw = w_conv.shape
    m = jnp.transpose(w_conv, (2, 3, 1, 0)).reshape(kh * kw * C, z)     # rows = (kh, kw, c)
    w_eff = m @ w_ln[0]                                                 # (16*C,)
    b_eff = (b_conv @ w_ln[0] + b_ln[0]).reshape(1)
    return (w_eff.reshape(kh * kw, C).astype(jnp.float32),              # (16, C) matches (n, c)
            b_eff.astype(jnp.float32))


def init_params(key, conv_dim=64, z_dim=100, gamma=0.0):
    ks = jax.random.split(key, 20)

    def nrm(k, shape, scale=0.05):
        return scale * jax.random.normal(k, shape, jnp.float32)

    p = {}
    p["l1"] = prep_conv_l1(spectral_normalize(nrm(ks[0], (conv_dim, 3, 4, 4)), ks[1]),
                           nrm(ks[2], (conv_dim,)))
    p["l2"] = prep_conv_stack(spectral_normalize(nrm(ks[3], (conv_dim * 2, conv_dim, 4, 4)), ks[4]),
                              nrm(ks[5], (conv_dim * 2,)), H=16, W=16)
    p["l3"] = prep_conv_stack(spectral_normalize(nrm(ks[6], (conv_dim * 4, conv_dim * 2, 4, 4)), ks[7]),
                              nrm(ks[8], (conv_dim * 4,)), H=8, W=8)
    C = conv_dim * 4            # 256 -- matches the hard-coded Self_Attn(256)
    C8 = C // 8
    # gamma defaults to 0, exactly like the module's nn.Parameter(torch.zeros(1)) init.
    p["attn1"] = prep_attn(nrm(ks[9], (C8, C)), nrm(ks[10], (C8,)),
                           nrm(ks[11], (C8, C)), nrm(ks[12], (C8,)),
                           nrm(ks[13], (C, C)), nrm(ks[14], (C,)),
                           gamma)
    p["last"] = prep_last(nrm(ks[15], (z_dim, C, 4, 4)), nrm(ks[16], (z_dim,)),
                          nrm(ks[17], (1, z_dim)), nrm(ks[18], (1,)))
    return p


if __name__ == "__main__":
    key = jax.random.PRNGKey(0)
    k_x, k_p = jax.random.split(key)

    B = 2
    # image_size=32 (non-128 branch): 32 -> 16 -> 8 -> 4 -> Self_Attn(256) -> fused last layers
    x = jax.random.normal(k_x, (B, 3, 32, 32), jnp.float32)
    params = init_params(k_p)

    fwd = jax.jit(discriminator_forward)
    out = jax.block_until_ready(fwd(x, params))
    assert out.shape == (B, 1), out.shape
    assert bool(jnp.all(jnp.isfinite(out)))
    print("KERNEL_OK")
</pallas_src>

<mosaic_0001>
module attributes {stable_mosaic.version = 11 : i64} {
  func.func @_disc_kernel(%arg0: i32, %arg1: memref<1x256x64xbf16, #tpu.memory_space<vmem>>, %arg2: memref<64x64xbf16, #tpu.memory_space<vmem>>, %arg3: memref<1x64xf32, #tpu.memory_space<vmem>>, %arg4: memref<16x64x256xbf16, #tpu.memory_space<vmem>>, %arg5: memref<16x64x128xbf16, #tpu.memory_space<vmem>>, %arg6: memref<1x128xf32, #tpu.memory_space<vmem>>, %arg7: memref<16x16x64xbf16, #tpu.memory_space<vmem>>, %arg8: memref<16x128x256xbf16, #tpu.memory_space<vmem>>, %arg9: memref<1x256xf32, #tpu.memory_space<vmem>>, %arg10: memref<256x32xbf16, #tpu.memory_space<vmem>>, %arg11: memref<1x32xf32, #tpu.memory_space<vmem>>, %arg12: memref<256x32xbf16, #tpu.memory_space<vmem>>, %arg13: memref<1x32xf32, #tpu.memory_space<vmem>>, %arg14: memref<256x256xbf16, #tpu.memory_space<vmem>>, %arg15: memref<1x256xf32, #tpu.memory_space<vmem>>, %arg16: memref<16x256xf32, #tpu.memory_space<vmem>>, %arg17: memref<1xf32, #tpu.memory_space<smem>>, %arg18: memref<1xf32, #tpu.memory_space<smem>>, %arg19: memref<1x1x128xf32, #tpu.memory_space<vmem>>) attributes {dimension_semantics = [#tpu.dimension_semantics<parallel>], iteration_bounds = array<i64: 2>, scalar_prefetch = 0 : i64, scratch_operands = 0 : i64, tpu.core_type = #tpu.core_type<tc>, window_params = [{transform_indices = @transform_0, window_bounds = array<i64: 1, 256, 64>}, {pipeline_mode = #tpu.pipeline_mode<synchronous>, transform_indices = @transform_1, window_bounds = array<i64: 64, 64>}, {pipeline_mode = #tpu.pipeline_mode<synchronous>, transform_indices = @transform_2, window_bounds = array<i64: 1, 64>}, {pipeline_mode = #tpu.pipeline_mode<synchronous>, transform_indices = @transform_3, window_bounds = array<i64: 16, 64, 256>}, {pipeline_mode = #tpu.pipeline_mode<synchronous>, transform_indices = @transform_4, window_bounds = array<i64: 16, 64, 128>}, {pipeline_mode = #tpu.pipeline_mode<synchronous>, transform_indices = @transform_5, window_bounds = array<i64: 1, 128>}, {pipeline_mode = #tpu.pipeline_mode<synchronous>, transform_indices = @transform_6, window_bounds = array<i64: 16, 16, 64>}, {pipeline_mode = #tpu.pipeline_mode<synchronous>, transform_indices = @transform_7, window_bounds = array<i64: 16, 128, 256>}, {pipeline_mode = #tpu.pipeline_mode<synchronous>, transform_indices = @transform_8, window_bounds = array<i64: 1, 256>}, {pipeline_mode = #tpu.pipeline_mode<synchronous>, transform_indices = @transform_9, window_bounds = array<i64: 256, 32>}, {pipeline_mode = #tpu.pipeline_mode<synchronous>, transform_indices = @transform_10, window_bounds = array<i64: 1, 32>}, {pipeline_mode = #tpu.pipeline_mode<synchronous>, transform_indices = @transform_11, window_bounds = array<i64: 256, 32>}, {pipeline_mode = #tpu.pipeline_mode<synchronous>, transform_indices = @transform_12, window_bounds = array<i64: 1, 32>}, {pipeline_mode = #tpu.pipeline_mode<synchronous>, transform_indices = @transform_13, window_bounds = array<i64: 256, 256>}, {pipeline_mode = #tpu.pipeline_mode<synchronous>, transform_indices = @transform_14, window_bounds = array<i64: 1, 256>}, {pipeline_mode = #tpu.pipeline_mode<synchronous>, transform_indices = @transform_15, window_bounds = array<i64: 16, 256>}, {transform_indices = @transform_16, window_bounds = array<i64: 1>}, {transform_indices = @transform_17, window_bounds = array<i64: 1>}, {transform_indices = @transform_18, window_bounds = array<i64: 1, 1, 128>}]} {
    %c0 = arith.constant 0 : index
    %c0_0 = arith.constant 0 : index
    %c0_1 = arith.constant 0 : index
    %0 = vector.load %arg1[%c0, %c0_0, %c0_1] : memref<1x256x64xbf16, #tpu.memory_space<vmem>>, vector<1x256x64xbf16>
    %1 = vector.shape_cast %0 : vector<1x256x64xbf16> to vector<256x64xbf16>
    %c0_2 = arith.constant 0 : index
    %c0_3 = arith.constant 0 : index
    %2 = vector.load %arg2[%c0_2, %c0_3] : memref<64x64xbf16, #tpu.memory_space<vmem>>, vector<64x64xbf16>
    %cst = arith.constant dense<0.000000e+00> : vector<256x64xf32>
    %3 = tpu.matmul %1, %2, %cst {dimension_numbers = #tpu.dot_dimension_numbers<[1], [0], [0], [1], [0, 0, 1, 1], [], []>} : vector<256x64xbf16>, vector<64x64xbf16>, vector<256x64xf32> -> vector<256x64xf32>
    %c0_4 = arith.constant 0 : index
    %c0_5 = arith.constant 0 : index
    %4 = vector.load %arg3[%c0_4, %c0_5] : memref<1x64xf32, #tpu.memory_space<vmem>>, vector<1x64xf32>
    %5 = vector.broadcast %4 : vector<1x64xf32> to vector<256x64xf32>
    %6 = arith.addf %3, %5 : vector<256x64xf32>
    %cst_6 = arith.constant 0.000000e+00 : f32
    %7 = vector.broadcast %cst_6 : f32 to vector<256x64xf32>
    %8 = arith.cmpf oge, %6, %7 : vector<256x64xf32>
    %cst_7 = arith.constant 1.000000e-01 : f32
    %9 = vector.broadcast %cst_7 : f32 to vector<256x64xf32>
    %10 = arith.mulf %9, %6 : vector<256x64xf32>
    %11 = arith.select %8, %6, %10 : vector<256x64xi1>, vector<256x64xf32>
    %12 = arith.truncf %11 : vector<256x64xf32> to vector<256x64xbf16>
    %c0_8 = arith.constant 0 : index
    %c0_9 = arith.constant 0 : index
    %c0_10 = arith.constant 0 : index
    %13 = vector.load %arg4[%c0_8, %c0_9, %c0_10] : memref<16x64x256xbf16, #tpu.memory_space<vmem>>, vector<1x64x256xbf16>
    %14 = vector.shape_cast %13 : vector<1x64x256xbf16> to vector<64x256xbf16>
    %cst_11 = arith.constant dense<0.000000e+00> : vector<64x64xf32>
    %15 = tpu.matmul %14, %12, %cst_11 {dimension_numbers = #tpu.dot_dimension_numbers<[1], [0], [0], [1], [0, 0, 1, 1], [], []>} : vector<64x256xbf16>, vector<256x64xbf16>, vector<64x64xf32> -> vector<64x64xf32>
    %16 = arith.truncf %15 : vector<64x64xf32> to vector<64x64xbf16>
    %c0_12 = arith.constant 0 : index
    %c0_13 = arith.constant 0 : index
    %c0_14 = arith.constant 0 : index
    %17 = vector.load %arg5[%c0_12, %c0_13, %c0_14] : memref<16x64x128xbf16, #tpu.memory_space<vmem>>, vector<1x64x128xbf16>
    %18 = vector.shape_cast %17 : vector<1x64x128xbf16> to vector<64x128xbf16>
    %cst_15 = arith.constant dense<0.000000e+00> : vector<64x128xf32>
    %19 = tpu.matmul %16, %18, %cst_15 {dimension_numbers = #tpu.dot_dimension_numbers<[1], [0], [0], [1], [0, 0, 1, 1], [], []>} : vector<64x64xbf16>, vector<64x128xbf16>, vector<64x128xf32> -> vector<64x128xf32>
    %c1 = arith.constant 1 : index
    %c0_16 = arith.constant 0 : index
    %c0_17 = arith.constant 0 : index
    %20 = vector.load %arg4[%c1, %c0_16, %c0_17] : memref<16x64x256xbf16, #tpu.memory_space<vmem>>, vector<1x64x256xbf16>
    %21 = vector.shape_cast %20 : vector<1x64x256xbf16> to vector<64x256xbf16>
    %cst_18 = arith.constant dense<0.000000e+00> : vector<64x64xf32>
    %22 = tpu.matmul %21, %12, %cst_18 {dimension_numbers = #tpu.dot_dimension_numbers<[1], [0], [0], [1], [0, 0, 1, 1], [], []>} : vector<64x256xbf16>, vector<256x64xbf16>, vector<64x64xf32> -> vector<64x64xf32>
    %23 = arith.truncf %22 : vector<64x64xf32> to vector<64x64xbf16>
    %c1_19 = arith.constant 1 : index
    %c0_20 = arith.constant 0 : index
    %c0_21 = arith.constant 0 : index
    %24 = vector.load %arg5[%c1_19, %c0_20, %c0_21] : memref<16x64x128xbf16, #tpu.memory_space<vmem>>, vector<1x64x128xbf16>
    %25 = vector.shape_cast %24 : vector<1x64x128xbf16> to vector<64x128xbf16>
    %cst_22 = arith.constant dense<0.000000e+00> : vector<64x128xf32>
    %26 = tpu.matmul %23, %25, %cst_22 {dimension_numbers = #tpu.dot_dimension_numbers<[1], [0], [0], [1], [0, 0, 1, 1], [], []>} : vector<64x64xbf16>, vector<64x128xbf16>, vector<64x128xf32> -> vector<64x128xf32>
    %27 = arith.addf %19, %26 : vector<64x128xf32>
    %c2 = arith.constant 2 : index
    %c0_23 = arith.constant 0 : index
    %c0_24 = arith.constant 0 : index
    %28 = vector.load %arg4[%c2, %c0_23, %c0_24] : memref<16x64x256xbf16, #tpu.memory_space<vmem>>, vector<1x64x256xbf16>
    %29 = vector.shape_cast %28 : vector<1x64x256xbf16> to vector<64x256xbf16>
    %cst_25 = arith.constant dense<0.000000e+00> : vector<64x64xf32>
    %30 = tpu.matmul %29, %12, %cst_25 {dimension_numbers = #tpu.dot_dimension_numbers<[1], [0], [0], [1], [0, 0, 1, 1], [], []>} : vector<64x256xbf16>, vector<256x64xbf16>, vector<64x64xf32> -> vector<64x64xf32>
    %31 = arith.truncf %30 : vector<64x64xf32> to vector<64x64xbf16>
    %c2_26 = arith.constant 2 : index
    %c0_27 = arith.constant 0 : index
    %c0_28 = arith.constant 0 : index
    %32 = vector.load %arg5[%c2_26, %c0_27, %c0_28] : memref<16x64x128xbf16, #tpu.memory_space<vmem>>, vector<1x64x128xbf16>
    %33 = vector.shape_cast %32 : vector<1x64x128xbf16> to vector<64x128xbf16>
    %cst_29 = arith.constant dense<0.000000e+00> : vector<64x128xf32>
    %34 = tpu.matmul %31, %33, %cst_29 {dimension_numbers = #tpu.dot_dimension_numbers<[1], [0], [0], [1], [0, 0, 1, 1], [], []>} : vector<64x64xbf16>, vector<64x128xbf16>, vector<64x128xf32> -> vector<64x128xf32>
    %35 = arith.addf %27, %34 : vector<64x128xf32>
    %c3 = arith.constant 3 : index
    %c0_30 = arith.constant 0 : index
    %c0_31 = arith.constant 0 : index
    %36 = vector.load %arg4[%c3, %c0_30, %c0_31] : memref<16x64x256xbf16, #tpu.memory_space<vmem>>, vector<1x64x256xbf16>
    %37 = vector.shape_cast %36 : vector<1x64x256xbf16> to vector<64x256xbf16>
    %cst_32 = arith.constant dense<0.000000e+00> : vector<64x64xf32>
    %38 = tpu.matmul %37, %12, %cst_32 {dimension_numbers = #tpu.dot_dimension_numbers<[1], [0], [0], [1], [0, 0, 1, 1], [], []>} : vector<64x256xbf16>, vector<256x64xbf16>, vector<64x64xf32> -> vector<64x64xf32>
    %39 = arith.truncf %38 : vector<64x64xf32> to vector<64x64xbf16>
    %c3_33 = arith.constant 3 : index
    %c0_34 = arith.constant 0 : index
    %c0_35 = arith.constant 0 : index
    %40 = vector.load %arg5[%c3_33, %c0_34, %c0_35] : memref<16x64x128xbf16, #tpu.memory_space<vmem>>, vector<1x64x128xbf16>
    %41 = vector.shape_cast %40 : vector<1x64x128xbf16> to vector<64x128xbf16>
    %cst_36 = arith.constant dense<0.000000e+00> : vector<64x128xf32>
    %42 = tpu.matmul %39, %41, %cst_36 {dimension_numbers = #tpu.dot_dimension_numbers<[1], [0], [0], [1], [0, 0, 1, 1], [], []>} : vector<64x64xbf16>, vector<64x128xbf16>, vector<64x128xf32> -> vector<64x128xf32>
    %43 = arith.addf %35, %42 : vector<64x128xf32>
    %c4 = arith.constant 4 : index
    %c0_37 = arith.constant 0 : index
    %c0_38 = arith.constant 0 : index
    %44 = vector.load %arg4[%c4, %c0_37, %c0_38] : memref<16x64x256xbf16, #tpu.memory_space<vmem>>, vector<1x64x256xbf16>
    %45 = vector.shape_cast %44 : vector<1x64x256xbf16> to vector<64x256xbf16>
    %cst_39 = arith.constant dense<0.000000e+00> : vector<64x64xf32>
    %46 = tpu.matmul %45, %12, %cst_39 {dimension_numbers = #tpu.dot_dimension_numbers<[1], [0], [0], [1], [0, 0, 1, 1], [], []>} : vector<64x256xbf16>, vector<256x64xbf16>, vector<64x64xf32> -> vector<64x64xf32>
    %47 = arith.truncf %46 : vector<64x64xf32> to vector<64x64xbf16>
    %c4_40 = arith.constant 4 : index
    %c0_41 = arith.constant 0 : index
    %c0_42 = arith.constant 0 : index
    %48 = vector.load %arg5[%c4_40, %c0_41, %c0_42] : memref<16x64x128xbf16, #tpu.memory_space<vmem>>, vector<1x64x128xbf16>
    %49 = vector.shape_cast %48 : vector<1x64x128xbf16> to vector<64x128xbf16>
    %cst_43 = arith.constant dense<0.000000e+00> : vector<64x128xf32>
    %50 = tpu.matmul %47, %49, %cst_43 {dimension_numbers = #tpu.dot_dimension_numbers<[1], [0], [0], [1], [0, 0, 1, 1], [], []>} : vector<64x64xbf16>, vector<64x128xbf16>, vector<64x128xf32> -> vector<64x128xf32>
    %51 = arith.addf %43, %50 : vector<64x128xf32>
    %c5 = arith.constant 5 : index
    %c0_44 = arith.constant 0 : index
    %c0_45 = arith.constant 0 : index
    %52 = vector.load %arg4[%c5, %c0_44, %c0_45] : memref<16x64x256xbf16, #tpu.memory_space<vmem>>, vector<1x64x256xbf16>
    %53 = vector.shape_cast %52 : vector<1x64x256xbf16> to vector<64x256xbf16>
    %cst_46 = arith.constant dense<0.000000e+00> : vector<64x64xf32>
    %54 = tpu.matmul %53, %12, %cst_46 {dimension_numbers = #tpu.dot_dimension_numbers<[1], [0], [0], [1], [0, 0, 1, 1], [], []>} : vector<64x256xbf16>, vector<256x64xbf16>, vector<64x64xf32> -> vector<64x64xf32>
    %55 = arith.truncf %54 : vector<64x64xf32> to vector<64x64xbf16>
    %c5_47 = arith.constant 5 : index
    %c0_48 = arith.constant 0 : index
    %c0_49 = arith.constant 0 : index
    %56 = vector.load %arg5[%c5_47, %c0_48, %c0_49] : memref<16x64x128xbf16, #tpu.memory_space<vmem>>, vector<1x64x128xbf16>
    %57 = vector.shape_cast %56 : vector<1x64x128xbf16> to vector<64x128xbf16>
    %cst_50 = arith.constant dense<0.000000e+00> : vector<64x128xf32>
    %58 = tpu.matmul %55, %57, %cst_50 {dimension_numbers = #tpu.dot_dimension_numbers<[1], [0], [0], [1], [0, 0, 1, 1], [], []>} : vector<64x64xbf16>, vector<64x128xbf16>, vector<64x128xf32> -> vector<64x128xf32>
    %59 = arith.addf %51, %58 : vector<64x128xf32>
    %c6 = arith.constant 6 : index
    %c0_51 = arith.constant 0 : index
    %c0_52 = arith.constant 0 : index
    %60 = vector.load %arg4[%c6, %c0_51, %c0_52] : memref<16x64x256xbf16, #tpu.memory_space<vmem>>, vector<1x64x256xbf16>
    %61 = vector.shape_cast %60 : vector<1x64x256xbf16> to vector<64x256xbf16>
    %cst_53 = arith.constant dense<0.000000e+00> : vector<64x64xf32>
    %62 = tpu.matmul %61, %12, %cst_53 {dimension_numbers = #tpu.dot_dimension_numbers<[1], [0], [0], [1], [0, 0, 1, 1], [], []>} : vector<64x256xbf16>, vector<256x64xbf16>, vector<64x64xf32> -> vector<64x64xf32>
    %63 = arith.truncf %62 : vector<64x64xf32> to vector<64x64xbf16>
    %c6_54 = arith.constant 6 : index
    %c0_55 = arith.constant 0 : index
    %c0_56 = arith.constant 0 : index
    %64 = vector.load %arg5[%c6_54, %c0_55, %c0_56] : memref<16x64x128xbf16, #tpu.memory_space<vmem>>, vector<1x64x128xbf16>
    %65 = vector.shape_cast %64 : vector<1x64x128xbf16> to vector<64x128xbf16>
    %cst_57 = arith.constant dense<0.000000e+00> : vector<64x128xf32>
    %66 = tpu.matmul %63, %65, %cst_57 {dimension_numbers = #tpu.dot_dimension_numbers<[1], [0], [0], [1], [0, 0, 1, 1], [], []>} : vector<64x64xbf16>, vector<64x128xbf16>, vector<64x128xf32> -> vector<64x128xf32>
    %67 = arith.addf %59, %66 : vector<64x128xf32>
    %c7 = arith.constant 7 : index
    %c0_58 = arith.constant 0 : index
    %c0_59 = arith.constant 0 : index
    %68 = vector.load %arg4[%c7, %c0_58, %c0_59] : memref<16x64x256xbf16, #tpu.memory_space<vmem>>, vector<1x64x256xbf16>
    %69 = vector.shape_cast %68 : vector<1x64x256xbf16> to vector<64x256xbf16>
    %cst_60 = arith.constant dense<0.000000e+00> : vector<64x64xf32>
    %70 = tpu.matmul %69, %12, %cst_60 {dimension_numbers = #tpu.dot_dimension_numbers<[1], [0], [0], [1], [0, 0, 1, 1], [], []>} : vector<64x256xbf16>, vector<256x64xbf16>, vector<64x64xf32> -> vector<64x64xf32>
    %71 = arith.truncf %70 : vector<64x64xf32> to vector<64x64xbf16>
    %c7_61 = arith.constant 7 : index
    %c0_62 = arith.constant 0 : index
    %c0_63 = arith.constant 0 : index
    %72 = vector.load %arg5[%c7_61, %c0_62, %c0_63] : memref<16x64x128xbf16, #tpu.memory_space<vmem>>, vector<1x64x128xbf16>
    %73 = vector.shape_cast %72 : vector<1x64x128xbf16> to vector<64x128xbf16>
    %cst_64 = arith.constant dense<0.000000e+00> : vector<64x128xf32>
    %74 = tpu.matmul %71, %73, %cst_64 {dimension_numbers = #tpu.dot_dimension_numbers<[1], [0], [0], [1], [0, 0, 1, 1], [], []>} : vector<64x64xbf16>, vector<64x128xbf16>, vector<64x128xf32> -> vector<64x128xf32>
    %75 = arith.addf %67, %74 : vector<64x128xf32>
    %c8 = arith.constant 8 : index
    %c0_65 = arith.constant 0 : index
    %c0_66 = arith.constant 0 : index
    %76 = vector.load %arg4[%c8, %c0_65, %c0_66] : memref<16x64x256xbf16, #tpu.memory_space<vmem>>, vector<1x64x256xbf16>
    %77 = vector.shape_cast %76 : vector<1x64x256xbf16> to vector<64x256xbf16>
    %cst_67 = arith.constant dense<0.000000e+00> : vector<64x64xf32>
    %78 = tpu.matmul %77, %12, %cst_67 {dimension_numbers = #tpu.dot_dimension_numbers<[1], [0], [0], [1], [0, 0, 1, 1], [], []>} : vector<64x256xbf16>, vector<256x64xbf16>, vector<64x64xf32> -> vector<64x64xf32>
    %79 = arith.truncf %78 : vector<64x64xf32> to vector<64x64xbf16>
    %c8_68 = arith.constant 8 : index
    %c0_69 = arith.constant 0 : index
    %c0_70 = arith.constant 0 : index
    %80 = vector.load %arg5[%c8_68, %c0_69, %c0_70] : memref<16x64x128xbf16, #tpu.memory_space<vmem>>, vector<1x64x128xbf16>
    %81 = vector.shape_cast %80 : vector<1x64x128xbf16> to vector<64x128xbf16>
    %cst_71 = arith.constant dense<0.000000e+00> : vector<64x128xf32>
    %82 = tpu.matmul %79, %81, %cst_71 {dimension_numbers = #tpu.dot_dimension_numbers<[1], [0], [0], [1], [0, 0, 1, 1], [], []>} : vector<64x64xbf16>, vector<64x128xbf16>, vector<64x128xf32> -> vector<64x128xf32>
    %83 = arith.addf %75, %82 : vector<64x128xf32>
    %c9 = arith.constant 9 : index
    %c0_72 = arith.constant 0 : index
    %c0_73 = arith.constant 0 : index
    %84 = vector.load %arg4[%c9, %c0_72, %c0_73] : memref<16x64x256xbf16, #tpu.memory_space<vmem>>, vector<1x64x256xbf16>
    %85 = vector.shape_cast %84 : vector<1x64x256xbf16> to vector<64x256xbf16>
    %cst_74 = arith.constant dense<0.000000e+00> : vector<64x64xf32>
    %86 = tpu.matmul %85, %12, %cst_74 {dimension_numbers = #tpu.dot_dimension_numbers<[1], [0], [0], [1], [0, 0, 1, 1], [], []>} : vector<64x256xbf16>, vector<256x64xbf16>, vector<64x64xf32> -> vector<64x64xf32>
    %87 = arith.truncf %86 : vector<64x64xf32> to vector<64x64xbf16>
    %c9_75 = arith.constant 9 : index
    %c0_76 = arith.constant 0 : index
    %c0_77 = arith.constant 0 : index
    %88 = vector.load %arg5[%c9_75, %c0_76, %c0_77] : memref<16x64x128xbf16, #tpu.memory_space<vmem>>, vector<1x64x128xbf16>
    %89 = vector.shape_cast %88 : vector<1x64x128xbf16> to vector<64x128xbf16>
    %cst_78 = arith.constant dense<0.000000e+00> : vector<64x128xf32>
    %90 = tpu.matmul %87, %89, %cst_78 {dimension_numbers = #tpu.dot_dimension_numbers<[1], [0], [0], [1], [0, 0, 1, 1], [], []>} : vector<64x64xbf16>, vector<64x128xbf16>, vector<64x128xf32> -> vector<64x128xf32>
    %91 = arith.addf %83, %90 : vector<64x128xf32>
    %c10 = arith.constant 10 : index
    %c0_79 = arith.constant 0 : index
    %c0_80 = arith.constant 0 : index
    %92 = vector.load %arg4[%c10, %c0_79, %c0_80] : memref<16x64x256xbf16, #tpu.memory_space<vmem>>, vector<1x64x256xbf16>
    %93 = vector.shape_cast %92 : vector<1x64x256xbf16> to vector<64x256xbf16>
    %cst_81 = arith.constant dense<0.000000e+00> : vector<64x64xf32>
    %94 = tpu.matmul %93, %12, %cst_81 {dimension_numbers = #tpu.dot_dimension_numbers<[1], [0], [0], [1], [0, 0, 1, 1], [], []>} : vector<64x256xbf16>, vector<256x64xbf16>, vector<64x64xf32> -> vector<64x64xf32>
    %95 = arith.truncf %94 : vector<64x64xf32> to vector<64x64xbf16>
    %c10_82 = arith.constant 10 : index
    %c0_83 = arith.constant 0 : index
    %c0_84 = arith.constant 0 : index
    %96 = vector.load %arg5[%c10_82, %c0_83, %c0_84] : memref<16x64x128xbf16, #tpu.memory_space<vmem>>, vector<1x64x128xbf16>
    %97 = vector.shape_cast %96 : vector<1x64x128xbf16> to vector<64x128xbf16>
    %cst_85 = arith.constant dense<0.000000e+00> : vector<64x128xf32>
    %98 = tpu.matmul %95, %97, %cst_85 {dimension_numbers = #tpu.dot_dimension_numbers<[1], [0], [0], [1], [0, 0, 1, 1], [], []>} : vector<64x64xbf16>, vector<64x128xbf16>, vector<64x128xf32> -> vector<64x128xf32>
    %99 = arith.addf %91, %98 : vector<64x128xf32>
    %c11 = arith.constant 11 : index
    %c0_86 = arith.constant 0 : index
    %c0_87 = arith.constant 0 : index
    %100 = vector.load %arg4[%c11, %c0_86, %c0_87] : memref<16x64x256xbf16, #tpu.memory_space<vmem>>, vector<1x64x256xbf16>
    %101 = vector.shape_cast %100 : vector<1x64x256xbf16> to vector<64x256xbf16>
    %cst_88 = arith.constant dense<0.000000e+00> : vector<64x64xf32>
    %102 = tpu.matmul %101, %12, %cst_88 {dimension_numbers = #tpu.dot_dimension_numbers<[1], [0], [0], [1], [0, 0, 1, 1], [], []>} : vector<64x256xbf16>, vector<256x64xbf16>, vector<64x64xf32> -> vector<64x64xf32>
    %103 = arith.truncf %102 : vector<64x64xf32> to vector<64x64xbf16>
    %c11_89 = arith.constant 11 : index
    %c0_90 = arith.constant 0 : index
    %c0_91 = arith.constant 0 : index
    %104 = vector.load %arg5[%c11_89, %c0_90, %c0_91] : memref<16x64x128xbf16, #tpu.memory_space<vmem>>, vector<1x64x128xbf16>
    %105 = vector.shape_cast %104 : vector<1x64x128xbf16> to vector<64x128xbf16>
    %cst_92 = arith.constant dense<0.000000e+00> : vector<64x128xf32>
    %106 = tpu.matmul %103, %105, %cst_92 {dimension_numbers = #tpu.dot_dimension_numbers<[1], [0], [0], [1], [0, 0, 1, 1], [], []>} : vector<64x64xbf16>, vector<64x128xbf16>, vector<64x128xf32> -> vector<64x128xf32>
    %107 = arith.addf %99, %106 : vector<64x128xf32>
    %c12 = arith.constant 12 : index
    %c0_93 = arith.constant 0 : index
    %c0_94 = arith.constant 0 : index
    %108 = vector.load %arg4[%c12, %c0_93, %c0_94] : memref<16x64x256xbf16, #tpu.memory_space<vmem>>, vector<1x64x256xbf16>
    %109 = vector.shape_cast %108 : vector<1x64x256xbf16> to vector<64x256xbf16>
    %cst_95 = arith.constant dense<0.000000e+00> : vector<64x64xf32>
    %110 = tpu.matmul %109, %12, %cst_95 {dimension_numbers = #tpu.dot_dimension_numbers<[1], [0], [0], [1], [0, 0, 1, 1], [], []>} : vector<64x256xbf16>, vector<256x64xbf16>, vector<64x64xf32> -> vector<64x64xf32>
    %111 = arith.truncf %110 : vector<64x64xf32> to vector<64x64xbf16>
    %c12_96 = arith.constant 12 : index
    %c0_97 = arith.constant 0 : index
    %c0_98 = arith.constant 0 : index
    %112 = vector.load %arg5[%c12_96, %c0_97, %c0_98] : memref<16x64x128xbf16, #tpu.memory_space<vmem>>, vector<1x64x128xbf16>
    %113 = vector.shape_cast %112 : vector<1x64x128xbf16> to vector<64x128xbf16>
    %cst_99 = arith.constant dense<0.000000e+00> : vector<64x128xf32>
    %114 = tpu.matmul %111, %113, %cst_99 {dimension_numbers = #tpu.dot_dimension_numbers<[1], [0], [0], [1], [0, 0, 1, 1], [], []>} : vector<64x64xbf16>, vector<64x128xbf16>, vector<64x128xf32> -> vector<64x128xf32>
    %115 = arith.addf %107, %114 : vector<64x128xf32>
    %c13 = arith.constant 13 : index
    %c0_100 = arith.constant 0 : index
    %c0_101 = arith.constant 0 : index
    %116 = vector.load %arg4[%c13, %c0_100, %c0_101] : memref<16x64x256xbf16, #tpu.memory_space<vmem>>, vector<1x64x256xbf16>
    %117 = vector.shape_cast %116 : vector<1x64x256xbf16> to vector<64x256xbf16>
    %cst_102 = arith.constant dense<0.000000e+00> : vector<64x64xf32>
    %118 = tpu.matmul %117, %12, %cst_102 {dimension_numbers = #tpu.dot_dimension_numbers<[1], [0], [0], [1], [0, 0, 1, 1], [], []>} : vector<64x256xbf16>, vector<256x64xbf16>, vector<64x64xf32> -> vector<64x64xf32>
    %119 = arith.truncf %118 : vector<64x64xf32> to vector<64x64xbf16>
    %c13_103 = arith.constant 13 : index
    %c0_104 = arith.constant 0 : index
    %c0_105 = arith.constant 0 : index
    %120 = vector.load %arg5[%c13_103, %c0_104, %c0_105] : memref<16x64x128xbf16, #tpu.memory_space<vmem>>, vector<1x64x128xbf16>
    %121 = vector.shape_cast %120 : vector<1x64x128xbf16> to vector<64x128xbf16>
    %cst_106 = arith.constant dense<0.000000e+00> : vector<64x128xf32>
    %122 = tpu.matmul %119, %121, %cst_106 {dimension_numbers = #tpu.dot_dimension_numbers<[1], [0], [0], [1], [0, 0, 1, 1], [], []>} : vector<64x64xbf16>, vector<64x128xbf16>, vector<64x128xf32> -> vector<64x128xf32>
    %123 = arith.addf %115, %122 : vector<64x128xf32>
    %c14 = arith.constant 14 : index
    %c0_107 = arith.constant 0 : index
    %c0_108 = arith.constant 0 : index
    %124 = vector.load %arg4[%c14, %c0_107, %c0_108] : memref<16x64x256xbf16, #tpu.memory_space<vmem>>, vector<1x64x256xbf16>
    %125 = vector.shape_cast %124 : vector<1x64x256xbf16> to vector<64x256xbf16>
    %cst_109 = arith.constant dense<0.000000e+00> : vector<64x64xf32>
    %126 = tpu.matmul %125, %12, %cst_109 {dimension_numbers = #tpu.dot_dimension_numbers<[1], [0], [0], [1], [0, 0, 1, 1], [], []>} : vector<64x256xbf16>, vector<256x64xbf16>, vector<64x64xf32> -> vector<64x64xf32>
    %127 = arith.truncf %126 : vector<64x64xf32> to vector<64x64xbf16>
    %c14_110 = arith.constant 14 : index
    %c0_111 = arith.constant 0 : index
    %c0_112 = arith.constant 0 : index
    %128 = vector.load %arg5[%c14_110, %c0_111, %c0_112] : memref<16x64x128xbf16, #tpu.memory_space<vmem>>, vector<1x64x128xbf16>
    %129 = vector.shape_cast %128 : vector<1x64x128xbf16> to vector<64x128xbf16>
    %cst_113 = arith.constant dense<0.000000e+00> : vector<64x128xf32>
    %130 = tpu.matmul %127, %129, %cst_113 {dimension_numbers = #tpu.dot_dimension_numbers<[1], [0], [0], [1], [0, 0, 1, 1], [], []>} : vector<64x64xbf16>, vector<64x128xbf16>, vector<64x128xf32> -> vector<64x128xf32>
    %131 = arith.addf %123, %130 : vector<64x128xf32>
    %c15 = arith.constant 15 : index
    %c0_114 = arith.constant 0 : index
    %c0_115 = arith.constant 0 : index
    %132 = vector.load %arg4[%c15, %c0_114, %c0_115] : memref<16x64x256xbf16, #tpu.memory_space<vmem>>, vector<1x64x256xbf16>
    %133 = vector.shape_cast %132 : vector<1x64x256xbf16> to vector<64x256xbf16>
    %cst_116 = arith.constant dense<0.000000e+00> : vector<64x64xf32>
    %134 = tpu.matmul %133, %12, %cst_116 {dimension_numbers = #tpu.dot_dimension_numbers<[1], [0], [0], [1], [0, 0, 1, 1], [], []>} : vector<64x256xbf16>, vector<256x64xbf16>, vector<64x64xf32> -> vector<64x64xf32>
    %135 = arith.truncf %134 : vector<64x64xf32> to vector<64x64xbf16>
    %c15_117 = arith.constant 15 : index
    %c0_118 = arith.constant 0 : index
    %c0_119 = arith.constant 0 : index
    %136 = vector.load %arg5[%c15_117, %c0_118, %c0_119] : memref<16x64x128xbf16, #tpu.memory_space<vmem>>, vector<1x64x128xbf16>
    %137 = vector.shape_cast %136 : vector<1x64x128xbf16> to vector<64x128xbf16>
    %cst_120 = arith.constant dense<0.000000e+00> : vector<64x128xf32>
    %138 = tpu.matmul %135, %137, %cst_120 {dimension_numbers = #tpu.dot_dimension_numbers<[1], [0], [0], [1], [0, 0, 1, 1], [], []>} : vector<64x64xbf16>, vector<64x128xbf16>, vector<64x128xf32> -> vector<64x128xf32>
    %139 = arith.addf %131, %138 : vector<64x128xf32>
    %c0_121 = arith.constant 0 : index
    %c0_122 = arith.constant 0 : index
    %140 = vector.load %arg6[%c0_121, %c0_122] : memref<1x128xf32, #tpu.memory_space<vmem>>, vector<1x128xf32>
    %141 = vector.broadcast %140 : vector<1x128xf32> to vector<64x128xf32>
    %142 = arith.addf %139, %141 : vector<64x128xf32>
    %cst_123 = arith.constant 0.000000e+00 : f32
    %143 = vector.broadcast %cst_123 : f32 to vector<64x128xf32>
    %144 = arith.cmpf oge, %142, %143 : vector<64x128xf32>
    %cst_124 = arith.constant 1.000000e-01 : f32
    %145 = vector.broadcast %cst_124 : f32 to vector<64x128xf32>
    %146 = arith.mulf %145, %142 : vector<64x128xf32>
    %147 = arith.select %144, %142, %146 : vector<64x128xi1>, vector<64x128xf32>
    %148 = arith.truncf %147 : vector<64x128xf32> to vector<64x128xbf16>
    %c0_125 = arith.constant 0 : index
    %c0_126 = arith.constant 0 : index
    %c0_127 = arith.constant 0 : index
    %149 = vector.load %arg7[%c0_125, %c0_126, %c0_127] : memref<16x16x64xbf16, #tpu.memory_space<vmem>>, vector<1x16x64xbf16>
    %150 = vector.shape_cast %149 : vector<1x16x64xbf16> to vector<16x64xbf16>
    %cst_128 = arith.constant dense<0.000000e+00> : vector<16x128xf32>
    %151 = tpu.matmul %150, %148, %cst_128 {dimension_numbers = #tpu.dot_dimension_numbers<[1], [0], [0], [1], [0, 0, 1, 1], [], []>} : vector<16x64xbf16>, vector<64x128xbf16>, vector<16x128xf32> -> vector<16x128xf32>
    %152 = arith.truncf %151 : vector<16x128xf32> to vector<16x128xbf16>
    %c0_129 = arith.constant 0 : index
    %c0_130 = arith.constant 0 : index
    %c0_131 = arith.constant 0 : index
    %153 = vector.load %arg8[%c0_129, %c0_130, %c0_131] : memref<16x128x256xbf16, #tpu.memory_space<vmem>>, vector<1x128x256xbf16>
    %154 = vector.shape_cast %153 : vector<1x128x256xbf16> to vector<128x256xbf16>
    %cst_132 = arith.constant dense<0.000000e+00> : vector<16x256xf32>
    %155 = tpu.matmul %152, %154, %cst_132 {dimension_numbers = #tpu.dot_dimension_numbers<[1], [0], [0], [1], [0, 0, 1, 1], [], []>} : vector<16x128xbf16>, vector<128x256xbf16>, vector<16x256xf32> -> vector<16x256xf32>
    %c1_133 = arith.constant 1 : index
    %c0_134 = arith.constant 0 : index
    %c0_135 = arith.constant 0 : index
    %156 = vector.load %arg7[%c1_133, %c0_134, %c0_135] : memref<16x16x64xbf16, #tpu.memory_space<vmem>>, vector<1x16x64xbf16>
    %157 = vector.shape_cast %156 : vector<1x16x64xbf16> to vector<16x64xbf16>
    %cst_136 = arith.constant dense<0.000000e+00> : vector<16x128xf32>
    %158 = tpu.matmul %157, %148, %cst_136 {dimension_numbers = #tpu.dot_dimension_numbers<[1], [0], [0], [1], [0, 0, 1, 1], [], []>} : vector<16x64xbf16>, vector<64x128xbf16>, vector<16x128xf32> -> vector<16x128xf32>
    %159 = arith.truncf %158 : vector<16x128xf32> to vector<16x128xbf16>
    %c1_137 = arith.constant 1 : index
    %c0_138 = arith.constant 0 : index
    %c0_139 = arith.constant 0 : index
    %160 = vector.load %arg8[%c1_137, %c0_138, %c0_139] : memref<16x128x256xbf16, #tpu.memory_space<vmem>>, vector<1x128x256xbf16>
    %161 = vector.shape_cast %160 : vector<1x128x256xbf16> to vector<128x256xbf16>
    %cst_140 = arith.constant dense<0.000000e+00> : vector<16x256xf32>
    %162 = tpu.matmul %159, %161, %cst_140 {dimension_numbers = #tpu.dot_dimension_numbers<[1], [0], [0], [1], [0, 0, 1, 1], [], []>} : vector<16x128xbf16>, vector<128x256xbf16>, vector<16x256xf32> -> vector<16x256xf32>
    %163 = arith.addf %155, %162 : vector<16x256xf32>
    %c2_141 = arith.constant 2 : index
    %c0_142 = arith.constant 0 : index
    %c0_143 = arith.constant 0 : index
    %164 = vector.load %arg7[%c2_141, %c0_142, %c0_143] : memref<16x16x64xbf16, #tpu.memory_space<vmem>>, vector<1x16x64xbf16>
    %165 = vector.shape_cast %164 : vector<1x16x64xbf16> to vector<16x64xbf16>
    %cst_144 = arith.constant dense<0.000000e+00> : vector<16x128xf32>
    %166 = tpu.matmul %165, %148, %cst_144 {dimension_numbers = #tpu.dot_dimension_numbers<[1], [0], [0], [1], [0, 0, 1, 1], [], []>} : vector<16x64xbf16>, vector<64x128xbf16>, vector<16x128xf32> -> vector<16x128xf32>
    %167 = arith.truncf %166 : vector<16x128xf32> to vector<16x128xbf16>
    %c2_145 = arith.constant 2 : index
    %c0_146 = arith.constant 0 : index
    %c0_147 = arith.constant 0 : index
    %168 = vector.load %arg8[%c2_145, %c0_146, %c0_147] : memref<16x128x256xbf16, #tpu.memory_space<vmem>>, vector<1x128x256xbf16>
    %169 = vector.shape_cast %168 : vector<1x128x256xbf16> to vector<128x256xbf16>
    %cst_148 = arith.constant dense<0.000000e+00> : vector<16x256xf32>
    %170 = tpu.matmul %167, %169, %cst_148 {dimension_numbers = #tpu.dot_dimension_numbers<[1], [0], [0], [1], [0, 0, 1, 1], [], []>} : vector<16x128xbf16>, vector<128x256xbf16>, vector<16x256xf32> -> vector<16x256xf32>
    %171 = arith.addf %163, %170 : vector<16x256xf32>
    %c3_149 = arith.constant 3 : index
    %c0_150 = arith.constant 0 : index
    %c0_151 = arith.constant 0 : index
    %172 = vector.load %arg7[%c3_149, %c0_150, %c0_151] : memref<16x16x64xbf16, #tpu.memory_space<vmem>>, vector<1x16x64xbf16>
    %173 = vector.shape_cast %172 : vector<1x16x64xbf16> to vector<16x64xbf16>
    %cst_152 = arith.constant dense<0.000000e+00> : vector<16x128xf32>
    %174 = tpu.matmul %173, %148, %cst_152 {dimension_numbers = #tpu.dot_dimension_numbers<[1], [0], [0], [1], [0, 0, 1, 1], [], []>} : vector<16x64xbf16>, vector<64x128xbf16>, vector<16x128xf32> -> vector<16x128xf32>
    %175 = arith.truncf %174 : vector<16x128xf32> to vector<16x128xbf16>
    %c3_153 = arith.constant 3 : index
    %c0_154 = arith.constant 0 : index
    %c0_155 = arith.constant 0 : index
    %176 = vector.load %arg8[%c3_153, %c0_154, %c0_155] : memref<16x128x256xbf16, #tpu.memory_space<vmem>>, vector<1x128x256xbf16>
    %177 = vector.shape_cast %176 : vector<1x128x256xbf16> to vector<128x256xbf16>
    %cst_156 = arith.constant dense<0.000000e+00> : vector<16x256xf32>
    %178 = tpu.matmul %175, %177, %cst_156 {dimension_numbers = #tpu.dot_dimension_numbers<[1], [0], [0], [1], [0, 0, 1, 1], [], []>} : vector<16x128xbf16>, vector<128x256xbf16>, vector<16x256xf32> -> vector<16x256xf32>
    %179 = arith.addf %171, %178 : vector<16x256xf32>
    %c4_157 = arith.constant 4 : index
    %c0_158 = arith.constant 0 : index
    %c0_159 = arith.constant 0 : index
    %180 = vector.load %arg7[%c4_157, %c0_158, %c0_159] : memref<16x16x64xbf16, #tpu.memory_space<vmem>>, vector<1x16x64xbf16>
    %181 = vector.shape_cast %180 : vector<1x16x64xbf16> to vector<16x64xbf16>
    %cst_160 = arith.constant dense<0.000000e+00> : vector<16x128xf32>
    %182 = tpu.matmul %181, %148, %cst_160 {dimension_numbers = #tpu.dot_dimension_numbers<[1], [0], [0], [1], [0, 0, 1, 1], [], []>} : vector<16x64xbf16>, vector<64x128xbf16>, vector<16x128xf32> -> vector<16x128xf32>
    %183 = arith.truncf %182 : vector<16x128xf32> to vector<16x128xbf16>
    %c4_161 = arith.constant 4 : index
    %c0_162 = arith.constant 0 : index
    %c0_163 = arith.constant 0 : index
    %184 = vector.load %arg8[%c4_161, %c0_162, %c0_163] : memref<16x128x256xbf16, #tpu.memory_space<vmem>>, vector<1x128x256xbf16>
    %185 = vector.shape_cast %184 : vector<1x128x256xbf16> to vector<128x256xbf16>
    %cst_164 = arith.constant dense<0.000000e+00> : vector<16x256xf32>
    %186 = tpu.matmul %183, %185, %cst_164 {dimension_numbers = #tpu.dot_dimension_numbers<[1], [0], [0], [1], [0, 0, 1, 1], [], []>} : vector<16x128xbf16>, vector<128x256xbf16>, vector<16x256xf32> -> vector<16x256xf32>
    %187 = arith.addf %179, %186 : vector<16x256xf32>
    %c5_165 = arith.constant 5 : index
    %c0_166 = arith.constant 0 : index
    %c0_167 = arith.constant 0 : index
    %188 = vector.load %arg7[%c5_165, %c0_166, %c0_167] : memref<16x16x64xbf16, #tpu.memory_space<vmem>>, vector<1x16x64xbf16>
    %189 = vector.shape_cast %188 : vector<1x16x64xbf16> to vector<16x64xbf16>
    %cst_168 = arith.constant dense<0.000000e+00> : vector<16x128xf32>
    %190 = tpu.matmul %189, %148, %cst_168 {dimension_numbers = #tpu.dot_dimension_numbers<[1], [0], [0], [1], [0, 0, 1, 1], [], []>} : vector<16x64xbf16>, vector<64x128xbf16>, vector<16x128xf32> -> vector<16x128xf32>
    %191 = arith.truncf %190 : vector<16x128xf32> to vector<16x128xbf16>
    %c5_169 = arith.constant 5 : index
    %c0_170 = arith.constant 0 : index
    %c0_171 = arith.constant 0 : index
    %192 = vector.load %arg8[%c5_169, %c0_170, %c0_171] : memref<16x128x256xbf16, #tpu.memory_space<vmem>>, vector<1x128x256xbf16>
    %193 = vector.shape_cast %192 : vector<1x128x256xbf16> to vector<128x256xbf16>
    %cst_172 = arith.constant dense<0.000000e+00> : vector<16x256xf32>
    %194 = tpu.matmul %191, %193, %cst_172 {dimension_numbers = #tpu.dot_dimension_numbers<[1], [0], [0], [1], [0, 0, 1, 1], [], []>} : vector<16x128xbf16>, vector<128x256xbf16>, vector<16x256xf32> -> vector<16x256xf32>
    %195 = arith.addf %187, %194 : vector<16x256xf32>
    %c6_173 = arith.constant 6 : index
    %c0_174 = arith.constant 0 : index
    %c0_175 = arith.constant 0 : index
    %196 = vector.load %arg7[%c6_173, %c0_174, %c0_175] : memref<16x16x64xbf16, #tpu.memory_space<vmem>>, vector<1x16x64xbf16>
    %197 = vector.shape_cast %196 : vector<1x16x64xbf16> to vector<16x64xbf16>
    %cst_176 = arith.constant dense<0.000000e+00> : vector<16x128xf32>
    %198 = tpu.matmul %197, %148, %cst_176 {dimension_numbers = #tpu.dot_dimension_numbers<[1], [0], [0], [1], [0, 0, 1, 1], [], []>} : vector<16x64xbf16>, vector<64x128xbf16>, vector<16x128xf32> -> vector<16x128xf32>
    %199 = arith.truncf %198 : vector<16x128xf32> to vector<16x128xbf16>
    %c6_177 = arith.constant 6 : index
    %c0_178 = arith.constant 0 : index
    %c0_179 = arith.constant 0 : index
    %200 = vector.load %arg8[%c6_177, %c0_178, %c0_179] : memref<16x128x256xbf16, #tpu.memory_space<vmem>>, vector<1x128x256xbf16>
    %201 = vector.shape_cast %200 : vector<1x128x256xbf16> to vector<128x256xbf16>
    %cst_180 = arith.constant dense<0.000000e+00> : vector<16x256xf32>
    %202 = tpu.matmul %199, %201, %cst_180 {dimension_numbers = #tpu.dot_dimension_numbers<[1], [0], [0], [1], [0, 0, 1, 1], [], []>} : vector<16x128xbf16>, vector<128x256xbf16>, vector<16x256xf32> -> vector<16x256xf32>
    %203 = arith.addf %195, %202 : vector<16x256xf32>
    %c7_181 = arith.constant 7 : index
    %c0_182 = arith.constant 0 : index
    %c0_183 = arith.constant 0 : index
    %204 = vector.load %arg7[%c7_181, %c0_182, %c0_183] : memref<16x16x64xbf16, #tpu.memory_space<vmem>>, vector<1x16x64xbf16>
    %205 = vector.shape_cast %204 : vector<1x16x64xbf16> to vector<16x64xbf16>
    %cst_184 = arith.constant dense<0.000000e+00> : vector<16x128xf32>
    %206 = tpu.matmul %205, %148, %cst_184 {dimension_numbers = #tpu.dot_dimension_numbers<[1], [0], [0], [1], [0, 0, 1, 1], [], []>} : vector<16x64xbf16>, vector<64x128xbf16>, vector<16x128xf32> -> vector<16x128xf32>
    %207 = arith.truncf %206 : vector<16x128xf32> to vector<16x128xbf16>
    %c7_185 = arith.constant 7 : index
    %c0_186 = arith.constant 0 : index
    %c0_187 = arith.constant 0 : index
    %208 = vector.load %arg8[%c7_185, %c0_186, %c0_187] : memref<16x128x256xbf16, #tpu.memory_space<vmem>>, vector<1x128x256xbf16>
    %209 = vector.shape_cast %208 : vector<1x128x256xbf16> to vector<128x256xbf16>
    %cst_188 = arith.constant dense<0.000000e+00> : vector<16x256xf32>
    %210 = tpu.matmul %207, %209, %cst_188 {dimension_numbers = #tpu.dot_dimension_numbers<[1], [0], [0], [1], [0, 0, 1, 1], [], []>} : vector<16x128xbf16>, vector<128x256xbf16>, vector<16x256xf32> -> vector<16x256xf32>
    %211 = arith.addf %203, %210 : vector<16x256xf32>
    %c8_189 = arith.constant 8 : index
    %c0_190 = arith.constant 0 : index
    %c0_191 = arith.constant 0 : index
    %212 = vector.load %arg7[%c8_189, %c0_190, %c0_191] : memref<16x16x64xbf16, #tpu.memory_space<vmem>>, vector<1x16x64xbf16>
    %213 = vector.shape_cast %212 : vector<1x16x64xbf16> to vector<16x64xbf16>
    %cst_192 = arith.constant dense<0.000000e+00> : vector<16x128xf32>
    %214 = tpu.matmul %213, %148, %cst_192 {dimension_numbers = #tpu.dot_dimension_numbers<[1], [0], [0], [1], [0, 0, 1, 1], [], []>} : vector<16x64xbf16>, vector<64x128xbf16>, vector<16x128xf32> -> vector<16x128xf32>
    %215 = arith.truncf %214 : vector<16x128xf32> to vector<16x128xbf16>
    %c8_193 = arith.constant 8 : index
    %c0_194 = arith.constant 0 : index
    %c0_195 = arith.constant 0 : index
    %216 = vector.load %arg8[%c8_193, %c0_194, %c0_195] : memref<16x128x256xbf16, #tpu.memory_space<vmem>>, vector<1x128x256xbf16>
    %217 = vector.shape_cast %216 : vector<1x128x256xbf16> to vector<128x256xbf16>
    %cst_196 = arith.constant dense<0.000000e+00> : vector<16x256xf32>
    %218 = tpu.matmul %215, %217, %cst_196 {dimension_numbers = #tpu.dot_dimension_numbers<[1], [0], [0], [1], [0, 0, 1, 1], [], []>} : vector<16x128xbf16>, vector<128x256xbf16>, vector<16x256xf32> -> vector<16x256xf32>
    %219 = arith.addf %211, %218 : vector<16x256xf32>
    %c9_197 = arith.constant 9 : index
    %c0_198 = arith.constant 0 : index
    %c0_199 = arith.constant 0 : index
    %220 = vector.load %arg7[%c9_197, %c0_198, %c0_199] : memref<16x16x64xbf16, #tpu.memory_space<vmem>>, vector<1x16x64xbf16>
    %221 = vector.shape_cast %220 : vector<1x16x64xbf16> to vector<16x64xbf16>
    %cst_200 = arith.constant dense<0.000000e+00> : vector<16x128xf32>
    %222 = tpu.matmul %221, %148, %cst_200 {dimension_numbers = #tpu.dot_dimension_numbers<[1], [0], [0], [1], [0, 0, 1, 1], [], []>} : vector<16x64xbf16>, vector<64x128xbf16>, vector<16x128xf32> -> vector<16x128xf32>
    %223 = arith.truncf %222 : vector<16x128xf32> to vector<16x128xbf16>
    %c9_201 = arith.constant 9 : index
    %c0_202 = arith.constant 0 : index
    %c0_203 = arith.constant 0 : index
    %224 = vector.load %arg8[%c9_201, %c0_202, %c0_203] : memref<16x128x256xbf16, #tpu.memory_space<vmem>>, vector<1x128x256xbf16>
    %225 = vector.shape_cast %224 : vector<1x128x256xbf16> to vector<128x256xbf16>
    %cst_204 = arith.constant dense<0.000000e+00> : vector<16x256xf32>
    %226 = tpu.matmul %223, %225, %cst_204 {dimension_numbers = #tpu.dot_dimension_numbers<[1], [0], [0], [1], [0, 0, 1, 1], [], []>} : vector<16x128xbf16>, vector<128x256xbf16>, vector<16x256xf32> -> vector<16x256xf32>
    %227 = arith.addf %219, %226 : vector<16x256xf32>
    %c10_205 = arith.constant 10 : index
    %c0_206 = arith.constant 0 : index
    %c0_207 = arith.constant 0 : index
    %228 = vector.load %arg7[%c10_205, %c0_206, %c0_207] : memref<16x16x64xbf16, #tpu.memory_space<vmem>>, vector<1x16x64xbf16>
    %229 = vector.shape_cast %228 : vector<1x16x64xbf16> to vector<16x64xbf16>
    %cst_208 = arith.constant dense<0.000000e+00> : vector<16x128xf32>
    %230 = tpu.matmul %229, %148, %cst_208 {dimension_numbers = #tpu.dot_dimension_numbers<[1], [0], [0], [1], [0, 0, 1, 1], [], []>} : vector<16x64xbf16>, vector<64x128xbf16>, vector<16x128xf32> -> vector<16x128xf32>
    %231 = arith.truncf %230 : vector<16x128xf32> to vector<16x128xbf16>
    %c10_209 = arith.constant 10 : index
    %c0_210 = arith.constant 0 : index
    %c0_211 = arith.constant 0 : index
    %232 = vector.load %arg8[%c10_209, %c0_210, %c0_211] : memref<16x128x256xbf16, #tpu.memory_space<vmem>>, vector<1x128x256xbf16>
    %233 = vector.shape_cast %232 : vector<1x128x256xbf16> to vector<128x256xbf16>
    %cst_212 = arith.constant dense<0.000000e+00> : vector<16x256xf32>
    %234 = tpu.matmul %231, %233, %cst_212 {dimension_numbers = #tpu.dot_dimension_numbers<[1], [0], [0], [1], [0, 0, 1, 1], [], []>} : vector<16x128xbf16>, vector<128x256xbf16>, vector<16x256xf32> -> vector<16x256xf32>
    %235 = arith.addf %227, %234 : vector<16x256xf32>
    %c11_213 = arith.constant 11 : index
    %c0_214 = arith.constant 0 : index
    %c0_215 = arith.constant 0 : index
    %236 = vector.load %arg7[%c11_213, %c0_214, %c0_215] : memref<16x16x64xbf16, #tpu.memory_space<vmem>>, vector<1x16x64xbf16>
    %237 = vector.shape_cast %236 : vector<1x16x64xbf16> to vector<16x64xbf16>
    %cst_216 = arith.constant dense<0.000000e+00> : vector<16x128xf32>
    %238 = tpu.matmul %237, %148, %cst_216 {dimension_numbers = #tpu.dot_dimension_numbers<[1], [0], [0], [1], [0, 0, 1, 1], [], []>} : vector<16x64xbf16>, vector<64x128xbf16>, vector<16x128xf32> -> vector<16x128xf32>
    %239 = arith.truncf %238 : vector<16x128xf32> to vector<16x128xbf16>
    %c11_217 = arith.constant 11 : index
    %c0_218 = arith.constant 0 : index
    %c0_219 = arith.constant 0 : index
    %240 = vector.load %arg8[%c11_217, %c0_218, %c0_219] : memref<16x128x256xbf16, #tpu.memory_space<vmem>>, vector<1x128x256xbf16>
    %241 = vector.shape_cast %240 : vector<1x128x256xbf16> to vector<128x256xbf16>
    %cst_220 = arith.constant dense<0.000000e+00> : vector<16x256xf32>
    %242 = tpu.matmul %239, %241, %cst_220 {dimension_numbers = #tpu.dot_dimension_numbers<[1], [0], [0], [1], [0, 0, 1, 1], [], []>} : vector<16x128xbf16>, vector<128x256xbf16>, vector<16x256xf32> -> vector<16x256xf32>
    %243 = arith.addf %235, %242 : vector<16x256xf32>
    %c12_221 = arith.constant 12 : index
    %c0_222 = arith.constant 0 : index
    %c0_223 = arith.constant 0 : index
    %244 = vector.load %arg7[%c12_221, %c0_222, %c0_223] : memref<16x16x64xbf16, #tpu.memory_space<vmem>>, vector<1x16x64xbf16>
    %245 = vector.shape_cast %244 : vector<1x16x64xbf16> to vector<16x64xbf16>
    %cst_224 = arith.constant dense<0.000000e+00> : vector<16x128xf32>
    %246 = tpu.matmul %245, %148, %cst_224 {dimension_numbers = #tpu.dot_dimension_numbers<[1], [0], [0], [1], [0, 0, 1, 1], [], []>} : vector<16x64xbf16>, vector<64x128xbf16>, vector<16x128xf32> -> vector<16x128xf32>
    %247 = arith.truncf %246 : vector<16x128xf32> to vector<16x128xbf16>
    %c12_225 = arith.constant 12 : index
    %c0_226 = arith.constant 0 : index
    %c0_227 = arith.constant 0 : index
    %248 = vector.load %arg8[%c12_225, %c0_226, %c0_227] : memref<16x128x256xbf16, #tpu.memory_space<vmem>>, vector<1x128x256xbf16>
    %249 = vector.shape_cast %248 : vector<1x128x256xbf16> to vector<128x256xbf16>
    %cst_228 = arith.constant dense<0.000000e+00> : vector<16x256xf32>
    %250 = tpu.matmul %247, %249, %cst_228 {dimension_numbers = #tpu.dot_dimension_numbers<[1], [0], [0], [1], [0, 0, 1, 1], [], []>} : vector<16x128xbf16>, vector<128x256xbf16>, vector<16x256xf32> -> vector<16x256xf32>
    %251 = arith.addf %243, %250 : vector<16x256xf32>
    %c13_229 = arith.constant 13 : index
    %c0_230 = arith.constant 0 : index
    %c0_231 = arith.constant 0 : index
    %252 = vector.load %arg7[%c13_229, %c0_230, %c0_231] : memref<16x16x64xbf16, #tpu.memory_space<vmem>>, vector<1x16x64xbf16>
    %253 = vector.shape_cast %252 : vector<1x16x64xbf16> to vector<16x64xbf16>
    %cst_232 = arith.constant dense<0.000000e+00> : vector<16x128xf32>
    %254 = tpu.matmul %253, %148, %cst_232 {dimension_numbers = #tpu.dot_dimension_numbers<[1], [0], [0], [1], [0, 0, 1, 1], [], []>} : vector<16x64xbf16>, vector<64x128xbf16>, vector<16x128xf32> -> vector<16x128xf32>
    %255 = arith.truncf %254 : vector<16x128xf32> to vector<16x128xbf16>
    %c13_233 = arith.constant 13 : index
    %c0_234 = arith.constant 0 : index
    %c0_235 = arith.constant 0 : index
    %256 = vector.load %arg8[%c13_233, %c0_234, %c0_235] : memref<16x128x256xbf16, #tpu.memory_space<vmem>>, vector<1x128x256xbf16>
    %257 = vector.shape_cast %256 : vector<1x128x256xbf16> to vector<128x256xbf16>
    %cst_236 = arith.constant dense<0.000000e+00> : vector<16x256xf32>
    %258 = tpu.matmul %255, %257, %cst_236 {dimension_numbers = #tpu.dot_dimension_numbers<[1], [0], [0], [1], [0, 0, 1, 1], [], []>} : vector<16x128xbf16>, vector<128x256xbf16>, vector<16x256xf32> -> vector<16x256xf32>
    %259 = arith.addf %251, %258 : vector<16x256xf32>
    %c14_237 = arith.constant 14 : index
    %c0_238 = arith.constant 0 : index
    %c0_239 = arith.constant 0 : index
    %260 = vector.load %arg7[%c14_237, %c0_238, %c0_239] : memref<16x16x64xbf16, #tpu.memory_space<vmem>>, vector<1x16x64xbf16>
    %261 = vector.shape_cast %260 : vector<1x16x64xbf16> to vector<16x64xbf16>
    %cst_240 = arith.constant dense<0.000000e+00> : vector<16x128xf32>
    %262 = tpu.matmul %261, %148, %cst_240 {dimension_numbers = #tpu.dot_dimension_numbers<[1], [0], [0], [1], [0, 0, 1, 1], [], []>} : vector<16x64xbf16>, vector<64x128xbf16>, vector<16x128xf32> -> vector<16x128xf32>
    %263 = arith.truncf %262 : vector<16x128xf32> to vector<16x128xbf16>
    %c14_241 = arith.constant 14 : index
    %c0_242 = arith.constant 0 : index
    %c0_243 = arith.constant 0 : index
    %264 = vector.load %arg8[%c14_241, %c0_242, %c0_243] : memref<16x128x256xbf16, #tpu.memory_space<vmem>>, vector<1x128x256xbf16>
    %265 = vector.shape_cast %264 : vector<1x128x256xbf16> to vector<128x256xbf16>
    %cst_244 = arith.constant dense<0.000000e+00> : vector<16x256xf32>
    %266 = tpu.matmul %263, %265, %cst_244 {dimension_numbers = #tpu.dot_dimension_numbers<[1], [0], [0], [1], [0, 0, 1, 1], [], []>} : vector<16x128xbf16>, vector<128x256xbf16>, vector<16x256xf32> -> vector<16x256xf32>
    %267 = arith.addf %259, %266 : vector<16x256xf32>
    %c15_245 = arith.constant 15 : index
    %c0_246 = arith.constant 0 : index
    %c0_247 = arith.constant 0 : index
    %268 = vector.load %arg7[%c15_245, %c0_246, %c0_247] : memref<16x16x64xbf16, #tpu.memory_space<vmem>>, vector<1x16x64xbf16>
    %269 = vector.shape_cast %268 : vector<1x16x64xbf16> to vector<16x64xbf16>
    %cst_248 = arith.constant dense<0.000000e+00> : vector<16x128xf32>
    %270 = tpu.matmul %269, %148, %cst_248 {dimension_numbers = #tpu.dot_dimension_numbers<[1], [0], [0], [1], [0, 0, 1, 1], [], []>} : vector<16x64xbf16>, vector<64x128xbf16>, vector<16x128xf32> -> vector<16x128xf32>
    %271 = arith.truncf %270 : vector<16x128xf32> to vector<16x128xbf16>
    %c15_249 = arith.constant 15 : index
    %c0_250 = arith.constant 0 : index
    %c0_251 = arith.constant 0 : index
    %272 = vector.load %arg8[%c15_249, %c0_250, %c0_251] : memref<16x128x256xbf16, #tpu.memory_space<vmem>>, vector<1x128x256xbf16>
    %273 = vector.shape_cast %272 : vector<1x128x256xbf16> to vector<128x256xbf16>
    %cst_252 = arith.constant dense<0.000000e+00> : vector<16x256xf32>
    %274 = tpu.matmul %271, %273, %cst_252 {dimension_numbers = #tpu.dot_dimension_numbers<[1], [0], [0], [1], [0, 0, 1, 1], [], []>} : vector<16x128xbf16>, vector<128x256xbf16>, vector<16x256xf32> -> vector<16x256xf32>
    %275 = arith.addf %267, %274 : vector<16x256xf32>
    %c0_253 = arith.constant 0 : index
    %c0_254 = arith.constant 0 : index
    %276 = vector.load %arg9[%c0_253, %c0_254] : memref<1x256xf32, #tpu.memory_space<vmem>>, vector<1x256xf32>
    %277 = vector.broadcast %276 : vector<1x256xf32> to vector<16x256xf32>
    %278 = arith.addf %275, %277 : vector<16x256xf32>
    %cst_255 = arith.constant 0.000000e+00 : f32
    %279 = vector.broadcast %cst_255 : f32 to vector<16x256xf32>
    %280 = arith.cmpf oge, %278, %279 : vector<16x256xf32>
    %cst_256 = arith.constant 1.000000e-01 : f32
    %281 = vector.broadcast %cst_256 : f32 to vector<16x256xf32>
    %282 = arith.mulf %281, %278 : vector<16x256xf32>
    %283 = arith.select %280, %278, %282 : vector<16x256xi1>, vector<16x256xf32>
    %284 = arith.truncf %283 : vector<16x256xf32> to vector<16x256xbf16>
    %285 = arith.extf %284 : vector<16x256xbf16> to vector<16x256xf32>
    %c0_257 = arith.constant 0 : index
    %c0_258 = arith.constant 0 : index
    %286 = vector.load %arg10[%c0_257, %c0_258] : memref<256x32xbf16, #tpu.memory_space<vmem>>, vector<256x32xbf16>
    %cst_259 = arith.constant dense<0.000000e+00> : vector<16x32xf32>
    %287 = tpu.matmul %284, %286, %cst_259 {dimension_numbers = #tpu.dot_dimension_numbers<[1], [0], [0], [1], [0, 0, 1, 1], [], []>} : vector<16x256xbf16>, vector<256x32xbf16>, vector<16x32xf32> -> vector<16x32xf32>
    %c0_260 = arith.constant 0 : index
    %c0_261 = arith.constant 0 : index
    %288 = vector.load %arg11[%c0_260, %c0_261] : memref<1x32xf32, #tpu.memory_space<vmem>>, vector<1x32xf32>
    %289 = vector.broadcast %288 : vector<1x32xf32> to vector<16x32xf32>
    %290 = arith.addf %287, %289 : vector<16x32xf32>
    %c0_262 = arith.constant 0 : index
    %c0_263 = arith.constant 0 : index
    %291 = vector.load %arg12[%c0_262, %c0_263] : memref<256x32xbf16, #tpu.memory_space<vmem>>, vector<256x32xbf16>
    %cst_264 = arith.constant dense<0.000000e+00> : vector<16x32xf32>
    %292 = tpu.matmul %284, %291, %cst_264 {dimension_numbers = #tpu.dot_dimension_numbers<[1], [0], [0], [1], [0, 0, 1, 1], [], []>} : vector<16x256xbf16>, vector<256x32xbf16>, vector<16x32xf32> -> vector<16x32xf32>
    %c0_265 = arith.constant 0 : index
    %c0_266 = arith.constant 0 : index
    %293 = vector.load %arg13[%c0_265, %c0_266] : memref<1x32xf32, #tpu.memory_space<vmem>>, vector<1x32xf32>
    %294 = vector.broadcast %293 : vector<1x32xf32> to vector<16x32xf32>
    %295 = arith.addf %292, %294 : vector<16x32xf32>
    %c0_267 = arith.constant 0 : index
    %c0_268 = arith.constant 0 : index
    %296 = vector.load %arg14[%c0_267, %c0_268] : memref<256x256xbf16, #tpu.memory_space<vmem>>, vector<256x256xbf16>
    %cst_269 = arith.constant dense<0.000000e+00> : vector<16x256xf32>
    %297 = tpu.matmul %284, %296, %cst_269 {dimension_numbers = #tpu.dot_dimension_numbers<[1], [0], [0], [1], [0, 0, 1, 1], [], []>} : vector<16x256xbf16>, vector<256x256xbf16>, vector<16x256xf32> -> vector<16x256xf32>
    %c0_270 = arith.constant 0 : index
    %c0_271 = arith.constant 0 : index
    %298 = vector.load %arg15[%c0_270, %c0_271] : memref<1x256xf32, #tpu.memory_space<vmem>>, vector<1x256xf32>
    %299 = vector.broadcast %298 : vector<1x256xf32> to vector<16x256xf32>
    %300 = arith.addf %297, %299 : vector<16x256xf32>
    %cst_272 = arith.constant dense<0.000000e+00> : vector<16x16xf32>
    %301 = tpu.matmul %290, %295, %cst_272 {dimension_numbers = #tpu.dot_dimension_numbers<[1], [1], [0], [0], [0, 0, 1, 0], [], []>} : vector<16x32xf32>, vector<16x32xf32>, vector<16x16xf32> -> vector<16x16xf32>
    %cst_273 = arith.constant dense<0xFF800000> : vector<16xf32>
    %302 = vector.multi_reduction <maximumf>, %301, %cst_273 [1] : vector<16x16xf32> to vector<16xf32>
    %303 = vector.shape_cast %302 : vector<16xf32> to vector<16x1xf32>
    %304 = vector.broadcast %303 : vector<16x1xf32> to vector<16x16xf32>
    %305 = arith.subf %301, %304 : vector<16x16xf32>
    %306 = math.exp %305 : vector<16x16xf32>
    %cst_274 = arith.constant dense<0.000000e+00> : vector<16xf32>
    %307 = vector.multi_reduction <add>, %306, %cst_274 [1] : vector<16x16xf32> to vector<16xf32>
    %308 = vector.shape_cast %307 : vector<16xf32> to vector<16x1xf32>
    %309 = vector.broadcast %308 : vector<16x1xf32> to vector<16x16xf32>
    %310 = arith.divf %306, %309 : vector<16x16xf32>
    %cst_275 = arith.constant dense<0.000000e+00> : vector<16x256xf32>
    %311 = tpu.matmul %310, %300, %cst_275 {dimension_numbers = #tpu.dot_dimension_numbers<[1], [0], [0], [1], [0, 0, 1, 1], [], []>} : vector<16x16xf32>, vector<16x256xf32>, vector<16x256xf32> -> vector<16x256xf32>
    %c0_276 = arith.constant 0 : index
    %312 = memref.load %arg17[%c0_276] : memref<1xf32, #tpu.memory_space<smem>>
    %313 = vector.broadcast %312 : f32 to vector<16x256xf32>
    %314 = arith.mulf %313, %311 : vector<16x256xf32>
    %315 = arith.addf %314, %285 : vector<16x256xf32>
    %c0_277 = arith.constant 0 : index
    %c0_278 = arith.constant 0 : index
    %316 = vector.load %arg16[%c0_277, %c0_278] : memref<16x256xf32, #tpu.memory_space<vmem>>, vector<16x256xf32>
    %317 = arith.mulf %315, %316 : vector<16x256xf32>
    %318 = vector.shape_cast %317 : vector<16x256xf32> to vector<1x16x256xf32>
    %cst_279 = arith.constant dense<0.000000e+00> : vector<1xf32>
    %319 = vector.multi_reduction <add>, %318, %cst_279 [1, 2] : vector<1x16x256xf32> to vector<1xf32>
    %320 = vector.shape_cast %319 : vector<1xf32> to vector<1x1x1xf32>
    %321 = vector.extract %320[0, 0, 0] : f32 from vector<1x1x1xf32>
    %c0_280 = arith.constant 0 : index
    %322 = memref.load %arg18[%c0_280] : memref<1xf32, #tpu.memory_space<smem>>
    %323 = arith.addf %321, %322 : f32
    %324 = vector.broadcast %323 : f32 to vector<1x128xf32>
    %c0_281 = arith.constant 0 : index
    %c0_282 = arith.constant 0 : index
    %c0_283 = arith.constant 0 : index
    %325 = vector.load %arg19[%c0_281, %c0_282, %c0_283] : memref<1x1x128xf32, #tpu.memory_space<vmem>>, vector<1x1x128xf32>
    %326 = vector.shape_cast %325 : vector<1x1x128xf32> to vector<1x128xf32>
    %327 = vector.shape_cast %324 : vector<1x128xf32> to vector<1x1x128xf32>
    tpu.vector_store %arg19[%c0_281, %c0_282, %c0_283], %327 {strides = array<i32>} : memref<1x1x128xf32, #tpu.memory_space<vmem>>, vector<1x1x128xf32>,
    return
  }
  func.func @transform_0(%arg0: i32) -> (i32, i32, i32) {
    %c0_i32 = arith.constant 0 : i32
    %c0_i32_0 = arith.constant 0 : i32
    %c0_i32_1 = arith.constant 0 : i32
    return %arg0, %c0_i32, %c0_i32_0 : i32, i32, i32
  }
  func.func @transform_1(%arg0: i32) -> (i32, i32) {
    %c0_i32 = arith.constant 0 : i32
    %c0_i32_0 = arith.constant 0 : i32
    %c0_i32_1 = arith.constant 0 : i32
    return %c0_i32, %c0_i32_0 : i32, i32
  }
  func.func @transform_2(%arg0: i32) -> (i32, i32) {
    %c0_i32 = arith.constant 0 : i32
    %c0_i32_0 = arith.constant 0 : i32
    %c0_i32_1 = arith.constant 0 : i32
    return %c0_i32, %c0_i32_0 : i32, i32
  }
  func.func @transform_3(%arg0: i32) -> (i32, i32, i32) {
    %c0_i32 = arith.constant 0 : i32
    %c0_i32_0 = arith.constant 0 : i32
    %c0_i32_1 = arith.constant 0 : i32
    %c0_i32_2 = arith.constant 0 : i32
    return %c0_i32, %c0_i32_0, %c0_i32_1 : i32, i32, i32
  }
  func.func @transform_4(%arg0: i32) -> (i32, i32, i32) {
    %c0_i32 = arith.constant 0 : i32
    %c0_i32_0 = arith.constant 0 : i32
    %c0_i32_1 = arith.constant 0 : i32
    %c0_i32_2 = arith.constant 0 : i32
    return %c0_i32, %c0_i32_0, %c0_i32_1 : i32, i32, i32
  }
  func.func @transform_5(%arg0: i32) -> (i32, i32) {
    %c0_i32 = arith.constant 0 : i32
    %c0_i32_0 = arith.constant 0 : i32
    %c0_i32_1 = arith.constant 0 : i32
    return %c0_i32, %c0_i32_0 : i32, i32
  }
  func.func @transform_6(%arg0: i32) -> (i32, i32, i32) {
    %c0_i32 = arith.constant 0 : i32
    %c0_i32_0 = arith.constant 0 : i32
    %c0_i32_1 = arith.constant 0 : i32
    %c0_i32_2 = arith.constant 0 : i32
    return %c0_i32, %c0_i32_0, %c0_i32_1 : i32, i32, i32
  }
  func.func @transform_7(%arg0: i32) -> (i32, i32, i32) {
    %c0_i32 = arith.constant 0 : i32
    %c0_i32_0 = arith.constant 0 : i32
    %c0_i32_1 = arith.constant 0 : i32
    %c0_i32_2 = arith.constant 0 : i32
    return %c0_i32, %c0_i32_0, %c0_i32_1 : i32, i32, i32
  }
  func.func @transform_8(%arg0: i32) -> (i32, i32) {
    %c0_i32 = arith.constant 0 : i32
    %c0_i32_0 = arith.constant 0 : i32
    %c0_i32_1 = arith.constant 0 : i32
    return %c0_i32, %c0_i32_0 : i32, i32
  }
  func.func @transform_9(%arg0: i32) -> (i32, i32) {
    %c0_i32 = arith.constant 0 : i32
    %c0_i32_0 = arith.constant 0 : i32
    %c0_i32_1 = arith.constant 0 : i32
    return %c0_i32, %c0_i32_0 : i32, i32
  }
  func.func @transform_10(%arg0: i32) -> (i32, i32) {
    %c0_i32 = arith.constant 0 : i32
    %c0_i32_0 = arith.constant 0 : i32
    %c0_i32_1 = arith.constant 0 : i32
    return %c0_i32, %c0_i32_0 : i32, i32
  }
  func.func @transform_11(%arg0: i32) -> (i32, i32) {
    %c0_i32 = arith.constant 0 : i32
    %c0_i32_0 = arith.constant 0 : i32
    %c0_i32_1 = arith.constant 0 : i32
    return %c0_i32, %c0_i32_0 : i32, i32
  }
  func.func @transform_12(%arg0: i32) -> (i32, i32) {
    %c0_i32 = arith.constant 0 : i32
    %c0_i32_0 = arith.constant 0 : i32
    %c0_i32_1 = arith.constant 0 : i32
    return %c0_i32, %c0_i32_0 : i32, i32
  }
  func.func @transform_13(%arg0: i32) -> (i32, i32) {
    %c0_i32 = arith.constant 0 : i32
    %c0_i32_0 = arith.constant 0 : i32
    %c0_i32_1 = arith.constant 0 : i32
    return %c0_i32, %c0_i32_0 : i32, i32
  }
  func.func @transform_14(%arg0: i32) -> (i32, i32) {
    %c0_i32 = arith.constant 0 : i32
    %c0_i32_0 = arith.constant 0 : i32
    %c0_i32_1 = arith.constant 0 : i32
    return %c0_i32, %c0_i32_0 : i32, i32
  }
  func.func @transform_15(%arg0: i32) -> (i32, i32) {
    %c0_i32 = arith.constant 0 : i32
    %c0_i32_0 = arith.constant 0 : i32
    %c0_i32_1 = arith.constant 0 : i32
    return %c0_i32, %c0_i32_0 : i32, i32
  }
  func.func @transform_16(%arg0: i32) -> i32 {
    %c0_i32 = arith.constant 0 : i32
    %c0_i32_0 = arith.constant 0 : i32
    return %c0_i32 : i32
  }
  func.func @transform_17(%arg0: i32) -> i32 {
    %c0_i32 = arith.constant 0 : i32
    %c0_i32_0 = arith.constant 0 : i32
    return %c0_i32 : i32
  }
  func.func @transform_18(%arg0: i32) -> (i32, i32, i32) {
    %c0_i32 = arith.constant 0 : i32
    %c0_i32_0 = arith.constant 0 : i32
    %c0_i32_1 = arith.constant 0 : i32
    return %arg0, %c0_i32, %c0_i32_0 : i32, i32, i32
  }
}

</mosaic_0001>

<bundles_post_ra>
// kernel: discriminator_forward.1
= control target key start
LH: loop header
LB: loop body
LE: loop exit
PB: predicated region body
PF: predicated region fallthrough
CT: control target
= control target key end

     0   :  { %s14778_s0 = inlined_call_operand.vmem [shape: bf16[2,256,64], index: 0, kind: input, shape index: {}]   ;;  %s14779_s1 = inlined_call_operand.vmem [shape: bf16[64,64], index: 1, kind: input, shape index: {}]   ;;  %s14780_s2 = inlined_call_operand.vmem [shape: f32[1,64], index: 2, kind: input, shape index: {}]   ;;  %s14781_s3 = inlined_call_operand.vmem [shape: bf16[16,64,256], index: 3, kind: input, shape index: {}]   ;;  %s14782_s4 = inlined_call_operand.vmem [shape: bf16[16,64,128], index: 4, kind: input, shape index: {}]   ;;  %s14783_s5 = inlined_call_operand.vmem [shape: f32[1,128], index: 5, kind: input, shape index: {}]   ;;  %s14784_s6 = inlined_call_operand.vmem [shape: bf16[16,16,64], index: 6, kind: input, shape index: {}]   ;;  %s14785_s7 = inlined_call_operand.vmem [shape: bf16[16,128,256], index: 7, kind: input, shape index: {}]   ;;  %s14786_s8 = inlined_call_operand.vmem [shape: f32[1,256], index: 8, kind: input, shape index: {}]   ;;  %s14787_s9 = inlined_call_operand.vmem [shape: bf16[256,32], index: 9, kind: input, shape index: {}]   ;;  %s14788_s10 = inlined_call_operand.vmem [shape: f32[1,32], index: 10, kind: input, shape index: {}]   ;;  %s14789_s11 = inlined_call_operand.vmem [shape: bf16[256,32], index: 11, kind: input, shape index: {}]   ;;  %s14790_s12 = inlined_call_operand.vmem [shape: f32[1,32], index: 12, kind: input, shape index: {}]   ;;  %s14791_s13 = inlined_call_operand.vmem [shape: bf16[256,256], index: 13, kind: input, shape index: {}]   ;;  %s14792_s14 = inlined_call_operand.vmem [shape: f32[1,256], index: 14, kind: input, shape index: {}]   ;;  %s14793_s15 = inlined_call_operand.vmem [shape: f32[16,256], index: 15, kind: input, shape index: {}]   ;;  %s14794_s16 = inlined_call_operand.<no memory space> [shape: f32[1], index: 16, kind: input, shape index: {}]   ;;  %s14795_s17 = inlined_call_operand.<no memory space> [shape: f32[1], index: 17, kind: input, shape index: {}]   ;;  %s14796_s18 = inlined_call_operand.vmem [shape: f32[2,1,128], index: 18, kind: output, shape index: {}]  }
   0x1   :  { %14798 = sst [smem:[#allocation13_spill]] %s14778_s0  ;;  %s10880_s0 = smov 0  }
   0x2   :  { %14799 = sst [smem:[#allocation14_spill]] %s14779_s1 }
   0x3   :  { %14800 = sst [smem:[#allocation15_spill]] %s14780_s2 }
   0x4   :  { %23 = sst [smem:[#allocation2]] %s14794_s16 }
   0x5   :  { %24 = sst [smem:[#allocation3]] %s14795_s17 }
   0x6 LB: > { %s7383_s19 = sadd.s32 4294967295, %s10777_s0   ;;  %p7387_p0 = scmp.ge.s32.totalorder %s10777_s0, 1  ;;  %s10777_s0 = sphi %s10880_s0, %s30_s0  }
   0x7   : > { %p514_p1 = scmp.lt.s32.totalorder %s10777_s0, 3 }
   0x9   : > { %p515_p2 = pnand %p7387_p0, %p514_p1 }
   0xb   : > { %518 = sbr.rel (%p515_p2) target bundleno = 4580 (0x11e4), region = 92 }
  0x10   : > { %s14801_s20 = sld [smem:[#allocation14_spill]]  ;;  %p566_p3 = scmp.lt.s32.totalorder %s7383_s19, 1  ;;  %vm723_vm0 = vcmask 523264  }
  0x11   : > { %s14802_s28 = sld [smem:[#allocation13_spill]] }
  0x12   : > { %s14823_s19 = smov (!%p566_p3, %s7383_s19), 1  ;;  %s14803_s1 = sld [smem:[#allocation15_spill]] }
  0x13   : > { %s10198_s23 = sshll.u32 %s14823_s19, 7  ;;  %s7302_s27 = sld [smem:[#allocation2]] }
  0x14   : > { %s7332_s2 = sld [smem:[#allocation3]]  ;;  %s573_s26 = scalar_lea.vmem %s14796_s18, %s14823_s19 }
  0x16   : > { %v10218_v0 = vld [vmem:[%s14801_s20 + $0x18] sm:$0xff]  ;;  %v10217_v1 = vld [vmem:[%s14801_s20 + $0x10] sm:$0xff]  ;;  %v10216_v2 = vld [vmem:[%s14801_s20 + $0x8] sm:$0xff] }
  0x17   : > { %776 = vmatpush.bf16.msra.mxu0 %v10218_v0  ;;  %v10215_v3 = vld [vmem:[%s14801_s20] sm:$0xff]  ;;  %s10906_s29 = scalar_lea.vmem %s14802_s28, %s10198_s23 }
  0x18   : > { %v10199_v4 = vld [vmem:[%s10906_s29] sm:$0xff]  ;;  %v10200_v5 = vld [vmem:[%s10906_s29 + $0x8] sm:$0xff]  ;;  %v10201_v6 = vld [vmem:[%s10906_s29 + $0x10] sm:$0xff] }
  0x19   : > { %v10202_v7 = vld [vmem:[%s10906_s29 + $0x18] sm:$0xff]  ;;  %v10203_v8 = vld [vmem:[%s10906_s29 + $0x20] sm:$0xff]  ;;  %v10204_v9 = vld [vmem:[%s10906_s29 + $0x28] sm:$0xff] }
  0x1a   : > { %v10205_v10 = vld [vmem:[%s10906_s29 + $0x30] sm:$0xff]  ;;  %v10206_v11 = vld [vmem:[%s10906_s29 + $0x38] sm:$0xff]  ;;  %v10207_v12 = vld [vmem:[%s10906_s29 + $0x40] sm:$0xff] }
  0x1b   : > { %777 = vmatpush.bf16.msra.mxu0 %v10217_v1  ;;  %v10928_v14 = vld [vmem:[%s14803_s1] ss:$0 sm:$0xff]  ;;  %v10208_v23 = vld [vmem:[%s10906_s29 + $0x48] sm:$0xff]  ;;  %v10209_v33 = vld [vmem:[%s10906_s29 + $0x50] sm:$0xff] }
  0x1c   : > { %v10210_v43 = vld [vmem:[%s10906_s29 + $0x58] sm:$0xff]  ;;  %v10211_v53 = vld [vmem:[%s10906_s29 + $0x60] sm:$0xff]  ;;  %v10212_v56 = vld [vmem:[%s10906_s29 + $0x68] sm:$0xff] }
  0x1d   : > { %v10213_v59 = vld [vmem:[%s10906_s29 + $0x70] sm:$0xff]  ;;  %v10214_v62 = vld [vmem:[%s10906_s29 + $0x78] sm:$0xff] }
  0x1f   : > { %778 = vmatpush.bf16.msra.mxu0 %v10216_v2 }
  0x23   : > { %779 = vmatpush.bf16.msra.mxu0 %v10215_v3 }
  0x26   : > { %7470 = vmatmul.msk.bf16.vlgmr.msra.gmra.mxu0 %vm723_vm0, %v10199_v4 }
  0x36   : > { %7471 = vmatmul.msk.bf16.gmra.mxu0 %vm723_vm0, %v10200_v5 }
  0x46   : > { %7472 = vmatmul.msk.bf16.gmra.mxu0 %vm723_vm0, %v10201_v6 }
  0x56   : > { %7473 = vmatmul.msk.bf16.gmra.mxu0 %vm723_vm0, %v10202_v7 }
  0x66   : > { %7474 = vmatmul.msk.bf16.gmra.mxu0 %vm723_vm0, %v10203_v8 }
  0x76   : > { %7475 = vmatmul.msk.bf16.gmra.mxu0 %vm723_vm0, %v10204_v9 }
  0x86   : > { %7476 = vmatmul.msk.bf16.gmra.mxu0 %vm723_vm0, %v10205_v10 }
  0x96   : > { %7477 = vmatmul.msk.bf16.gmra.mxu0 %vm723_vm0, %v10206_v11 }
  0xa3   : > { %v781_v13 = vpop.f32.mrf.mxu0 }
  0xa4   : > { %v782_v15 = vadd.f32 %v10928_v14, %v781_v13 }
  0xa6   : > { %7478 = vmatmul.msk.bf16.gmra.mxu0 %vm723_vm0, %v10207_v12  ;;  %v893_v17 = vmul.f32 0.1, %v782_v15  ;;  %vm861_vm1 = vcmp.ge.f32.partialorder %v782_v15, 0.0 }
  0xa8   : > { %v925_v20 = vsel %vm861_vm1, %v782_v15, %v893_v17 }
  0xab   : > { %v783_v16 = vpop.f32.mrf.mxu0 }
  0xac   : > { %v784_v18 = vadd.f32 %v10928_v14, %v783_v16 }
  0xae   : > { %vm862_vm2 = vcmp.ge.f32.partialorder %v784_v18, 0.0  ;;  %v894_v19 = vmul.f32 0.1, %v784_v18 }
  0xb0   : > { %v926_v21 = vsel %vm862_vm2, %v784_v18, %v894_v19 }
  0xb1   : > { %v10933_v22 = vpack.c.bf16 %v926_v21, %v925_v20 }
  0xb3   : > { %v786_v24 = vpop.f32.mrf.mxu0 }
  0xb4   : > { %v787_v25 = vadd.f32 %v10928_v14, %v786_v24 }
  0xb6   : > { %7479 = vmatmul.msk.bf16.gmra.mxu0 %vm723_vm0, %v10208_v23  ;;  %v895_v27 = vmul.f32 0.1, %v787_v25  ;;  %vm863_vm3 = vcmp.ge.f32.partialorder %v787_v25, 0.0 }
  0xb8   : > { %v927_v30 = vsel %vm863_vm3, %v787_v25, %v895_v27 }
  0xbb   : > { %v788_v26 = vpop.f32.mrf.mxu0 }
  0xbc   : > { %v789_v28 = vadd.f32 %v10928_v14, %v788_v26 }
  0xbe   : > { %vm864_vm4 = vcmp.ge.f32.partialorder %v789_v28, 0.0  ;;  %v896_v29 = vmul.f32 0.1, %v789_v28 }
  0xc0   : > { %v928_v31 = vsel %vm864_vm4, %v789_v28, %v896_v29 }
  0xc1   : > { %v10939_v32 = vpack.c.bf16 %v928_v31, %v927_v30 }
  0xc3   : > { %v791_v34 = vpop.f32.mrf.mxu0 }
  0xc4   : > { %v792_v35 = vadd.f32 %v10928_v14, %v791_v34 }
  0xc6   : > { %7480 = vmatmul.msk.bf16.gmra.mxu0 %vm723_vm0, %v10209_v33  ;;  %v897_v37 = vmul.f32 0.1, %v792_v35  ;;  %vm865_vm5 = vcmp.ge.f32.partialorder %v792_v35, 0.0 }
  0xc8   : > { %v929_v40 = vsel %vm865_vm5, %v792_v35, %v897_v37 }
  0xcb   : > { %v793_v36 = vpop.f32.mrf.mxu0 }
  0xcc   : > { %v794_v38 = vadd.f32 %v10928_v14, %v793_v36 }
  0xce   : > { %vm866_vm6 = vcmp.ge.f32.partialorder %v794_v38, 0.0  ;;  %v898_v39 = vmul.f32 0.1, %v794_v38 }
  0xd0   : > { %v930_v41 = vsel %vm866_vm6, %v794_v38, %v898_v39  ;;  %v7488_v39 = vld [vmem:[%s14781_s3] sm:$0xf] }
  0xd1   : > { %v10945_v42 = vpack.c.bf16 %v930_v41, %v929_v40  ;;  %v10220_v40 = vld [vmem:[%s14781_s3 + $0x4] sm:$0xf0] }
  0xd2   : > { %v7489_v41 = vor.u32 %v10220_v40, %v7488_v39 }
  0xd3   : > { %v796_v44 = vpop.f32.mrf.mxu0 }
  0xd4   : > { %v797_v45 = vadd.f32 %v10928_v14, %v796_v44 }
  0xd6   : > { %7481 = vmatmul.msk.bf16.gmra.mxu0 %vm723_vm0, %v10210_v43  ;;  %v899_v47 = vmul.f32 0.1, %v797_v45  ;;  %vm867_vm7 = vcmp.ge.f32.partialorder %v797_v45, 0.0 }
  0xd8   : > { %v931_v50 = vsel %vm867_vm7, %v797_v45, %v899_v47  ;;  %v7496_v45 = vld [vmem:[%s14781_s3 + $0x10] sm:$0xf] }
  0xdb   : > { %v798_v46 = vpop.f32.mrf.mxu0 }
  0xdc   : > { %v799_v48 = vadd.f32 %v10928_v14, %v798_v46  ;;  %v10222_v46 = vld [vmem:[%s14781_s3 + $0x14] sm:$0xf0] }
  0xdd   : > { %v7497_v47 = vor.u32 %v10222_v46, %v7496_v45  ;;  %v7536_v46 = vld [vmem:[%s14781_s3 + $0x50] sm:$0xf] }
  0xde   : > { %vm868_vm8 = vcmp.ge.f32.partialorder %v799_v48, 0.0  ;;  %v900_v49 = vmul.f32 0.1, %v799_v48 }
  0xe0   : > { %v932_v51 = vsel %vm868_vm8, %v799_v48, %v900_v49  ;;  %v7752_v49 = vld [vmem:[%s14781_s3 + $0x100] sm:$0xf] }
  0xe1   : > { %v10951_v52 = vpack.c.bf16 %v932_v51, %v931_v50  ;;  %v10268_v50 = vld [vmem:[%s14781_s3 + $0x104] sm:$0xf0] }
  0xe2   : > { %v7753_v51 = vor.u32 %v10268_v50, %v7752_v49 }
  0xe3   : > { %v801_v54 = vpop.f32.mrf.mxu0 }
  0xe4   : > { %v802_v19 = vadd.f32 %v10928_v14, %v801_v54  ;;  %v7504_v54 = vld [vmem:[%s14781_s3 + $0x20] sm:$0xf] }
  0xe6   : > { %7482 = vmatmul.msk.bf16.gmra.mxu0 %vm723_vm0, %v10211_v53  ;;  %v901_v26 = vmul.f32 0.1, %v802_v19  ;;  %vm869_vm1 = vcmp.ge.f32.partialorder %v802_v19, 0.0 }
  0xe8   : > { %v933_v31 = vsel %vm869_vm1, %v802_v19, %v901_v26 }
  0xeb   : > { %v803_v55 = vpop.f32.mrf.mxu0 }
  0xec   : > { %v804_v15 = vadd.f32 %v10928_v14, %v803_v55  ;;  %v10224_v55 = vld [vmem:[%s14781_s3 + $0x24] sm:$0xf0] }
  0xee   : > { %v902_v24 = vmul.f32 0.1, %v804_v15  ;;  %vm870_vm15 = vcmp.ge.f32.partialorder %v804_v15, 0.0 }
  0xf0   : > { %v934_v29 = vsel %vm870_vm15, %v804_v15, %v902_v24  ;;  %v10274_v15 = vld [vmem:[%s14781_s3 + $0x134] sm:$0xf0] }
  0xf1   : > { %v10988_v33 = vpack.c.bf16 %v934_v29, %v933_v31 }
  0xf3   : > { %v806_v57 = vpop.f32.mrf.mxu0 }
  0xf4   : > { %v807_v9 = vadd.f32 %v10928_v14, %v806_v57 }
  0xf6   : > { %7483 = vmatmul.msk.bf16.gmra.mxu0 %vm723_vm0, %v10212_v56  ;;  %v903_v20 = vmul.f32 0.1, %v807_v9  ;;  %vm871_vm14 = vcmp.ge.f32.partialorder %v807_v9, 0.0  ;;  %v7505_v56 = vor.u32 %v10224_v55, %v7504_v54 }
  0xf8   : > { %v935_v27 = vsel %vm871_vm14, %v807_v9, %v903_v20 }
  0xfb   : > { %v808_v58 = vpop.f32.mrf.mxu0 }
  0xfc   : > { %v809_v6 = vadd.f32 %v10928_v14, %v808_v58  ;;  %v7760_v58 = vld [vmem:[%s14781_s3 + $0x110] sm:$0xf] }
  0xfe   : > { %v904_v16 = vmul.f32 0.1, %v809_v6  ;;  %vm872_vm13 = vcmp.ge.f32.partialorder %v809_v6, 0.0 }
 0x100   : > { %v936_v25 = vsel %vm872_vm13, %v809_v6, %v904_v16  ;;  %v10232_v6 = vld [vmem:[%s14781_s3 + $0x44] sm:$0xf0] }
 0x101   : > { %v10981_v28 = vpack.c.bf16 %v936_v25, %v935_v27 }
 0x103   : > { %v811_v60 = vpop.f32.mrf.mxu0 }
 0x104   : > { %v812_v3 = vadd.f32 %v10928_v14, %v811_v60 }
 0x106   : > { %7484 = vmatmul.msk.bf16.gmra.mxu0 %vm723_vm0, %v10213_v59  ;;  %v905_v10 = vmul.f32 0.1, %v812_v3  ;;  %vm873_vm12 = vcmp.ge.f32.partialorder %v812_v3, 0.0  ;;  %v10270_v59 = vld [vmem:[%s14781_s3 + $0x114] sm:$0xf0] }
 0x107   : > { %v7761_v60 = vor.u32 %v10270_v59, %v7760_v58 }
 0x108   : > { %v937_v21 = vsel %vm873_vm12, %v812_v3, %v905_v10  ;;  %v10272_v3 = vld [vmem:[%s14781_s3 + $0x124] sm:$0xf0] }
 0x10b   : > { %v813_v61 = vpop.f32.mrf.mxu0 }
 0x10c   : > { %v814_v1 = vadd.f32 %v10928_v14, %v813_v61 }
 0x10e   : > { %v906_v7 = vmul.f32 0.1, %v814_v1  ;;  %vm874_vm11 = vcmp.ge.f32.partialorder %v814_v1, 0.0 }
 0x110   : > { %v938_v17 = vsel %vm874_vm11, %v814_v1, %v906_v7 }
 0x111   : > { %v10976_v23 = vpack.c.bf16 %v938_v17, %v937_v21 }
 0x113   : > { %v816_v63 = vpop.f32.mrf.mxu0 }
 0x114   : > { %v817_v0 = vadd.f32 %v10928_v14, %v816_v63  ;;  %v10226_v63 = vld [vmem:[%s14781_s3 + $0x34] sm:$0xf0] }
 0x116   : > { %7485 = vmatmul.msk.bf16.gmra.mxu0 %vm723_vm0, %v10214_v62  ;;  %v907_v4 = vmul.f32 0.1, %v817_v0  ;;  %vm875_vm9 = vcmp.ge.f32.partialorder %v817_v0, 0.0  ;;  %v7512_v62 = vld [vmem:[%s14781_s3 + $0x30] sm:$0xf] }
 0x118   : > { %v939_v11 = vsel %vm875_vm9, %v817_v0, %v907_v4  ;;  %v7513_v0 = vor.u32 %v10226_v63, %v7512_v62 }
 0x11b   : > { %v818_v2 = vpop.f32.mrf.mxu0 }
 0x11c   : > { %v819_v5 = vadd.f32 %v10928_v14, %v818_v2  ;;  %v7768_v2 = vld [vmem:[%s14781_s3 + $0x120] sm:$0xf] }
 0x11d   : > { %v7769_v4 = vor.u32 %v10272_v3, %v7768_v2 }
 0x11e   : > { %vm876_vm10 = vcmp.ge.f32.partialorder %v819_v5, 0.0  ;;  %v908_v8 = vmul.f32 0.1, %v819_v5 }
 0x120   : > { %v940_v12 = vsel %vm876_vm10, %v819_v5, %v908_v8  ;;  %v7528_v5 = vld [vmem:[%s14781_s3 + $0x40] sm:$0xf] }
 0x121   : > { %v10967_v13 = vpack.c.bf16 %v940_v12, %v939_v11  ;;  %v7529_v8 = vor.u32 %v10232_v6, %v7528_v5  ;;  %v7776_v12 = vld [vmem:[%s14781_s3 + $0x130] sm:$0xf] }
 0x122   : > { %v7777_v20 = vor.u32 %v10274_v15, %v7776_v12 }
 0x123   : > { %v10970_v18 = vpop.f32.mrf.mxu0  ;;  %1021 = vmatpush.bf16.msra.mxu1 %v10967_v13  ;;  %1140 = vmatpush.bf16.msra.mxu3 %v10967_v13 }
 0x124   : > { %1776 = vmatpush.bf16.msrb.mxu0 %v10967_v13 }
 0x127   : > { %1022 = vmatpush.bf16.msra.mxu1 %v10976_v23  ;;  %1141 = vmatpush.bf16.msra.mxu3 %v10976_v23 }
 0x128   : > { %1777 = vmatpush.bf16.msrb.mxu0 %v10976_v23 }
 0x12b   : > { %v10983_v30 = vpop.f32.mrf.mxu0  ;;  %1023 = vmatpush.bf16.msra.mxu1 %v10981_v28  ;;  %1142 = vmatpush.bf16.msra.mxu3 %v10981_v28 }
 0x12c   : > { %1778 = vmatpush.bf16.msrb.mxu0 %v10981_v28 }
 0x12f   : > { %1024 = vmatpush.bf16.msra.mxu1 %v10988_v33  ;;  %1143 = vmatpush.bf16.msra.mxu3 %v10988_v33 }
 0x130   : > { %1779 = vmatpush.bf16.msrb.mxu0 %v10988_v33 }
 0x133   : > { %v10993_v34 = vpop.f32.mrf.mxu0  ;;  %1025 = vmatpush.bf16.msra.mxu1 %v10951_v52  ;;  %1144 = vmatpush.bf16.msra.mxu3 %v10951_v52 }
 0x134   : > { %1780 = vmatpush.bf16.msrb.mxu0 %v10951_v52 }
 0x137   : > { %1026 = vmatpush.bf16.msra.mxu1 %v10945_v42  ;;  %1145 = vmatpush.bf16.msra.mxu3 %v10945_v42 }
 0x138   : > { %1781 = vmatpush.bf16.msrb.mxu0 %v10945_v42 }
 0x13b   : > { %v11001_v35 = vpop.f32.mrf.mxu0  ;;  %1027 = vmatpush.bf16.msra.mxu1 %v10939_v32  ;;  %1146 = vmatpush.bf16.msra.mxu3 %v10939_v32 }
 0x13c   : > { %1782 = vmatpush.bf16.msrb.mxu0 %v10939_v32 }
 0x13f   : > { %1028 = vmatpush.bf16.msra.mxu1 %v10933_v22  ;;  %1147 = vmatpush.bf16.msra.mxu3 %v10933_v22 }
 0x140   : > { %1783 = vmatpush.bf16.msrb.mxu0 %v10933_v22 }
 0x142   : > { %1029 = vmatmul.bf16.vlgmr.msra.gmra.mxu1 %v7489_v41  ;;  %1148 = vmatmul.bf16.vlgmr.msra.gmra.mxu3 %v7529_v8  ;;  %v7544_v8 = vld [vmem:[%s14781_s3 + $0x60] sm:$0xf] }
 0x143   : > { %v11009_v36 = vpop.f32.mrf.mxu0  ;;  %1784 = vmatmul.bf16.vlgmr.msrb.gmra.mxu0 %v7753_v51 }
 0x14b   : > { %v11011_v37 = vpop.f32.mrf.mxu0 }
 0x152   : > { %1034 = vmatmul.bf16.gmra.mxu1 %v7497_v47  ;;  %v10234_v47 = vld [vmem:[%s14781_s3 + $0x54] sm:$0xf0] }
 0x153   : > { %v11013_v38 = vpop.f32.mrf.mxu0  ;;  %1789 = vmatmul.bf16.gmra.mxu0 %v7761_v60  ;;  %v7537_v49 = vor.u32 %v10234_v47, %v7536_v46 }
 0x155   : > { %1153 = vmatmul.bf16.gmra.mxu3 %v7537_v49  ;;  %v10241_v49 = vld [vmem:[%s14782_s4 + $0x30] sm:$0xff] }
 0x15b   : > { %v11021_v43 = vpop.f32.mrf.mxu0 }
 0x15c   : > { %v839_v54 = vadd.f32 %v10928_v14, %v11021_v43  ;;  %v834_v43 = vadd.f32 %v10928_v14, %v11011_v37  ;;  %v829_v37 = vadd.f32 %v10928_v14, %v11001_v35  ;;  %v824_v35 = vadd.f32 %v10928_v14, %v10983_v30 }
 0x15e   : > { %v916_v60 = vmul.f32 0.1, %v839_v54  ;;  %vm884_vm10 = vcmp.ge.f32.partialorder %v839_v54, 0.0  ;;  %vm882_vm12 = vcmp.ge.f32.partialorder %v834_v43, 0.0  ;;  %v912_v6 = vmul.f32 0.1, %v829_v37 }
 0x15f   : > { %vm880_vm14 = vcmp.ge.f32.partialorder %v829_v37, 0.0  ;;  %v910_v15 = vmul.f32 0.1, %v824_v35  ;;  %vm878_vm1 = vcmp.ge.f32.partialorder %v824_v35, 0.0 }
 0x160   : > { %v948_v2 = vsel %vm884_vm10, %v839_v54, %v916_v60  ;;  %v10240_v54 = vld [vmem:[%s14782_s4 + $0x28] sm:$0xff]  ;;  %v10233_v60 = vld [vmem:[%s14781_s3 + $0x54] sm:$0xf] }
 0x162   : > { %1039 = vmatmul.bf16.gmra.mxu1 %v7505_v56 }
 0x163   : > { %v11023_v44 = vpop.f32.mrf.mxu0  ;;  %1794 = vmatmul.bf16.gmra.mxu0 %v7769_v4 }
 0x164   : > { %v842_v50 = vadd.f32 %v10928_v14, %v11023_v44  ;;  %v837_v44 = vadd.f32 %v10928_v14, %v11013_v38  ;;  %v832_v38 = vadd.f32 %v10928_v14, %v11009_v36  ;;  %v827_v36 = vadd.f32 %v10928_v14, %v10993_v34  ;;  %v10236_v34 = vld [vmem:[%s14781_s3 + $0x64] sm:$0xf0] }
 0x166   : > { %vm885_vm9 = vcmp.ge.f32.partialorder %v842_v50, 0.0  ;;  %v915_v62 = vmul.f32 0.1, %v837_v44  ;;  %vm883_vm11 = vcmp.ge.f32.partialorder %v837_v44, 0.0  ;;  %v913_v3 = vmul.f32 0.1, %v832_v38 }
 0x167   : > { %vm881_vm13 = vcmp.ge.f32.partialorder %v832_v38, 0.0  ;;  %v911_v30 = vmul.f32 0.1, %v827_v36  ;;  %vm879_vm15 = vcmp.ge.f32.partialorder %v827_v36, 0.0 }
 0x168   : > { %v947_v4 = vsel %vm883_vm11, %v837_v44, %v915_v62  ;;  %v10239_v44 = vld [vmem:[%s14782_s4 + $0x20] sm:$0xff] }
 0x169   : > { %v11120_v5 = vpack.c.bf16 %v948_v2, %v947_v4  ;;  %v7546_v2 = vld [vmem:[%s14781_s3 + $0x68] sm:$0xf0]  ;;  %v10225_v4 = vld [vmem:[%s14781_s3 + $0x34] sm:$0xf] }
 0x16b   : > { %v843_v48 = vpop.f32.mrf.mxu0 }
 0x16c   : > { %v844_v40 = vadd.f32 %v10928_v14, %v843_v48 }
 0x16e   : > { %v918_v55 = vmul.f32 0.1, %v844_v40  ;;  %vm886_vm8 = vcmp.ge.f32.partialorder %v844_v40, 0.0 }
 0x172   : > { %1044 = vmatmul.bf16.gmra.mxu1 %v7513_v0 }
 0x173   : > { %v846_v53 = vpop.f32.mrf.mxu0  ;;  %1799 = vmatmul.bf16.gmra.mxu0 %v7777_v20  ;;  %v10219_v20 = vld [vmem:[%s14781_s3 + $0x4] sm:$0xf] }
 0x174   : > { %v847_v26 = vadd.f32 %v10928_v14, %v846_v53 }
 0x176   : > { %v919_v48 = vmul.f32 0.1, %v847_v26  ;;  %vm887_vm7 = vcmp.ge.f32.partialorder %v847_v26, 0.0 }
 0x178   : > { %v951_v58 = vsel %vm887_vm7, %v847_v26, %v919_v48  ;;  %v7552_v48 = vld [vmem:[%s14781_s3 + $0x70] sm:$0xf] }
 0x17b   : > { %v848_v57 = vpop.f32.mrf.mxu0 }
 0x17c   : > { %v849_v21 = vadd.f32 %v10928_v14, %v848_v57  ;;  %v917_v57 = vmul.f32 0.1, %v842_v50 }
 0x17e   : > { %v920_v41 = vmul.f32 0.1, %v849_v21  ;;  %vm888_vm6 = vcmp.ge.f32.partialorder %v849_v21, 0.0  ;;  %v949_v63 = vsel %vm885_vm9, %v842_v50, %v917_v57  ;;  %v10301_v50 = vld [vmem:[%s14782_s4 + $0xd0] sm:$0xff]  ;;  %v10299_v57 = vld [vmem:[%s14782_s4 + $0xc0] sm:$0xff] }
 0x180   : > { %v952_v56 = vsel %vm888_vm6, %v849_v21, %v920_v41  ;;  %v7490_v21 = vld [vmem:[%s14781_s3 + $0x8] sm:$0xf0]  ;;  %v10302_v41 = vld [vmem:[%s14782_s4 + $0xd8] sm:$0xff] }
 0x181   : > { %v11102_v59 = vpack.c.bf16 %v952_v56, %v951_v58  ;;  %v10300_v56 = vld [vmem:[%s14782_s4 + $0xc8] sm:$0xff]  ;;  %v10221_v58 = vld [vmem:[%s14781_s3 + $0x14] sm:$0xf] }
 0x183   : > { %v851_v61 = vpop.f32.mrf.mxu0 }
 0x184   : > { %v852_v16 = vadd.f32 %v10928_v14, %v851_v61  ;;  %v950_v61 = vsel %vm886_vm8, %v844_v40, %v918_v55 }
 0x185   : > { %v11111_v0 = vpack.c.bf16 %v950_v61, %v949_v63  ;;  %v7538_v61 = vld [vmem:[%s14781_s3 + $0x58] sm:$0xf0]  ;;  %v10223_v63 = vld [vmem:[%s14781_s3 + $0x24] sm:$0xf] }
 0x186   : > { %v921_v27 = vmul.f32 0.1, %v852_v16  ;;  %vm889_vm5 = vcmp.ge.f32.partialorder %v852_v16, 0.0  ;;  %v7541_v62 = vor.u32 %v10233_v60, %v7538_v61 }
 0x188   : > { %v953_v51 = vsel %vm889_vm5, %v852_v16, %v921_v27  ;;  %v944_v16 = vsel %vm880_vm14, %v829_v37, %v912_v6  ;;  %v10242_v27 = vld [vmem:[%s14782_s4 + $0x38] sm:$0xff]  ;;  %v7506_v37 = vld [vmem:[%s14781_s3 + $0x28] sm:$0xf0]  ;;  %v10237_v6 = vld [vmem:[%s14781_s3 + $0x74] sm:$0xf]  ;;  %vm7165_vm14 = vcmask 261120  }
 0x18b   : > { %v853_v1 = vpop.f32.mrf.mxu0 }
 0x18c   : > { %v854_v10 = vadd.f32 %v10928_v14, %v853_v1  ;;  %v914_v1 = vmul.f32 0.1, %v834_v43 }
 0x18e   : > { %v922_v24 = vmul.f32 0.1, %v854_v10  ;;  %vm890_vm4 = vcmp.ge.f32.partialorder %v854_v10, 0.0 }
 0x190   : > { %v954_v45 = vsel %vm890_vm4, %v854_v10, %v922_v24  ;;  %v822_v10 = vadd.f32 %v10928_v14, %v10970_v18  ;;  %v942_v18 = vsel %vm878_vm1, %v824_v35, %v910_v15  ;;  %v10231_v24 = vld [vmem:[%s14781_s3 + $0x44] sm:$0xf]  ;;  %v7514_v35 = vld [vmem:[%s14781_s3 + $0x38] sm:$0xf0] }
 0x191   : > { %v11093_v53 = vpack.c.bf16 %v954_v45, %v953_v51  ;;  %v7493_v45 = vor.u32 %v10219_v20, %v7490_v21  ;;  %v10238_v51 = vld [vmem:[%s14781_s3 + $0x74] sm:$0xf0] }
 0x192   : > { %v7553_v55 = vor.u32 %v10238_v51, %v7552_v48 }
 0x193   : > { %v856_v7 = vpop.f32.mrf.mxu0 }
 0x194   : > { %v857_v9 = vadd.f32 %v10928_v14, %v856_v7  ;;  %v946_v7 = vsel %vm882_vm12, %v834_v43, %v914_v1  ;;  %v7498_v43 = vld [vmem:[%s14781_s3 + $0x18] sm:$0xf0]  ;;  %v10235_v1 = vld [vmem:[%s14781_s3 + $0x64] sm:$0xf] }
 0x196   : > { %v923_v17 = vmul.f32 0.1, %v857_v9  ;;  %vm891_vm2 = vcmp.ge.f32.partialorder %v857_v9, 0.0 }
 0x198   : > { %v955_v29 = vsel %vm891_vm2, %v857_v9, %v923_v17  ;;  %v7545_v9 = vor.u32 %v10236_v34, %v7544_v8  ;;  %v909_v17 = vmul.f32 0.1, %v822_v10  ;;  %vm877_vm2 = vcmp.ge.f32.partialorder %v822_v10, 0.0 }
 0x199   : > { %v7517_v8 = vor.u32 %v10225_v4, %v7514_v35 }
 0x19a   : > { %1158 = vmatmul.bf16.gmra.mxu3 %v7545_v9  ;;  %v941_v26 = vsel %vm877_vm2, %v822_v10, %v909_v17  ;;  %v7624_v17 = vld [vmem:[%s14781_s3 + $0x90] sm:$0xf] }
 0x19b   : > { %v858_v11 = vpop.f32.mrf.mxu0  ;;  %v11166_v40 = vpack.c.bf16 %v942_v18, %v941_v26 }
 0x19c   : > { %v859_v19 = vadd.f32 %v10928_v14, %v858_v11  ;;  %v945_v11 = vsel %vm881_vm13, %v832_v38, %v913_v3  ;;  %v7501_v38 = vor.u32 %v10221_v58, %v7498_v43  ;;  %v7549_v3 = vor.u32 %v10235_v1, %v7546_v2  ;;  %v10258_v1 = vld [vmem:[%s14781_s3 + $0xd4] sm:$0xf0] }
 0x19d   : > { %v11135_v12 = vpack.c.bf16 %v946_v7, %v945_v11  ;;  %v7554_v7 = vld [vmem:[%s14781_s3 + $0x78] sm:$0xf0]  ;;  %v10244_v11 = vld [vmem:[%s14781_s3 + $0x84] sm:$0xf0] }
 0x19e   : > { %vm892_vm3 = vcmp.ge.f32.partialorder %v859_v19, 0.0  ;;  %v924_v25 = vmul.f32 0.1, %v859_v19  ;;  %v7557_v34 = vor.u32 %v10237_v6, %v7554_v7 }
 0x1a0   : > { %v956_v31 = vsel %vm892_vm3, %v859_v19, %v924_v25  ;;  %v943_v19 = vsel %vm879_vm15, %v827_v36, %v911_v30  ;;  %v7530_v25 = vld [vmem:[%s14781_s3 + $0x48] sm:$0xf0]  ;;  %v7509_v36 = vor.u32 %v10223_v63, %v7506_v37  ;;  %v7616_v30 = vld [vmem:[%s14781_s3 + $0x80] sm:$0xf]  ;;  %v7692_v37 = vld [vmem:[%s14781_s3 + $0xd0] sm:$0xf] }
 0x1a1   : > { %v11079_v39 = vpack.c.bf16 %v956_v31, %v955_v29  ;;  %v11140_v14 = vpack.c.bf16 %v944_v16, %v943_v19  ;;  %v10279_v29 = vld [vmem:[%s14781_s3 + $0x144] sm:$0xf]  ;;  %v7822_v31 = vld [vmem:[%s14781_s3 + $0x148] sm:$0xf0]  ;;  %v7533_v46 = vor.u32 %v10231_v24, %v7530_v25  ;;  %v7617_v15 = vor.u32 %v10244_v11, %v7616_v30  ;;  %v10246_v19 = vld [vmem:[%s14781_s3 + $0x94] sm:$0xf0] }
 0x1a2   : > { %v7825_v47 = vor.u32 %v10279_v29, %v7822_v31  ;;  %v7625_v20 = vor.u32 %v10246_v19, %v7624_v17  ;;  %v7632_v24 = vld [vmem:[%s14781_s3 + $0xa0] sm:$0xf]  ;;  %v10248_v25 = vld [vmem:[%s14781_s3 + $0xa4] sm:$0xf0]  ;;  %v10230_v29 = vld [vmem:[%s14782_s4 + $0x18] sm:$0xff]  ;;  %v7693_v35 = vor.u32 %v10258_v1, %v7692_v37  ;;  %vm7201_vm15 = vcmask 130048  }
 0x1a3   : > { %1050 = vmatpush.bf16.msra.mxu2 %v11079_v39  ;;  %1169 = vmatpush.bf16.msrb.mxu1 %v11079_v39  ;;  %v7633_v26 = vor.u32 %v10248_v25, %v7632_v24  ;;  %v10229_v31 = vld [vmem:[%s14782_s4 + $0x10] sm:$0xff]  ;;  %v7700_v17 = vld [vmem:[%s14781_s3 + $0xe0] sm:$0xf]  ;;  %v10260_v19 = vld [vmem:[%s14781_s3 + $0xe4] sm:$0xf0] }
 0x1a4   : > { %1998 = vmatpush.bf16.msra.mxu0 %v11079_v39  ;;  %1316 = vmatpush.bf16.msrb.mxu3 %v10230_v29  ;;  %v10289_v30 = vld [vmem:[%s14782_s4 + $0xb0] sm:$0xff]  ;;  %v10288_v24 = vld [vmem:[%s14782_s4 + $0xa8] sm:$0xff]  ;;  %v7701_v29 = vor.u32 %v10260_v19, %v7700_v17  ;;  %v7626_v17 = vld [vmem:[%s14781_s3 + $0x98] sm:$0xf0] }
 0x1a7   : > { %1051 = vmatpush.bf16.msra.mxu2 %v11093_v53  ;;  %1170 = vmatpush.bf16.msrb.mxu1 %v11093_v53 }
 0x1a8   : > { %1999 = vmatpush.bf16.msra.mxu0 %v11093_v53  ;;  %1317 = vmatpush.bf16.msrb.mxu3 %v10229_v31 }
 0x1aa   : > { %1163 = vmatmul.bf16.gmra.mxu3 %v7553_v55  ;;  %v7684_v55 = vld [vmem:[%s14781_s3 + $0xc0] sm:$0xf] }
 0x1ab   : > { %1052 = vmatpush.bf16.msra.mxu2 %v11102_v59  ;;  %1171 = vmatpush.bf16.msrb.mxu1 %v11102_v59 }
 0x1ac   : > { %2000 = vmatpush.bf16.msra.mxu0 %v11102_v59 }
 0x1af   : > { %1053 = vmatpush.bf16.msra.mxu2 %v11111_v0  ;;  %1172 = vmatpush.bf16.msrb.mxu1 %v11111_v0 }
 0x1b0   : > { %2001 = vmatpush.bf16.msra.mxu0 %v11111_v0 }
 0x1b3   : > { %1054 = vmatpush.bf16.msra.mxu2 %v11120_v5  ;;  %1173 = vmatpush.bf16.msrb.mxu1 %v11120_v5 }
 0x1b4   : > { %2002 = vmatpush.bf16.msra.mxu0 %v11120_v5 }
 0x1b7   : > { %1055 = vmatpush.bf16.msra.mxu2 %v11135_v12  ;;  %1174 = vmatpush.bf16.msrb.mxu1 %v11135_v12 }
 0x1b8   : > { %2003 = vmatpush.bf16.msra.mxu0 %v11135_v12 }
 0x1bb   : > { %1056 = vmatpush.bf16.msra.mxu2 %v11140_v14  ;;  %1175 = vmatpush.bf16.msrb.mxu1 %v11140_v14 }
 0x1bc   : > { %2004 = vmatpush.bf16.msra.mxu0 %v11140_v14 }
 0x1bf   : > { %1057 = vmatpush.bf16.msra.mxu2 %v11166_v40  ;;  %1176 = vmatpush.bf16.msrb.mxu1 %v11166_v40  ;;  %v11263_v9 = vpop.f32.mrf.mxu1 }
 0x1c0   : > { %2005 = vmatpush.bf16.msra.mxu0 %v11166_v40 }
 0x1c2   : > { %1058 = vmatmul.bf16.vlgmr.msra.gmra.mxu2 %v7493_v45  ;;  %1177 = vmatmul.bf16.vlgmr.msrb.gmra.mxu1 %v7533_v46  ;;  %v7640_v46 = vld [vmem:[%s14781_s3 + $0xb0] sm:$0xf] }
 0x1c3   : > { %1251 = vmatpush.bf16.msrb.mxu2 %v10242_v27  ;;  %1390 = vmatpush.bf16.msra.mxu1 %v10967_v13 }
 0x1c4   : > { %2273 = vmatpush.bf16.msrb.mxu0 %v10302_v41  ;;  %v10228_v41 = vld [vmem:[%s14782_s4 + $0x8] sm:$0xff] }
 0x1c5   : > { %2006 = vmatmul.bf16.vlgmr.msra.gmra.mxu0 %v7825_v47  ;;  %v10250_v47 = vld [vmem:[%s14781_s3 + $0xb4] sm:$0xf0]  ;;  %1318 = vmatpush.bf16.msrb.mxu3 %v10228_v41  ;;  %v1149_v48 = vpop.f32.mrf.mxu3 }
 0x1c7   : > { %1252 = vmatpush.bf16.msrb.mxu2 %v10241_v49  ;;  %1391 = vmatpush.bf16.msra.mxu1 %v10976_v23  ;;  %v1032_v10 = vpop.f32.mrf.mxu1  ;;  %v7641_v49 = vor.u32 %v10250_v47, %v7640_v46  ;;  %v10287_v46 = vld [vmem:[%s14782_s4 + $0xa0] sm:$0xff] }
 0x1c8   : > { %2274 = vmatpush.bf16.msrb.mxu0 %v10301_v50  ;;  %v10227_v50 = vld [vmem:[%s14782_s4] sm:$0xff] }
 0x1c9   : > { %1319 = vmatpush.bf16.msrb.mxu3 %v10227_v50 }
 0x1cb   : > { %1253 = vmatpush.bf16.msrb.mxu2 %v10240_v54  ;;  %1392 = vmatpush.bf16.msra.mxu1 %v10981_v28 }
 0x1cc   : > { %2275 = vmatpush.bf16.msrb.mxu0 %v10300_v56  ;;  %v10256_v56 = vld [vmem:[%s14781_s3 + $0xc4] sm:$0xf0] }
 0x1cd   : > { %v1151_v54 = vpop.f32.mrf.mxu3 }
 0x1cf   : > { %1254 = vmatpush.bf16.msrb.mxu2 %v10239_v44  ;;  %1393 = vmatpush.bf16.msra.mxu1 %v10988_v33  ;;  %v11275_v16 = vpop.f32.mrf.mxu1 }
 0x1d0   : > { %2276 = vmatpush.bf16.msrb.mxu0 %v10299_v57  ;;  %v7685_v57 = vor.u32 %v10256_v56, %v7684_v55  ;;  %v10262_v55 = vld [vmem:[%s14781_s3 + $0xf4] sm:$0xf0] }
 0x1d2   : > { %1063 = vmatmul.bf16.gmra.mxu2 %v7501_v38  ;;  %1182 = vmatmul.bf16.gmra.mxu1 %v7541_v62 }
 0x1d3   : > { %1419 = vmatpush.bf16.msra.mxu2 %v11079_v39  ;;  %1394 = vmatpush.bf16.msra.mxu1 %v10951_v52 }
 0x1d4   : > { %2548 = vmatpush.bf16.msra.mxu0 %v10967_v13 }
 0x1d7   : > { %1420 = vmatpush.bf16.msra.mxu2 %v11093_v53  ;;  %1395 = vmatpush.bf16.msra.mxu1 %v10945_v42  ;;  %v11285_v18 = vpop.f32.mrf.mxu1 }
 0x1d8   : > { %2549 = vmatpush.bf16.msra.mxu0 %v10976_v23  ;;  %v1154_v43 = vpop.f32.mrf.mxu3 }
 0x1db   : > { %1421 = vmatpush.bf16.msra.mxu2 %v11102_v59  ;;  %1396 = vmatpush.bf16.msra.mxu1 %v10939_v32 }
 0x1dc   : > { %2550 = vmatpush.bf16.msra.mxu0 %v10981_v28 }
 0x1df   : > { %1422 = vmatpush.bf16.msra.mxu2 %v11111_v0  ;;  %1397 = vmatpush.bf16.msra.mxu1 %v10933_v22  ;;  %v11290_v21 = vpop.f32.mrf.mxu1 }
 0x1e0   : > { %2551 = vmatpush.bf16.msra.mxu0 %v10988_v33  ;;  %v1156_v6 = vpop.f32.mrf.mxu3 }
 0x1e2   : > { %1068 = vmatmul.bf16.gmra.mxu2 %v7509_v36  ;;  %1187 = vmatmul.bf16.gmra.mxu1 %v7549_v3 }
 0x1e3   : > { %1423 = vmatpush.bf16.msra.mxu2 %v11120_v5  ;;  %1583 = vmatpush.bf16.msrb.mxu1 %v10967_v13 }
 0x1e4   : > { %2552 = vmatpush.bf16.msra.mxu0 %v10951_v52 }
 0x1e7   : > { %1424 = vmatpush.bf16.msra.mxu2 %v11135_v12  ;;  %1584 = vmatpush.bf16.msrb.mxu1 %v10976_v23  ;;  %v11300_v27 = vpop.f32.mrf.mxu1 }
 0x1e8   : > { %2553 = vmatpush.bf16.msra.mxu0 %v10945_v42 }
 0x1eb   : > { %1425 = vmatpush.bf16.msra.mxu2 %v11140_v14  ;;  %1585 = vmatpush.bf16.msrb.mxu1 %v10981_v28 }
 0x1ec   : > { %2554 = vmatpush.bf16.msra.mxu0 %v10939_v32 }
 0x1ef   : > { %1426 = vmatpush.bf16.msra.mxu2 %v11166_v40  ;;  %1586 = vmatpush.bf16.msrb.mxu1 %v10988_v33  ;;  %v11311_v45 = vpop.f32.mrf.mxu1 }
 0x1f0   : > { %2555 = vmatpush.bf16.msra.mxu0 %v10933_v22 }
 0x1f2   : > { %1073 = vmatmul.bf16.gmra.mxu2 %v7517_v8  ;;  %1192 = vmatmul.bf16.gmra.mxu1 %v7557_v34  ;;  %v10290_v8 = vld [vmem:[%s14782_s4 + $0xb8] sm:$0xff] }
 0x1f3   : > { %1587 = vmatpush.bf16.msrb.mxu1 %v10951_v52 }
 0x1f7   : > { %1588 = vmatpush.bf16.msrb.mxu1 %v10945_v42  ;;  %v11322_v51 = vpop.f32.mrf.mxu1 }
 0x1fb   : > { %1589 = vmatpush.bf16.msrb.mxu1 %v10939_v32 }
 0x1ff   : > { %1590 = vmatpush.bf16.msrb.mxu1 %v10933_v22 }
 0x202   : > { %1398 = vmatmul.bf16.vlgmr.msra.gmra.mxu1 %v7617_v15 }
 0x203   : > { %1805 = vmatpush.bf16.msra.mxu1 %v11079_v39 }
 0x207   : > { %1806 = vmatpush.bf16.msra.mxu1 %v11093_v53 }
 0x20b   : > { %1807 = vmatpush.bf16.msra.mxu1 %v11102_v59 }
 0x20f   : > { %1808 = vmatpush.bf16.msra.mxu1 %v11111_v0 }
 0x212   : > { %1403 = vmatmul.bf16.gmra.mxu1 %v7625_v20 }
 0x213   : > { %1809 = vmatpush.bf16.msra.mxu1 %v11120_v5 }
 0x217   : > { %1810 = vmatpush.bf16.msra.mxu1 %v11135_v12 }
 0x21b   : > { %1811 = vmatpush.bf16.msra.mxu1 %v11140_v14 }
 0x21d   : > { %v1159_v11 = vpop.f32.mrf.mxu3 }
 0x21f   : > { %1812 = vmatpush.bf16.msra.mxu1 %v11166_v40 }
 0x222   : > { %1408 = vmatmul.bf16.gmra.mxu1 %v7633_v26 }
 0x225   : > { %v1161_v47 = vpop.f32.mrf.mxu3 }
 0x232   : > { %1413 = vmatmul.bf16.gmra.mxu1 %v7641_v49 }
 0x23f   : > { %v1178_v44 = vpop.f32.mrf.mxu1 }
 0x240   : > { %v1179_v61 = vadd.f32 %v1178_v44, %v1149_v48 }
 0x242   : > { %1591 = vmatmul.bf16.vlgmr.msrb.gmra.mxu1 %v7685_v57  ;;  %v1164_v57 = vpop.f32.mrf.mxu3 }
 0x243   : > { %2080 = vmatpush.bf16.msrb.mxu1 %v10290_v8  ;;  %v10243_v8 = vld [vmem:[%s14781_s3 + $0x84] sm:$0xf] }
 0x245   : > { %v1059_v58 = vpop.f32.mrf.mxu2 }
 0x246   : > { %v1060_v2 = vadd.f32 %v1059_v58, %v11263_v9 }
 0x247   : > { %v1180_v60 = vpop.f32.mrf.mxu1  ;;  %2081 = vmatpush.bf16.msrb.mxu1 %v10289_v30 }
 0x248   : > { %v1181_v38 = vadd.f32 %v1180_v60, %v1151_v54  ;;  %v7708_v54 = vld [vmem:[%s14781_s3 + $0xf0] sm:$0xf] }
 0x24a   : > { %v1198_v62 = vpack.c.bf16 %v1181_v38, %v1179_v61 }
 0x24b   : > { %2082 = vmatpush.bf16.msrb.mxu1 %v10288_v24  ;;  %v10271_v24 = vld [vmem:[%s14781_s3 + $0x124] sm:$0xf] }
 0x24c   : > { %7582 = vmatmul.msk.bf16.vlgmr.msrb.gmra.mxu2 %vm723_vm0, %v1198_v62  ;;  %v1166_v62 = vpop.f32.mrf.mxu3 }
 0x24d   : > { %1612 = vmatpush.bf16.msrb.mxu2 %v11079_v39  ;;  %v1061_v63 = vpop.f32.mrf.mxu2 }
 0x24e   : > { %v1062_v36 = vadd.f32 %v1061_v63, %v1032_v10 }
 0x24f   : > { %v1183_v4 = vpop.f32.mrf.mxu1  ;;  %2083 = vmatpush.bf16.msrb.mxu1 %v10287_v46  ;;  %v10247_v46 = vld [vmem:[%s14781_s3 + $0xa4] sm:$0xf] }
 0x250   : > { %v1079_v3 = vpack.c.bf16 %v1062_v36, %v1060_v2  ;;  %v1184_v9 = vadd.f32 %v1183_v4, %v1154_v43  ;;  %v7709_v43 = vor.u32 %v10262_v55, %v7708_v54  ;;  %v10267_v36 = vld [vmem:[%s14781_s3 + $0x104] sm:$0xf]  ;;  %v7778_v54 = vld [vmem:[%s14781_s3 + $0x138] sm:$0xf0] }
 0x251   : > { %1613 = vmatpush.bf16.msrb.mxu2 %v11093_v53 }
 0x252   : > { %7602 = vmatmul.msk.bf16.vlgmr.msrb.gmra.mxu3 %vm723_vm0, %v1079_v3  ;;  %1596 = vmatmul.bf16.gmra.mxu1 %v7693_v35 }
 0x255   : > { %1614 = vmatpush.bf16.msrb.mxu2 %v11102_v59  ;;  %v1064_v7 = vpop.f32.mrf.mxu2 }
 0x256   : > { %v1065_v25 = vadd.f32 %v1064_v7, %v11275_v16 }
 0x257   : > { %v1185_v34 = vpop.f32.mrf.mxu1 }
 0x258   : > { %v1186_v10 = vadd.f32 %v1185_v34, %v1156_v6  ;;  %v7618_v34 = vld [vmem:[%s14781_s3 + $0x88] sm:$0xf0] }
 0x259   : > { %1615 = vmatpush.bf16.msrb.mxu2 %v11111_v0 }
 0x25a   : > { %v1199_v15 = vpack.c.bf16 %v1186_v10, %v1184_v9  ;;  %v10269_v9 = vld [vmem:[%s14781_s3 + $0x114] sm:$0xf]  ;;  %v7762_v10 = vld [vmem:[%s14781_s3 + $0x118] sm:$0xf0] }
 0x25b   : > { %v7765_v30 = vor.u32 %v10269_v9, %v7762_v10 }
 0x25c   : > { %7583 = vmatmul.msk.bf16.gmra.mxu2 %vm723_vm0, %v1199_v15  ;;  %v10245_v15 = vld [vmem:[%s14781_s3 + $0x94] sm:$0xf] }
 0x25d   : > { %1616 = vmatpush.bf16.msrb.mxu2 %v11120_v5  ;;  %v1066_v20 = vpop.f32.mrf.mxu2 }
 0x25e   : > { %v1067_v26 = vadd.f32 %v1066_v20, %v11285_v18  ;;  %v7629_v20 = vor.u32 %v10245_v15, %v7626_v17  ;;  %v7702_v15 = vld [vmem:[%s14781_s3 + $0xe8] sm:$0xf0]  ;;  %v10253_v17 = vld [vmem:[%s14782_s4 + $0x50] sm:$0xff] }
 0x25f   : > { %v1188_v41 = vpop.f32.mrf.mxu1 }
 0x260   : > { %v1080_v31 = vpack.c.bf16 %v1067_v26, %v1065_v25  ;;  %v1189_v18 = vadd.f32 %v1188_v41, %v1159_v11  ;;  %v7770_v25 = vld [vmem:[%s14781_s3 + $0x128] sm:$0xf0]  ;;  %v10277_v41 = vld [vmem:[%s14782_s4 + $0x90] sm:$0xff] }
 0x261   : > { %1617 = vmatpush.bf16.msrb.mxu2 %v11135_v12  ;;  %v7773_v26 = vor.u32 %v10271_v24, %v7770_v25 }
 0x262   : > { %7603 = vmatmul.msk.bf16.gmra.mxu3 %vm723_vm0, %v1080_v31  ;;  %1601 = vmatmul.bf16.gmra.mxu1 %v7701_v29  ;;  %v10278_v29 = vld [vmem:[%s14782_s4 + $0x98] sm:$0xff] }
 0x265   : > { %1618 = vmatpush.bf16.msrb.mxu2 %v11140_v14  ;;  %v1069_v16 = vpop.f32.mrf.mxu2 }
 0x266   : > { %v1070_v44 = vadd.f32 %v1069_v16, %v11290_v21  ;;  %v7754_v21 = vld [vmem:[%s14781_s3 + $0x108] sm:$0xf0] }
 0x267   : > { %v1190_v49 = vpop.f32.mrf.mxu1  ;;  %v7757_v35 = vor.u32 %v10267_v36, %v7754_v21  ;;  %v10276_v16 = vld [vmem:[%s14782_s4 + $0x88] sm:$0xff] }
 0x268   : > { %v1191_v50 = vadd.f32 %v1190_v49, %v1161_v47  ;;  %v7634_v47 = vld [vmem:[%s14781_s3 + $0xa8] sm:$0xf0] }
 0x269   : > { %1619 = vmatpush.bf16.msrb.mxu2 %v11166_v40 }
 0x26a   : > { %v1200_v48 = vpack.c.bf16 %v1191_v50, %v1189_v18  ;;  %v7637_v18 = vor.u32 %v10247_v46, %v7634_v47  ;;  %v10275_v50 = vld [vmem:[%s14782_s4 + $0x80] sm:$0xff]  ;;  %v1785_v46 = vpop.f32.mrf.mxu0  ;;  %v10266_v47 = vld [vmem:[%s14782_s4 + $0x78] sm:$0xff] }
 0x26c   : > { %7584 = vmatmul.msk.bf16.gmra.mxu2 %vm723_vm0, %v1200_v48  ;;  %v10273_v48 = vld [vmem:[%s14781_s3 + $0x134] sm:$0xf] }
 0x26d   : > { %v1071_v56 = vpop.f32.mrf.mxu2  ;;  %v7781_v55 = vor.u32 %v10273_v48, %v7778_v54 }
 0x26e   : > { %v1072_v58 = vadd.f32 %v1071_v56, %v11300_v27 }
 0x26f   : > { %v1193_v61 = vpop.f32.mrf.mxu1 }
 0x270   : > { %v1081_v60 = vpack.c.bf16 %v1072_v58, %v1070_v44  ;;  %v1194_v37 = vadd.f32 %v1193_v61, %v1164_v57  ;;  %v10249_v44 = vld [vmem:[%s14781_s3 + $0xb4] sm:$0xf]  ;;  %v7642_v57 = vld [vmem:[%s14781_s3 + $0xb8] sm:$0xf0]  ;;  %v10255_v61 = vld [vmem:[%s14781_s3 + $0xc4] sm:$0xf] }
 0x272   : > { %7604 = vmatmul.msk.bf16.gmra.mxu3 %vm723_vm0, %v1081_v60  ;;  %1606 = vmatmul.bf16.gmra.mxu1 %v7709_v43  ;;  %v7645_v43 = vor.u32 %v10249_v44, %v7642_v57  ;;  %v7710_v44 = vld [vmem:[%s14781_s3 + $0xf8] sm:$0xf0]  ;;  %v10264_v57 = vld [vmem:[%s14782_s4 + $0x68] sm:$0xff] }
 0x275   : > { %v1074_v38 = vpop.f32.mrf.mxu2 }
 0x276   : > { %v1075_v3 = vadd.f32 %v1074_v38, %v11311_v45  ;;  %v7686_v38 = vld [vmem:[%s14781_s3 + $0xc8] sm:$0xf0] }
 0x277   : > { %v1195_v63 = vpop.f32.mrf.mxu1 }
 0x278   : > { %v1196_v1 = vadd.f32 %v1195_v63, %v1166_v62  ;;  %v7689_v63 = vor.u32 %v10255_v61, %v7686_v38 }
 0x27a   : > { %v1201_v2 = vpack.c.bf16 %v1196_v1, %v1194_v37 }
 0x27c   : > { %7585 = vmatmul.msk.bf16.gmra.mxu2 %vm723_vm0, %v1201_v2 }
 0x27d   : > { %v1076_v27 = vpop.f32.mrf.mxu2 }
 0x27e   : > { %v1077_v4 = vadd.f32 %v1076_v27, %v11322_v51  ;;  %v7621_v51 = vor.u32 %v10243_v8, %v7618_v34  ;;  %v10257_v27 = vld [vmem:[%s14781_s3 + $0xd4] sm:$0xf] }
 0x27f   : > { %v11388_v7 = vpop.f32.mrf.mxu1 }
 0x280   : > { %v1082_v6 = vpack.c.bf16 %v1077_v4, %v1075_v3  ;;  %v7694_v3 = vld [vmem:[%s14781_s3 + $0xd8] sm:$0xf0] }
 0x282   : > { %7605 = vmatmul.msk.bf16.gmra.mxu3 %vm723_vm0, %v1082_v6  ;;  %1813 = vmatmul.bf16.vlgmr.msra.gmra.mxu1 %v7757_v35  ;;  %v7697_v35 = vor.u32 %v10257_v27, %v7694_v3 }
 0x283   : > { %2355 = vmatpush.bf16.msra.mxu1 %v10967_v13 }
 0x287   : > { %2356 = vmatpush.bf16.msra.mxu1 %v10976_v23  ;;  %v11399_v45 = vpop.f32.mrf.mxu1 }
 0x28b   : > { %2357 = vmatpush.bf16.msra.mxu1 %v10981_v28 }
 0x28c   : > { %1427 = vmatmul.bf16.vlgmr.msra.gmra.mxu2 %v7621_v51  ;;  %v10254_v51 = vld [vmem:[%s14782_s4 + $0x58] sm:$0xff] }
 0x28d   : > { %1887 = vmatpush.bf16.msra.mxu2 %v10278_v29  ;;  %1501 = vmatpush.bf16.msra.mxu3 %v10254_v51 }
 0x28f   : > { %2358 = vmatpush.bf16.msra.mxu1 %v10988_v33  ;;  %v11409_v11 = vpop.f32.mrf.mxu1 }
 0x291   : > { %1888 = vmatpush.bf16.msra.mxu2 %v10277_v41  ;;  %1502 = vmatpush.bf16.msra.mxu3 %v10253_v17  ;;  %v10251_v41 = vld [vmem:[%s14782_s4 + $0x40] sm:$0xff] }
 0x292   : > { %1818 = vmatmul.bf16.gmra.mxu1 %v7765_v30  ;;  %v10259_v30 = vld [vmem:[%s14781_s3 + $0xe4] sm:$0xf] }
 0x293   : > { %2359 = vmatpush.bf16.msra.mxu1 %v10951_v52  ;;  %v7705_v25 = vor.u32 %v10259_v30, %v7702_v15 }
 0x295   : > { %1889 = vmatpush.bf16.msra.mxu2 %v10276_v16 }
 0x297   : > { %2360 = vmatpush.bf16.msra.mxu1 %v10945_v42  ;;  %v11419_v19 = vpop.f32.mrf.mxu1 }
 0x299   : > { %1890 = vmatpush.bf16.msra.mxu2 %v10275_v50  ;;  %v10265_v50 = vld [vmem:[%s14782_s4 + $0x70] sm:$0xff] }
 0x29b   : > { %2361 = vmatpush.bf16.msra.mxu1 %v10939_v32 }
 0x29c   : > { %1432 = vmatmul.bf16.gmra.mxu2 %v7629_v20 }
 0x29f   : > { %2362 = vmatpush.bf16.msra.mxu1 %v10933_v22  ;;  %v11432_v31 = vpop.f32.mrf.mxu1 }
 0x2a2   : > { %1823 = vmatmul.bf16.gmra.mxu1 %v7773_v26  ;;  %v10252_v26 = vld [vmem:[%s14782_s4 + $0x48] sm:$0xff] }
 0x2a3   : > { %1503 = vmatpush.bf16.msra.mxu3 %v10252_v26 }
 0x2a7   : > { %v11446_v49 = vpop.f32.mrf.mxu1  ;;  %1504 = vmatpush.bf16.msra.mxu3 %v10251_v41 }
 0x2ab   : > { %1694 = vmatpush.bf16.msrb.mxu3 %v10266_v47 }
 0x2ac   : > { %1437 = vmatmul.bf16.gmra.mxu2 %v7637_v18 }
 0x2af   : > { %v11457_v56 = vpop.f32.mrf.mxu1  ;;  %1695 = vmatpush.bf16.msrb.mxu3 %v10265_v50 }
 0x2b2   : > { %1828 = vmatmul.bf16.gmra.mxu1 %v7781_v55  ;;  %v10261_v55 = vld [vmem:[%s14781_s3 + $0xf4] sm:$0xf] }
 0x2b3   : > { %v7713_v38 = vor.u32 %v10261_v55, %v7710_v44  ;;  %1696 = vmatpush.bf16.msrb.mxu3 %v10264_v57 }
 0x2b7   : > { %v11465_v58 = vpop.f32.mrf.mxu1 }
 0x2bc   : > { %1442 = vmatmul.bf16.gmra.mxu2 %v7645_v43 }
 0x2bf   : > { %v11467_v60 = vpop.f32.mrf.mxu1 }
 0x2c7   : > { %v11475_v62 = vpop.f32.mrf.mxu1 }
 0x2cc   : > { %1620 = vmatmul.bf16.vlgmr.msrb.gmra.mxu2 %v7689_v63  ;;  %v1787_v63 = vpop.f32.mrf.mxu0 }
 0x2cd   : > { %2162 = vmatpush.bf16.msrb.mxu2 %v10967_v13 }
 0x2cf   : > { %v1256_v37 = vpop.f32.mrf.mxu2  ;;  %v11478_v1 = vpop.f32.mrf.mxu1 }
 0x2d1   : > { %2163 = vmatpush.bf16.msrb.mxu2 %v10976_v23 }
 0x2d5   : > { %v1321_v2 = vpop.f32.mrf.mxu3  ;;  %2164 = vmatpush.bf16.msrb.mxu2 %v10981_v28 }
 0x2d6   : > { %v11481_v36 = vadd.f32 %v1321_v2, %v1256_v37  ;;  %v10263_v37 = vld [vmem:[%s14782_s4 + $0x60] sm:$0xff] }
 0x2d7   : > { %v11484_v21 = vpop.f32.mrf.mxu2  ;;  %v11492_v4 = vpop.f32.mrf.mxu1  ;;  %1697 = vmatpush.bf16.msrb.mxu3 %v10263_v37 }
 0x2d9   : > { %2165 = vmatpush.bf16.msrb.mxu2 %v10988_v33 }
 0x2dc   : > { %1625 = vmatmul.bf16.gmra.mxu2 %v7697_v35  ;;  %v1790_v35 = vpop.f32.mrf.mxu0 }
 0x2dd   : > { %v11495_v6 = vpop.f32.mrf.mxu3  ;;  %2166 = vmatpush.bf16.msrb.mxu2 %v10951_v52 }
 0x2df   : > { %v1261_v8 = vpop.f32.mrf.mxu2  ;;  %v11498_v34 = vpop.f32.mrf.mxu1 }
 0x2e1   : > { %2167 = vmatpush.bf16.msrb.mxu2 %v10945_v42 }
 0x2e4   : > { %v1792_v26 = vpop.f32.mrf.mxu0 }
 0x2e5   : > { %v1326_v9 = vpop.f32.mrf.mxu3  ;;  %2168 = vmatpush.bf16.msrb.mxu2 %v10939_v32 }
 0x2e6   : > { %v11505_v10 = vadd.f32 %v1326_v9, %v1261_v8 }
 0x2e7   : > { %v11516_v20 = vpop.f32.mrf.mxu2  ;;  %v11518_v24 = vpop.f32.mrf.mxu1 }
 0x2e9   : > { %2169 = vmatpush.bf16.msrb.mxu2 %v10933_v22 }
 0x2ec   : > { %1630 = vmatmul.bf16.gmra.mxu2 %v7705_v25  ;;  %v1795_v50 = vpop.f32.mrf.mxu0 }
 0x2ed   : > { %v11524_v29 = vpop.f32.mrf.mxu3 }
 0x2ef   : > { %v1266_v16 = vpop.f32.mrf.mxu2  ;;  %v11532_v18 = vpop.f32.mrf.mxu1 }
 0x2f5   : > { %v1331_v48 = vpop.f32.mrf.mxu3 }
 0x2f6   : > { %v11537_v54 = vadd.f32 %v1331_v48, %v1266_v16 }
 0x2f7   : > { %v11548_v43 = vpop.f32.mrf.mxu2  ;;  %v11550_v61 = vpop.f32.mrf.mxu1 }
 0x2fc   : > { %1635 = vmatmul.bf16.gmra.mxu2 %v7713_v38 }
 0x2fd   : > { %v11555_v2 = vpop.f32.mrf.mxu3 }
 0x2ff   : > { %v1271_v27 = vpop.f32.mrf.mxu2  ;;  %v1814_v3 = vpop.f32.mrf.mxu1 }
 0x300   : > { %v1815_v9 = vadd.f32 %v1814_v3, %v1785_v46 }
 0x305   : > { %v1336_v8 = vpop.f32.mrf.mxu3 }
 0x306   : > { %v11557_v51 = vadd.f32 %v1336_v8, %v1271_v27 }
 0x307   : > { %v11559_v30 = vpop.f32.mrf.mxu2  ;;  %v1816_v15 = vpop.f32.mrf.mxu1 }
 0x308   : > { %v1817_v17 = vadd.f32 %v1816_v15, %v1787_v63 }
 0x30a   : > { %v1834_v25 = vpack.c.bf16 %v1817_v17, %v1815_v9 }
 0x30c   : > { %7806 = vmatmul.msk.bf16.vlgmr.msra.gmra.mxu2 %vm723_vm0, %v1834_v25 }
 0x30d   : > { %2384 = vmatpush.bf16.msra.mxu2 %v11079_v39 }
 0x30f   : > { %v1428_v41 = vpop.f32.mrf.mxu2  ;;  %v1819_v47 = vpop.f32.mrf.mxu1 }
 0x310   : > { %v1820_v16 = vadd.f32 %v1819_v47, %v1790_v35  ;;  %v1429_v55 = vadd.f32 %v1428_v41, %v11388_v7  ;;  %v1797_v7 = vpop.f32.mrf.mxu0 }
 0x311   : > { %2385 = vmatpush.bf16.msra.mxu2 %v11093_v53 }
 0x315   : > { %2386 = vmatpush.bf16.msra.mxu2 %v11102_v59 }
 0x317   : > { %v1430_v48 = vpop.f32.mrf.mxu2  ;;  %v1821_v46 = vpop.f32.mrf.mxu1 }
 0x318   : > { %v1431_v44 = vadd.f32 %v1430_v48, %v11399_v45  ;;  %v1822_v57 = vadd.f32 %v1821_v46, %v1792_v26  ;;  %v1800_v26 = vpop.f32.mrf.mxu0 }
 0x319   : > { %2387 = vmatpush.bf16.msra.mxu2 %v11111_v0 }
 0x31a   : > { %v1448_v38 = vpack.c.bf16 %v1431_v44, %v1429_v55  ;;  %v1835_v63 = vpack.c.bf16 %v1822_v57, %v1820_v16 }
 0x31c   : > { %7670 = vmatmul.msk.bf16.vlgmr.msra.gmra.mxu3 %vm723_vm0, %v1448_v38  ;;  %7807 = vmatmul.msk.bf16.gmra.mxu2 %vm723_vm0, %v1835_v63  ;;  %v7888_v63 = vld [vmem:[%s14781_s3 + $0x180] sm:$0xf] }
 0x31d   : > { %1969 = vmatpush.bf16.msra.mxu3 %v10967_v13  ;;  %2388 = vmatpush.bf16.msra.mxu2 %v11120_v5 }
 0x31f   : > { %v1433_v37 = vpop.f32.mrf.mxu2  ;;  %v1824_v27 = vpop.f32.mrf.mxu1 }
 0x320   : > { %v1825_v45 = vadd.f32 %v1824_v27, %v1795_v50  ;;  %v1434_v8 = vadd.f32 %v1433_v37, %v11409_v11  ;;  %v1802_v11 = vpop.f32.mrf.mxu0 }
 0x321   : > { %1970 = vmatpush.bf16.msra.mxu3 %v10976_v23  ;;  %2389 = vmatpush.bf16.msra.mxu2 %v11135_v12 }
 0x325   : > { %1971 = vmatpush.bf16.msra.mxu3 %v10981_v28  ;;  %2390 = vmatpush.bf16.msra.mxu2 %v11140_v14 }
 0x327   : > { %v1435_v3 = vpop.f32.mrf.mxu2  ;;  %v1826_v35 = vpop.f32.mrf.mxu1 }
 0x328   : > { %v1436_v9 = vadd.f32 %v1435_v3, %v11419_v19  ;;  %v1827_v15 = vadd.f32 %v1826_v35, %v1797_v7  ;;  %v7896_v35 = vld [vmem:[%s14781_s3 + $0x190] sm:$0xf] }
 0x329   : > { %1972 = vmatpush.bf16.msra.mxu3 %v10988_v33  ;;  %2391 = vmatpush.bf16.msra.mxu2 %v11166_v40 }
 0x32a   : > { %v1449_v17 = vpack.c.bf16 %v1436_v9, %v1434_v8  ;;  %v1836_v25 = vpack.c.bf16 %v1827_v15, %v1825_v45  ;;  %v10294_v8 = vld [vmem:[%s14781_s3 + $0x194] sm:$0xf0] }
 0x32c   : > { %7671 = vmatmul.msk.bf16.gmra.mxu3 %vm723_vm0, %v1449_v17  ;;  %7808 = vmatmul.msk.bf16.gmra.mxu2 %vm723_vm0, %v1836_v25  ;;  %v10326_v25 = vld [vmem:[%s14782_s4 + $0x118] sm:$0xff] }
 0x32d   : > { %1973 = vmatpush.bf16.msra.mxu3 %v10951_v52 }
 0x32f   : > { %v1438_v41 = vpop.f32.mrf.mxu2  ;;  %v1829_v47 = vpop.f32.mrf.mxu1 }
 0x330   : > { %v1830_v19 = vadd.f32 %v1829_v47, %v1800_v26  ;;  %v1439_v48 = vadd.f32 %v1438_v41, %v11432_v31  ;;  %v10292_v31 = vld [vmem:[%s14781_s3 + $0x184] sm:$0xf0]  ;;  %v10325_v41 = vld [vmem:[%s14782_s4 + $0x110] sm:$0xff] }
 0x331   : > { %1974 = vmatpush.bf16.msra.mxu3 %v10945_v42  ;;  %v7889_v7 = vor.u32 %v10292_v31, %v7888_v63  ;;  %v10324_v47 = vld [vmem:[%s14782_s4 + $0x108] sm:$0xff] }
 0x335   : > { %1975 = vmatpush.bf16.msra.mxu3 %v10939_v32 }
 0x337   : > { %v1440_v16 = vpop.f32.mrf.mxu2  ;;  %v1831_v50 = vpop.f32.mrf.mxu1 }
 0x338   : > { %v1441_v46 = vadd.f32 %v1440_v16, %v11446_v49  ;;  %v1832_v55 = vadd.f32 %v1831_v50, %v1802_v11 }
 0x339   : > { %1976 = vmatpush.bf16.msra.mxu3 %v10933_v22 }
 0x33a   : > { %v1450_v44 = vpack.c.bf16 %v1441_v46, %v1439_v48  ;;  %v1837_v57 = vpack.c.bf16 %v1832_v55, %v1830_v19  ;;  %v10323_v46 = vld [vmem:[%s14782_s4 + $0x100] sm:$0xff] }
 0x33c   : > { %7672 = vmatmul.msk.bf16.gmra.mxu3 %vm723_vm0, %v1450_v44  ;;  %7809 = vmatmul.msk.bf16.gmra.mxu2 %vm723_vm0, %v1837_v57 }
 0x33f   : > { %v1443_v38 = vpop.f32.mrf.mxu2 }
 0x340   : > { %v1444_v49 = vadd.f32 %v1443_v38, %v11457_v56 }
 0x347   : > { %v1445_v37 = vpop.f32.mrf.mxu2 }
 0x348   : > { %v1446_v27 = vadd.f32 %v1445_v37, %v11465_v58  ;;  %v7897_v58 = vor.u32 %v10294_v8, %v7896_v35  ;;  %v7830_v35 = vld [vmem:[%s14781_s3 + $0x158] sm:$0xf0] }
 0x34a   : > { %v1451_v45 = vpack.c.bf16 %v1446_v27, %v1444_v49  ;;  %v10303_v49 = vld [vmem:[%s14781_s3 + $0x1c4] sm:$0xf]  ;;  %v7958_v27 = vld [vmem:[%s14781_s3 + $0x1c8] sm:$0xf0] }
 0x34c   : > { %7673 = vmatmul.msk.bf16.gmra.mxu3 %vm723_vm0, %v1451_v45  ;;  %2170 = vmatmul.bf16.vlgmr.msrb.gmra.mxu2 %v7889_v7  ;;  %v7961_v45 = vor.u32 %v10303_v49, %v7958_v27  ;;  %v1334_v27 = vadd.f32 %v11555_v2, %v11548_v43 }
 0x34d   : > { %2659 = vmatpush.bf16.msrb.mxu2 %v10326_v25 }
 0x34f   : > { %v1621_v3 = vpop.f32.mrf.mxu2 }
 0x350   : > { %v1622_v15 = vadd.f32 %v1621_v3, %v11467_v60  ;;  %v7904_v60 = vld [vmem:[%s14781_s3 + $0x1a0] sm:$0xf]  ;;  %v10281_v3 = vld [vmem:[%s14781_s3 + $0x154] sm:$0xf] }
 0x351   : > { %2660 = vmatpush.bf16.msrb.mxu2 %v10325_v41  ;;  %v7833_v8 = vor.u32 %v10281_v3, %v7830_v35  ;;  %v10291_v35 = vld [vmem:[%s14781_s3 + $0x184] sm:$0xf] }
 0x353   : > { %2011 = vmatmul.bf16.gmra.mxu0 %v7833_v8  ;;  %v7890_v8 = vld [vmem:[%s14781_s3 + $0x188] sm:$0xf0] }
 0x355   : > { %2661 = vmatpush.bf16.msrb.mxu2 %v10324_v47  ;;  %v1324_v47 = vadd.f32 %v11495_v6, %v11484_v21  ;;  %v10314_v21 = vld [vmem:[%s14782_s4 + $0xf8] sm:$0xff] }
 0x357   : > { %v1623_v9 = vpop.f32.mrf.mxu2 }
 0x358   : > { %v1624_v56 = vadd.f32 %v1623_v9, %v11475_v62  ;;  %v10296_v62 = vld [vmem:[%s14781_s3 + $0x1a4] sm:$0xf0] }
 0x359   : > { %v7905_v50 = vor.u32 %v10296_v62, %v7904_v60  ;;  %2662 = vmatpush.bf16.msrb.mxu2 %v10323_v46  ;;  %v7828_v60 = vld [vmem:[%s14781_s3 + $0x150] sm:$0xf]  ;;  %v10282_v62 = vld [vmem:[%s14781_s3 + $0x154] sm:$0xf0] }
 0x35a   : > { %v1641_v17 = vpack.c.bf16 %v1624_v56, %v1622_v15  ;;  %v1338_v15 = vpop.f32.mrf.mxu3 }
 0x35c   : > { %7738 = vmatmul.msk.bf16.vlgmr.msrb.gmra.mxu3 %vm723_vm0, %v1641_v17  ;;  %2175 = vmatmul.bf16.gmra.mxu2 %v7897_v58  ;;  %v10283_v58 = vld [vmem:[%s14781_s3 + $0x164] sm:$0xf]  ;;  %v7838_v17 = vld [vmem:[%s14781_s3 + $0x168] sm:$0xf0] }
 0x35d   : > { %2191 = vmatpush.bf16.msrb.mxu3 %v11079_v39  ;;  %v7841_v25 = vor.u32 %v10283_v58, %v7838_v17 }
 0x35f   : > { %v1626_v26 = vpop.f32.mrf.mxu2 }
 0x360   : > { %v1627_v19 = vadd.f32 %v1626_v26, %v11478_v1  ;;  %v7912_v1 = vld [vmem:[%s14781_s3 + $0x1b0] sm:$0xf] }
 0x361   : > { %2192 = vmatpush.bf16.msrb.mxu3 %v11093_v53 }
 0x363   : > { %2016 = vmatmul.bf16.gmra.mxu0 %v7841_v25 }
 0x365   : > { %2193 = vmatpush.bf16.msrb.mxu3 %v11102_v59 }
 0x367   : > { %v1628_v11 = vpop.f32.mrf.mxu2 }
 0x368   : > { %v1629_v16 = vadd.f32 %v1628_v11, %v11492_v4  ;;  %v10298_v4 = vld [vmem:[%s14781_s3 + $0x1b4] sm:$0xf0] }
 0x369   : > { %2194 = vmatpush.bf16.msrb.mxu3 %v11111_v0  ;;  %v7913_v63 = vor.u32 %v10298_v4, %v7912_v1  ;;  %v7836_v1 = vld [vmem:[%s14781_s3 + $0x160] sm:$0xf]  ;;  %v10284_v4 = vld [vmem:[%s14781_s3 + $0x164] sm:$0xf0] }
 0x36a   : > { %v1642_v48 = vpack.c.bf16 %v1629_v16, %v1627_v19  ;;  %v7829_v16 = vor.u32 %v10282_v62, %v7828_v60 }
 0x36c   : > { %7739 = vmatmul.msk.bf16.gmra.mxu3 %vm723_vm0, %v1642_v48  ;;  %2180 = vmatmul.bf16.gmra.mxu2 %v7905_v50  ;;  %v7846_v50 = vld [vmem:[%s14781_s3 + $0x178] sm:$0xf0] }
 0x36d   : > { %2195 = vmatpush.bf16.msrb.mxu3 %v11120_v5 }
 0x36f   : > { %v1631_v55 = vpop.f32.mrf.mxu2 }
 0x370   : > { %v1632_v57 = vadd.f32 %v1631_v55, %v11498_v34  ;;  %v10313_v55 = vld [vmem:[%s14782_s4 + $0xf0] sm:$0xff] }
 0x371   : > { %2196 = vmatpush.bf16.msrb.mxu3 %v11135_v12 }
 0x375   : > { %2197 = vmatpush.bf16.msrb.mxu3 %v11140_v14 }
 0x377   : > { %v1633_v44 = vpop.f32.mrf.mxu2 }
 0x378   : > { %v1634_v38 = vadd.f32 %v1633_v44, %v11518_v24  ;;  %v1329_v44 = vadd.f32 %v11524_v29, %v11516_v20  ;;  %v7844_v20 = vld [vmem:[%s14781_s3 + $0x170] sm:$0xf]  ;;  %v10286_v29 = vld [vmem:[%s14781_s3 + $0x174] sm:$0xf0] }
 0x379   : > { %2198 = vmatpush.bf16.msrb.mxu3 %v11166_v40 }
 0x37a   : > { %v1643_v31 = vpack.c.bf16 %v1634_v38, %v1632_v57 }
 0x37c   : > { %7740 = vmatmul.msk.bf16.gmra.mxu3 %vm723_vm0, %v1643_v31  ;;  %2185 = vmatmul.bf16.gmra.mxu2 %v7913_v63  ;;  %v7837_v63 = vor.u32 %v10284_v4, %v7836_v1  ;;  %v10311_v31 = vld [vmem:[%s14782_s4 + $0xe0] sm:$0xff]  ;;  %v10297_v1 = vld [vmem:[%s14781_s3 + $0x1b4] sm:$0xf]  ;;  %v7914_v4 = vld [vmem:[%s14781_s3 + $0x1b8] sm:$0xf0] }
 0x37f   : > { %v1636_v37 = vpop.f32.mrf.mxu2 }
 0x380   : > { %v1637_v34 = vadd.f32 %v1636_v37, %v11532_v18  ;;  %v7820_v18 = vld [vmem:[%s14781_s3 + $0x140] sm:$0xf] }
 0x387   : > { %v1638_v7 = vpop.f32.mrf.mxu2 }
 0x388   : > { %v1639_v24 = vadd.f32 %v1638_v7, %v11550_v61  ;;  %v10280_v61 = vld [vmem:[%s14781_s3 + $0x144] sm:$0xf0] }
 0x389   : > { %v7821_v56 = vor.u32 %v10280_v61, %v7820_v18  ;;  %v7893_v18 = vor.u32 %v10291_v35, %v7890_v8 }
 0x38a   : > { %v1644_v9 = vpack.c.bf16 %v1639_v24, %v1637_v34  ;;  %v7845_v24 = vor.u32 %v10286_v29, %v7844_v20 }
 0x38c   : > { %7741 = vmatmul.msk.bf16.gmra.mxu3 %vm723_vm0, %v1644_v9  ;;  %2392 = vmatmul.bf16.vlgmr.msra.gmra.mxu2 %v7961_v45  ;;  %v1339_v9 = vadd.f32 %v1338_v15, %v11559_v30  ;;  %v10293_v30 = vld [vmem:[%s14781_s3 + $0x194] sm:$0xf]  ;;  %v7898_v15 = vld [vmem:[%s14781_s3 + $0x198] sm:$0xf0] }
 0x38d   : > { %2934 = vmatpush.bf16.msra.mxu2 %v10967_v13 }
 0x391   : > { %2935 = vmatpush.bf16.msra.mxu2 %v10976_v23 }
 0x395   : > { %2936 = vmatpush.bf16.msra.mxu2 %v10981_v28 }
 0x399   : > { %2937 = vmatpush.bf16.msra.mxu2 %v10988_v33 }
 0x39c   : > { %1977 = vmatmul.bf16.vlgmr.msra.gmra.mxu3 %v7821_v56 }
 0x39d   : > { %2938 = vmatpush.bf16.msra.mxu2 %v10951_v52  ;;  %2466 = vmatpush.bf16.msra.mxu3 %v10314_v21 }
 0x39f   : > { %v1506_v26 = vpop.f32.mrf.mxu3 }
 0x3a0   : > { %v1526_v41 = vadd.f32 %v1506_v26, %v11481_v36  ;;  %v10285_v36 = vld [vmem:[%s14781_s3 + $0x174] sm:$0xf]  ;;  %v7901_v26 = vor.u32 %v10293_v30, %v7898_v15 }
 0x3a1   : > { %2939 = vmatpush.bf16.msra.mxu2 %v10945_v42  ;;  %v7849_v48 = vor.u32 %v10285_v36, %v7846_v50  ;;  %2467 = vmatpush.bf16.msra.mxu3 %v10313_v55 }
 0x3a3   : > { %2021 = vmatmul.bf16.gmra.mxu0 %v7849_v48 }
 0x3a5   : > { %2940 = vmatpush.bf16.msra.mxu2 %v10939_v32 }
 0x3a7   : > { %v1508_v11 = vpop.f32.mrf.mxu3 }
 0x3a8   : > { %v11689_v19 = vadd.f32 %v1508_v11, %v1324_v47  ;;  %v10295_v11 = vld [vmem:[%s14781_s3 + $0x1a4] sm:$0xf] }
 0x3a9   : > { %2941 = vmatpush.bf16.msra.mxu2 %v10933_v22 }
 0x3ac   : > { %1982 = vmatmul.bf16.gmra.mxu3 %v7829_v16  ;;  %v7906_v16 = vld [vmem:[%s14781_s3 + $0x1a8] sm:$0xf0] }
 0x3ad   : > { %v7909_v50 = vor.u32 %v10295_v11, %v7906_v16  ;;  %v10305_v16 = vld [vmem:[%s14781_s3 + $0x1d4] sm:$0xf] }
 0x3af   : > { %v1511_v6 = vpop.f32.mrf.mxu3 }
 0x3b0   : > { %v1528_v46 = vadd.f32 %v1511_v6, %v11505_v10  ;;  %v10312_v10 = vld [vmem:[%s14782_s4 + $0xe8] sm:$0xff] }
 0x3b1   : > { %2468 = vmatpush.bf16.msra.mxu3 %v10312_v10  ;;  %v7917_v10 = vor.u32 %v10297_v1, %v7914_v4 }
 0x3b5   : > { %2469 = vmatpush.bf16.msra.mxu3 %v10311_v31 }
 0x3b7   : > { %v1513_v57 = vpop.f32.mrf.mxu3 }
 0x3b8   : > { %v11716_v38 = vadd.f32 %v1513_v57, %v1329_v44 }
 0x3bc   : > { %1987 = vmatmul.bf16.gmra.mxu3 %v7837_v63 }
 0x3bf   : > { %v1516_v37 = vpop.f32.mrf.mxu3 }
 0x3c0   : > { %v1530_v49 = vadd.f32 %v1516_v37, %v11537_v54  ;;  %v1892_v54 = vpop.f32.mrf.mxu2  ;;  %v2007_v37 = vpop.f32.mrf.mxu0 }
 0x3c7   : > { %v1518_v7 = vpop.f32.mrf.mxu3 }
 0x3c8   : > { %v11730_v34 = vadd.f32 %v1518_v7, %v1334_v27  ;;  %v11743_v61 = vpop.f32.mrf.mxu2  ;;  %v2009_v29 = vpop.f32.mrf.mxu0 }
 0x3cc   : > { %1992 = vmatmul.bf16.gmra.mxu3 %v7845_v24 }
 0x3cf   : > { %v1521_v45 = vpop.f32.mrf.mxu3 }
 0x3d0   : > { %v1532_v3 = vadd.f32 %v1521_v45, %v11557_v51  ;;  %v1897_v25 = vpop.f32.mrf.mxu2  ;;  %v2012_v7 = vpop.f32.mrf.mxu0 }
 0x3d7   : > { %v1523_v43 = vpop.f32.mrf.mxu3 }
 0x3d8   : > { %v11740_v2 = vadd.f32 %v1523_v43, %v1339_v9  ;;  %v11760_v62 = vpop.f32.mrf.mxu2  ;;  %v2014_v9 = vpop.f32.mrf.mxu0 }
 0x3dc   : > { %2199 = vmatmul.bf16.vlgmr.msrb.gmra.mxu3 %v7893_v18 }
 0x3dd   : > { %2741 = vmatpush.bf16.msrb.mxu3 %v10967_v13 }
 0x3df   : > { %v1699_v51 = vpop.f32.mrf.mxu3 }
 0x3e0   : > { %v1719_v56 = vadd.f32 %v1699_v51, %v1526_v41  ;;  %v1902_v48 = vpop.f32.mrf.mxu2  ;;  %v2017_v51 = vpop.f32.mrf.mxu0 }
 0x3e1   : > { %2742 = vmatpush.bf16.msrb.mxu3 %v10976_v23 }
 0x3e2   : > { %v11746_v58 = vadd.f32 %v1892_v54, %v1719_v56 }
 0x3e5   : > { %2743 = vmatpush.bf16.msrb.mxu3 %v10981_v28 }
 0x3e7   : > { %v11755_v17 = vpop.f32.mrf.mxu3 }
 0x3e8   : > { %v11776_v55 = vpop.f32.mrf.mxu2  ;;  %v2019_v15 = vpop.f32.mrf.mxu0 }
 0x3e9   : > { %2744 = vmatpush.bf16.msrb.mxu3 %v10988_v33 }
 0x3ec   : > { %2204 = vmatmul.bf16.gmra.mxu3 %v7901_v26 }
 0x3ed   : > { %2745 = vmatpush.bf16.msrb.mxu3 %v10951_v52 }
 0x3ef   : > { %v1704_v41 = vpop.f32.mrf.mxu3 }
 0x3f0   : > { %v1721_v60 = vadd.f32 %v1704_v41, %v1528_v46  ;;  %v1907_v63 = vpop.f32.mrf.mxu2 }
 0x3f1   : > { %2746 = vmatpush.bf16.msrb.mxu3 %v10945_v42 }
 0x3f2   : > { %v11762_v47 = vadd.f32 %v1897_v25, %v1721_v60 }
 0x3f5   : > { %2747 = vmatpush.bf16.msrb.mxu3 %v10939_v32 }
 0x3f7   : > { %v11771_v36 = vpop.f32.mrf.mxu3 }
 0x3f8   : > { %v11799_v25 = vpop.f32.mrf.mxu2 }
 0x3f9   : > { %2748 = vmatpush.bf16.msrb.mxu3 %v10933_v22 }
 0x3fc   : > { %2209 = vmatmul.bf16.gmra.mxu3 %v7909_v50  ;;  %v7966_v50 = vld [vmem:[%s14781_s3 + $0x1d8] sm:$0xf0] }
 0x3ff   : > { %v1709_v21 = vpop.f32.mrf.mxu3 }
 0x400   : > { %v1723_v6 = vadd.f32 %v1709_v21, %v1530_v49  ;;  %v7969_v21 = vor.u32 %v10305_v16, %v7966_v50  ;;  %v2171_v1 = vpop.f32.mrf.mxu2 }
 0x402   : > { %v11774_v46 = vadd.f32 %v1902_v48, %v1723_v6  ;;  %2397 = vmatmul.bf16.gmra.mxu2 %v7969_v21 }
 0x407   : > { %v11784_v44 = vpop.f32.mrf.mxu3 }
 0x40c   : > { %2214 = vmatmul.bf16.gmra.mxu3 %v7917_v10 }
 0x40f   : > { %v1714_v57 = vpop.f32.mrf.mxu3 }
 0x410   : > { %v1725_v31 = vadd.f32 %v1714_v57, %v1532_v3 }
 0x412   : > { %v11786_v49 = vadd.f32 %v1907_v63, %v1725_v31  ;;  %v2173_v31 = vpop.f32.mrf.mxu2 }
 0x417   : > { %v11788_v20 = vpop.f32.mrf.mxu3 }
 0x41f   : > { %v1978_v27 = vpop.f32.mrf.mxu3 }
 0x420   : > { %v2008_v45 = vadd.f32 %v2007_v37, %v1978_v27  ;;  %v2022_v48 = vpop.f32.mrf.mxu0  ;;  %v7974_v27 = vld [vmem:[%s14781_s3 + $0x1e8] sm:$0xf0] }
 0x427   : > { %v1980_v24 = vpop.f32.mrf.mxu3 }
 0x428   : > { %v2010_v54 = vadd.f32 %v2009_v29, %v1980_v24  ;;  %v2024_v4 = vpop.f32.mrf.mxu0  ;;  %v10307_v29 = vld [vmem:[%s14781_s3 + $0x1e4] sm:$0xf] }
 0x42a   : > { %v2027_v35 = vpack.c.bf16 %v2010_v54, %v2008_v45  ;;  %v2176_v45 = vpop.f32.mrf.mxu2  ;;  %v7956_v54 = vld [vmem:[%s14781_s3 + $0x1c0] sm:$0xf] }
 0x42c   : > { %7874 = vmatmul.msk.bf16.vlgmr.msrb.gmra.mxu1 %vm723_vm0, %v2027_v35  ;;  %v10304_v35 = vld [vmem:[%s14781_s3 + $0x1c4] sm:$0xf0] }
 0x42d   : > { %2577 = vmatpush.bf16.msrb.mxu1 %v11079_v39 }
 0x42f   : > { %v1983_v8 = vpop.f32.mrf.mxu3 }
 0x430   : > { %v2013_v43 = vadd.f32 %v2012_v7, %v1983_v8  ;;  %v7977_v7 = vor.u32 %v10307_v29, %v7974_v27 }
 0x431   : > { %2578 = vmatpush.bf16.msrb.mxu1 %v11093_v53 }
 0x432   : > { %2402 = vmatmul.bf16.gmra.mxu2 %v7977_v7 }
 0x435   : > { %2579 = vmatpush.bf16.msrb.mxu1 %v11102_v59 }
 0x437   : > { %v1985_v3 = vpop.f32.mrf.mxu3 }
 0x438   : > { %v2015_v18 = vadd.f32 %v2014_v9, %v1985_v3 }
 0x439   : > { %2580 = vmatpush.bf16.msrb.mxu1 %v11111_v0 }
 0x43a   : > { %v2028_v56 = vpack.c.bf16 %v2015_v18, %v2013_v43  ;;  %v7957_v43 = vor.u32 %v10304_v35, %v7956_v54  ;;  %v10335_v54 = vld [vmem:[%s14782_s4 + $0x120] sm:$0xff] }
 0x43c   : > { %7875 = vmatmul.msk.bf16.gmra.mxu1 %vm723_vm0, %v2028_v56  ;;  %v7982_v56 = vld [vmem:[%s14781_s3 + $0x1f8] sm:$0xf0] }
 0x43d   : > { %2581 = vmatpush.bf16.msrb.mxu1 %v11120_v5 }
 0x43f   : > { %v1988_v30 = vpop.f32.mrf.mxu3 }
 0x440   : > { %v2018_v41 = vadd.f32 %v2017_v51, %v1988_v30  ;;  %v10309_v51 = vld [vmem:[%s14781_s3 + $0x1f4] sm:$0xf]  ;;  %v2178_v30 = vpop.f32.mrf.mxu2 }
 0x441   : > { %2582 = vmatpush.bf16.msrb.mxu1 %v11135_v12 }
 0x445   : > { %2583 = vmatpush.bf16.msrb.mxu1 %v11140_v14 }
 0x447   : > { %v1990_v26 = vpop.f32.mrf.mxu3 }
 0x448   : > { %v2020_v60 = vadd.f32 %v2019_v15, %v1990_v26  ;;  %v7985_v15 = vor.u32 %v10309_v51, %v7982_v56  ;;  %v2181_v50 = vpop.f32.mrf.mxu2 }
 0x449   : > { %2584 = vmatpush.bf16.msrb.mxu1 %v11166_v40 }
 0x44a   : > { %v2029_v11 = vpack.c.bf16 %v2020_v60, %v2018_v41  ;;  %2407 = vmatmul.bf16.gmra.mxu2 %v7985_v15  ;;  %v7964_v41 = vld [vmem:[%s14781_s3 + $0x1d0] sm:$0xf]  ;;  %v10306_v60 = vld [vmem:[%s14781_s3 + $0x1d4] sm:$0xf0] }
 0x44b   : > { %v7965_v21 = vor.u32 %v10306_v60, %v7964_v41  ;;  %v10316_v41 = vld [vmem:[%s14781_s3 + $0x204] sm:$0xf0]  ;;  %v10315_v60 = vld [vmem:[%s14781_s3 + $0x204] sm:$0xf] }
 0x44c   : > { %7876 = vmatmul.msk.bf16.gmra.mxu1 %vm723_vm0, %v2029_v11 }
 0x44f   : > { %v1993_v6 = vpop.f32.mrf.mxu3 }
 0x450   : > { %v2023_v57 = vadd.f32 %v2022_v48, %v1993_v6 }
 0x457   : > { %v1995_v10 = vpop.f32.mrf.mxu3 }
 0x458   : > { %v2025_v63 = vadd.f32 %v2024_v4, %v1995_v10  ;;  %v10337_v4 = vld [vmem:[%s14782_s4 + $0x130] sm:$0xff] }
 0x45a   : > { %v2030_v37 = vpack.c.bf16 %v2025_v63, %v2023_v57  ;;  %v2183_v57 = vpop.f32.mrf.mxu2  ;;  %v10336_v63 = vld [vmem:[%s14782_s4 + $0x128] sm:$0xff] }
 0x45c   : > { %7877 = vmatmul.msk.bf16.gmra.mxu1 %vm723_vm0, %v2030_v37  ;;  %v10308_v37 = vld [vmem:[%s14781_s3 + $0x1e4] sm:$0xf0] }
 0x45f   : > { %v2200_v24 = vpop.f32.mrf.mxu3 }
 0x460   : > { %v2201_v8 = vadd.f32 %v2200_v24, %v2171_v1  ;;  %v10338_v1 = vld [vmem:[%s14782_s4 + $0x138] sm:$0xff] }
 0x462   : > { %v2186_v35 = vpop.f32.mrf.mxu2 }
 0x467   : > { %v2202_v9 = vpop.f32.mrf.mxu3 }
 0x468   : > { %v2203_v3 = vadd.f32 %v2202_v9, %v2173_v31  ;;  %v7972_v31 = vld [vmem:[%s14781_s3 + $0x1e0] sm:$0xf] }
 0x469   : > { %v7973_v24 = vor.u32 %v10308_v37, %v7972_v31 }
 0x46a   : > { %v2220_v18 = vpack.c.bf16 %v2203_v3, %v2201_v8  ;;  %v2188_v9 = vpop.f32.mrf.mxu2  ;;  %v7980_v3 = vld [vmem:[%s14781_s3 + $0x1f0] sm:$0xf] }
 0x46c   : > { %7942 = vmatmul.msk.bf16.vlgmr.msrb.gmra.mxu0 %vm723_vm0, %v2220_v18  ;;  %2363 = vmatmul.bf16.vlgmr.msra.gmra.mxu1 %v7957_v43  ;;  %v10310_v43 = vld [vmem:[%s14781_s3 + $0x1f4] sm:$0xf0] }
 0x46d   : > { %2770 = vmatpush.bf16.msrb.mxu0 %v11079_v39  ;;  %2852 = vmatpush.bf16.msra.mxu1 %v10338_v1  ;;  %v8032_v1 = vld [vmem:[%s14781_s3 + $0x210] sm:$0xf] }
 0x46f   : > { %v2205_v26 = vpop.f32.mrf.mxu3 }
 0x470   : > { %v2206_v11 = vadd.f32 %v2205_v26, %v2176_v45  ;;  %v8024_v26 = vld [vmem:[%s14781_s3 + $0x200] sm:$0xf] }
 0x471   : > { %2771 = vmatpush.bf16.msrb.mxu0 %v11093_v53  ;;  %2853 = vmatpush.bf16.msra.mxu1 %v10337_v4  ;;  %v10318_v4 = vld [vmem:[%s14781_s3 + $0x214] sm:$0xf0] }
 0x475   : > { %2772 = vmatpush.bf16.msrb.mxu0 %v11102_v59  ;;  %2854 = vmatpush.bf16.msra.mxu1 %v10336_v63 }
 0x477   : > { %v2207_v16 = vpop.f32.mrf.mxu3 }
 0x478   : > { %v2208_v48 = vadd.f32 %v2207_v16, %v2178_v30  ;;  %v7981_v30 = vor.u32 %v10310_v43, %v7980_v3  ;;  %v8025_v16 = vor.u32 %v10316_v41, %v8024_v26 }
 0x479   : > { %2773 = vmatpush.bf16.msrb.mxu0 %v11111_v0  ;;  %2855 = vmatpush.bf16.msra.mxu1 %v10335_v54  ;;  %v10319_v54 = vld [vmem:[%s14781_s3 + $0x224] sm:$0xf] }
 0x47a   : > { %v2221_v6 = vpack.c.bf16 %v2208_v48, %v2206_v11  ;;  %v8026_v11 = vld [vmem:[%s14781_s3 + $0x208] sm:$0xf0] }
 0x47c   : > { %7943 = vmatmul.msk.bf16.gmra.mxu0 %vm723_vm0, %v2221_v6  ;;  %2368 = vmatmul.bf16.gmra.mxu1 %v7965_v21 }
 0x47d   : > { %2774 = vmatpush.bf16.msrb.mxu0 %v11120_v5 }
 0x47f   : > { %v2210_v10 = vpop.f32.mrf.mxu3 }
 0x480   : > { %v2211_v29 = vadd.f32 %v2210_v10, %v2181_v50  ;;  %v8029_v50 = vor.u32 %v10315_v60, %v8026_v11  ;;  %v8034_v10 = vld [vmem:[%s14781_s3 + $0x218] sm:$0xf0] }
 0x481   : > { %2775 = vmatpush.bf16.msrb.mxu0 %v11135_v12 }
 0x485   : > { %2776 = vmatpush.bf16.msrb.mxu0 %v11140_v14 }
 0x487   : > { %v2212_v27 = vpop.f32.mrf.mxu3 }
 0x488   : > { %v2213_v7 = vadd.f32 %v2212_v27, %v2183_v57  ;;  %v8033_v57 = vor.u32 %v10318_v4, %v8032_v1  ;;  %v10327_v1 = vld [vmem:[%s14781_s3 + $0x244] sm:$0xf]  ;;  %v8094_v4 = vld [vmem:[%s14781_s3 + $0x248] sm:$0xf0] }
 0x489   : > { %2777 = vmatpush.bf16.msrb.mxu0 %v11166_v40 }
 0x48a   : > { %v2222_v45 = vpack.c.bf16 %v2213_v7, %v2211_v29  ;;  %v10350_v29 = vld [vmem:[%s14782_s4 + $0x158] sm:$0xff]  ;;  %v10349_v7 = vld [vmem:[%s14782_s4 + $0x150] sm:$0xff] }
 0x48c   : > { %7944 = vmatmul.msk.bf16.gmra.mxu0 %vm723_vm0, %v2222_v45  ;;  %2373 = vmatmul.bf16.gmra.mxu1 %v7973_v24  ;;  %v10348_v24 = vld [vmem:[%s14782_s4 + $0x148] sm:$0xff] }
 0x48d   : > { %v10320_v45 = vld [vmem:[%s14781_s3 + $0x224] sm:$0xf0] }
 0x48f   : > { %v2215_v8 = vpop.f32.mrf.mxu3 }
 0x490   : > { %v2216_v18 = vadd.f32 %v2215_v8, %v2186_v35  ;;  %v8042_v35 = vld [vmem:[%s14781_s3 + $0x228] sm:$0xf0] }
 0x497   : > { %v2217_v51 = vpop.f32.mrf.mxu3 }
 0x498   : > { %v2218_v56 = vadd.f32 %v2217_v51, %v2188_v9  ;;  %v8045_v9 = vor.u32 %v10319_v54, %v8042_v35 }
 0x49a   : > { %v2223_v15 = vpack.c.bf16 %v2218_v56, %v2216_v18  ;;  %v10347_v18 = vld [vmem:[%s14782_s4 + $0x140] sm:$0xff]  ;;  %v8048_v56 = vld [vmem:[%s14781_s3 + $0x230] sm:$0xf] }
 0x49c   : > { %7945 = vmatmul.msk.bf16.gmra.mxu0 %vm723_vm0, %v2223_v15  ;;  %2378 = vmatmul.bf16.gmra.mxu1 %v7981_v30  ;;  %v10322_v30 = vld [vmem:[%s14781_s3 + $0x234] sm:$0xf0]  ;;  %v8050_v15 = vld [vmem:[%s14781_s3 + $0x238] sm:$0xf0] }
 0x49d   : > { %v8049_v26 = vor.u32 %v10322_v30, %v8048_v56 }
 0x4a9   : > { %v2085_v48 = vpop.f32.mrf.mxu1 }
 0x4aa   : > { %v2105_v21 = vadd.f32 %v2085_v48, %v11746_v58  ;;  %v10317_v58 = vld [vmem:[%s14781_s3 + $0x214] sm:$0xf] }
 0x4ab   : > { %v8037_v63 = vor.u32 %v10317_v58, %v8034_v10  ;;  %v8097_v58 = vor.u32 %v10327_v1, %v8094_v4 }
 0x4ac   : > { %2556 = vmatmul.bf16.vlgmr.msra.gmra.mxu0 %v8025_v16  ;;  %2585 = vmatmul.bf16.vlgmr.msrb.gmra.mxu1 %v8029_v50  ;;  %v2393_v16 = vpop.f32.mrf.mxu2 }
 0x4ad   : > { %3127 = vmatpush.bf16.msrb.mxu1 %v10967_v13  ;;  %3045 = vmatpush.bf16.msra.mxu0 %v10350_v29 }
 0x4b1   : > { %3128 = vmatpush.bf16.msrb.mxu1 %v10976_v23  ;;  %v11885_v6 = vpop.f32.mrf.mxu1  ;;  %3046 = vmatpush.bf16.msra.mxu0 %v10349_v7 }
 0x4b4   : > { %v2395_v48 = vpop.f32.mrf.mxu2 }
 0x4b5   : > { %3129 = vmatpush.bf16.msrb.mxu1 %v10981_v28  ;;  %3047 = vmatpush.bf16.msra.mxu0 %v10348_v24 }
 0x4b9   : > { %3130 = vmatpush.bf16.msrb.mxu1 %v10988_v33  ;;  %v2090_v31 = vpop.f32.mrf.mxu1  ;;  %3048 = vmatpush.bf16.msra.mxu0 %v10347_v18 }
 0x4ba   : > { %v2107_v37 = vadd.f32 %v2090_v31, %v11762_v47  ;;  %v8040_v47 = vld [vmem:[%s14781_s3 + $0x220] sm:$0xf] }
 0x4bb   : > { %v8041_v8 = vor.u32 %v10320_v45, %v8040_v47 }
 0x4bc   : > { %2561 = vmatmul.bf16.gmra.mxu0 %v8033_v57  ;;  %2590 = vmatmul.bf16.gmra.mxu1 %v8037_v63 }
 0x4bd   : > { %3131 = vmatpush.bf16.msrb.mxu1 %v10951_v52 }
 0x4c1   : > { %3132 = vmatpush.bf16.msrb.mxu1 %v10945_v42  ;;  %v11907_v27 = vpop.f32.mrf.mxu1 }
 0x4c5   : > { %3133 = vmatpush.bf16.msrb.mxu1 %v10939_v32 }
 0x4c9   : > { %3134 = vmatpush.bf16.msrb.mxu1 %v10933_v22  ;;  %v2095_v3 = vpop.f32.mrf.mxu1 }
 0x4ca   : > { %v2109_v43 = vadd.f32 %v2095_v3, %v11774_v46  ;;  %v10321_v46 = vld [vmem:[%s14781_s3 + $0x234] sm:$0xf] }
 0x4cb   : > { %v8053_v41 = vor.u32 %v10321_v46, %v8050_v15 }
 0x4cc   : > { %2566 = vmatmul.bf16.gmra.mxu0 %v8041_v8  ;;  %2595 = vmatmul.bf16.gmra.mxu1 %v8045_v9 }
 0x4d1   : > { %v11933_v51 = vpop.f32.mrf.mxu1 }
 0x4d9   : > { %v2100_v60 = vpop.f32.mrf.mxu1 }
 0x4da   : > { %v2111_v11 = vadd.f32 %v2100_v60, %v11786_v49  ;;  %v2398_v49 = vpop.f32.mrf.mxu2 }
 0x4dc   : > { %2571 = vmatmul.bf16.gmra.mxu0 %v8049_v26  ;;  %2600 = vmatmul.bf16.gmra.mxu1 %v8053_v41 }
 0x4e1   : > { %v11948_v50 = vpop.f32.mrf.mxu1 }
 0x4e9   : > { %v2278_v10 = vpop.f32.mrf.mxu0  ;;  %v2364_v57 = vpop.f32.mrf.mxu1 }
 0x4ea   : > { %v11956_v63 = vadd.f32 %v2278_v10, %v2105_v21  ;;  %v2394_v7 = vadd.f32 %v2393_v16, %v2364_v57  ;;  %v2400_v21 = vpop.f32.mrf.mxu2 }
 0x4ec   : > { %2778 = vmatmul.bf16.vlgmr.msrb.gmra.mxu0 %v8097_v58 }
 0x4ed   : > { %3320 = vmatpush.bf16.msrb.mxu0 %v10967_v13 }
 0x4f1   : > { %3321 = vmatpush.bf16.msrb.mxu0 %v10976_v23  ;;  %v11960_v31 = vpop.f32.mrf.mxu0  ;;  %v2366_v29 = vpop.f32.mrf.mxu1 }
 0x4f2   : > { %v2396_v47 = vadd.f32 %v2395_v48, %v2366_v29  ;;  %v2403_v56 = vpop.f32.mrf.mxu2 }
 0x4f4   : > { %v2413_v24 = vpack.c.bf16 %v2396_v47, %v2394_v7 }
 0x4f5   : > { %3322 = vmatpush.bf16.msrb.mxu0 %v10981_v28 }
 0x4f6   : > { %8010 = vmatmul.msk.bf16.vlgmr.msra.gmra.mxu3 %vm723_vm0, %v2413_v24  ;;  %v10329_v24 = vld [vmem:[%s14781_s3 + $0x254] sm:$0xf] }
 0x4f7   : > { %2963 = vmatpush.bf16.msra.mxu3 %v11079_v39 }
 0x4f9   : > { %3323 = vmatpush.bf16.msrb.mxu0 %v10988_v33  ;;  %v2283_v45 = vpop.f32.mrf.mxu0  ;;  %v2369_v54 = vpop.f32.mrf.mxu1 }
 0x4fa   : > { %v11966_v35 = vadd.f32 %v2283_v45, %v2107_v37  ;;  %v2399_v3 = vadd.f32 %v2398_v49, %v2369_v54  ;;  %v2405_v26 = vpop.f32.mrf.mxu2 }
 0x4fb   : > { %2964 = vmatpush.bf16.msra.mxu3 %v11093_v53 }
 0x4fd   : > { %3324 = vmatpush.bf16.msrb.mxu0 %v10951_v52 }
 0x4ff   : > { %2965 = vmatpush.bf16.msra.mxu3 %v11102_v59 }
 0x501   : > { %3325 = vmatpush.bf16.msrb.mxu0 %v10945_v42  ;;  %v11972_v8 = vpop.f32.mrf.mxu0  ;;  %v2371_v9 = vpop.f32.mrf.mxu1 }
 0x502   : > { %v2401_v18 = vadd.f32 %v2400_v21, %v2371_v9  ;;  %v2408_v4 = vpop.f32.mrf.mxu2  ;;  %v8102_v21 = vld [vmem:[%s14781_s3 + $0x258] sm:$0xf0] }
 0x503   : > { %2966 = vmatpush.bf16.msra.mxu3 %v11111_v0  ;;  %v8105_v45 = vor.u32 %v10329_v24, %v8102_v21 }
 0x504   : > { %v2414_v30 = vpack.c.bf16 %v2401_v18, %v2399_v3  ;;  %v8092_v3 = vld [vmem:[%s14781_s3 + $0x240] sm:$0xf]  ;;  %v10328_v18 = vld [vmem:[%s14781_s3 + $0x244] sm:$0xf0] }
 0x505   : > { %3326 = vmatpush.bf16.msrb.mxu0 %v10939_v32 }
 0x506   : > { %8011 = vmatmul.msk.bf16.gmra.mxu3 %vm723_vm0, %v2414_v30  ;;  %2783 = vmatmul.bf16.gmra.mxu0 %v8105_v45  ;;  %v10333_v45 = vld [vmem:[%s14781_s3 + $0x274] sm:$0xf] }
 0x507   : > { %2967 = vmatpush.bf16.msra.mxu3 %v11120_v5 }
 0x509   : > { %3327 = vmatpush.bf16.msrb.mxu0 %v10933_v22  ;;  %v2288_v37 = vpop.f32.mrf.mxu0  ;;  %v2374_v46 = vpop.f32.mrf.mxu1 }
 0x50a   : > { %v11979_v15 = vadd.f32 %v2288_v37, %v2109_v43  ;;  %v2404_v16 = vadd.f32 %v2403_v56, %v2374_v46  ;;  %v2410_v57 = vpop.f32.mrf.mxu2 }
 0x50b   : > { %2968 = vmatpush.bf16.msra.mxu3 %v11135_v12 }
 0x50f   : > { %2969 = vmatpush.bf16.msra.mxu3 %v11140_v14 }
 0x511   : > { %v11983_v41 = vpop.f32.mrf.mxu0  ;;  %v2376_v60 = vpop.f32.mrf.mxu1 }
 0x512   : > { %v2406_v48 = vadd.f32 %v2405_v26, %v2376_v60  ;;  %v8093_v26 = vor.u32 %v10328_v18, %v8092_v3  ;;  %v10331_v60 = vld [vmem:[%s14781_s3 + $0x264] sm:$0xf]  ;;  %v10362_v3 = vld [vmem:[%s14782_s4 + $0x178] sm:$0xff]  ;;  %v10361_v18 = vld [vmem:[%s14782_s4 + $0x170] sm:$0xff] }
 0x513   : > { %2970 = vmatpush.bf16.msra.mxu3 %v11166_v40 }
 0x514   : > { %v2415_v1 = vpack.c.bf16 %v2406_v48, %v2404_v16  ;;  %v8110_v16 = vld [vmem:[%s14781_s3 + $0x268] sm:$0xf0] }
 0x515   : > { %v8113_v48 = vor.u32 %v10331_v60, %v8110_v16  ;;  %v10359_v16 = vld [vmem:[%s14782_s4 + $0x160] sm:$0xff] }
 0x516   : > { %8012 = vmatmul.msk.bf16.gmra.mxu3 %vm723_vm0, %v2415_v1 }
 0x517   : > { %2788 = vmatmul.bf16.gmra.mxu0 %v8113_v48 }
 0x519   : > { %v2293_v58 = vpop.f32.mrf.mxu0  ;;  %v2379_v10 = vpop.f32.mrf.mxu1 }
 0x51a   : > { %v11987_v43 = vadd.f32 %v2293_v58, %v2111_v11  ;;  %v2409_v7 = vadd.f32 %v2408_v4, %v2379_v10  ;;  %v8100_v10 = vld [vmem:[%s14781_s3 + $0x250] sm:$0xf] }
 0x521   : > { %v11989_v49 = vpop.f32.mrf.mxu0  ;;  %v2381_v29 = vpop.f32.mrf.mxu1 }
 0x522   : > { %14804 = vst [vmem:[#allocation4_spill] sm:$0xff] %v11989_v49  ;;  %v2411_v47 = vadd.f32 %v2410_v57, %v2381_v29  ;;  %v10330_v57 = vld [vmem:[%s14781_s3 + $0x254] sm:$0xf0] }
 0x523   : > { %v8101_v21 = vor.u32 %v10330_v57, %v8100_v10 }
 0x524   : > { %v2416_v54 = vpack.c.bf16 %v2411_v47, %v2409_v7 }
 0x526   : > { %8013 = vmatmul.msk.bf16.gmra.mxu3 %vm723_vm0, %v2416_v54  ;;  %v8118_v54 = vld [vmem:[%s14781_s3 + $0x278] sm:$0xf0] }
 0x529   : > { %v2557_v11 = vpop.f32.mrf.mxu0  ;;  %v2586_v9 = vpop.f32.mrf.mxu1 }
 0x52a   : > { %v2587_v56 = vadd.f32 %v2586_v9, %v2557_v11  ;;  %v8121_v11 = vor.u32 %v10333_v45, %v8118_v54 }
 0x52c   : > { %2793 = vmatmul.bf16.gmra.mxu0 %v8121_v11 }
 0x531   : > { %v2559_v30 = vpop.f32.mrf.mxu0  ;;  %v2588_v37 = vpop.f32.mrf.mxu1 }
 0x532   : > { %v2589_v46 = vadd.f32 %v2588_v37, %v2559_v30  ;;  %v10360_v37 = vld [vmem:[%s14782_s4 + $0x168] sm:$0xff] }
 0x534   : > { %v2606_v1 = vpack.c.bf16 %v2589_v46, %v2587_v56  ;;  %v8108_v46 = vld [vmem:[%s14781_s3 + $0x260] sm:$0xf] }
 0x536   : > { %8078 = vmatmul.msk.bf16.vlgmr.msrb.gmra.mxu2 %vm723_vm0, %v2606_v1  ;;  %2749 = vmatmul.bf16.vlgmr.msrb.gmra.mxu3 %v8093_v26  ;;  %v10332_v26 = vld [vmem:[%s14781_s3 + $0x264] sm:$0xf0] }
 0x537   : > { %3156 = vmatpush.bf16.msrb.mxu2 %v11079_v39  ;;  %3238 = vmatpush.bf16.msrb.mxu3 %v10362_v3  ;;  %v8160_v3 = vld [vmem:[%s14781_s3 + $0x280] sm:$0xf] }
 0x539   : > { %v2562_v4 = vpop.f32.mrf.mxu0  ;;  %v2591_v58 = vpop.f32.mrf.mxu1 }
 0x53a   : > { %v2592_v29 = vadd.f32 %v2591_v58, %v2562_v4  ;;  %v8109_v58 = vor.u32 %v10332_v26, %v8108_v46 }
 0x53b   : > { %3157 = vmatpush.bf16.msrb.mxu2 %v11093_v53  ;;  %3239 = vmatpush.bf16.msrb.mxu3 %v10361_v18  ;;  %v10340_v18 = vld [vmem:[%s14781_s3 + $0x284] sm:$0xf0] }
 0x53f   : > { %3158 = vmatpush.bf16.msrb.mxu2 %v11102_v59  ;;  %3240 = vmatpush.bf16.msrb.mxu3 %v10360_v37  ;;  %v8161_v37 = vor.u32 %v10340_v18, %v8160_v3  ;;  %v10371_v18 = vld [vmem:[%s14782_s4 + $0x180] sm:$0xff] }
 0x541   : > { %v2564_v7 = vpop.f32.mrf.mxu0  ;;  %v2593_v47 = vpop.f32.mrf.mxu1 }
 0x542   : > { %v2594_v24 = vadd.f32 %v2593_v47, %v2564_v7  ;;  %v8116_v7 = vld [vmem:[%s14781_s3 + $0x270] sm:$0xf]  ;;  %v10334_v47 = vld [vmem:[%s14781_s3 + $0x274] sm:$0xf0] }
 0x543   : > { %3159 = vmatpush.bf16.msrb.mxu2 %v11111_v0  ;;  %3241 = vmatpush.bf16.msrb.mxu3 %v10359_v16  ;;  %v8117_v11 = vor.u32 %v10334_v47, %v8116_v7  ;;  %v8168_v16 = vld [vmem:[%s14781_s3 + $0x290] sm:$0xf] }
 0x544   : > { %v2607_v9 = vpack.c.bf16 %v2594_v24, %v2592_v29  ;;  %v10373_v47 = vld [vmem:[%s14782_s4 + $0x190] sm:$0xff] }
 0x546   : > { %8079 = vmatmul.msk.bf16.gmra.mxu2 %vm723_vm0, %v2607_v9  ;;  %2754 = vmatmul.bf16.gmra.mxu3 %v8101_v21 }
 0x547   : > { %3160 = vmatpush.bf16.msrb.mxu2 %v11120_v5 }
 0x549   : > { %v2567_v56 = vpop.f32.mrf.mxu0  ;;  %v2596_v30 = vpop.f32.mrf.mxu1 }
 0x54a   : > { %v2597_v60 = vadd.f32 %v2596_v30, %v2567_v56  ;;  %v10339_v56 = vld [vmem:[%s14781_s3 + $0x284] sm:$0xf]  ;;  %v8162_v30 = vld [vmem:[%s14781_s3 + $0x288] sm:$0xf0] }
 0x54b   : > { %3161 = vmatpush.bf16.msrb.mxu2 %v11135_v12  ;;  %v8165_v46 = vor.u32 %v10339_v56, %v8162_v30 }
 0x54f   : > { %3162 = vmatpush.bf16.msrb.mxu2 %v11140_v14 }
 0x551   : > { %v2569_v48 = vpop.f32.mrf.mxu0  ;;  %v2598_v1 = vpop.f32.mrf.mxu1 }
 0x552   : > { %v2599_v4 = vadd.f32 %v2598_v1, %v2569_v48  ;;  %v10342_v48 = vld [vmem:[%s14781_s3 + $0x294] sm:$0xf0]  ;;  %v10341_v1 = vld [vmem:[%s14781_s3 + $0x294] sm:$0xf] }
 0x553   : > { %3163 = vmatpush.bf16.msrb.mxu2 %v11166_v40 }
 0x554   : > { %v2608_v10 = vpack.c.bf16 %v2599_v4, %v2597_v60 }
 0x556   : > { %8080 = vmatmul.msk.bf16.gmra.mxu2 %vm723_vm0, %v2608_v10  ;;  %2759 = vmatmul.bf16.gmra.mxu3 %v8109_v58  ;;  %v8169_v58 = vor.u32 %v10342_v48, %v8168_v16  ;;  %v8186_v16 = vld [vmem:[%s14781_s3 + $0x2b8] sm:$0xf0] }
 0x559   : > { %v2572_v57 = vpop.f32.mrf.mxu0  ;;  %v2601_v29 = vpop.f32.mrf.mxu1 }
 0x55a   : > { %v2602_v24 = vadd.f32 %v2601_v29, %v2572_v57  ;;  %v10374_v57 = vld [vmem:[%s14782_s4 + $0x198] sm:$0xff] }
 0x561   : > { %v2574_v21 = vpop.f32.mrf.mxu0  ;;  %v2603_v45 = vpop.f32.mrf.mxu1 }
 0x562   : > { %v2604_v54 = vadd.f32 %v2603_v45, %v2574_v21  ;;  %v10344_v21 = vld [vmem:[%s14781_s3 + $0x2a4] sm:$0xf0]  ;;  %v8178_v45 = vld [vmem:[%s14781_s3 + $0x2a8] sm:$0xf0] }
 0x564   : > { %v2609_v9 = vpack.c.bf16 %v2604_v54, %v2602_v24  ;;  %v8176_v24 = vld [vmem:[%s14781_s3 + $0x2a0] sm:$0xf]  ;;  %v10372_v54 = vld [vmem:[%s14782_s4 + $0x188] sm:$0xff] }
 0x566   : > { %8081 = vmatmul.msk.bf16.gmra.mxu2 %vm723_vm0, %v2609_v9  ;;  %2764 = vmatmul.bf16.gmra.mxu3 %v8117_v11  ;;  %v8177_v9 = vor.u32 %v10344_v21, %v8176_v24 }
 0x576   : > { %2942 = vmatmul.bf16.vlgmr.msra.gmra.mxu2 %v8161_v37  ;;  %2971 = vmatmul.bf16.vlgmr.msra.gmra.mxu3 %v8165_v46  ;;  %v8184_v37 = vld [vmem:[%s14781_s3 + $0x2b0] sm:$0xf]  ;;  %v10346_v46 = vld [vmem:[%s14781_s3 + $0x2b4] sm:$0xf0] }
 0x577   : > { %3513 = vmatpush.bf16.msra.mxu3 %v10967_v13  ;;  %3431 = vmatpush.bf16.msra.mxu2 %v10374_v57  ;;  %v10351_v57 = vld [vmem:[%s14781_s3 + $0x2c4] sm:$0xf] }
 0x579   : > { %v2471_v26 = vpop.f32.mrf.mxu3 }
 0x57a   : > { %v2491_v60 = vadd.f32 %v2471_v26, %v11956_v63  ;;  %v8170_v63 = vld [vmem:[%s14781_s3 + $0x298] sm:$0xf0]  ;;  %v10345_v26 = vld [vmem:[%s14781_s3 + $0x2b4] sm:$0xf] }
 0x57b   : > { %3514 = vmatpush.bf16.msra.mxu3 %v10976_v23  ;;  %v8173_v10 = vor.u32 %v10341_v1, %v8170_v63  ;;  %3432 = vmatpush.bf16.msra.mxu2 %v10373_v47  ;;  %v8185_v1 = vor.u32 %v10346_v46, %v8184_v37 }
 0x57f   : > { %3515 = vmatpush.bf16.msra.mxu3 %v10981_v28  ;;  %3433 = vmatpush.bf16.msra.mxu2 %v10372_v54 }
 0x581   : > { %v12086_v4 = vpop.f32.mrf.mxu3 }
 0x583   : > { %3516 = vmatpush.bf16.msra.mxu3 %v10988_v33  ;;  %3434 = vmatpush.bf16.msra.mxu2 %v10371_v18 }
 0x586   : > { %2947 = vmatmul.bf16.gmra.mxu2 %v8169_v58  ;;  %2976 = vmatmul.bf16.gmra.mxu3 %v8173_v10  ;;  %v2779_v10 = vpop.f32.mrf.mxu0 }
 0x587   : > { %3517 = vmatpush.bf16.msra.mxu3 %v10951_v52 }
 0x589   : > { %v2476_v29 = vpop.f32.mrf.mxu3 }
 0x58a   : > { %v2493_v7 = vadd.f32 %v2476_v29, %v11966_v35  ;;  %v10343_v35 = vld [vmem:[%s14781_s3 + $0x2a4] sm:$0xf]  ;;  %v8230_v29 = vld [vmem:[%s14781_s3 + $0x2c8] sm:$0xf0] }
 0x58b   : > { %3518 = vmatpush.bf16.msra.mxu3 %v10945_v42  ;;  %v8181_v3 = vor.u32 %v10343_v35, %v8178_v45  ;;  %v8233_v24 = vor.u32 %v10351_v57, %v8230_v29 }
 0x58e   : > { %v2781_v21 = vpop.f32.mrf.mxu0 }
 0x58f   : > { %3519 = vmatpush.bf16.msra.mxu3 %v10939_v32 }
 0x591   : > { %v12114_v11 = vpop.f32.mrf.mxu3 }
 0x593   : > { %3520 = vmatpush.bf16.msra.mxu3 %v10933_v22 }
 0x596   : > { %2952 = vmatmul.bf16.gmra.mxu2 %v8177_v9  ;;  %2981 = vmatmul.bf16.gmra.mxu3 %v8181_v3 }
 0x599   : > { %v2481_v56 = vpop.f32.mrf.mxu3 }
 0x59a   : > { %v2495_v30 = vadd.f32 %v2481_v56, %v11979_v15  ;;  %v8189_v15 = vor.u32 %v10345_v26, %v8186_v16 }
 0x5a1   : > { %v12133_v48 = vpop.f32.mrf.mxu3 }
 0x5a6   : > { %2957 = vmatmul.bf16.gmra.mxu2 %v8185_v1  ;;  %2986 = vmatmul.bf16.gmra.mxu3 %v8189_v15 }
 0x5a9   : > { %v2486_v63 = vpop.f32.mrf.mxu3 }
 0x5aa   : > { %v2497_v58 = vadd.f32 %v2486_v63, %v11987_v43  ;;  %v2784_v43 = vpop.f32.mrf.mxu0 }
 0x5b1   : > { %v12142_v47 = vpop.f32.mrf.mxu3 }
 0x5b2   : > { %14805 = vst [vmem:[#allocation5_spill] sm:$0xff] %v12142_v47 }
 0x5b6   : > { %3164 = vmatmul.bf16.vlgmr.msrb.gmra.mxu2 %v8233_v24 }
 0x5b7   : > { %3706 = vmatpush.bf16.msrb.mxu2 %v10967_v13 }
 0x5b9   : > { %v2664_v35 = vpop.f32.mrf.mxu2  ;;  %v2750_v45 = vpop.f32.mrf.mxu3 }
 0x5ba   : > { %v12145_v54 = vadd.f32 %v2664_v35, %v2491_v60  ;;  %v2780_v18 = vadd.f32 %v2779_v10, %v2750_v45  ;;  %v2786_v60 = vpop.f32.mrf.mxu0 }
 0x5bb   : > { %3707 = vmatpush.bf16.msrb.mxu2 %v10976_v23 }
 0x5bf   : > { %3708 = vmatpush.bf16.msrb.mxu2 %v10981_v28 }
 0x5c1   : > { %v12149_v9 = vpop.f32.mrf.mxu2  ;;  %v2752_v3 = vpop.f32.mrf.mxu3 }
 0x5c2   : > { %v2782_v56 = vadd.f32 %v2781_v21, %v2752_v3  ;;  %v2789_v57 = vpop.f32.mrf.mxu0 }
 0x5c3   : > { %3709 = vmatpush.bf16.msrb.mxu2 %v10988_v33 }
 0x5c4   : > { %v2799_v37 = vpack.c.bf16 %v2782_v56, %v2780_v18 }
 0x5c6   : > { %8146 = vmatmul.msk.bf16.vlgmr.msra.gmra.mxu1 %vm723_vm0, %v2799_v37 }
 0x5c7   : > { %3349 = vmatpush.bf16.msra.mxu1 %v11079_v39  ;;  %3710 = vmatpush.bf16.msrb.mxu2 %v10951_v52 }
 0x5c9   : > { %v2669_v46 = vpop.f32.mrf.mxu2  ;;  %v2755_v26 = vpop.f32.mrf.mxu3 }
 0x5ca   : > { %v12155_v16 = vadd.f32 %v2669_v46, %v2493_v7  ;;  %v2785_v63 = vadd.f32 %v2784_v43, %v2755_v26  ;;  %v2791_v35 = vpop.f32.mrf.mxu0 }
 0x5cb   : > { %3350 = vmatpush.bf16.msra.mxu1 %v11093_v53  ;;  %3711 = vmatpush.bf16.msrb.mxu2 %v10945_v42 }
 0x5cf   : > { %3351 = vmatpush.bf16.msra.mxu1 %v11102_v59  ;;  %3712 = vmatpush.bf16.msrb.mxu2 %v10939_v32 }
 0x5d1   : > { %v12161_v1 = vpop.f32.mrf.mxu2  ;;  %v2757_v15 = vpop.f32.mrf.mxu3 }
 0x5d2   : > { %v2787_v10 = vadd.f32 %v2786_v60, %v2757_v15  ;;  %v2794_v37 = vpop.f32.mrf.mxu0  ;;  %v8238_v60 = vld [vmem:[%s14781_s3 + $0x2d8] sm:$0xf0] }
 0x5d3   : > { %3352 = vmatpush.bf16.msra.mxu1 %v11111_v0  ;;  %3713 = vmatpush.bf16.msrb.mxu2 %v10933_v22 }
 0x5d4   : > { %v2800_v7 = vpack.c.bf16 %v2787_v10, %v2785_v63 }
 0x5d6   : > { %8147 = vmatmul.msk.bf16.gmra.mxu1 %vm723_vm0, %v2800_v7 }
 0x5d7   : > { %3353 = vmatpush.bf16.msra.mxu1 %v11120_v5 }
 0x5d9   : > { %v2674_v29 = vpop.f32.mrf.mxu2  ;;  %v2760_v24 = vpop.f32.mrf.mxu3 }
 0x5da   : > { %v12167_v21 = vadd.f32 %v2674_v29, %v2495_v30  ;;  %v2790_v3 = vadd.f32 %v2789_v57, %v2760_v24  ;;  %v10353_v30 = vld [vmem:[%s14781_s3 + $0x2d4] sm:$0xf]  ;;  %v2796_v10 = vpop.f32.mrf.mxu0 }
 0x5db   : > { %3354 = vmatpush.bf16.msra.mxu1 %v11135_v12  ;;  %v8241_v46 = vor.u32 %v10353_v30, %v8238_v60  ;;  %v10352_v30 = vld [vmem:[%s14781_s3 + $0x2c4] sm:$0xf0] }
 0x5dd   : > { %3169 = vmatmul.bf16.gmra.mxu2 %v8241_v46 }
 0x5df   : > { %3355 = vmatpush.bf16.msra.mxu1 %v11140_v14 }
 0x5e1   : > { %v12171_v45 = vpop.f32.mrf.mxu2  ;;  %v2762_v43 = vpop.f32.mrf.mxu3 }
 0x5e2   : > { %v2792_v18 = vadd.f32 %v2791_v35, %v2762_v43  ;;  %v10355_v43 = vld [vmem:[%s14781_s3 + $0x2e4] sm:$0xf] }
 0x5e3   : > { %3356 = vmatpush.bf16.msra.mxu1 %v11166_v40 }
 0x5e4   : > { %v2801_v56 = vpack.c.bf16 %v2792_v18, %v2790_v3  ;;  %v8246_v3 = vld [vmem:[%s14781_s3 + $0x2e8] sm:$0xf0] }
 0x5e5   : > { %v8249_v18 = vor.u32 %v10355_v43, %v8246_v3 }
 0x5e6   : > { %8148 = vmatmul.msk.bf16.gmra.mxu1 %vm723_vm0, %v2801_v56 }
 0x5e9   : > { %v2679_v26 = vpop.f32.mrf.mxu2  ;;  %v2765_v15 = vpop.f32.mrf.mxu3 }
 0x5ea   : > { %v12181_v63 = vadd.f32 %v2679_v26, %v2497_v58  ;;  %v2795_v29 = vadd.f32 %v2794_v37, %v2765_v15  ;;  %v8228_v37 = vld [vmem:[%s14781_s3 + $0x2c0] sm:$0xf] }
 0x5ed   : > { %3174 = vmatmul.bf16.gmra.mxu2 %v8249_v18  ;;  %v8236_v18 = vld [vmem:[%s14781_s3 + $0x2d0] sm:$0xf] }
 0x5f1   : > { %v12183_v57 = vpop.f32.mrf.mxu2  ;;  %v2767_v7 = vpop.f32.mrf.mxu3 }
 0x5f2   : > { %14806 = vst [vmem:[#allocation6_spill] sm:$0xff] %v12183_v57  ;;  %v2797_v24 = vadd.f32 %v2796_v10, %v2767_v7  ;;  %v8229_v10 = vor.u32 %v10352_v30, %v8228_v37 }
 0x5f4   : > { %v2802_v35 = vpack.c.bf16 %v2797_v24, %v2795_v29  ;;  %v10357_v29 = vld [vmem:[%s14781_s3 + $0x2f4] sm:$0xf]  ;;  %v8254_v24 = vld [vmem:[%s14781_s3 + $0x2f8] sm:$0xf0] }
 0x5f6   : > { %8149 = vmatmul.msk.bf16.gmra.mxu1 %vm723_vm0, %v2802_v35  ;;  %v8257_v35 = vor.u32 %v10357_v29, %v8254_v24  ;;  %v10384_v24 = vld [vmem:[%s14782_s4 + $0x1a8] sm:$0xff] }
 0x5f9   : > { %v2943_v58 = vpop.f32.mrf.mxu2  ;;  %v2972_v56 = vpop.f32.mrf.mxu3 }
 0x5fa   : > { %v2973_v60 = vadd.f32 %v2972_v56, %v2943_v58  ;;  %v10354_v58 = vld [vmem:[%s14781_s3 + $0x2d4] sm:$0xf0] }
 0x5fd   : > { %3179 = vmatmul.bf16.gmra.mxu2 %v8257_v35  ;;  %v8244_v35 = vld [vmem:[%s14781_s3 + $0x2e0] sm:$0xf] }
 0x601   : > { %v2945_v46 = vpop.f32.mrf.mxu2  ;;  %v2974_v26 = vpop.f32.mrf.mxu3 }
 0x602   : > { %v2975_v15 = vadd.f32 %v2974_v26, %v2945_v46  ;;  %v8237_v46 = vor.u32 %v10354_v58, %v8236_v18 }
 0x604   : > { %v2992_v7 = vpack.c.bf16 %v2975_v15, %v2973_v60  ;;  %v10386_v15 = vld [vmem:[%s14782_s4 + $0x1b8] sm:$0xff] }
 0x606   : > { %8214 = vmatmul.msk.bf16.vlgmr.msra.gmra.mxu0 %vm723_vm0, %v2992_v7  ;;  %3135 = vmatmul.bf16.vlgmr.msrb.gmra.mxu1 %v8229_v10  ;;  %v10385_v10 = vld [vmem:[%s14782_s4 + $0x1b0] sm:$0xff] }
 0x607   : > { %3542 = vmatpush.bf16.msra.mxu0 %v11079_v39  ;;  %3624 = vmatpush.bf16.msrb.mxu1 %v10386_v15  ;;  %v8252_v15 = vld [vmem:[%s14781_s3 + $0x2f0] sm:$0xf] }
 0x609   : > { %v2948_v43 = vpop.f32.mrf.mxu2  ;;  %v2977_v3 = vpop.f32.mrf.mxu3 }
 0x60a   : > { %v2978_v56 = vadd.f32 %v2977_v3, %v2948_v43  ;;  %v10356_v43 = vld [vmem:[%s14781_s3 + $0x2e4] sm:$0xf0] }
 0x60b   : > { %3543 = vmatpush.bf16.msra.mxu0 %v11093_v53  ;;  %3625 = vmatpush.bf16.msrb.mxu1 %v10385_v10  ;;  %v10358_v10 = vld [vmem:[%s14781_s3 + $0x2f4] sm:$0xf0] }
 0x60f   : > { %3544 = vmatpush.bf16.msra.mxu0 %v11102_v59  ;;  %3626 = vmatpush.bf16.msrb.mxu1 %v10384_v24 }
 0x611   : > { %v2950_v37 = vpop.f32.mrf.mxu2  ;;  %v2979_v30 = vpop.f32.mrf.mxu3 }
 0x612   : > { %v2980_v60 = vadd.f32 %v2979_v30, %v2950_v37  ;;  %v8245_v37 = vor.u32 %v10356_v43, %v8244_v35  ;;  %v8253_v43 = vor.u32 %v10358_v10, %v8252_v15  ;;  %v8304_v10 = vld [vmem:[%s14781_s3 + $0x310] sm:$0xf] }
 0x613   : > { %3545 = vmatpush.bf16.msra.mxu0 %v11111_v0 }
 0x614   : > { %v2993_v26 = vpack.c.bf16 %v2980_v60, %v2978_v56  ;;  %v10383_v60 = vld [vmem:[%s14782_s4 + $0x1a0] sm:$0xff] }
 0x615   : > { %3627 = vmatpush.bf16.msrb.mxu1 %v10383_v60 }
 0x616   : > { %8215 = vmatmul.msk.bf16.gmra.mxu0 %vm723_vm0, %v2993_v26  ;;  %3140 = vmatmul.bf16.gmra.mxu1 %v8237_v46 }
 0x617   : > { %3546 = vmatpush.bf16.msra.mxu0 %v11120_v5 }
 0x619   : > { %v2953_v7 = vpop.f32.mrf.mxu2  ;;  %v2982_v29 = vpop.f32.mrf.mxu3 }
 0x61a   : > { %v2983_v3 = vadd.f32 %v2982_v29, %v2953_v7 }
 0x61b   : > { %3547 = vmatpush.bf16.msra.mxu0 %v11135_v12 }
 0x61f   : > { %3548 = vmatpush.bf16.msra.mxu0 %v11140_v14 }
 0x621   : > { %v2955_v18 = vpop.f32.mrf.mxu2  ;;  %v2984_v58 = vpop.f32.mrf.mxu3 }
 0x622   : > { %v2985_v56 = vadd.f32 %v2984_v58, %v2955_v18  ;;  %v8296_v18 = vld [vmem:[%s14781_s3 + $0x300] sm:$0xf]  ;;  %v10364_v58 = vld [vmem:[%s14781_s3 + $0x304] sm:$0xf0] }
 0x623   : > { %3549 = vmatpush.bf16.msra.mxu0 %v11166_v40 }
 0x624   : > { %v2994_v30 = vpack.c.bf16 %v2985_v56, %v2983_v3  ;;  %v10363_v56 = vld [vmem:[%s14781_s3 + $0x304] sm:$0xf] }
 0x626   : > { %8216 = vmatmul.msk.bf16.gmra.mxu0 %vm723_vm0, %v2994_v30  ;;  %3145 = vmatmul.bf16.gmra.mxu1 %v8245_v37  ;;  %v8298_v37 = vld [vmem:[%s14781_s3 + $0x308] sm:$0xf0]  ;;  %v8297_v30 = vor.u32 %v10364_v58, %v8296_v18 }
 0x627   : > { %v8301_v60 = vor.u32 %v10363_v56, %v8298_v37  ;;  %v8320_v56 = vld [vmem:[%s14781_s3 + $0x330] sm:$0xf]  ;;  %v10370_v37 = vld [vmem:[%s14781_s3 + $0x334] sm:$0xf0] }
 0x629   : > { %v2958_v46 = vpop.f32.mrf.mxu2  ;;  %v2987_v26 = vpop.f32.mrf.mxu3 }
 0x62a   : > { %v2988_v7 = vadd.f32 %v2987_v26, %v2958_v46 }
 0x631   : > { %v2960_v29 = vpop.f32.mrf.mxu2  ;;  %v2989_v24 = vpop.f32.mrf.mxu3 }
 0x632   : > { %v2990_v35 = vadd.f32 %v2989_v24, %v2960_v29 }
 0x634   : > { %v2995_v3 = vpack.c.bf16 %v2990_v35, %v2988_v7  ;;  %v10366_v7 = vld [vmem:[%s14781_s3 + $0x314] sm:$0xf0] }
 0x636   : > { %8217 = vmatmul.msk.bf16.gmra.mxu0 %vm723_vm0, %v2995_v3  ;;  %3150 = vmatmul.bf16.gmra.mxu1 %v8253_v43  ;;  %v8312_v43 = vld [vmem:[%s14781_s3 + $0x320] sm:$0xf] }
 0x643   : > { %v2857_v46 = vpop.f32.mrf.mxu1 }
 0x644   : > { %v2877_v26 = vadd.f32 %v2857_v46, %v12145_v54  ;;  %v10365_v54 = vld [vmem:[%s14781_s3 + $0x314] sm:$0xf] }
 0x646   : > { %3328 = vmatmul.bf16.vlgmr.msrb.gmra.mxu0 %v8297_v30  ;;  %3357 = vmatmul.bf16.vlgmr.msra.gmra.mxu1 %v8301_v60  ;;  %v10369_v30 = vld [vmem:[%s14781_s3 + $0x334] sm:$0xf] }
 0x647   : > { %3899 = vmatpush.bf16.msra.mxu1 %v10967_v13  ;;  %v8306_v13 = vld [vmem:[%s14781_s3 + $0x318] sm:$0xf0] }
 0x648   : > { %v8309_v29 = vor.u32 %v10365_v54, %v8306_v13 }
 0x64b   : > { %3900 = vmatpush.bf16.msra.mxu1 %v10976_v23  ;;  %v12261_v15 = vpop.f32.mrf.mxu1  ;;  %v8305_v23 = vor.u32 %v10366_v7, %v8304_v10  ;;  %v3165_v7 = vpop.f32.mrf.mxu2 }
 0x64f   : > { %3901 = vmatpush.bf16.msra.mxu1 %v10981_v28 }
 0x653   : > { %3902 = vmatpush.bf16.msra.mxu1 %v10988_v33  ;;  %v2862_v24 = vpop.f32.mrf.mxu1  ;;  %v10368_v33 = vld [vmem:[%s14781_s3 + $0x324] sm:$0xf0]  ;;  %v3167_v13 = vpop.f32.mrf.mxu2 }
 0x654   : > { %v2879_v35 = vadd.f32 %v2862_v24, %v12155_v16  ;;  %v10367_v16 = vld [vmem:[%s14781_s3 + $0x324] sm:$0xf] }
 0x656   : > { %3333 = vmatmul.bf16.gmra.mxu0 %v8305_v23  ;;  %3362 = vmatmul.bf16.gmra.mxu1 %v8309_v29 }
 0x657   : > { %3903 = vmatpush.bf16.msra.mxu1 %v10951_v52  ;;  %v8313_v52 = vor.u32 %v10368_v33, %v8312_v43 }
 0x65b   : > { %3904 = vmatpush.bf16.msra.mxu1 %v10945_v42  ;;  %v12280_v28 = vpop.f32.mrf.mxu1  ;;  %v8314_v42 = vld [vmem:[%s14781_s3 + $0x328] sm:$0xf0] }
 0x65c   : > { %v8317_v3 = vor.u32 %v10367_v16, %v8314_v42 }
 0x65f   : > { %3905 = vmatpush.bf16.msra.mxu1 %v10939_v32 }
 0x660   : > { %v3170_v43 = vpop.f32.mrf.mxu2 }
 0x663   : > { %3906 = vmatpush.bf16.msra.mxu1 %v10933_v22  ;;  %v2867_v18 = vpop.f32.mrf.mxu1  ;;  %v8322_v22 = vld [vmem:[%s14781_s3 + $0x338] sm:$0xf0] }
 0x664   : > { %v2881_v58 = vadd.f32 %v2867_v18, %v12167_v21  ;;  %v8321_v21 = vor.u32 %v10370_v37, %v8320_v56  ;;  %v8325_v60 = vor.u32 %v10369_v30, %v8322_v22 }
 0x666   : > { %3338 = vmatmul.bf16.gmra.mxu0 %v8313_v52  ;;  %3367 = vmatmul.bf16.gmra.mxu1 %v8317_v3 }
 0x66b   : > { %v12297_v32 = vpop.f32.mrf.mxu1 }
 0x673   : > { %v2872_v46 = vpop.f32.mrf.mxu1 }
 0x674   : > { %v2883_v10 = vadd.f32 %v2872_v46, %v12181_v63  ;;  %v3172_v63 = vpop.f32.mrf.mxu2 }
 0x676   : > { %3343 = vmatmul.bf16.gmra.mxu0 %v8321_v21  ;;  %3372 = vmatmul.bf16.gmra.mxu1 %v8325_v60 }
 0x67b   : > { %v12312_v54 = vpop.f32.mrf.mxu1 }
 0x67c   : > { %14807 = vst [vmem:[#allocation7_spill] sm:$0xff] %v12312_v54  ;;  %v3175_v60 = vpop.f32.mrf.mxu2 }
 0x683   : > { %v3050_v23 = vpop.f32.mrf.mxu0  ;;  %v3136_v29 = vpop.f32.mrf.mxu1 }
 0x684   : > { %v12314_v24 = vadd.f32 %v3050_v23, %v2877_v26  ;;  %v3166_v42 = vadd.f32 %v3165_v7, %v3136_v29  ;;  %v3177_v23 = vpop.f32.mrf.mxu2 }
 0x68b   : > { %v12316_v33 = vpop.f32.mrf.mxu0  ;;  %v3138_v16 = vpop.f32.mrf.mxu1 }
 0x68c   : > { %v3168_v52 = vadd.f32 %v3167_v13, %v3138_v16 }
 0x68e   : > { %v3185_v3 = vpack.c.bf16 %v3168_v52, %v3166_v42  ;;  %v10375_v52 = vld [vmem:[%s14781_s3 + $0x344] sm:$0xf] }
 0x690   : > { %8282 = vmatmul.msk.bf16.vlgmr.msrb.gmra.mxu3 %vm723_vm0, %v3185_v3  ;;  %v8366_v3 = vld [vmem:[%s14781_s3 + $0x348] sm:$0xf0] }
 0x691   : > { %3735 = vmatpush.bf16.msrb.mxu3 %v11079_v39 }
 0x693   : > { %v3055_v18 = vpop.f32.mrf.mxu0  ;;  %v3141_v56 = vpop.f32.mrf.mxu1 }
 0x694   : > { %v12320_v37 = vadd.f32 %v3055_v18, %v2879_v35  ;;  %v3171_v22 = vadd.f32 %v3170_v43, %v3141_v56  ;;  %v3180_v18 = vpop.f32.mrf.mxu2 }
 0x695   : > { %3736 = vmatpush.bf16.msrb.mxu3 %v11093_v53 }
 0x699   : > { %3737 = vmatpush.bf16.msrb.mxu3 %v11102_v59 }
 0x69b   : > { %v12324_v26 = vpop.f32.mrf.mxu0  ;;  %v3143_v30 = vpop.f32.mrf.mxu1 }
 0x69c   : > { %v3173_v21 = vadd.f32 %v3172_v63, %v3143_v30 }
 0x69d   : > { %3738 = vmatpush.bf16.msrb.mxu3 %v11111_v0 }
 0x69e   : > { %v3186_v46 = vpack.c.bf16 %v3173_v21, %v3171_v22  ;;  %v3182_v21 = vpop.f32.mrf.mxu2 }
 0x6a0   : > { %8283 = vmatmul.msk.bf16.gmra.mxu3 %vm723_vm0, %v3186_v46 }
 0x6a1   : > { %3739 = vmatpush.bf16.msrb.mxu3 %v11120_v5 }
 0x6a3   : > { %v3060_v7 = vpop.f32.mrf.mxu0  ;;  %v3146_v35 = vpop.f32.mrf.mxu1 }
 0x6a4   : > { %v12329_v13 = vadd.f32 %v3060_v7, %v2881_v58  ;;  %v3176_v16 = vadd.f32 %v3175_v60, %v3146_v35  ;;  %v8369_v58 = vor.u32 %v10375_v52, %v8366_v3  ;;  %v8364_v3 = vld [vmem:[%s14781_s3 + $0x340] sm:$0xf] }
 0x6a5   : > { %3740 = vmatpush.bf16.msrb.mxu3 %v11135_v12 }
 0x6a6   : > { %3550 = vmatmul.bf16.vlgmr.msra.gmra.mxu0 %v8369_v58  ;;  %v10376_v58 = vld [vmem:[%s14781_s3 + $0x344] sm:$0xf0] }
 0x6a9   : > { %3741 = vmatpush.bf16.msrb.mxu3 %v11140_v14 }
 0x6ab   : > { %v12333_v29 = vpop.f32.mrf.mxu0  ;;  %v3148_v43 = vpop.f32.mrf.mxu1 }
 0x6ac   : > { %v3178_v42 = vadd.f32 %v3177_v23, %v3148_v43  ;;  %v10377_v23 = vld [vmem:[%s14781_s3 + $0x354] sm:$0xf]  ;;  %v8374_v43 = vld [vmem:[%s14781_s3 + $0x358] sm:$0xf0] }
 0x6ad   : > { %3742 = vmatpush.bf16.msrb.mxu3 %v11166_v40 }
 0x6ae   : > { %v3187_v63 = vpack.c.bf16 %v3178_v42, %v3176_v16  ;;  %v8377_v16 = vor.u32 %v10377_v23, %v8374_v43 }
 0x6b0   : > { %8284 = vmatmul.msk.bf16.gmra.mxu3 %vm723_vm0, %v3187_v63 }
 0x6b3   : > { %v3065_v56 = vpop.f32.mrf.mxu0  ;;  %v3151_v30 = vpop.f32.mrf.mxu1 }
 0x6b4   : > { %v12343_v22 = vadd.f32 %v3065_v56, %v2883_v10  ;;  %v3181_v7 = vadd.f32 %v3180_v18, %v3151_v30 }
 0x6b6   : > { %3555 = vmatmul.bf16.gmra.mxu0 %v8377_v16 }
 0x6bb   : > { %v12345_v60 = vpop.f32.mrf.mxu0  ;;  %v3153_v46 = vpop.f32.mrf.mxu1 }
 0x6bc   : > { %14808 = vst [vmem:[#allocation8_spill] sm:$0xff] %v12345_v60  ;;  %v3183_v35 = vadd.f32 %v3182_v21, %v3153_v46  ;;  %v8365_v21 = vor.u32 %v10376_v58, %v8364_v3  ;;  %v10379_v46 = vld [vmem:[%s14781_s3 + $0x364] sm:$0xf] }
 0x6be   : > { %v3188_v42 = vpack.c.bf16 %v3183_v35, %v3181_v7  ;;  %v8382_v7 = vld [vmem:[%s14781_s3 + $0x368] sm:$0xf0] }
 0x6bf   : > { %v8385_v35 = vor.u32 %v10379_v46, %v8382_v7  ;;  %v8380_v46 = vld [vmem:[%s14781_s3 + $0x360] sm:$0xf] }
 0x6c0   : > { %8285 = vmatmul.msk.bf16.gmra.mxu3 %vm723_vm0, %v3188_v42  ;;  %v8372_v42 = vld [vmem:[%s14781_s3 + $0x350] sm:$0xf] }
 0x6c3   : > { %v3329_v10 = vpop.f32.mrf.mxu0  ;;  %v3358_v52 = vpop.f32.mrf.mxu1 }
 0x6c4   : > { %v3359_v63 = vadd.f32 %v3358_v52, %v3329_v10  ;;  %v10378_v10 = vld [vmem:[%s14781_s3 + $0x354] sm:$0xf0] }
 0x6c6   : > { %3560 = vmatmul.bf16.gmra.mxu0 %v8385_v35 }
 0x6cb   : > { %v3331_v18 = vpop.f32.mrf.mxu0  ;;  %v3360_v56 = vpop.f32.mrf.mxu1 }
 0x6cc   : > { %v3361_v30 = vadd.f32 %v3360_v56, %v3331_v18  ;;  %v8373_v18 = vor.u32 %v10378_v10, %v8372_v42  ;;  %v8388_v42 = vld [vmem:[%s14781_s3 + $0x370] sm:$0xf]  ;;  %v10382_v10 = vld [vmem:[%s14781_s3 + $0x374] sm:$0xf0] }
 0x6ce   : > { %v3378_v23 = vpack.c.bf16 %v3361_v30, %v3359_v63 }
 0x6d0   : > { %8350 = vmatmul.msk.bf16.vlgmr.msra.gmra.mxu2 %vm723_vm0, %v3378_v23  ;;  %3521 = vmatmul.bf16.vlgmr.msra.gmra.mxu3 %v8365_v21 }
 0x6d1   : > { %3928 = vmatpush.bf16.msra.mxu2 %v11079_v39  ;;  %v10381_v39 = vld [vmem:[%s14781_s3 + $0x374] sm:$0xf] }
 0x6d3   : > { %v3334_v43 = vpop.f32.mrf.mxu0  ;;  %v3363_v16 = vpop.f32.mrf.mxu1 }
 0x6d4   : > { %v3364_v52 = vadd.f32 %v3363_v16, %v3334_v43 }
 0x6d5   : > { %3929 = vmatpush.bf16.msra.mxu2 %v11093_v53  ;;  %v8390_v53 = vld [vmem:[%s14781_s3 + $0x378] sm:$0xf0] }
 0x6d9   : > { %3930 = vmatpush.bf16.msra.mxu2 %v11102_v59  ;;  %v8393_v59 = vor.u32 %v10381_v39, %v8390_v53  ;;  %v8432_v39 = vld [vmem:[%s14781_s3 + $0x380] sm:$0xf]  ;;  %v10388_v53 = vld [vmem:[%s14781_s3 + $0x384] sm:$0xf0] }
 0x6db   : > { %v3336_v3 = vpop.f32.mrf.mxu0  ;;  %v3365_v58 = vpop.f32.mrf.mxu1  ;;  %3565 = vmatmul.bf16.gmra.mxu0 %v8393_v59  ;;  %v10387_v59 = vld [vmem:[%s14781_s3 + $0x384] sm:$0xf] }
 0x6dc   : > { %v3366_v63 = vadd.f32 %v3365_v58, %v3336_v3 }
 0x6dd   : > { %3931 = vmatpush.bf16.msra.mxu2 %v11111_v0  ;;  %v10380_v0 = vld [vmem:[%s14781_s3 + $0x364] sm:$0xf0] }
 0x6de   : > { %v3379_v56 = vpack.c.bf16 %v3366_v63, %v3364_v52  ;;  %v8381_v16 = vor.u32 %v10380_v0, %v8380_v46 }
 0x6e0   : > { %8351 = vmatmul.msk.bf16.gmra.mxu2 %vm723_vm0, %v3379_v56  ;;  %3526 = vmatmul.bf16.gmra.mxu3 %v8373_v18  ;;  %v8389_v18 = vor.u32 %v10382_v10, %v8388_v42  ;;  %v8434_v56 = vld [vmem:[%s14781_s3 + $0x388] sm:$0xf0]  ;;  %v8448_v42 = vld [vmem:[%s14781_s3 + $0x3a0] sm:$0xf]  ;;  %v10392_v10 = vld [vmem:[%s14781_s3 + $0x3a4] sm:$0xf0] }
 0x6e1   : > { %3932 = vmatpush.bf16.msra.mxu2 %v11120_v5 }
 0x6e3   : > { %v3339_v30 = vpop.f32.mrf.mxu0  ;;  %v3368_v21 = vpop.f32.mrf.mxu1 }
 0x6e4   : > { %v3369_v7 = vadd.f32 %v3368_v21, %v3339_v30  ;;  %v8433_v30 = vor.u32 %v10388_v53, %v8432_v39  ;;  %v8437_v21 = vor.u32 %v10387_v59, %v8434_v56  ;;  %v8456_v39 = vld [vmem:[%s14781_s3 + $0x3b0] sm:$0xf]  ;;  %v10394_v53 = vld [vmem:[%s14781_s3 + $0x3b4] sm:$0xf0]  ;;  %v10393_v59 = vld [vmem:[%s14781_s3 + $0x3b4] sm:$0xf] }
 0x6e5   : > { %3933 = vmatpush.bf16.msra.mxu2 %v11135_v12  ;;  %v8458_v56 = vld [vmem:[%s14781_s3 + $0x3b8] sm:$0xf0] }
 0x6e9   : > { %3934 = vmatpush.bf16.msra.mxu2 %v11140_v14 }
 0x6eb   : > { %v3341_v35 = vpop.f32.mrf.mxu0  ;;  %v3370_v23 = vpop.f32.mrf.mxu1 }
 0x6ec   : > { %v3371_v43 = vadd.f32 %v3370_v23, %v3341_v35  ;;  %v10390_v35 = vld [vmem:[%s14781_s3 + $0x394] sm:$0xf0]  ;;  %v10389_v23 = vld [vmem:[%s14781_s3 + $0x394] sm:$0xf] }
 0x6ed   : > { %3935 = vmatpush.bf16.msra.mxu2 %v11166_v40 }
 0x6ee   : > { %v3380_v5 = vpack.c.bf16 %v3371_v43, %v3369_v7  ;;  %v8440_v7 = vld [vmem:[%s14781_s3 + $0x390] sm:$0xf]  ;;  %v8442_v43 = vld [vmem:[%s14781_s3 + $0x398] sm:$0xf0] }
 0x6f0   : > { %8352 = vmatmul.msk.bf16.gmra.mxu2 %vm723_vm0, %v3380_v5  ;;  %3531 = vmatmul.bf16.gmra.mxu3 %v8381_v16  ;;  %v8441_v5 = vor.u32 %v10390_v35, %v8440_v7 }
 0x6f3   : > { %v3344_v12 = vpop.f32.mrf.mxu0  ;;  %v3373_v14 = vpop.f32.mrf.mxu1 }
 0x6f4   : > { %v3374_v52 = vadd.f32 %v3373_v14, %v3344_v12 }
 0x6fb   : > { %v3346_v3 = vpop.f32.mrf.mxu0  ;;  %v3375_v58 = vpop.f32.mrf.mxu1 }
 0x6fc   : > { %v3376_v63 = vadd.f32 %v3375_v58, %v3346_v3  ;;  %v8450_v3 = vld [vmem:[%s14781_s3 + $0x3a8] sm:$0xf0] }
 0x6fe   : > { %v3381_v40 = vpack.c.bf16 %v3376_v63, %v3374_v52  ;;  %v10391_v52 = vld [vmem:[%s14781_s3 + $0x3a4] sm:$0xf]  ;;  %v8449_v63 = vor.u32 %v10392_v10, %v8448_v42 }
 0x700   : > { %8353 = vmatmul.msk.bf16.gmra.mxu2 %vm723_vm0, %v3381_v40  ;;  %3536 = vmatmul.bf16.gmra.mxu3 %v8389_v18 }
 0x710   : > { %3714 = vmatmul.bf16.vlgmr.msrb.gmra.mxu2 %v8433_v30  ;;  %3743 = vmatmul.bf16.vlgmr.msrb.gmra.mxu3 %v8437_v21  ;;  %v8457_v21 = vor.u32 %v10394_v53, %v8456_v39 }
 0x713   : > { %v3243_v46 = vpop.f32.mrf.mxu3 }
 0x714   : > { %v3263_v0 = vadd.f32 %v3243_v46, %v12314_v24  ;;  %v8445_v24 = vor.u32 %v10389_v23, %v8442_v43 }
 0x71b   : > { %v12427_v16 = vpop.f32.mrf.mxu3 }
 0x720   : > { %3719 = vmatmul.bf16.gmra.mxu2 %v8441_v5  ;;  %3748 = vmatmul.bf16.gmra.mxu3 %v8445_v24 }
 0x723   : > { %v3248_v12 = vpop.f32.mrf.mxu3  ;;  %v3551_v35 = vpop.f32.mrf.mxu0 }
 0x724   : > { %v3265_v14 = vadd.f32 %v3248_v12, %v12320_v37  ;;  %v8453_v37 = vor.u32 %v10391_v52, %v8450_v3 }
 0x72b   : > { %v12442_v58 = vpop.f32.mrf.mxu3  ;;  %v3553_v43 = vpop.f32.mrf.mxu0 }
 0x730   : > { %3724 = vmatmul.bf16.gmra.mxu2 %v8449_v63  ;;  %3753 = vmatmul.bf16.gmra.mxu3 %v8453_v37 }
 0x733   : > { %v3253_v18 = vpop.f32.mrf.mxu3  ;;  %v3556_v42 = vpop.f32.mrf.mxu0 }
 0x734   : > { %v3267_v40 = vadd.f32 %v3253_v18, %v12329_v13  ;;  %v8461_v13 = vor.u32 %v10393_v59, %v8458_v56 }
 0x73b   : > { %v12457_v30 = vpop.f32.mrf.mxu3  ;;  %v3558_v18 = vpop.f32.mrf.mxu0 }
 0x740   : > { %3729 = vmatmul.bf16.gmra.mxu2 %v8457_v21  ;;  %3758 = vmatmul.bf16.gmra.mxu3 %v8461_v13 }
 0x743   : > { %v3258_v46 = vpop.f32.mrf.mxu3  ;;  %v3561_v13 = vpop.f32.mrf.mxu0 }
 0x744   : > { %v3269_v7 = vadd.f32 %v3258_v46, %v12343_v22 }
 0x74b   : > { %v12460_v23 = vpop.f32.mrf.mxu3 }
 0x74c   : > { %14809 = vst [vmem:[#allocation9_spill] sm:$0xff] %v12460_v23 }
 0x753   : > { %v3436_v5 = vpop.f32.mrf.mxu2  ;;  %v3522_v24 = vpop.f32.mrf.mxu3 }
 0x754   : > { %v12462_v12 = vadd.f32 %v3436_v5, %v3263_v0  ;;  %v3552_v3 = vadd.f32 %v3551_v35, %v3522_v24  ;;  %v10398_v35 = vld [vmem:[%s14782_s4 + $0x1d8] sm:$0xff] }
 0x755   : > { %3817 = vmatpush.bf16.msrb.mxu0 %v10398_v35  ;;  %v8510_v35 = vld [vmem:[%s14781_s3 + $0x3d8] sm:$0xf0] }
 0x75b   : > { %v12464_v10 = vpop.f32.mrf.mxu2  ;;  %v3524_v52 = vpop.f32.mrf.mxu3 }
 0x75c   : > { %v3554_v63 = vadd.f32 %v3553_v43, %v3524_v52  ;;  %v10399_v43 = vld [vmem:[%s14781_s3 + $0x3c4] sm:$0xf] }
 0x75e   : > { %v3571_v37 = vpack.c.bf16 %v3554_v63, %v3552_v3  ;;  %v10397_v3 = vld [vmem:[%s14782_s4 + $0x1d0] sm:$0xff]  ;;  %v3563_v63 = vpop.f32.mrf.mxu0 }
 0x75f   : > { %3818 = vmatpush.bf16.msrb.mxu0 %v10397_v3 }
 0x760   : > { %8418 = vmatmul.msk.bf16.vlgmr.msrb.gmra.mxu1 %vm723_vm0, %v3571_v37  ;;  %v10396_v37 = vld [vmem:[%s14782_s4 + $0x1c8] sm:$0xff] }
 0x763   : > { %v3441_v39 = vpop.f32.mrf.mxu2  ;;  %v3527_v22 = vpop.f32.mrf.mxu3  ;;  %3819 = vmatpush.bf16.msrb.mxu0 %v10396_v37 }
 0x764   : > { %v12467_v53 = vadd.f32 %v3441_v39, %v3265_v14  ;;  %v3557_v21 = vadd.f32 %v3556_v42, %v3527_v22  ;;  %v8502_v14 = vld [vmem:[%s14781_s3 + $0x3c8] sm:$0xf0] }
 0x765   : > { %v8505_v5 = vor.u32 %v10399_v43, %v8502_v14 }
 0x767   : > { %3936 = vmatmul.bf16.vlgmr.msra.gmra.mxu2 %v8505_v5 }
 0x76b   : > { %v12469_v59 = vpop.f32.mrf.mxu2  ;;  %v3529_v56 = vpop.f32.mrf.mxu3 }
 0x76c   : > { %v3559_v0 = vadd.f32 %v3558_v18, %v3529_v56 }
 0x76e   : > { %v3572_v46 = vpack.c.bf16 %v3559_v0, %v3557_v21  ;;  %v3566_v0 = vpop.f32.mrf.mxu0 }
 0x770   : > { %8419 = vmatmul.msk.bf16.gmra.mxu1 %vm723_vm0, %v3572_v46  ;;  %v10401_v46 = vld [vmem:[%s14781_s3 + $0x3d4] sm:$0xf] }
 0x771   : > { %v8513_v43 = vor.u32 %v10401_v46, %v8510_v35  ;;  %v10400_v46 = vld [vmem:[%s14781_s3 + $0x3c4] sm:$0xf0] }
 0x773   : > { %v3446_v24 = vpop.f32.mrf.mxu2  ;;  %v3532_v42 = vpop.f32.mrf.mxu3 }
 0x774   : > { %v12481_v52 = vadd.f32 %v3446_v24, %v3267_v40  ;;  %v3562_v22 = vadd.f32 %v3561_v13, %v3532_v42  ;;  %v10395_v40 = vld [vmem:[%s14782_s4 + $0x1c0] sm:$0xff] }
 0x775   : > { %3820 = vmatpush.bf16.msrb.mxu0 %v10395_v40 }
 0x776   : > { %v3568_v24 = vpop.f32.mrf.mxu0 }
 0x777   : > { %3941 = vmatmul.bf16.gmra.mxu2 %v8513_v43 }
 0x77b   : > { %v12489_v18 = vpop.f32.mrf.mxu2  ;;  %v3534_v39 = vpop.f32.mrf.mxu3 }
 0x77c   : > { %v3564_v56 = vadd.f32 %v3563_v63, %v3534_v39 }
 0x77e   : > { %v3573_v21 = vpack.c.bf16 %v3564_v56, %v3562_v22  ;;  %v10403_v22 = vld [vmem:[%s14781_s3 + $0x3e4] sm:$0xf]  ;;  %v8518_v56 = vld [vmem:[%s14781_s3 + $0x3e8] sm:$0xf0] }
 0x77f   : > { %v8521_v40 = vor.u32 %v10403_v22, %v8518_v56 }
 0x780   : > { %8420 = vmatmul.msk.bf16.gmra.mxu1 %vm723_vm0, %v3573_v21 }
 0x783   : > { %v3451_v13 = vpop.f32.mrf.mxu2  ;;  %v3537_v14 = vpop.f32.mrf.mxu3 }
 0x784   : > { %v12501_v5 = vadd.f32 %v3451_v13, %v3269_v7  ;;  %v3567_v63 = vadd.f32 %v3566_v0, %v3537_v14  ;;  %v8500_v0 = vld [vmem:[%s14781_s3 + $0x3c0] sm:$0xf] }
 0x787   : > { %3946 = vmatmul.bf16.gmra.mxu2 %v8521_v40  ;;  %v8508_v40 = vld [vmem:[%s14781_s3 + $0x3d0] sm:$0xf] }
 0x78b   : > { %v12503_v42 = vpop.f32.mrf.mxu2  ;;  %v3539_v3 = vpop.f32.mrf.mxu3 }
 0x78c   : > { %14810 = vst [vmem:[#allocation10_spill] sm:$0xff] %v12503_v42  ;;  %v3569_v37 = vadd.f32 %v3568_v24, %v3539_v3  ;;  %v8501_v24 = vor.u32 %v10400_v46, %v8500_v0 }
 0x78e   : > { %v3574_v39 = vpack.c.bf16 %v3569_v37, %v3567_v63  ;;  %v10405_v63 = vld [vmem:[%s14781_s3 + $0x3f4] sm:$0xf]  ;;  %v8526_v37 = vld [vmem:[%s14781_s3 + $0x3f8] sm:$0xf0] }
 0x790   : > { %8421 = vmatmul.msk.bf16.gmra.mxu1 %vm723_vm0, %v3574_v39  ;;  %v8529_v39 = vor.u32 %v10405_v63, %v8526_v37  ;;  %v10404_v63 = vld [vmem:[%s14781_s3 + $0x3e4] sm:$0xf0] }
 0x793   : > { %v3715_v7 = vpop.f32.mrf.mxu2  ;;  %v3744_v21 = vpop.f32.mrf.mxu3 }
 0x794   : > { %v3745_v35 = vadd.f32 %v3744_v21, %v3715_v7  ;;  %v10402_v7 = vld [vmem:[%s14781_s3 + $0x3d4] sm:$0xf0] }
 0x797   : > { %3951 = vmatmul.bf16.gmra.mxu2 %v8529_v39 }
 0x79b   : > { %v3717_v43 = vpop.f32.mrf.mxu2  ;;  %v3746_v13 = vpop.f32.mrf.mxu3 }
 0x79c   : > { %v3747_v14 = vadd.f32 %v3746_v13, %v3717_v43  ;;  %v8509_v43 = vor.u32 %v10402_v7, %v8508_v40 }
 0x79e   : > { %v3764_v3 = vpack.c.bf16 %v3747_v14, %v3745_v35 }
 0x7a0   : > { %8486 = vmatmul.msk.bf16.vlgmr.msrb.gmra.mxu0 %vm723_vm0, %v3764_v3  ;;  %3907 = vmatmul.bf16.vlgmr.msra.gmra.mxu1 %v8501_v24  ;;  %v8516_v3 = vld [vmem:[%s14781_s3 + $0x3e0] sm:$0xf] }
 0x7a3   : > { %v3720_v22 = vpop.f32.mrf.mxu2  ;;  %v3749_v56 = vpop.f32.mrf.mxu3 }
 0x7a4   : > { %v3750_v21 = vadd.f32 %v3749_v56, %v3720_v22 }
 0x7ab   : > { %v3722_v0 = vpop.f32.mrf.mxu2  ;;  %v3751_v46 = vpop.f32.mrf.mxu3 }
 0x7ac   : > { %v3752_v35 = vadd.f32 %v3751_v46, %v3722_v0  ;;  %v8517_v0 = vor.u32 %v10404_v63, %v8516_v3  ;;  %v8524_v46 = vld [vmem:[%s14781_s3 + $0x3f0] sm:$0xf] }
 0x7ae   : > { %v3765_v13 = vpack.c.bf16 %v3752_v35, %v3750_v21  ;;  %v10406_v35 = vld [vmem:[%s14781_s3 + $0x3f4] sm:$0xf0] }
 0x7b0   : > { %8487 = vmatmul.msk.bf16.gmra.mxu0 %vm723_vm0, %v3765_v13  ;;  %3912 = vmatmul.bf16.gmra.mxu1 %v8509_v43 }
 0x7b3   : > { %v3725_v14 = vpop.f32.mrf.mxu2  ;;  %v3754_v24 = vpop.f32.mrf.mxu3 }
 0x7b4   : > { %v3755_v37 = vadd.f32 %v3754_v24, %v3725_v14 }
 0x7bb   : > { %v3727_v39 = vpop.f32.mrf.mxu2  ;;  %v3756_v22 = vpop.f32.mrf.mxu3 }
 0x7bc   : > { %v3757_v56 = vadd.f32 %v3756_v22, %v3727_v39  ;;  %v8525_v39 = vor.u32 %v10406_v35, %v8524_v46 }
 0x7be   : > { %v3766_v40 = vpack.c.bf16 %v3757_v56, %v3755_v37 }
 0x7c0   : > { %8488 = vmatmul.msk.bf16.gmra.mxu0 %vm723_vm0, %v3766_v40  ;;  %3917 = vmatmul.bf16.gmra.mxu1 %v8517_v0 }
 0x7c3   : > { %v3730_v7 = vpop.f32.mrf.mxu2  ;;  %v3759_v21 = vpop.f32.mrf.mxu3 }
 0x7c4   : > { %v3760_v43 = vadd.f32 %v3759_v21, %v3730_v7  ;;  %v10410_v7 = vld [vmem:[%s14782_s4 + $0x1f8] sm:$0xff] }
 0x7c5   : > { %4010 = vmatpush.bf16.msra.mxu3 %v10410_v7 }
 0x7cb   : > { %v3732_v13 = vpop.f32.mrf.mxu2  ;;  %v3761_v14 = vpop.f32.mrf.mxu3 }
 0x7cc   : > { %v3762_v24 = vadd.f32 %v3761_v14, %v3732_v13 }
 0x7ce   : > { %v3767_v3 = vpack.c.bf16 %v3762_v24, %v3760_v43  ;;  %v10407_v43 = vld [vmem:[%s14782_s4 + $0x1e0] sm:$0xff] }
 0x7d0   : > { %8489 = vmatmul.msk.bf16.gmra.mxu0 %vm723_vm0, %v3767_v3  ;;  %3922 = vmatmul.bf16.gmra.mxu1 %v8525_v39 }
 0x7dd   : > { %v3629_v63 = vpop.f32.mrf.mxu1 }
 0x7de   : > { %v3649_v37 = vadd.f32 %v3629_v63, %v12462_v12  ;;  %v10409_v12 = vld [vmem:[%s14782_s4 + $0x1f0] sm:$0xff] }
 0x7df   : > { %4011 = vmatpush.bf16.msra.mxu3 %v10409_v12 }
 0x7e5   : > { %v12547_v22 = vpop.f32.mrf.mxu1 }
 0x7ea   : > { %v3937_v14 = vpop.f32.mrf.mxu2 }
 0x7ed   : > { %v3634_v56 = vpop.f32.mrf.mxu1 }
 0x7ee   : > { %v12550_v0 = vadd.f32 %v3634_v56, %v12467_v53  ;;  %v10408_v53 = vld [vmem:[%s14782_s4 + $0x1e8] sm:$0xff] }
 0x7ef   : > { %4012 = vmatpush.bf16.msra.mxu3 %v10408_v53 }
 0x7f2   : > { %v3939_v39 = vpop.f32.mrf.mxu2 }
 0x7f3   : > { %4013 = vmatpush.bf16.msra.mxu3 %v10407_v43 }
 0x7f5   : > { %v12552_v40 = vpop.f32.mrf.mxu1 }
 0x7fa   : > { %v3942_v7 = vpop.f32.mrf.mxu2 }
 0x7fd   : > { %v3639_v21 = vpop.f32.mrf.mxu1 }
 0x7fe   : > { %v12558_v46 = vadd.f32 %v3639_v21, %v12481_v52 }
 0x802   : > { %v3944_v43 = vpop.f32.mrf.mxu2 }
 0x805   : > { %v12566_v35 = vpop.f32.mrf.mxu1 }
 0x80d   : > { %v3644_v13 = vpop.f32.mrf.mxu1 }
 0x80e   : > { %v12572_v52 = vadd.f32 %v3644_v13, %v12501_v5  ;;  %v3947_v13 = vpop.f32.mrf.mxu2 }
 0x810   : > { %14811 = vst [vmem:[#allocation11_spill] sm:$0xff] %v12572_v52 }
 0x815   : > { %v12574_v24 = vpop.f32.mrf.mxu1 }
 0x816   : > { %14812 = vst [vmem:[#allocation12_spill] sm:$0xff] %v12574_v24  ;;  %v3949_v57 = vpop.f32.mrf.mxu2 }
 0x81d   : > { %v3822_v3 = vpop.f32.mrf.mxu0  ;;  %v3908_v63 = vpop.f32.mrf.mxu1 }
 0x81e   : > { %v3842_v56 = vadd.f32 %v3822_v3, %v3649_v37  ;;  %v3938_v12 = vadd.f32 %v3937_v14, %v3908_v63  ;;  %v3952_v14 = vpop.f32.mrf.mxu2 }
 0x825   : > { %v3910_v21 = vpop.f32.mrf.mxu1 }
 0x826   : > { %v3940_v53 = vadd.f32 %v3939_v39, %v3910_v21 }
 0x828   : > { %v3957_v42 = vpack.c.bf16 %v3940_v53, %v3938_v12  ;;  %v1722_v53 = vadd.f32 %v11771_v36, %v11716_v38  ;;  %v8644_v38 = vld [vmem:[%s14785_s7 + $0xf0] sm:$0xf]  ;;  %v10444_v36 = vld [vmem:[%s14785_s7 + $0xf4] sm:$0xf0] }
 0x82a   : > { %8554 = vmatmul.msk.bf16.vlgmr.msra.gmra.mxu3 %vm723_vm0, %v3957_v42  ;;  %v3954_v42 = vpop.f32.mrf.mxu2 }
 0x82d   : > { %v3913_v23 = vpop.f32.mrf.mxu1 }
 0x82e   : > { %v3943_v54 = vadd.f32 %v3942_v7, %v3913_v23 }
 0x835   : > { %v3915_v60 = vpop.f32.mrf.mxu1 }
 0x836   : > { %v3945_v5 = vadd.f32 %v3944_v43, %v3915_v60 }
 0x838   : > { %v3958_v52 = vpack.c.bf16 %v3945_v5, %v3943_v54  ;;  %v1720_v54 = vadd.f32 %v11755_v17, %v11689_v19 }
 0x83a   : > { %8555 = vmatmul.msk.bf16.gmra.mxu3 %vm723_vm0, %v3958_v52  ;;  %v1913_v60 = vadd.f32 %v11743_v61, %v1720_v54 }
 0x83c   : > { %v2106_v52 = vadd.f32 %v11885_v6, %v1913_v60  ;;  %v1915_v6 = vadd.f32 %v11760_v62, %v1722_v53 }
 0x83d   : > { %v3918_v24 = vpop.f32.mrf.mxu1 }
 0x83e   : > { %v3948_v37 = vadd.f32 %v3947_v13, %v3918_v24  ;;  %v10442_v13 = vld [vmem:[%s14785_s7 + $0xe4] sm:$0xf0] }
 0x845   : > { %v3920_v47 = vpop.f32.mrf.mxu1 }
 0x846   : > { %v3950_v3 = vadd.f32 %v3949_v57, %v3920_v47  ;;  %v2299_v47 = vadd.f32 %v11960_v31, %v2106_v52  ;;  %v3824_v57 = vpop.f32.mrf.mxu0 }
 0x848   : > { %v3959_v49 = vpack.c.bf16 %v3950_v3, %v3948_v37 }
 0x84a   : > { %8556 = vmatmul.msk.bf16.gmra.mxu3 %vm723_vm0, %v3959_v49  ;;  %v2492_v49 = vadd.f32 %v12086_v4, %v2299_v47  ;;  %v12597_v4 = vld [vmem:[%s14783_s5] ss:$0 sm:$0xff] }
 0x84b   : > { %v8620_v47 = vld [vmem:[%s14785_s7 + $0xc0] sm:$0xf] }
 0x84c   : > { %v2685_v24 = vadd.f32 %v12149_v9, %v2492_v49  ;;  %v8645_v9 = vor.u32 %v10444_v36, %v8644_v38 }
 0x84d   : > { %v3923_v39 = vpop.f32.mrf.mxu1 }
 0x84e   : > { %v3953_v21 = vadd.f32 %v3952_v14, %v3923_v39  ;;  %v2878_v7 = vadd.f32 %v12261_v15, %v2685_v24  ;;  %v3827_v17 = vpop.f32.mrf.mxu0  ;;  %v2108_v15 = vadd.f32 %v11907_v27, %v1915_v6  ;;  %4247 = vmatpush.bf16.msrb.mxu1 %v8645_v9  ;;  %v8604_v6 = vld [vmem:[%s14785_s7 + $0xa0] sm:$0xf] }
 0x850   : > { %v3071_v43 = vadd.f32 %v12316_v33, %v2878_v7  ;;  %v2301_v33 = vadd.f32 %v11972_v8, %v2108_v15 }
 0x852   : > { %v3264_v19 = vadd.f32 %v12427_v16, %v3071_v43  ;;  %v2494_v27 = vadd.f32 %v12114_v11, %v2301_v33  ;;  %v8612_v43 = vld [vmem:[%s14785_s7 + $0xb0] sm:$0xf]  ;;  %v10432_v33 = vld [vmem:[%s14785_s7 + $0x94] sm:$0xf0] }
 0x854   : > { %v3457_v31 = vadd.f32 %v12464_v10, %v3264_v19 }
 0x855   : > { %v3925_v63 = vpop.f32.mrf.mxu1 }
 0x856   : > { %v3955_v12 = vadd.f32 %v3954_v42, %v3925_v63  ;;  %v3650_v62 = vadd.f32 %v12547_v22, %v3457_v31  ;;  %v2687_v22 = vadd.f32 %v12161_v1, %v2494_v27  ;;  %v8628_v42 = vld [vmem:[%s14785_s7 + $0xd0] sm:$0xf]  ;;  %v10440_v63 = vld [vmem:[%s14785_s7 + $0xd4] sm:$0xf0]  ;;  %v1724_v1 = vadd.f32 %v11784_v44, %v11730_v34  ;;  %v10434_v31 = vld [vmem:[%s14785_s7 + $0xa4] sm:$0xf0] }
 0x857   : > { %v3844_v34 = vadd.f32 %v3827_v17, %v12550_v0  ;;  %v8605_v36 = vor.u32 %v10434_v31, %v8604_v6  ;;  %v10430_v27 = vld [vmem:[%s14785_s7 + $0x84] sm:$0xf0] }
 0x858   : > { %v3960_v23 = vpack.c.bf16 %v3955_v12, %v3953_v21  ;;  %v3843_v16 = vadd.f32 %v3824_v57, %v3650_v62  ;;  %v3829_v21 = vpop.f32.mrf.mxu0  ;;  %v8629_v12 = vor.u32 %v10440_v63, %v8628_v42  ;;  %v2880_v11 = vadd.f32 %v12280_v28, %v2687_v22  ;;  %v10438_v57 = vld [vmem:[%s14785_s7 + $0xc4] sm:$0xf0]  ;;  %v8596_v62 = vld [vmem:[%s14785_s7 + $0x90] sm:$0xf] }
 0x859   : > { %v8621_v24 = vor.u32 %v10438_v57, %v8620_v47  ;;  %v1917_v44 = vadd.f32 %v11776_v55, %v1724_v1  ;;  %v14815_v47 = vld [vmem:[#allocation6_spill] sm:$0xff] }
 0x85a   : > { %8557 = vmatmul.msk.bf16.gmra.mxu3 %vm723_vm0, %v3960_v23  ;;  %v3073_v54 = vadd.f32 %v12324_v26, %v2880_v11 }
 0x85c   : > { %v3266_v7 = vadd.f32 %v12442_v58, %v3073_v54 }
 0x85e   : > { %v3459_v26 = vadd.f32 %v12469_v59, %v3266_v7 }
 0x860   : > { %v3652_v58 = vadd.f32 %v12552_v40, %v3459_v26  ;;  %v3832_v0 = vpop.f32.mrf.mxu0 }
 0x862   : > { %v3845_v17 = vadd.f32 %v3829_v21, %v3652_v58  ;;  %v14820_v58 = vld [vmem:[#allocation10_spill] sm:$0xff] }
 0x8ad   : > { %v4015_v5 = vpop.f32.mrf.mxu3 }
 0x8ae   : > { %v4035_v61 = vadd.f32 %v4015_v5, %v3842_v56  ;;  %v8636_v56 = vld [vmem:[%s14785_s7 + $0xe0] sm:$0xf]  ;;  %v10436_v5 = vld [vmem:[%s14785_s7 + $0xb4] sm:$0xf0] }
 0x8af   : > { %v8637_v3 = vor.u32 %v10442_v13, %v8636_v56  ;;  %v8613_v19 = vor.u32 %v10436_v5, %v8612_v43  ;;  %v14818_v43 = vld [vmem:[#allocation9_spill] sm:$0xff] }
 0x8b0   : > { %v4047_v10 = vadd.f32 %v12597_v4, %v4035_v61  ;;  %v2110_v61 = vadd.f32 %v11933_v51, %v1917_v44 }
 0x8b1   : > { %4248 = vmatpush.bf16.msrb.mxu1 %v8637_v3  ;;  %v8588_v3 = vld [vmem:[%s14785_s7 + $0x80] sm:$0xf] }
 0x8b2   : > { %v4063_v8 = vmul.f32 0.1, %v4047_v10  ;;  %vm4055_vm3 = vcmp.ge.f32.partialorder %v4047_v10, 0.0  ;;  %v2303_v55 = vadd.f32 %v11983_v41, %v2110_v61 }
 0x8b4   : > { %v4071_v60 = vsel %vm4055_vm3, %v4047_v10, %v4063_v8  ;;  %v2496_v51 = vadd.f32 %v12133_v48, %v2303_v55  ;;  %v8589_v8 = vor.u32 %v10430_v27, %v8588_v3  ;;  %v8630_v3 = vld [vmem:[%s14785_s7 + $0xd8] sm:$0xf0] }
 0x8b5   : > { %v4017_v37 = vpop.f32.mrf.mxu3  ;;  %4249 = vmatpush.bf16.msrb.mxu1 %v8629_v12  ;;  %v14813_v12 = vld [vmem:[#allocation4_spill] sm:$0xff] }
 0x8b6   : > { %v4036_v14 = vadd.f32 %v4017_v37, %v3843_v16  ;;  %v2689_v9 = vadd.f32 %v12171_v45, %v2496_v51  ;;  %v8597_v16 = vor.u32 %v10432_v33, %v8596_v62  ;;  %v1726_v45 = vadd.f32 %v11788_v20, %v11740_v2 }
 0x8b7   : > { %v3846_v2 = vadd.f32 %v3832_v0, %v12558_v46 }
 0x8b8   : > { %v4048_v39 = vadd.f32 %v12597_v4, %v4036_v14  ;;  %v2882_v10 = vadd.f32 %v12297_v32, %v2689_v9  ;;  %v3834_v14 = vpop.f32.mrf.mxu0  ;;  %v1919_v20 = vadd.f32 %v11799_v25, %v1726_v45  ;;  %v8638_v45 = vld [vmem:[%s14785_s7 + $0xe8] sm:$0xf0] }
 0x8b9   : > { %4250 = vmatpush.bf16.msrb.mxu1 %v8621_v24  ;;  %v14817_v24 = vld [vmem:[#allocation8_spill] sm:$0xff] }
 0x8ba   : > { %vm4056_vm4 = vcmp.ge.f32.partialorder %v4048_v39, 0.0  ;;  %v4064_v23 = vmul.f32 0.1, %v4048_v39  ;;  %v3075_v56 = vadd.f32 %v12333_v29, %v2882_v10  ;;  %v2112_v63 = vadd.f32 %v11948_v50, %v1919_v20 }
 0x8bc   : > { %v4072_v52 = vsel %vm4056_vm4, %v4048_v39, %v4064_v23  ;;  %v3268_v39 = vadd.f32 %v12457_v30, %v3075_v56  ;;  %v2305_v11 = vadd.f32 %v14813_v12, %v2112_v63  ;;  %v10411_v56 = vld [vmem:[%s14784_s6] sm:$0xff]  ;;  %v10435_v63 = vld [vmem:[%s14785_s7 + $0xb4] sm:$0xf] }
 0x8bd   : > { %v12634_v49 = vpack.c.bf16 %v4072_v52, %v4071_v60  ;;  %v4020_v28 = vpop.f32.mrf.mxu3  ;;  %4251 = vmatpush.bf16.msrb.mxu1 %v8613_v19  ;;  %v14814_v60 = vld [vmem:[#allocation5_spill] sm:$0xff]  ;;  %v14819_v19 = vld [vmem:[#allocation11_spill] sm:$0xff] }
 0x8be   : > { %v4037_v53 = vadd.f32 %v4020_v28, %v3844_v34  ;;  %v3461_v29 = vadd.f32 %v12489_v18, %v3268_v39  ;;  %v2498_v30 = vadd.f32 %v14814_v60, %v2305_v11  ;;  %v14816_v28 = vld [vmem:[#allocation7_spill] sm:$0xff]  ;;  %v10428_v11 = vld [vmem:[%s14784_s6 + $0x8] sm:$0xff]  ;;  %v10433_v60 = vld [vmem:[%s14785_s7 + $0xa4] sm:$0xf] }
 0x8bf   : > { %v8710_v39 = vld [vmem:[%s14785_s7 + $0x78] sm:$0xf0] }
 0x8c0   : > { %v4049_v59 = vadd.f32 %v12597_v4, %v4037_v53  ;;  %v3654_v21 = vadd.f32 %v12566_v35, %v3461_v29  ;;  %v3837_v46 = vpop.f32.mrf.mxu0  ;;  %v2691_v57 = vadd.f32 %v14815_v47, %v2498_v30  ;;  %v10424_v29 = vld [vmem:[%s14785_s7 + $0x64] sm:$0xf]  ;;  %v8606_v30 = vld [vmem:[%s14785_s7 + $0xa8] sm:$0xf0] }
 0x8c1   : > { %4252 = vmatpush.bf16.msrb.mxu1 %v8605_v36  ;;  %v3848_v61 = vadd.f32 %v3837_v46, %v14819_v19  ;;  %v10420_v47 = vld [vmem:[%s14785_s7 + $0x44] sm:$0xf] }
 0x8c2   : > { %v4065_v41 = vmul.f32 0.1, %v4049_v59  ;;  %vm4057_vm5 = vcmp.ge.f32.partialorder %v4049_v59, 0.0  ;;  %v3847_v23 = vadd.f32 %v3834_v14, %v3654_v21  ;;  %v2884_v50 = vadd.f32 %v14816_v28, %v2691_v57  ;;  %v10437_v14 = vld [vmem:[%s14785_s7 + $0xc4] sm:$0xf] }
 0x8c3   : > { %v8614_v21 = vld [vmem:[%s14785_s7 + $0xb8] sm:$0xf0]  ;;  %v8686_v57 = vld [vmem:[%s14785_s7 + $0x48] sm:$0xf0] }
 0x8c4   : > { %v4073_v13 = vsel %vm4057_vm5, %v4049_v59, %v4065_v41  ;;  %v3077_v7 = vadd.f32 %v14817_v24, %v2884_v50  ;;  %v14821_v59 = vld [vmem:[#allocation12_spill] sm:$0xff]  ;;  %v8617_v12 = vor.u32 %v10435_v63, %v8614_v21  ;;  %v8689_v50 = vor.u32 %v10420_v47, %v8686_v57  ;;  %v8678_v24 = vld [vmem:[%s14785_s7 + $0x38] sm:$0xf0]  ;;  %v10421_v63 = vld [vmem:[%s14785_s7 + $0x44] sm:$0xf0] }
 0x8c5   : > { %v4022_v38 = vpop.f32.mrf.mxu3  ;;  %4253 = vmatpush.bf16.msrb.mxu1 %v8597_v16  ;;  %v10443_v16 = vld [vmem:[%s14785_s7 + $0xf4] sm:$0xf]  ;;  %v10468_v57 = vld [vmem:[%s14785_s7 + $0x1a4] sm:$0xf0] }
 0x8c6   : > { %v4038_v40 = vadd.f32 %v4022_v38, %v3845_v17  ;;  %v3270_v5 = vadd.f32 %v14818_v43, %v3077_v7  ;;  %v10429_v7 = vld [vmem:[%s14785_s7 + $0x84] sm:$0xf]  ;;  %v10461_v43 = vld [vmem:[%s14785_s7 + $0x174] sm:$0xf0] }
 0x8c8   : > { %v4050_v15 = vadd.f32 %v12597_v4, %v4038_v40  ;;  %v3463_v0 = vadd.f32 %v14820_v58, %v3270_v5  ;;  %v3839_v17 = vpop.f32.mrf.mxu0  ;;  %v8670_v58 = vld [vmem:[%s14785_s7 + $0x28] sm:$0xf0] }
 0x8c9   : > { %4254 = vmatpush.bf16.msrb.mxu1 %v8589_v8  ;;  %v10426_v8 = vld [vmem:[%s14785_s7 + $0x74] sm:$0xf] }
 0x8ca   : > { %vm4058_vm6 = vcmp.ge.f32.partialorder %v4050_v15, 0.0  ;;  %v4066_v48 = vmul.f32 0.1, %v4050_v15  ;;  %v3656_v6 = vadd.f32 %v14821_v59, %v3463_v0  ;;  %v8713_v20 = vor.u32 %v10426_v8, %v8710_v39  ;;  %v10425_v8 = vld [vmem:[%s14785_s7 + $0x64] sm:$0xf0] }
 0x8cc   : > { %v4074_v37 = vsel %vm4058_vm6, %v4050_v15, %v4066_v48  ;;  %v3849_v31 = vadd.f32 %v3839_v17, %v3656_v6  ;;  %v10441_v48 = vld [vmem:[%s14785_s7 + $0xe4] sm:$0xf]  ;;  %v8662_v17 = vld [vmem:[%s14785_s7 + $0x18] sm:$0xf0] }
 0x8cd   : > { %v12675_v32 = vpack.c.bf16 %v4074_v37, %v4073_v13  ;;  %v4025_v22 = vpop.f32.mrf.mxu3  ;;  %v8641_v13 = vor.u32 %v10441_v48, %v8638_v45  ;;  %v10439_v37 = vld [vmem:[%s14785_s7 + $0xd4] sm:$0xf]  ;;  %v10412_v6 = vld [vmem:[%s14785_s7 + $0x4] sm:$0xf]  ;;  %v10472_v48 = vld [vmem:[%s14785_s7 + $0x1c4] sm:$0xf0] }
 0x8ce   : > { %v4039_v42 = vadd.f32 %v4025_v22, %v3846_v2  ;;  %v8633_v27 = vor.u32 %v10439_v37, %v8630_v3  ;;  %v8622_v22 = vld [vmem:[%s14785_s7 + $0xc8] sm:$0xf0]  ;;  %v8708_v3 = vld [vmem:[%s14785_s7 + $0x70] sm:$0xf] }
 0x8cf   : > { %v8625_v2 = vor.u32 %v10437_v14, %v8622_v22  ;;  %v8700_v22 = vld [vmem:[%s14785_s7 + $0x60] sm:$0xf] }
 0x8d0   : > { %v4051_v1 = vadd.f32 %v12597_v4, %v4039_v42  ;;  %v8702_v42 = vld [vmem:[%s14785_s7 + $0x68] sm:$0xf0]  ;;  %v8701_v39 = vor.u32 %v10425_v8, %v8700_v22  ;;  %v10477_v22 = vld [vmem:[%s14785_s7 + $0x1f4] sm:$0xf]  ;;  %v8884_v8 = vld [vmem:[%s14785_s7 + $0x1f8] sm:$0xf0] }
 0x8d2   : > { %v4067_v25 = vmul.f32 0.1, %v4051_v1  ;;  %vm4059_vm7 = vcmp.ge.f32.partialorder %v4051_v1, 0.0 }
 0x8d4   : > { %v4075_v34 = vsel %vm4059_vm7, %v4051_v1, %v4067_v25  ;;  %v10422_v1 = vld [vmem:[%s14785_s7 + $0x54] sm:$0xf] }
 0x8d5   : > { %v4027_v54 = vpop.f32.mrf.mxu3  ;;  %v10431_v25 = vld [vmem:[%s14785_s7 + $0x94] sm:$0xf] }
 0x8d6   : > { %v4040_v52 = vadd.f32 %v4027_v54, %v3847_v23  ;;  %v8705_v23 = vor.u32 %v10424_v29, %v8702_v42  ;;  %v8694_v54 = vld [vmem:[%s14785_s7 + $0x58] sm:$0xf0]  ;;  %v8684_v42 = vld [vmem:[%s14785_s7 + $0x40] sm:$0xf] }
 0x8d7   : > { %v8697_v46 = vor.u32 %v10422_v1, %v8694_v54  ;;  %v8685_v21 = vor.u32 %v10421_v63, %v8684_v42  ;;  %v8668_v1 = vld [vmem:[%s14785_s7 + $0x20] sm:$0xf]  ;;  %v10417_v54 = vld [vmem:[%s14785_s7 + $0x24] sm:$0xf0]  ;;  %v10473_v63 = vld [vmem:[%s14785_s7 + $0x1d4] sm:$0xf] }
 0x8d8   : > { %v4052_v18 = vadd.f32 %v12597_v4, %v4040_v52  ;;  %v8609_v52 = vor.u32 %v10433_v60, %v8606_v30  ;;  %v8669_v60 = vor.u32 %v10417_v54, %v8668_v1  ;;  %v8787_v30 = vld [vmem:[%s14785_s7 + $0x160] sm:$0xf]  ;;  %v10462_v54 = vld [vmem:[%s14784_s6 + $0x18] sm:$0xff] }
 0x8da   : > { %vm4060_vm8 = vcmp.ge.f32.partialorder %v4052_v18, 0.0  ;;  %v4068_v35 = vmul.f32 0.1, %v4052_v18 }
 0x8dc   : > { %v4076_v44 = vsel %vm4060_vm8, %v4052_v18, %v4068_v35  ;;  %v8598_v18 = vld [vmem:[%s14785_s7 + $0x98] sm:$0xf0]  ;;  %v10418_v35 = vld [vmem:[%s14785_s7 + $0x34] sm:$0xf] }
 0x8dd   : > { %v12690_v26 = vpack.c.bf16 %v4076_v44, %v4075_v34  ;;  %v4030_v53 = vpop.f32.mrf.mxu3  ;;  %v8601_v28 = vor.u32 %v10431_v25, %v8598_v18  ;;  %v8590_v34 = vld [vmem:[%s14785_s7 + $0x88] sm:$0xf0]  ;;  %v8795_v44 = vld [vmem:[%s14785_s7 + $0x170] sm:$0xf]  ;;  %v8681_v19 = vor.u32 %v10418_v35, %v8678_v24  ;;  %v10457_v18 = vld [vmem:[%s14785_s7 + $0x154] sm:$0xf0] }
 0x8de   : > { %v4041_v55 = vadd.f32 %v4030_v53, %v3848_v61  ;;  %v8593_v53 = vor.u32 %v10429_v7, %v8590_v34  ;;  %v8796_v5 = vor.u32 %v10461_v43, %v8795_v44  ;;  %v10416_v61 = vld [vmem:[%s14785_s7 + $0x24] sm:$0xf]  ;;  %v8779_v25 = vld [vmem:[%s14785_s7 + $0x150] sm:$0xf]  ;;  %v10466_v35 = vld [vmem:[%s14785_s7 + $0x194] sm:$0xf0] }
 0x8df   : > { %v8673_v0 = vor.u32 %v10416_v61, %v8670_v58  ;;  %v8660_v24 = vld [vmem:[%s14785_s7 + $0x10] sm:$0xf]  ;;  %v8780_v7 = vor.u32 %v10457_v18, %v8779_v25  ;;  %v10415_v34 = vld [vmem:[%s14785_s7 + $0x14] sm:$0xf0]  ;;  %v8652_v43 = vld [vmem:[%s14785_s7] sm:$0xf] }
 0x8e0   : > { %v4053_v38 = vadd.f32 %v12597_v4, %v4041_v55  ;;  %v10414_v55 = vld [vmem:[%s14785_s7 + $0x14] sm:$0xf]  ;;  %v8771_v61 = vld [vmem:[%s14785_s7 + $0x140] sm:$0xf]  ;;  %v10455_v58 = vld [vmem:[%s14785_s7 + $0x144] sm:$0xf0] }
 0x8e1   : > { %v8665_v59 = vor.u32 %v10414_v55, %v8662_v17  ;;  %v8772_v55 = vor.u32 %v10455_v58, %v8771_v61  ;;  %v10464_v17 = vld [vmem:[%s14785_s7 + $0x184] sm:$0xf0]  ;;  %v10456_v25 = vld [vmem:[%s14785_s7 + $0x154] sm:$0xf]  ;;  %v8781_v18 = vld [vmem:[%s14785_s7 + $0x158] sm:$0xf0] }
 0x8e2   : > { %v4069_v40 = vmul.f32 0.1, %v4053_v38  ;;  %vm4061_vm9 = vcmp.ge.f32.partialorder %v4053_v38, 0.0  ;;  %v8765_v61 = vld [vmem:[%s14785_s7 + $0x138] sm:$0xf0] }
 0x8e3   : > { %v10463_v58 = vld [vmem:[%s14785_s7 + $0x184] sm:$0xf] }
 0x8e4   : > { %v4077_v15 = vsel %vm4061_vm9, %v4053_v38, %v4069_v40  ;;  %v8882_v38 = vld [vmem:[%s14785_s7 + $0x1f0] sm:$0xf] }
 0x8e5   : > { %v4032_v36 = vpop.f32.mrf.mxu3 }
 0x8e6   : > { %v4042_v51 = vadd.f32 %v4032_v36, %v3849_v31  ;;  %v8654_v31 = vld [vmem:[%s14785_s7 + $0x8] sm:$0xf0]  ;;  %v10478_v36 = vld [vmem:[%s14785_s7 + $0x1f4] sm:$0xf0] }
 0x8e7   : > { %v8883_v40 = vor.u32 %v10478_v36, %v8882_v38  ;;  %v8755_v36 = vld [vmem:[%s14785_s7 + $0x120] sm:$0xf] }
 0x8e8   : > { %v4054_v9 = vadd.f32 %v12597_v4, %v4042_v51  ;;  %v8646_v4 = vld [vmem:[%s14785_s7 + $0xf8] sm:$0xf0]  ;;  %v8657_v51 = vor.u32 %v10412_v6, %v8654_v31  ;;  %v8763_v6 = vld [vmem:[%s14785_s7 + $0x130] sm:$0xf]  ;;  %v10453_v31 = vld [vmem:[%s14785_s7 + $0x134] sm:$0xf0] }
 0x8e9   : > { %v8649_v10 = vor.u32 %v10443_v16, %v8646_v4  ;;  %v10474_v16 = vld [vmem:[%s14785_s7 + $0x1d4] sm:$0xf0]  ;;  %v8764_v38 = vor.u32 %v10453_v31, %v8763_v6 }
 0x8ea   : > { %vm4062_vm10 = vcmp.ge.f32.partialorder %v4054_v9, 0.0  ;;  %v4070_v41 = vmul.f32 0.1, %v4054_v9 }
 0x8eb   : > { %4261 = vmatpush.bf16.msrb.mxu2 %v8649_v10  ;;  %v8858_v10 = vld [vmem:[%s14785_s7 + $0x1c0] sm:$0xf] }
 0x8ec   : > { %v4078_v62 = vsel %vm4062_vm10, %v4054_v9, %v4070_v41  ;;  %v8874_v9 = vld [vmem:[%s14785_s7 + $0x1e0] sm:$0xf]  ;;  %v10476_v41 = vld [vmem:[%s14785_s7 + $0x1e4] sm:$0xf0]  ;;  %v8859_v45 = vor.u32 %v10472_v48, %v8858_v10 }
 0x8ed   : > { %v12698_v33 = vpack.c.bf16 %v4078_v62, %v4077_v15  ;;  %v8875_v15 = vor.u32 %v10476_v41, %v8874_v9  ;;  %v8866_v62 = vld [vmem:[%s14785_s7 + $0x1d0] sm:$0xf]  ;;  %v10449_v41 = vld [vmem:[%s14785_s7 + $0x114] sm:$0xf0] }
 0x8ee   : > { %v8867_v4 = vor.u32 %v10474_v16, %v8866_v62  ;;  %v8747_v9 = vld [vmem:[%s14785_s7 + $0x110] sm:$0xf]  ;;  %v8739_v62 = vld [vmem:[%s14785_s7 + $0x100] sm:$0xf]  ;;  %v10447_v16 = vld [vmem:[%s14785_s7 + $0x104] sm:$0xf0] }
 0x8ef   : > { %4097 = vmatpush.bf16.msra.mxu0 %v12698_v33  ;;  %4398 = vmatpush.bf16.msra.mxu1 %v12698_v33 }
 0x8f0   : > { %4262 = vmatpush.bf16.msrb.mxu2 %v8641_v13  ;;  %v10470_v13 = vld [vmem:[%s14785_s7 + $0x1b4] sm:$0xf0] }
 0x8f3   : > { %4098 = vmatpush.bf16.msra.mxu0 %v12690_v26  ;;  %4399 = vmatpush.bf16.msra.mxu1 %v12690_v26 }
 0x8f4   : > { %4263 = vmatpush.bf16.msrb.mxu2 %v8633_v27  ;;  %v10427_v27 = vld [vmem:[%s14785_s7 + $0x74] sm:$0xf0] }
 0x8f5   : > { %v8709_v14 = vor.u32 %v10427_v27, %v8708_v3  ;;  %v10460_v3 = vld [vmem:[%s14785_s7 + $0x174] sm:$0xf]  ;;  %v8797_v27 = vld [vmem:[%s14785_s7 + $0x178] sm:$0xf0] }
 0x8f7   : > { %4099 = vmatpush.bf16.msra.mxu0 %v12675_v32  ;;  %4400 = vmatpush.bf16.msra.mxu1 %v12675_v32 }
 0x8f8   : > { %4264 = vmatpush.bf16.msrb.mxu2 %v8625_v2  ;;  %4355 = vmatpush.bf16.msrb.mxu3 %v8709_v14  ;;  %v8692_v2 = vld [vmem:[%s14785_s7 + $0x50] sm:$0xf]  ;;  %v8800_v14 = vor.u32 %v10460_v3, %v8797_v27  ;;  %v10506_v3 = vld [vmem:[%s14785_s7 + $0x2c4] sm:$0xf0] }
 0x8fb   : > { %4100 = vmatpush.bf16.msra.mxu0 %v12634_v49  ;;  %4401 = vmatpush.bf16.msra.mxu1 %v12634_v49 }
 0x8fc   : > { %4265 = vmatpush.bf16.msrb.mxu2 %v8617_v12  ;;  %4356 = vmatpush.bf16.msrb.mxu3 %v8701_v39  ;;  %v8676_v12 = vld [vmem:[%s14785_s7 + $0x30] sm:$0xf] }
 0x8fd   : > { %v10445_v39 = vld [vmem:[%s14784_s6 + $0x10] sm:$0xff] }
 0x8fe   : > { %8562 = vmatmul.msk.bf16.vlgmr.msra.gmra.mxu0 %vm723_vm0, %v10411_v56  ;;  %v8850_v56 = vld [vmem:[%s14785_s7 + $0x1b0] sm:$0xf] }
 0x8ff   : > { %4139 = vmatpush.bf16.msrb.mxu0 %v12698_v33  ;;  %v8851_v37 = vor.u32 %v10470_v13, %v8850_v56 }
 0x900   : > { %4266 = vmatpush.bf16.msrb.mxu2 %v8609_v52  ;;  %v10459_v52 = vld [vmem:[%s14785_s7 + $0x164] sm:$0xf0] }
 0x901   : > { %v8788_v47 = vor.u32 %v10459_v52, %v8787_v30  ;;  %v8789_v30 = vld [vmem:[%s14785_s7 + $0x168] sm:$0xf0] }
 0x903   : > { %4140 = vmatpush.bf16.msrb.mxu0 %v12690_v26 }
 0x904   : > { %4267 = vmatpush.bf16.msrb.mxu2 %v8601_v28 }
 0x907   : > { %4141 = vmatpush.bf16.msrb.mxu0 %v12675_v32 }
 0x908   : > { %4268 = vmatpush.bf16.msrb.mxu2 %v8593_v53  ;;  %v8661_v53 = vor.u32 %v10415_v34, %v8660_v24  ;;  %v8773_v34 = vld [vmem:[%s14785_s7 + $0x148] sm:$0xf0] }
 0x90b   : > { %4142 = vmatpush.bf16.msrb.mxu0 %v12634_v49 }
 0x90c   : > { %4506 = vmatpush.bf16.msra.mxu2 %v8796_v5  ;;  %v10413_v5 = vld [vmem:[%s14785_s7 + $0x4] sm:$0xf0] }
 0x90e   : > { %8569 = vmatmul.msk.bf16.vlgmr.msrb.gmra.mxu0 %vm723_vm0, %v10428_v11  ;;  %v10419_v11 = vld [vmem:[%s14785_s7 + $0x34] sm:$0xf0] }
 0x90f   : > { %4369 = vmatpush.bf16.msra.mxu0 %v8713_v20  ;;  %v10423_v20 = vld [vmem:[%s14785_s7 + $0x54] sm:$0xf0] }
 0x910   : > { %v8693_v29 = vor.u32 %v10423_v20, %v8692_v2  ;;  %4507 = vmatpush.bf16.msra.mxu2 %v8788_v47  ;;  %v8887_v2 = vor.u32 %v10477_v22, %v8884_v8  ;;  %v10475_v20 = vld [vmem:[%s14785_s7 + $0x1e4] sm:$0xf]  ;;  %v8852_v47 = vld [vmem:[%s14785_s7 + $0x1b8] sm:$0xf0]  ;;  %v10504_v22 = vld [vmem:[%s14785_s7 + $0x2b4] sm:$0xf0] }
 0x912   : > { %4357 = vmatpush.bf16.msrb.mxu3 %v8693_v29  ;;  %v8876_v29 = vld [vmem:[%s14785_s7 + $0x1e8] sm:$0xf0] }
 0x913   : > { %4370 = vmatpush.bf16.msra.mxu0 %v8705_v23  ;;  %v8677_v23 = vor.u32 %v10419_v11, %v8676_v12  ;;  %v8879_v42 = vor.u32 %v10475_v20, %v8876_v29  ;;  %v10471_v11 = vld [vmem:[%s14785_s7 + $0x1c4] sm:$0xf]  ;;  %v9016_v20 = vld [vmem:[%s14785_s7 + $0x2a0] sm:$0xf]  ;;  %v10502_v29 = vld [vmem:[%s14785_s7 + $0x2a4] sm:$0xf0] }
 0x914   : > { %4508 = vmatpush.bf16.msra.mxu2 %v8780_v7  ;;  %v10454_v7 = vld [vmem:[%s14785_s7 + $0x144] sm:$0xf] }
 0x916   : > { %4358 = vmatpush.bf16.msrb.mxu3 %v8685_v21  ;;  %v8868_v21 = vld [vmem:[%s14785_s7 + $0x1d8] sm:$0xf0] }
 0x917   : > { %4371 = vmatpush.bf16.msra.mxu0 %v8697_v46  ;;  %v8842_v46 = vld [vmem:[%s14785_s7 + $0x1a0] sm:$0xf]  ;;  %v8871_v12 = vor.u32 %v10473_v63, %v8868_v21  ;;  %v9017_v21 = vor.u32 %v10502_v29, %v9016_v20  ;;  %v8931_v20 = vld [vmem:[%s14785_s7 + $0x228] sm:$0xf0] }
 0x918   : > { %v8843_v28 = vor.u32 %v10468_v57, %v8842_v46  ;;  %4509 = vmatpush.bf16.msra.mxu2 %v8772_v55  ;;  %v10469_v46 = vld [vmem:[%s14785_s7 + $0x1b4] sm:$0xf]  ;;  %v8828_v55 = vld [vmem:[%s14785_s7 + $0x188] sm:$0xf0] }
 0x919   : > { %v8855_v57 = vor.u32 %v10469_v46, %v8852_v47  ;;  %v8831_v6 = vor.u32 %v10463_v58, %v8828_v55  ;;  %v8963_v58 = vld [vmem:[%s14785_s7 + $0x268] sm:$0xf0] }
 0x91a   : > { %4359 = vmatpush.bf16.msrb.mxu3 %v8677_v23  ;;  %v8860_v23 = vld [vmem:[%s14785_s7 + $0x1c8] sm:$0xf0] }
 0x91b   : > { %4372 = vmatpush.bf16.msra.mxu0 %v8689_v50  ;;  %v8834_v50 = vld [vmem:[%s14785_s7 + $0x190] sm:$0xf]  ;;  %v8863_v1 = vor.u32 %v10471_v11, %v8860_v23 }
 0x91c   : > { %v8835_v44 = vor.u32 %v10466_v35, %v8834_v50  ;;  %4510 = vmatpush.bf16.msra.mxu2 %v8764_v38  ;;  %v8784_v50 = vor.u32 %v10456_v25, %v8781_v18  ;;  %v8844_v35 = vld [vmem:[%s14785_s7 + $0x1a8] sm:$0xf0]  ;;  %v10450_v38 = vld [vmem:[%s14785_s7 + $0x124] sm:$0xf] }
 0x91e   : > { %4360 = vmatpush.bf16.msrb.mxu3 %v8669_v60  ;;  %v10458_v60 = vld [vmem:[%s14785_s7 + $0x164] sm:$0xf] }
 0x91f   : > { %4373 = vmatpush.bf16.msra.mxu0 %v8681_v19  ;;  %v8653_v19 = vor.u32 %v10413_v5, %v8652_v43  ;;  %v8792_v52 = vor.u32 %v10458_v60, %v8789_v30  ;;  %v8836_v43 = vld [vmem:[%s14785_s7 + $0x198] sm:$0xf0]  ;;  %v9000_v30 = vld [vmem:[%s14785_s7 + $0x280] sm:$0xf] }
 0x922   : > { %4361 = vmatpush.bf16.msrb.mxu3 %v8661_v53  ;;  %v10465_v53 = vld [vmem:[%s14785_s7 + $0x194] sm:$0xf] }
 0x923   : > { %4374 = vmatpush.bf16.msra.mxu0 %v8673_v0  ;;  %v8826_v0 = vld [vmem:[%s14785_s7 + $0x180] sm:$0xf]  ;;  %v8839_v5 = vor.u32 %v10465_v53, %v8836_v43  ;;  %v8971_v53 = vld [vmem:[%s14785_s7 + $0x278] sm:$0xf0] }
 0x924   : > { %v8961_v43 = vld [vmem:[%s14785_s7 + $0x260] sm:$0xf] }
 0x926   : > { %4362 = vmatpush.bf16.msrb.mxu3 %v8653_v19  ;;  %v10452_v19 = vld [vmem:[%s14785_s7 + $0x134] sm:$0xf] }
 0x927   : > { %4375 = vmatpush.bf16.msra.mxu0 %v8665_v59  ;;  %v8827_v59 = vor.u32 %v10464_v17, %v8826_v0  ;;  %v8768_v0 = vor.u32 %v10452_v19, %v8765_v61  ;;  %v9056_v17 = vld [vmem:[%s14785_s7 + $0x2f0] sm:$0xf]  ;;  %v10492_v61 = vld [vmem:[%s14785_s7 + $0x264] sm:$0xf] }
 0x928   : > { %v8966_v55 = vor.u32 %v10492_v61, %v8963_v58  ;;  %v10527_v58 = vld [vmem:[%s14785_s7 + $0x364] sm:$0xf0] }
 0x92a   : > { %4520 = vmatpush.bf16.msra.mxu3 %v8800_v14  ;;  %v9024_v14 = vld [vmem:[%s14785_s7 + $0x2b0] sm:$0xf] }
 0x92b   : > { %4376 = vmatpush.bf16.msra.mxu0 %v8657_v51  ;;  %v10451_v51 = vld [vmem:[%s14785_s7 + $0x124] sm:$0xf0]  ;;  %v9025_v8 = vor.u32 %v10504_v22, %v9024_v14 }
 0x92e   : > { %4521 = vmatpush.bf16.msra.mxu3 %v8792_v52  ;;  %v10498_v52 = vld [vmem:[%s14785_s7 + $0x284] sm:$0xf0] }
 0x92f   : > { %4661 = vmatpush.bf16.msrb.mxu0 %v8883_v40  ;;  %v8756_v40 = vor.u32 %v10451_v51, %v8755_v36  ;;  %v8757_v36 = vld [vmem:[%s14785_s7 + $0x128] sm:$0xf0]  ;;  %v9001_v46 = vor.u32 %v10498_v52, %v9000_v30 }
 0x930   : > { %v8760_v51 = vor.u32 %v10450_v38, %v8757_v36 }
 0x931   : > { %4511 = vmatpush.bf16.msra.mxu2 %v8756_v40  ;;  %v9048_v40 = vld [vmem:[%s14785_s7 + $0x2e0] sm:$0xf] }
 0x932   : > { %4522 = vmatpush.bf16.msra.mxu3 %v8784_v50  ;;  %v10479_v50 = vld [vmem:[%s14784_s6 + $0x20] sm:$0xff] }
 0x933   : > { %4662 = vmatpush.bf16.msrb.mxu0 %v8875_v15  ;;  %v8748_v15 = vor.u32 %v10449_v41, %v8747_v9  ;;  %v10510_v9 = vld [vmem:[%s14785_s7 + $0x2e4] sm:$0xf0]  ;;  %v10448_v41 = vld [vmem:[%s14785_s7 + $0x114] sm:$0xf] }
 0x935   : > { %4512 = vmatpush.bf16.msra.mxu2 %v8748_v15  ;;  %v9049_v15 = vor.u32 %v10510_v9, %v9048_v40  ;;  %v10489_v40 = vld [vmem:[%s14785_s7 + $0x244] sm:$0xf0]  ;;  %v10488_v9 = vld [vmem:[%s14785_s7 + $0x244] sm:$0xf] }
 0x937   : > { %4663 = vmatpush.bf16.msrb.mxu0 %v8867_v4  ;;  %v8740_v4 = vor.u32 %v10447_v16, %v8739_v62  ;;  %v8749_v62 = vld [vmem:[%s14785_s7 + $0x118] sm:$0xf0]  ;;  %v9040_v16 = vld [vmem:[%s14785_s7 + $0x2d0] sm:$0xf] }
 0x939   : > { %4513 = vmatpush.bf16.msra.mxu2 %v8740_v4  ;;  %v10508_v4 = vld [vmem:[%s14785_s7 + $0x2d4] sm:$0xf0] }
 0x93b   : > { %4664 = vmatpush.bf16.msrb.mxu0 %v8859_v45 }
 0x93f   : > { %4665 = vmatpush.bf16.msrb.mxu0 %v8851_v37 }
 0x943   : > { %4666 = vmatpush.bf16.msrb.mxu0 %v8843_v28  ;;  %v10467_v28 = vld [vmem:[%s14785_s7 + $0x1a4] sm:$0xf] }
 0x944   : > { %v8847_v24 = vor.u32 %v10467_v28, %v8844_v35 }
 0x947   : > { %4667 = vmatpush.bf16.msrb.mxu0 %v8835_v44  ;;  %v8776_v44 = vor.u32 %v10454_v7, %v8773_v34  ;;  %v10495_v7 = vld [vmem:[%s14785_s7 + $0x274] sm:$0xf0]  ;;  %v10494_v34 = vld [vmem:[%s14785_s7 + $0x274] sm:$0xf] }
 0x948   : > { %v8974_v19 = vor.u32 %v10494_v34, %v8971_v53 }
 0x949   : > { %4523 = vmatpush.bf16.msra.mxu3 %v8776_v44 }
 0x94b   : > { %4668 = vmatpush.bf16.msrb.mxu0 %v8827_v59  ;;  %v10512_v59 = vld [vmem:[%s14785_s7 + $0x2f4] sm:$0xf0] }
 0x94c   : > { %v9057_v31 = vor.u32 %v10512_v59, %v9056_v17  ;;  %v8953_v17 = vld [vmem:[%s14785_s7 + $0x250] sm:$0xf]  ;;  %v10491_v59 = vld [vmem:[%s14785_s7 + $0x254] sm:$0xf0] }
 0x94d   : > { %4524 = vmatpush.bf16.msra.mxu3 %v8768_v0  ;;  %v8954_v38 = vor.u32 %v10491_v59, %v8953_v17 }
 0x951   : > { %4525 = vmatpush.bf16.msra.mxu3 %v8760_v51  ;;  %v8945_v51 = vld [vmem:[%s14785_s7 + $0x240] sm:$0xf] }
 0x97b   : > { %v4102_v10 = vpop.f32.mrf.mxu0 }
 0x983   : > { %v4104_v48 = vpop.f32.mrf.mxu0 }
 0x984   : > { %v4107_v45 = vpack.c.bf16 %v4104_v48, %v4102_v10  ;;  %v8752_v10 = vor.u32 %v10448_v41, %v8749_v62  ;;  %v9041_v48 = vor.u32 %v10508_v4, %v9040_v16  ;;  %v8947_v41 = vld [vmem:[%s14785_s7 + $0x248] sm:$0xf0]  ;;  %v9145_v62 = vld [vmem:[%s14785_s7 + $0x378] sm:$0xf0]  ;;  %v8946_v16 = vor.u32 %v10489_v40, %v8945_v51  ;;  %v10525_v51 = vld [vmem:[%s14785_s7 + $0x354] sm:$0xf0] }
 0x985   : > { %v10496_v4 = vld [vmem:[%s14784_s6 + $0x28] sm:$0xff]  ;;  %v10522_v40 = vld [vmem:[%s14785_s7 + $0x344] sm:$0xf] }
 0x986   : > { %4377 = vmatmul.bf16.vlgmr.msra.gmra.mxu0 %v4107_v45  ;;  %4363 = vmatmul.bf16.vlgmr.msrb.gmra.mxu3 %v4107_v45  ;;  %v10446_v45 = vld [vmem:[%s14785_s7 + $0x104] sm:$0xf] }
 0x987   : > { %4863 = vmatpush.bf16.msra.mxu0 %v12698_v33  ;;  %4526 = vmatpush.bf16.msra.mxu3 %v8752_v10  ;;  %v8950_v10 = vor.u32 %v10488_v9, %v8947_v41  ;;  %v9121_v9 = vld [vmem:[%s14785_s7 + $0x348] sm:$0xf0] }
 0x98b   : > { %4864 = vmatpush.bf16.msra.mxu0 %v12690_v26  ;;  %v4144_v56 = vpop.f32.mrf.mxu0 }
 0x98f   : > { %4865 = vmatpush.bf16.msra.mxu0 %v12675_v32 }
 0x993   : > { %4866 = vmatpush.bf16.msra.mxu0 %v12634_v49  ;;  %v4146_v13 = vpop.f32.mrf.mxu0 }
 0x994   : > { %v4149_v37 = vpack.c.bf16 %v4146_v13, %v4144_v56  ;;  %v8741_v56 = vld [vmem:[%s14785_s7 + $0x108] sm:$0xf0] }
 0x995   : > { %v8744_v13 = vor.u32 %v10446_v45, %v8741_v56  ;;  %v10487_v45 = vld [vmem:[%s14785_s7 + $0x234] sm:$0xf0]  ;;  %v10486_v56 = vld [vmem:[%s14785_s7 + $0x234] sm:$0xf] }
 0x996   : > { %4255 = vmatmul.bf16.vlgmr.msrb.gmra.mxu1 %v4149_v37  ;;  %4269 = vmatmul.bf16.vlgmr.msrb.gmra.mxu2 %v4149_v37  ;;  %v9032_v37 = vld [vmem:[%s14785_s7 + $0x2c0] sm:$0xf] }
 0x997   : > { %4553 = vmatpush.bf16.msrb.mxu1 %v12698_v33  ;;  %4708 = vmatpush.bf16.msrb.mxu2 %v12698_v33  ;;  %v9033_v27 = vor.u32 %v10506_v3, %v9032_v37  ;;  %v10526_v3 = vld [vmem:[%s14785_s7 + $0x364] sm:$0xf] }
 0x998   : > { %4527 = vmatpush.bf16.msra.mxu3 %v8744_v13  ;;  %v8939_v13 = vld [vmem:[%s14785_s7 + $0x238] sm:$0xf0] }
 0x999   : > { %v8942_v22 = vor.u32 %v10486_v56, %v8939_v13  ;;  %v9113_v56 = vld [vmem:[%s14785_s7 + $0x338] sm:$0xf0] }
 0x99b   : > { %4554 = vmatpush.bf16.msrb.mxu1 %v12690_v26  ;;  %4709 = vmatpush.bf16.msrb.mxu2 %v12690_v26 }
 0x99f   : > { %4555 = vmatpush.bf16.msrb.mxu1 %v12675_v32  ;;  %4710 = vmatpush.bf16.msrb.mxu2 %v12675_v32 }
 0x9a3   : > { %4556 = vmatpush.bf16.msrb.mxu1 %v12634_v49  ;;  %4711 = vmatpush.bf16.msrb.mxu2 %v12634_v49 }
 0x9a6   : > { %8720 = vmatmul.msk.bf16.vlgmr.msra.gmra.mxu1 %vm723_vm0, %v10445_v39 }
 0x9a7   : > { %4675 = vmatpush.bf16.msra.mxu1 %v8887_v2 }
 0x9ab   : > { %4676 = vmatpush.bf16.msra.mxu1 %v8879_v42  ;;  %v9008_v42 = vld [vmem:[%s14785_s7 + $0x290] sm:$0xf] }
 0x9af   : > { %4677 = vmatpush.bf16.msra.mxu1 %v8871_v12  ;;  %v10500_v12 = vld [vmem:[%s14785_s7 + $0x294] sm:$0xf0] }
 0x9b0   : > { %v9009_v11 = vor.u32 %v10500_v12, %v9008_v42  ;;  %v8921_v12 = vld [vmem:[%s14785_s7 + $0x210] sm:$0xf] }
 0x9b3   : > { %4678 = vmatpush.bf16.msra.mxu1 %v8863_v1 }
 0x9b6   : > { %8807 = vmatmul.msk.bf16.vlgmr.msrb.gmra.mxu1 %vm723_vm0, %v10462_v54 }
 0x9b7   : > { %4679 = vmatpush.bf16.msra.mxu1 %v8855_v57 }
 0x9bb   : > { %4680 = vmatpush.bf16.msra.mxu1 %v8847_v24  ;;  %v8969_v24 = vld [vmem:[%s14785_s7 + $0x270] sm:$0xf] }
 0x9bc   : > { %v8970_v44 = vor.u32 %v10495_v7, %v8969_v24  ;;  %v10513_v7 = vld [vmem:[%s14784_s6 + $0x30] sm:$0xff] }
 0x9be   : > { %4816 = vmatpush.bf16.msrb.mxu3 %v8970_v44 }
 0x9bf   : > { %4681 = vmatpush.bf16.msra.mxu1 %v8839_v5  ;;  %v10493_v5 = vld [vmem:[%s14785_s7 + $0x264] sm:$0xf0] }
 0x9c0   : > { %v8962_v0 = vor.u32 %v10493_v5, %v8961_v43  ;;  %v10509_v43 = vld [vmem:[%s14785_s7 + $0x2e4] sm:$0xf]  ;;  %v9050_v5 = vld [vmem:[%s14785_s7 + $0x2e8] sm:$0xf0] }
 0x9c1   : > { %v9053_v61 = vor.u32 %v10509_v43, %v9050_v5  ;;  %v10497_v5 = vld [vmem:[%s14785_s7 + $0x284] sm:$0xf] }
 0x9c2   : > { %4817 = vmatpush.bf16.msrb.mxu3 %v8962_v0  ;;  %v10524_v0 = vld [vmem:[%s14785_s7 + $0x354] sm:$0xf] }
 0x9c3   : > { %4682 = vmatpush.bf16.msra.mxu1 %v8831_v6  ;;  %v10490_v6 = vld [vmem:[%s14785_s7 + $0x254] sm:$0xf] }
 0x9c6   : > { %4818 = vmatpush.bf16.msrb.mxu3 %v8954_v38  ;;  %v9127_v38 = vld [vmem:[%s14785_s7 + $0x350] sm:$0xf] }
 0x9c7   : > { %4971 = vmatpush.bf16.msrb.mxu1 %v9057_v31  ;;  %v8955_v31 = vld [vmem:[%s14785_s7 + $0x258] sm:$0xf0]  ;;  %v9128_v41 = vor.u32 %v10525_v51, %v9127_v38  ;;  %v9301_v38 = vld [vmem:[%s14785_s7 + $0x450] sm:$0xf] }
 0x9c8   : > { %v8958_v36 = vor.u32 %v10490_v6, %v8955_v31  ;;  %v10507_v6 = vld [vmem:[%s14785_s7 + $0x2d4] sm:$0xf]  ;;  %v9042_v31 = vld [vmem:[%s14785_s7 + $0x2d8] sm:$0xf0] }
 0x9ca   : > { %4819 = vmatpush.bf16.msrb.mxu3 %v8946_v16  ;;  %v9034_v16 = vld [vmem:[%s14785_s7 + $0x2c8] sm:$0xf0] }
 0x9cb   : > { %4972 = vmatpush.bf16.msrb.mxu1 %v9049_v15  ;;  %v10528_v15 = vld [vmem:[%s14785_s7 + $0x374] sm:$0xf] }
 0x9cc   : > { %v9148_v37 = vor.u32 %v10528_v15, %v9145_v62  ;;  %v9124_v15 = vor.u32 %v10522_v40, %v9121_v9  ;;  %v10505_v62 = vld [vmem:[%s14785_s7 + $0x2c4] sm:$0xf] }
 0x9cf   : > { %4973 = vmatpush.bf16.msrb.mxu1 %v9041_v48  ;;  %v8937_v48 = vld [vmem:[%s14785_s7 + $0x230] sm:$0xf] }
 0x9d0   : > { %v8938_v14 = vor.u32 %v10487_v45, %v8937_v48  ;;  %v10523_v48 = vld [vmem:[%s14785_s7 + $0x344] sm:$0xf0]  ;;  %v10520_v45 = vld [vmem:[%s14785_s7 + $0x334] sm:$0xf] }
 0x9d2   : > { %4820 = vmatpush.bf16.msrb.mxu3 %v8938_v14  ;;  %v9111_v14 = vld [vmem:[%s14785_s7 + $0x330] sm:$0xf] }
 0x9d3   : > { %4974 = vmatpush.bf16.msrb.mxu1 %v9033_v27  ;;  %v9137_v27 = vld [vmem:[%s14785_s7 + $0x368] sm:$0xf0] }
 0x9d4   : > { %v9140_v29 = vor.u32 %v10526_v3, %v9137_v27  ;;  %v10503_v3 = vld [vmem:[%s14785_s7 + $0x2b4] sm:$0xf]  ;;  %v9026_v27 = vld [vmem:[%s14785_s7 + $0x2b8] sm:$0xf0] }
 0x9d7   : > { %4975 = vmatpush.bf16.msrb.mxu1 %v9025_v8  ;;  %v8929_v8 = vld [vmem:[%s14785_s7 + $0x220] sm:$0xf] }
 0x9db   : > { %4976 = vmatpush.bf16.msrb.mxu1 %v9017_v21 }
 0x9df   : > { %4977 = vmatpush.bf16.msrb.mxu1 %v9009_v11  ;;  %v10483_v11 = vld [vmem:[%s14785_s7 + $0x214] sm:$0xf0] }
 0x9e0   : > { %v8922_v30 = vor.u32 %v10483_v11, %v8921_v12  ;;  %v9103_v12 = vld [vmem:[%s14785_s7 + $0x320] sm:$0xf] }
 0x9e3   : > { %4978 = vmatpush.bf16.msrb.mxu1 %v9001_v46  ;;  %v8913_v46 = vld [vmem:[%s14785_s7 + $0x200] sm:$0xf] }
 0xa03   : > { %v4378_v1 = vpop.f32.mrf.mxu0 }
 0xa09   : > { %v4364_v2 = vpop.f32.mrf.mxu3 }
 0xa0b   : > { %v13414_v9 = vpop.f32.mrf.mxu0 }
 0xa13   : > { %v4256_v39 = vpop.f32.mrf.mxu1 }
 0xa14   : > { %v13115_v63 = vadd.f32 %v4364_v2, %v4256_v39  ;;  %v10485_v39 = vld [vmem:[%s14785_s7 + $0x224] sm:$0xf0]  ;;  %v10484_v2 = vld [vmem:[%s14785_s7 + $0x224] sm:$0xf] }
 0xa15   : > { %v8930_v42 = vor.u32 %v10485_v39, %v8929_v8  ;;  %v8934_v21 = vor.u32 %v10484_v2, %v8931_v20  ;;  %v10521_v8 = vld [vmem:[%s14785_s7 + $0x334] sm:$0xf0]  ;;  %v10518_v39 = vld [vmem:[%s14785_s7 + $0x324] sm:$0xf]  ;;  %v9105_v2 = vld [vmem:[%s14785_s7 + $0x328] sm:$0xf0] }
 0xa16   : > { %v9112_v20 = vor.u32 %v10521_v8, %v9111_v14  ;;  %v10553_v14 = vld [vmem:[%s14785_s7 + $0x424] sm:$0xf0]  ;;  %v10551_v8 = vld [vmem:[%s14785_s7 + $0x414] sm:$0xf0] }
 0xa17   : > { %4821 = vmatpush.bf16.msrb.mxu3 %v8930_v42  ;;  %v10501_v42 = vld [vmem:[%s14785_s7 + $0x2a4] sm:$0xf] }
 0xa19   : > { %v4270_v23 = vpop.f32.mrf.mxu2 }
 0xa1a   : > { %v13120_v54 = vadd.f32 %v4378_v1, %v4270_v23  ;;  %v10482_v23 = vld [vmem:[%s14785_s7 + $0x214] sm:$0xf]  ;;  %v8923_v1 = vld [vmem:[%s14785_s7 + $0x218] sm:$0xf0] }
 0xa1b   : > { %v13122_v60 = vpop.f32.mrf.mxu1  ;;  %v8926_v52 = vor.u32 %v10482_v23, %v8923_v1  ;;  %4822 = vmatpush.bf16.msrb.mxu3 %v8922_v30  ;;  %v10519_v23 = vld [vmem:[%s14785_s7 + $0x324] sm:$0xf0]  ;;  %v10516_v1 = vld [vmem:[%s14785_s7 + $0x314] sm:$0xf]  ;;  %v9097_v30 = vld [vmem:[%s14785_s7 + $0x318] sm:$0xf0] }
 0xa23   : > { %v4403_v47 = vpop.f32.mrf.mxu1 }
 0xa2b   : > { %v4405_v57 = vpop.f32.mrf.mxu1 }
 0xa2c   : > { %v4408_v25 = vpack.c.bf16 %v4405_v57, %v4403_v47  ;;  %v10481_v47 = vld [vmem:[%s14785_s7 + $0x204] sm:$0xf0]  ;;  %v10480_v57 = vld [vmem:[%s14785_s7 + $0x204] sm:$0xf] }
 0xa2d   : > { %v8914_v24 = vor.u32 %v10481_v47, %v8913_v46  ;;  %v9100_v46 = vor.u32 %v10516_v1, %v9097_v30  ;;  %v10499_v47 = vld [vmem:[%s14785_s7 + $0x294] sm:$0xf] }
 0xa2e   : > { %4514 = vmatmul.bf16.vlgmr.msra.gmra.mxu2 %v4408_v25  ;;  %4528 = vmatmul.bf16.vlgmr.msra.gmra.mxu3 %v4408_v25  ;;  %v8915_v25 = vld [vmem:[%s14785_s7 + $0x208] sm:$0xf0] }
 0xa2f   : > { %4830 = vmatpush.bf16.msra.mxu2 %v8974_v19  ;;  %v8918_v34 = vor.u32 %v10480_v57, %v8915_v25  ;;  %4823 = vmatpush.bf16.msrb.mxu3 %v8914_v24  ;;  %v9135_v19 = vld [vmem:[%s14785_s7 + $0x360] sm:$0xf]  ;;  %v9010_v57 = vld [vmem:[%s14785_s7 + $0x298] sm:$0xf0]  ;;  %v9095_v25 = vld [vmem:[%s14785_s7 + $0x310] sm:$0xf] }
 0xa30   : > { %v9136_v17 = vor.u32 %v10527_v58, %v9135_v19  ;;  %v9002_v19 = vld [vmem:[%s14785_s7 + $0x288] sm:$0xf0] }
 0xa31   : > { %v9005_v58 = vor.u32 %v10497_v5, %v9002_v19  ;;  %v10545_v5 = vld [vmem:[%s14785_s7 + $0x3f4] sm:$0xf]  ;;  %v9232_v19 = vld [vmem:[%s14785_s7 + $0x3f8] sm:$0xf0] }
 0xa33   : > { %v4558_v18 = vpop.f32.mrf.mxu1  ;;  %4831 = vmatpush.bf16.msra.mxu2 %v8966_v55  ;;  %v9129_v55 = vld [vmem:[%s14785_s7 + $0x358] sm:$0xf0] }
 0xa34   : > { %v9132_v59 = vor.u32 %v10524_v0, %v9129_v55  ;;  %v10515_v0 = vld [vmem:[%s14785_s7 + $0x304] sm:$0xf0] }
 0xa37   : > { %4832 = vmatpush.bf16.msra.mxu2 %v8958_v36  ;;  %v9045_v36 = vor.u32 %v10507_v6, %v9042_v31  ;;  %v13404_v31 = vpop.f32.mrf.mxu3 }
 0xa3b   : > { %v4560_v28 = vpop.f32.mrf.mxu1  ;;  %4833 = vmatpush.bf16.msra.mxu2 %v8950_v10  ;;  %v9037_v10 = vor.u32 %v10505_v62, %v9034_v16 }
 0xa3c   : > { %v4563_v35 = vpack.c.bf16 %v4560_v28, %v4558_v18  ;;  %v10511_v18 = vld [vmem:[%s14785_s7 + $0x2f4] sm:$0xf]  ;;  %v9058_v28 = vld [vmem:[%s14785_s7 + $0x2f8] sm:$0xf0] }
 0xa3d   : > { %v9061_v44 = vor.u32 %v10511_v18, %v9058_v28  ;;  %v9013_v18 = vor.u32 %v10499_v47, %v9010_v57  ;;  %v10517_v28 = vld [vmem:[%s14785_s7 + $0x314] sm:$0xf0]  ;;  %v10544_v47 = vld [vmem:[%s14785_s7 + $0x3e4] sm:$0xf0] }
 0xa3e   : > { %4669 = vmatmul.bf16.vlgmr.msrb.gmra.mxu0 %v4563_v35  ;;  %4683 = vmatmul.bf16.vlgmr.msra.gmra.mxu1 %v4563_v35  ;;  %v10529_v35 = vld [vmem:[%s14785_s7 + $0x374] sm:$0xf0]  ;;  %v9096_v24 = vor.u32 %v10517_v28, %v9095_v25  ;;  %v9214_v25 = vld [vmem:[%s14785_s7 + $0x3d0] sm:$0xf] }
 0xa3f   : > { %8894 = vmatmul.msk.bf16.vlgmr.msrb.gmra.mxu2 %vm723_vm0, %v10479_v50  ;;  %5018 = vmatpush.bf16.msrb.mxu0 %v12698_v33  ;;  %v9143_v50 = vld [vmem:[%s14785_s7 + $0x370] sm:$0xf] }
 0xa40   : > { %5173 = vmatpush.bf16.msra.mxu1 %v12698_v33  ;;  %4834 = vmatpush.bf16.msra.mxu2 %v8942_v22  ;;  %v9144_v53 = vor.u32 %v10529_v35, %v9143_v50  ;;  %v9029_v22 = vor.u32 %v10503_v3, %v9026_v27  ;;  %v10514_v50 = vld [vmem:[%s14785_s7 + $0x304] sm:$0xf]  ;;  %v9089_v35 = vld [vmem:[%s14785_s7 + $0x308] sm:$0xf0]  ;;  %v9277_v27 = vld [vmem:[%s14785_s7 + $0x420] sm:$0xf] }
 0xa41   : > { %4985 = vmatpush.bf16.msra.mxu3 %v9061_v44  ;;  %v10563_v44 = vld [vmem:[%s14785_s7 + $0x474] sm:$0xf0] }
 0xa43   : > { %5019 = vmatpush.bf16.msrb.mxu0 %v12690_v26 }
 0xa44   : > { %5174 = vmatpush.bf16.msra.mxu1 %v12690_v26  ;;  %4835 = vmatpush.bf16.msra.mxu2 %v8934_v21  ;;  %v9018_v21 = vld [vmem:[%s14785_s7 + $0x2a8] sm:$0xf0] }
 0xa45   : > { %4986 = vmatpush.bf16.msra.mxu3 %v9053_v61  ;;  %v9021_v11 = vor.u32 %v10501_v42, %v9018_v21  ;;  %v9087_v61 = vld [vmem:[%s14785_s7 + $0x300] sm:$0xf]  ;;  %v10549_v42 = vld [vmem:[%s14785_s7 + $0x404] sm:$0xf0] }
 0xa46   : > { %v9088_v55 = vor.u32 %v10515_v0, %v9087_v61  ;;  %v9235_v61 = vor.u32 %v10545_v5, %v9232_v19  ;;  %v9224_v0 = vld [vmem:[%s14785_s7 + $0x3e8] sm:$0xf0]  ;;  %v9396_v19 = vld [vmem:[%s14785_s7 + $0x4e0] sm:$0xf] }
 0xa47   : > { %5020 = vmatpush.bf16.msrb.mxu0 %v12675_v32 }
 0xa48   : > { %5175 = vmatpush.bf16.msra.mxu1 %v12675_v32  ;;  %4836 = vmatpush.bf16.msra.mxu2 %v8926_v52  ;;  %v9104_v52 = vor.u32 %v10519_v23, %v9103_v12  ;;  %v9230_v12 = vld [vmem:[%s14785_s7 + $0x3f0] sm:$0xf] }
 0xa49   : > { %4987 = vmatpush.bf16.msra.mxu3 %v9045_v36  ;;  %v10559_v36 = vld [vmem:[%s14785_s7 + $0x454] sm:$0xf0] }
 0xa4a   : > { %v9302_v40 = vor.u32 %v10559_v36, %v9301_v38  ;;  %v10541_v36 = vld [vmem:[%s14785_s7 + $0x3d4] sm:$0xf] }
 0xa4b   : > { %5021 = vmatpush.bf16.msrb.mxu0 %v12634_v49 }
 0xa4c   : > { %5176 = vmatpush.bf16.msra.mxu1 %v12634_v49  ;;  %4837 = vmatpush.bf16.msra.mxu2 %v8918_v34  ;;  %v9317_v34 = vld [vmem:[%s14785_s7 + $0x470] sm:$0xf] }
 0xa4d   : > { %4988 = vmatpush.bf16.msra.mxu3 %v9037_v10  ;;  %v9318_v43 = vor.u32 %v10563_v44, %v9317_v34  ;;  %v10555_v10 = vld [vmem:[%s14785_s7 + $0x434] sm:$0xf0]  ;;  %v9198_v44 = vld [vmem:[%s14785_s7 + $0x3b0] sm:$0xf] }
 0xa4e   : > { %8981 = vmatmul.msk.bf16.vlgmr.msra.gmra.mxu0 %vm723_vm0, %v10496_v4  ;;  %v9119_v4 = vld [vmem:[%s14785_s7 + $0x340] sm:$0xf] }
 0xa4f   : > { %5140 = vmatpush.bf16.msra.mxu0 %v9148_v37  ;;  %v9120_v13 = vor.u32 %v10523_v48, %v9119_v4  ;;  %v9116_v37 = vor.u32 %v10520_v45, %v9113_v56  ;;  %v9285_v4 = vld [vmem:[%s14785_s7 + $0x430] sm:$0xf] }
 0xa50   : > { %5126 = vmatpush.bf16.msrb.mxu2 %v9144_v53  ;;  %v13384_v53 = vpop.f32.mrf.mxu2  ;;  %v9286_v45 = vor.u32 %v10555_v10, %v9285_v4  ;;  %v10539_v4 = vld [vmem:[%s14785_s7 + $0x3c4] sm:$0xf]  ;;  %v9208_v10 = vld [vmem:[%s14785_s7 + $0x3c8] sm:$0xf0] }
 0xa51   : > { %4989 = vmatpush.bf16.msra.mxu3 %v9029_v22  ;;  %v9278_v22 = vor.u32 %v10553_v14, %v9277_v27  ;;  %v10530_v14 = vld [vmem:[%s14784_s6 + $0x38] sm:$0xff] }
 0xa53   : > { %5141 = vmatpush.bf16.msra.mxu0 %v9140_v29  ;;  %v9108_v29 = vor.u32 %v10518_v39, %v9105_v2 }
 0xa54   : > { %5127 = vmatpush.bf16.msrb.mxu2 %v9136_v17  ;;  %v9309_v17 = vld [vmem:[%s14785_s7 + $0x460] sm:$0xf] }
 0xa55   : > { %4990 = vmatpush.bf16.msra.mxu3 %v9021_v11  ;;  %v10546_v11 = vld [vmem:[%s14785_s7 + $0x3f4] sm:$0xf0] }
 0xa56   : > { %v9231_v1 = vor.u32 %v10546_v11, %v9230_v12  ;;  %v10560_v12 = vld [vmem:[%s14785_s7 + $0x464] sm:$0xf]  ;;  %v9311_v11 = vld [vmem:[%s14785_s7 + $0x468] sm:$0xf0] }
 0xa57   : > { %5142 = vmatpush.bf16.msra.mxu0 %v9132_v59  ;;  %v10561_v59 = vld [vmem:[%s14785_s7 + $0x464] sm:$0xf0] }
 0xa58   : > { %5128 = vmatpush.bf16.msrb.mxu2 %v9128_v41  ;;  %v9310_v6 = vor.u32 %v10561_v59, %v9309_v17  ;;  %v9293_v41 = vld [vmem:[%s14785_s7 + $0x440] sm:$0xf] }
 0xa59   : > { %4991 = vmatpush.bf16.msra.mxu3 %v9013_v18  ;;  %v10542_v18 = vld [vmem:[%s14785_s7 + $0x3d4] sm:$0xf0]  ;;  %v9190_v59 = vld [vmem:[%s14785_s7 + $0x3a0] sm:$0xf] }
 0xa5a   : > { %v9215_v28 = vor.u32 %v10542_v18, %v9214_v25  ;;  %v10547_v18 = vld [vmem:[%s14784_s6 + $0x40] sm:$0xff] }
 0xa5b   : > { %5143 = vmatpush.bf16.msra.mxu0 %v9124_v15  ;;  %v10557_v15 = vld [vmem:[%s14785_s7 + $0x444] sm:$0xf0] }
 0xa5c   : > { %5129 = vmatpush.bf16.msrb.mxu2 %v9120_v13  ;;  %v9294_v62 = vor.u32 %v10557_v15, %v9293_v41  ;;  %v9182_v15 = vld [vmem:[%s14785_s7 + $0x390] sm:$0xf] }
 0xa5d   : > { %4992 = vmatpush.bf16.msra.mxu3 %v9005_v58  ;;  %v10543_v58 = vld [vmem:[%s14785_s7 + $0x3e4] sm:$0xf] }
 0xa5e   : > { %9068 = vmatmul.msk.bf16.vlgmr.msrb.gmra.mxu0 %vm723_vm0, %v10513_v7  ;;  %v9092_v7 = vor.u32 %v10514_v50, %v9089_v35  ;;  %v9206_v35 = vld [vmem:[%s14785_s7 + $0x3c0] sm:$0xf]  ;;  %v9227_v38 = vor.u32 %v10543_v58, %v9224_v0  ;;  %v10556_v0 = vld [vmem:[%s14785_s7 + $0x444] sm:$0xf] }
 0xa5f   : > { %5144 = vmatpush.bf16.msra.mxu0 %v9116_v37 }
 0xa60   : > { %5130 = vmatpush.bf16.msrb.mxu2 %v9112_v20 }
 0xa63   : > { %5145 = vmatpush.bf16.msra.mxu0 %v9108_v29  ;;  %v9261_v29 = vld [vmem:[%s14785_s7 + $0x400] sm:$0xf] }
 0xa64   : > { %5131 = vmatpush.bf16.msrb.mxu2 %v9104_v52  ;;  %v9262_v21 = vor.u32 %v10549_v42, %v9261_v29  ;;  %v9200_v29 = vld [vmem:[%s14785_s7 + $0x3b8] sm:$0xf0] }
 0xa67   : > { %5146 = vmatpush.bf16.msra.mxu0 %v9100_v46  ;;  %v9222_v46 = vld [vmem:[%s14785_s7 + $0x3e0] sm:$0xf] }
 0xa68   : > { %5132 = vmatpush.bf16.msrb.mxu2 %v9096_v24  ;;  %v9223_v57 = vor.u32 %v10544_v47, %v9222_v46  ;;  %v10540_v24 = vld [vmem:[%s14785_s7 + $0x3c4] sm:$0xf0]  ;;  %v10533_v47 = vld [vmem:[%s14785_s7 + $0x394] sm:$0xf] }
 0xa69   : > { %v9207_v34 = vor.u32 %v10540_v24, %v9206_v35  ;;  %v9404_v24 = vld [vmem:[%s14785_s7 + $0x4f0] sm:$0xf] }
 0xa6b   : > { %5147 = vmatpush.bf16.msra.mxu0 %v9092_v7 }
 0xa6c   : > { %5133 = vmatpush.bf16.msrb.mxu2 %v9088_v55 }
 0xa6f   : > { %5436 = vmatpush.bf16.msrb.mxu0 %v9318_v43  ;;  %v10538_v43 = vld [vmem:[%s14785_s7 + $0x3b4] sm:$0xf0] }
 0xa70   : > { %v9199_v55 = vor.u32 %v10538_v43, %v9198_v44  ;;  %v10558_v44 = vld [vmem:[%s14785_s7 + $0x454] sm:$0xf]  ;;  %v9303_v43 = vld [vmem:[%s14785_s7 + $0x458] sm:$0xf0] }
 0xa71   : > { %v9306_v5 = vor.u32 %v10558_v44, %v9303_v43 }
 0xa73   : > { %5437 = vmatpush.bf16.msrb.mxu0 %v9310_v6  ;;  %v10536_v6 = vld [vmem:[%s14785_s7 + $0x3a4] sm:$0xf0] }
 0xa74   : > { %v9191_v41 = vor.u32 %v10536_v6, %v9190_v59  ;;  %v9388_v59 = vld [vmem:[%s14785_s7 + $0x4d0] sm:$0xf]  ;;  %v10576_v6 = vld [vmem:[%s14785_s7 + $0x4d4] sm:$0xf0] }
 0xa77   : > { %5438 = vmatpush.bf16.msrb.mxu0 %v9302_v40  ;;  %v9216_v40 = vld [vmem:[%s14785_s7 + $0x3d8] sm:$0xf0] }
 0xa7b   : > { %5439 = vmatpush.bf16.msrb.mxu0 %v9294_v62  ;;  %v10534_v62 = vld [vmem:[%s14785_s7 + $0x394] sm:$0xf0] }
 0xa7f   : > { %5440 = vmatpush.bf16.msrb.mxu0 %v9286_v45  ;;  %v9183_v45 = vor.u32 %v10534_v62, %v9182_v15  ;;  %v9380_v15 = vld [vmem:[%s14785_s7 + $0x4c0] sm:$0xf]  ;;  %v10574_v62 = vld [vmem:[%s14785_s7 + $0x4c4] sm:$0xf0] }
 0xa83   : > { %5441 = vmatpush.bf16.msrb.mxu0 %v9278_v22  ;;  %v9174_v22 = vld [vmem:[%s14785_s7 + $0x380] sm:$0xf] }
 0xab1   : > { %v13412_v51 = vpop.f32.mrf.mxu2  ;;  %v4529_v16 = vpop.f32.mrf.mxu3 }
 0xab2   : > { %v4535_v56 = vadd.f32 %v4529_v16, %v13120_v54  ;;  %v9269_v54 = vld [vmem:[%s14785_s7 + $0x410] sm:$0xf]  ;;  %v9219_v16 = vor.u32 %v10541_v36, %v9216_v40  ;;  %v10554_v36 = vld [vmem:[%s14785_s7 + $0x434] sm:$0xf]  ;;  %v9287_v40 = vld [vmem:[%s14785_s7 + $0x438] sm:$0xf0] }
 0xab3   : > { %v9270_v39 = vor.u32 %v10551_v8, %v9269_v54  ;;  %v10532_v54 = vld [vmem:[%s14785_s7 + $0x384] sm:$0xf0] }
 0xab5   : > { %5442 = vmatpush.bf16.msrb.mxu0 %v9270_v39  ;;  %v9211_v39 = vor.u32 %v10539_v4, %v9208_v10  ;;  %v10552_v4 = vld [vmem:[%s14785_s7 + $0x424] sm:$0xf]  ;;  %v9279_v10 = vld [vmem:[%s14785_s7 + $0x428] sm:$0xf0] }
 0xab9   : > { %v13428_v48 = vpop.f32.mrf.mxu2  ;;  %5443 = vmatpush.bf16.msrb.mxu0 %v9262_v21  ;;  %v9175_v21 = vor.u32 %v10532_v54, %v9174_v22  ;;  %v9271_v22 = vld [vmem:[%s14785_s7 + $0x418] sm:$0xf0] }
 0xabb   : > { %v13431_v13 = vpop.f32.mrf.mxu0  ;;  %v4684_v37 = vpop.f32.mrf.mxu1 }
 0xabc   : > { %v13433_v3 = vadd.f32 %v4684_v37, %v4535_v56  ;;  %v10562_v56 = vld [vmem:[%s14785_s7 + $0x474] sm:$0xf]  ;;  %v9319_v37 = vld [vmem:[%s14785_s7 + $0x478] sm:$0xf0] }
 0xabd   : > { %v9322_v42 = vor.u32 %v10562_v56, %v9319_v37  ;;  %v9372_v56 = vld [vmem:[%s14785_s7 + $0x4b0] sm:$0xf]  ;;  %v10572_v37 = vld [vmem:[%s14785_s7 + $0x4b4] sm:$0xf0] }
 0xac2   : > { %v4713_v2 = vpop.f32.mrf.mxu2 }
 0xac3   : > { %v13447_v20 = vpop.f32.mrf.mxu0 }
 0xaca   : > { %v4715_v23 = vpop.f32.mrf.mxu2 }
 0xacb   : > { %v4718_v30 = vpack.c.bf16 %v4715_v23, %v4713_v2  ;;  %v4868_v52 = vpop.f32.mrf.mxu0  ;;  %v10537_v2 = vld [vmem:[%s14785_s7 + $0x3b4] sm:$0xf] }
 0xacc   : > { %v9203_v23 = vor.u32 %v10537_v2, %v9200_v29  ;;  %v10548_v29 = vld [vmem:[%s14785_s7 + $0x404] sm:$0xf] }
 0xacd   : > { %4824 = vmatmul.bf16.vlgmr.msrb.gmra.mxu3 %v4718_v30  ;;  %4838 = vmatmul.bf16.vlgmr.msra.gmra.mxu2 %v4718_v30  ;;  %v9192_v30 = vld [vmem:[%s14785_s7 + $0x3a8] sm:$0xf0] }
 0xace   : > { %5281 = vmatpush.bf16.msrb.mxu3 %v9231_v1  ;;  %5328 = vmatpush.bf16.msra.mxu2 %v12698_v33  ;;  %v10535_v1 = vld [vmem:[%s14785_s7 + $0x3a4] sm:$0xf] }
 0xacf   : > { %v9195_v46 = vor.u32 %v10535_v1, %v9192_v30  ;;  %v13661_v1 = vpop.f32.mrf.mxu3  ;;  %v9356_v30 = vld [vmem:[%s14785_s7 + $0x490] sm:$0xf] }
 0xad2   : > { %5282 = vmatpush.bf16.msrb.mxu3 %v9223_v57  ;;  %5329 = vmatpush.bf16.msra.mxu2 %v12690_v26  ;;  %v9184_v57 = vld [vmem:[%s14785_s7 + $0x398] sm:$0xf0] }
 0xad3   : > { %v4870_v50 = vpop.f32.mrf.mxu0  ;;  %v9187_v25 = vor.u32 %v10533_v47, %v9184_v57  ;;  %v9483_v47 = vld [vmem:[%s14785_s7 + $0x560] sm:$0xf]  ;;  %v10595_v57 = vld [vmem:[%s14785_s7 + $0x564] sm:$0xf0] }
 0xad4   : > { %v4873_v7 = vpack.c.bf16 %v4870_v50, %v4868_v52  ;;  %v9314_v52 = vor.u32 %v10560_v12, %v9311_v11  ;;  %v9176_v50 = vld [vmem:[%s14785_s7 + $0x388] sm:$0xf0]  ;;  %v9491_v12 = vld [vmem:[%s14785_s7 + $0x570] sm:$0xf]  ;;  %v10597_v11 = vld [vmem:[%s14785_s7 + $0x574] sm:$0xf0] }
 0xad6   : > { %5283 = vmatpush.bf16.msrb.mxu3 %v9215_v28  ;;  %5330 = vmatpush.bf16.msra.mxu2 %v12675_v32  ;;  %v10531_v28 = vld [vmem:[%s14785_s7 + $0x384] sm:$0xf] }
 0xad7   : > { %4979 = vmatmul.bf16.vlgmr.msrb.gmra.mxu1 %v4873_v7  ;;  %v9179_v35 = vor.u32 %v10531_v28, %v9176_v50  ;;  %v9348_v28 = vld [vmem:[%s14785_s7 + $0x480] sm:$0xf]  ;;  %v10566_v50 = vld [vmem:[%s14785_s7 + $0x484] sm:$0xf0] }
 0xad8   : > { %5295 = vmatpush.bf16.msrb.mxu1 %v9235_v61  ;;  %v10578_v61 = vld [vmem:[%s14785_s7 + $0x4e4] sm:$0xf0] }
 0xad9   : > { %v9397_v58 = vor.u32 %v10578_v61, %v9396_v19 }
 0xada   : > { %5284 = vmatpush.bf16.msrb.mxu3 %v9207_v34  ;;  %5331 = vmatpush.bf16.msra.mxu2 %v12634_v49 }
 0xadb   : > { %v5023_v17 = vpop.f32.mrf.mxu0 }
 0xadc   : > { %5296 = vmatpush.bf16.msrb.mxu1 %v9227_v38  ;;  %v9389_v38 = vor.u32 %v10576_v6, %v9388_v59  ;;  %v10589_v6 = vld [vmem:[%s14785_s7 + $0x534] sm:$0xf0] }
 0xadd   : > { %4993 = vmatmul.bf16.vlgmr.msra.gmra.mxu3 %v4873_v7  ;;  %v10580_v7 = vld [vmem:[%s14785_s7 + $0x4f4] sm:$0xf0] }
 0xade   : > { %5285 = vmatpush.bf16.msrb.mxu3 %v9199_v55  ;;  %v9405_v34 = vor.u32 %v10580_v7, %v9404_v24  ;;  %v9295_v55 = vld [vmem:[%s14785_s7 + $0x448] sm:$0xf0]  ;;  %v9349_v24 = vor.u32 %v10566_v50, %v9348_v28  ;;  %v9475_v7 = vld [vmem:[%s14785_s7 + $0x550] sm:$0xf]  ;;  %v9390_v28 = vld [vmem:[%s14785_s7 + $0x4d8] sm:$0xf0] }
 0xadf   : > { %v10564_v50 = vld [vmem:[%s14784_s6 + $0x48] sm:$0xff] }
 0xae0   : > { %5297 = vmatpush.bf16.msrb.mxu1 %v9219_v16  ;;  %v9381_v16 = vor.u32 %v10574_v62, %v9380_v15 }
 0xae2   : > { %5286 = vmatpush.bf16.msrb.mxu3 %v9191_v41  ;;  %v9290_v41 = vor.u32 %v10554_v36, %v9287_v40 }
 0xae3   : > { %v5025_v27 = vpop.f32.mrf.mxu0 }
 0xae4   : > { %v5028_v8 = vpack.c.bf16 %v5025_v27, %v5023_v17  ;;  %5298 = vmatpush.bf16.msrb.mxu1 %v9211_v39  ;;  %v9298_v17 = vor.u32 %v10556_v0, %v9295_v55  ;;  %v9373_v27 = vor.u32 %v10572_v37, %v9372_v56  ;;  %v10570_v39 = vld [vmem:[%s14785_s7 + $0x4a4] sm:$0xf0]  ;;  %v4367_v0 = vadd.f32 %v13404_v31, %v13122_v60  ;;  %v9451_v60 = vld [vmem:[%s14785_s7 + $0x520] sm:$0xf] }
 0xae5   : > { %v10587_v31 = vld [vmem:[%s14785_s7 + $0x524] sm:$0xf0]  ;;  %v9435_v37 = vld [vmem:[%s14785_s7 + $0x500] sm:$0xf] }
 0xae6   : > { %5287 = vmatpush.bf16.msrb.mxu3 %v9183_v45  ;;  %5134 = vmatmul.bf16.vlgmr.msrb.gmra.mxu2 %v5028_v8  ;;  %v9282_v45 = vor.u32 %v10552_v4, %v9279_v10 }
 0xae7   : > { %5148 = vmatmul.bf16.vlgmr.msra.gmra.mxu0 %v5028_v8  ;;  %9155 = vmatmul.msk.bf16.vlgmr.msra.gmra.mxu1 %vm723_vm0, %v10530_v14  ;;  %v10550_v14 = vld [vmem:[%s14785_s7 + $0x414] sm:$0xf]  ;;  %v9364_v8 = vld [vmem:[%s14785_s7 + $0x4a0] sm:$0xf] }
 0xae8   : > { %5638 = vmatpush.bf16.msra.mxu0 %v12698_v33  ;;  %5450 = vmatpush.bf16.msrb.mxu2 %v9322_v42  ;;  %v9274_v54 = vor.u32 %v10550_v14, %v9271_v22  ;;  %v9365_v2 = vor.u32 %v10570_v39, %v9364_v8  ;;  %v9263_v42 = vld [vmem:[%s14785_s7 + $0x408] sm:$0xf0] }
 0xae9   : > { %5299 = vmatpush.bf16.msrb.mxu1 %v9203_v23  ;;  %v9492_v23 = vor.u32 %v10597_v11, %v9491_v12  ;;  %v10579_v11 = vld [vmem:[%s14785_s7 + $0x4f4] sm:$0xf] }
 0xaea   : > { %5288 = vmatpush.bf16.msrb.mxu3 %v9175_v21  ;;  %v9266_v21 = vor.u32 %v10548_v29, %v9263_v42 }
 0xaec   : > { %5639 = vmatpush.bf16.msra.mxu0 %v12690_v26  ;;  %5451 = vmatpush.bf16.msrb.mxu2 %v9314_v52  ;;  %v10568_v52 = vld [vmem:[%s14785_s7 + $0x494] sm:$0xf0] }
 0xaed   : > { %5300 = vmatpush.bf16.msrb.mxu1 %v9195_v46  ;;  %v9357_v46 = vor.u32 %v10568_v52, %v9356_v30  ;;  %v10577_v30 = vld [vmem:[%s14785_s7 + $0x4e4] sm:$0xf] }
 0xaee   : > { %5483 = vmatpush.bf16.msra.mxu3 %v12698_v33 }
 0xaf0   : > { %5640 = vmatpush.bf16.msra.mxu0 %v12675_v32  ;;  %5452 = vmatpush.bf16.msrb.mxu2 %v9306_v5 }
 0xaf1   : > { %5301 = vmatpush.bf16.msrb.mxu1 %v9187_v25  ;;  %v9484_v25 = vor.u32 %v10595_v57, %v9483_v47 }
 0xaf2   : > { %5484 = vmatpush.bf16.msra.mxu3 %v12690_v26 }
 0xaf4   : > { %5641 = vmatpush.bf16.msra.mxu0 %v12634_v49  ;;  %5453 = vmatpush.bf16.msrb.mxu2 %v9298_v17  ;;  %v4536_v17 = vadd.f32 %v13428_v48, %v4367_v0  ;;  %v9452_v48 = vor.u32 %v10587_v31, %v9451_v60  ;;  %v9485_v0 = vld [vmem:[%s14785_s7 + $0x568] sm:$0xf0]  ;;  %v10581_v31 = vld [vmem:[%s14784_s6 + $0x50] sm:$0xff] }
 0xaf5   : > { %5302 = vmatpush.bf16.msrb.mxu1 %v9179_v35  ;;  %v4534_v35 = vadd.f32 %v13412_v51, %v13115_v63  ;;  %v9467_v63 = vld [vmem:[%s14785_s7 + $0x540] sm:$0xf]  ;;  %v10591_v51 = vld [vmem:[%s14785_s7 + $0x544] sm:$0xf0] }
 0xaf6   : > { %5485 = vmatpush.bf16.msra.mxu3 %v12675_v32  ;;  %9242 = vmatmul.msk.bf16.vlgmr.msra.gmra.mxu2 %vm723_vm0, %v10547_v18  ;;  %v13675_v18 = vpop.f32.mrf.mxu1 }
 0xaf7   : > { %v4689_v44 = vadd.f32 %v13431_v13, %v4534_v35  ;;  %v9468_v13 = vor.u32 %v10591_v51, %v9467_v63  ;;  %v10594_v51 = vld [vmem:[%s14785_s7 + $0x564] sm:$0xf] }
 0xaf8   : > { %5454 = vmatpush.bf16.msrb.mxu2 %v9290_v41 }
 0xaf9   : > { %5591 = vmatpush.bf16.msra.mxu1 %v9405_v34  ;;  %v10593_v34 = vld [vmem:[%s14785_s7 + $0x554] sm:$0xf0] }
 0xafa   : > { %5486 = vmatpush.bf16.msra.mxu3 %v12634_v49  ;;  %v9476_v43 = vor.u32 %v10593_v34, %v9475_v7  ;;  %v9382_v7 = vld [vmem:[%s14785_s7 + $0x4c8] sm:$0xf0]  ;;  %v10596_v34 = vld [vmem:[%s14785_s7 + $0x574] sm:$0xf] }
 0xafc   : > { %5455 = vmatpush.bf16.msrb.mxu2 %v9282_v45 }
 0xafd   : > { %5592 = vmatpush.bf16.msra.mxu1 %v9397_v58 }
 0xb00   : > { %5456 = vmatpush.bf16.msrb.mxu2 %v9274_v54 }
 0xb01   : > { %5593 = vmatpush.bf16.msra.mxu1 %v9389_v38  ;;  %v4691_v38 = vadd.f32 %v13447_v20, %v4536_v17  ;;  %v9443_v20 = vld [vmem:[%s14785_s7 + $0x510] sm:$0xf]  ;;  %v9366_v17 = vld [vmem:[%s14785_s7 + $0x4a8] sm:$0xf0] }
 0xb04   : > { %5457 = vmatpush.bf16.msrb.mxu2 %v9266_v21 }
 0xb05   : > { %5594 = vmatpush.bf16.msra.mxu1 %v9381_v16  ;;  %v10585_v16 = vld [vmem:[%s14785_s7 + $0x514] sm:$0xf0] }
 0xb06   : > { %v9444_v4 = vor.u32 %v10585_v16, %v9443_v20  ;;  %v9469_v16 = vld [vmem:[%s14785_s7 + $0x548] sm:$0xf0] }
 0xb08   : > { %5746 = vmatpush.bf16.msra.mxu2 %v9492_v23  ;;  %v9406_v23 = vld [vmem:[%s14785_s7 + $0x4f8] sm:$0xf0] }
 0xb09   : > { %5595 = vmatpush.bf16.msra.mxu1 %v9373_v27  ;;  %v10583_v27 = vld [vmem:[%s14785_s7 + $0x504] sm:$0xf0]  ;;  %v9409_v52 = vor.u32 %v10579_v11, %v9406_v23  ;;  %v9562_v11 = vld [vmem:[%s14785_s7 + $0x5d0] sm:$0xf] }
 0xb0a   : > { %v9436_v14 = vor.u32 %v10583_v27, %v9435_v37  ;;  %v10588_v27 = vld [vmem:[%s14785_s7 + $0x534] sm:$0xf] }
 0xb0c   : > { %5747 = vmatpush.bf16.msra.mxu2 %v9484_v25  ;;  %v10575_v25 = vld [vmem:[%s14785_s7 + $0x4d4] sm:$0xf] }
 0xb0d   : > { %5596 = vmatpush.bf16.msra.mxu1 %v9365_v2  ;;  %v9393_v35 = vor.u32 %v10575_v25, %v9390_v28  ;;  %v9554_v25 = vld [vmem:[%s14785_s7 + $0x5c0] sm:$0xf]  ;;  %v10608_v28 = vld [vmem:[%s14785_s7 + $0x5c4] sm:$0xf0] }
 0xb10   : > { %5748 = vmatpush.bf16.msra.mxu2 %v9476_v43 }
 0xb11   : > { %5597 = vmatpush.bf16.msra.mxu1 %v9357_v46  ;;  %v9398_v46 = vld [vmem:[%s14785_s7 + $0x4e8] sm:$0xf0] }
 0xb12   : > { %v9401_v47 = vor.u32 %v10577_v30, %v9398_v46  ;;  %v10610_v30 = vld [vmem:[%s14785_s7 + $0x5d4] sm:$0xf0]  ;;  %v10584_v46 = vld [vmem:[%s14785_s7 + $0x514] sm:$0xf] }
 0xb14   : > { %5749 = vmatpush.bf16.msra.mxu2 %v9468_v13 }
 0xb15   : > { %5598 = vmatpush.bf16.msra.mxu1 %v9349_v24  ;;  %v10573_v24 = vld [vmem:[%s14785_s7 + $0x4c4] sm:$0xf] }
 0xb50   : > { %v4825_v5 = vpop.f32.mrf.mxu3  ;;  %v4839_v19 = vpop.f32.mrf.mxu2 }
 0xb51   : > { %v4844_v61 = vadd.f32 %v4825_v5, %v4689_v44  ;;  %v4845_v58 = vadd.f32 %v4839_v19, %v13433_v3  ;;  %v9459_v3 = vld [vmem:[%s14785_s7 + $0x530] sm:$0xf]  ;;  %v9493_v44 = vld [vmem:[%s14785_s7 + $0x578] sm:$0xf0]  ;;  %v9385_v5 = vor.u32 %v10573_v24, %v9382_v7  ;;  %v9437_v24 = vld [vmem:[%s14785_s7 + $0x508] sm:$0xf0] }
 0xb52   : > { %v9460_v36 = vor.u32 %v10589_v6, %v9459_v3  ;;  %v9496_v63 = vor.u32 %v10596_v34, %v9493_v44  ;;  %v10592_v3 = vld [vmem:[%s14785_s7 + $0x554] sm:$0xf]  ;;  %v9477_v6 = vld [vmem:[%s14785_s7 + $0x558] sm:$0xf0]  ;;  %v9546_v7 = vld [vmem:[%s14785_s7 + $0x5b0] sm:$0xf] }
 0xb53   : > { %v10606_v34 = vld [vmem:[%s14785_s7 + $0x5b4] sm:$0xf0]  ;;  %v9665_v44 = vld [vmem:[%s14785_s7 + $0x670] sm:$0xf] }
 0xb54   : > { %v4980_v55 = vpop.f32.mrf.mxu1  ;;  %5750 = vmatpush.bf16.msra.mxu2 %v9460_v36  ;;  %v10567_v36 = vld [vmem:[%s14785_s7 + $0x494] sm:$0xf] }
 0xb55   : > { %v4999_v59 = vadd.f32 %v4980_v55, %v4844_v61  ;;  %v10571_v61 = vld [vmem:[%s14785_s7 + $0x4b4] sm:$0xf]  ;;  %v10569_v55 = vld [vmem:[%s14785_s7 + $0x4a4] sm:$0xf] }
 0xb58   : > { %v4827_v40 = vpop.f32.mrf.mxu3  ;;  %5751 = vmatpush.bf16.msra.mxu2 %v9452_v48  ;;  %v13721_v45 = vpop.f32.mrf.mxu2  ;;  %v10565_v48 = vld [vmem:[%s14785_s7 + $0x484] sm:$0xf] }
 0xb59   : > { %v4846_v41 = vadd.f32 %v4827_v40, %v4691_v38  ;;  %v9369_v38 = vor.u32 %v10569_v55, %v9366_v17  ;;  %v9358_v40 = vld [vmem:[%s14785_s7 + $0x498] sm:$0xf0]  ;;  %v9530_v17 = vld [vmem:[%s14785_s7 + $0x590] sm:$0xf] }
 0xb5a   : > { %v9361_v60 = vor.u32 %v10567_v36, %v9358_v40 }
 0xb5c   : > { %v4982_v15 = vpop.f32.mrf.mxu1  ;;  %5752 = vmatpush.bf16.msra.mxu2 %v9444_v4  ;;  %v9578_v4 = vld [vmem:[%s14785_s7 + $0x5f0] sm:$0xf] }
 0xb5d   : > { %v5001_v62 = vadd.f32 %v4982_v15, %v4846_v41  ;;  %v9480_v41 = vor.u32 %v10592_v3, %v9477_v6  ;;  %v9350_v15 = vld [vmem:[%s14785_s7 + $0x488] sm:$0xf0]  ;;  %v9649_v3 = vld [vmem:[%s14785_s7 + $0x650] sm:$0xf] }
 0xb5e   : > { %v9353_v20 = vor.u32 %v10565_v48, %v9350_v15  ;;  %v10625_v15 = vld [vmem:[%s14785_s7 + $0x644] sm:$0xf0] }
 0xb60   : > { %v4994_v10 = vpop.f32.mrf.mxu3  ;;  %5753 = vmatpush.bf16.msra.mxu2 %v9436_v14  ;;  %v9461_v14 = vld [vmem:[%s14785_s7 + $0x538] sm:$0xf0] }
 0xb61   : > { %v5000_v56 = vadd.f32 %v4994_v10, %v4845_v58  ;;  %v9374_v58 = vld [vmem:[%s14785_s7 + $0x4b8] sm:$0xf0]  ;;  %v10614_v10 = vld [vmem:[%s14785_s7 + $0x5f4] sm:$0xf0] }
 0xb62   : > { %v9377_v13 = vor.u32 %v10571_v61, %v9374_v58  ;;  %v9579_v37 = vor.u32 %v10614_v10, %v9578_v4  ;;  %v9538_v58 = vld [vmem:[%s14785_s7 + $0x5a0] sm:$0xf]  ;;  %v9633_v4 = vld [vmem:[%s14785_s7 + $0x630] sm:$0xf]  ;;  %v10623_v10 = vld [vmem:[%s14785_s7 + $0x634] sm:$0xf0] }
 0xb64   : > { %v5149_v22 = vpop.f32.mrf.mxu0  ;;  %v5178_v54 = vpop.f32.mrf.mxu1 }
 0xb65   : > { %v13729_v8 = vadd.f32 %v5149_v22, %v5000_v56  ;;  %v9464_v22 = vor.u32 %v10588_v27, %v9461_v14  ;;  %v9625_v27 = vld [vmem:[%s14785_s7 + $0x620] sm:$0xf] }
 0xb68   : > { %v13907_v40 = vpop.f32.mrf.mxu3 }
 0xb69   : > { %v5135_v39 = vpop.f32.mrf.mxu2 }
 0xb6a   : > { %v13731_v2 = vadd.f32 %v5135_v39, %v4999_v59  ;;  %v9488_v59 = vor.u32 %v10594_v51, %v9485_v0  ;;  %v10612_v39 = vld [vmem:[%s14785_s7 + $0x5e4] sm:$0xf0]  ;;  %v9657_v51 = vld [vmem:[%s14785_s7 + $0x660] sm:$0xf] }
 0xb6c   : > { %v5180_v29 = vpop.f32.mrf.mxu1 }
 0xb6d   : > { %v5183_v42 = vpack.c.bf16 %v5180_v29, %v5178_v54  ;;  %v9570_v54 = vld [vmem:[%s14785_s7 + $0x5e0] sm:$0xf] }
 0xb6e   : > { %v9571_v29 = vor.u32 %v10612_v39, %v9570_v54  ;;  %v9617_v54 = vld [vmem:[%s14785_s7 + $0x610] sm:$0xf]  ;;  %v10619_v39 = vld [vmem:[%s14785_s7 + $0x614] sm:$0xf0] }
 0xb6f   : > { %5289 = vmatmul.bf16.vlgmr.msrb.gmra.mxu3 %v5183_v42  ;;  %5303 = vmatmul.bf16.vlgmr.msrb.gmra.mxu1 %v5183_v42  ;;  %v10586_v42 = vld [vmem:[%s14785_s7 + $0x524] sm:$0xf] }
 0xb70   : > { %5793 = vmatpush.bf16.msrb.mxu1 %v12698_v33  ;;  %5605 = vmatpush.bf16.msrb.mxu3 %v9409_v52  ;;  %v9563_v52 = vor.u32 %v10610_v30, %v9562_v11  ;;  %v9609_v11 = vld [vmem:[%s14785_s7 + $0x600] sm:$0xf] }
 0xb71   : > { %v5137_v21 = vpop.f32.mrf.mxu2 }
 0xb72   : > { %v13734_v12 = vadd.f32 %v5137_v21, %v5001_v62  ;;  %v10590_v62 = vld [vmem:[%s14785_s7 + $0x544] sm:$0xf]  ;;  %v9453_v21 = vld [vmem:[%s14785_s7 + $0x528] sm:$0xf0] }
 0xb73   : > { %v9472_v56 = vor.u32 %v10590_v62, %v9469_v16  ;;  %v9456_v23 = vor.u32 %v10586_v42, %v9453_v21  ;;  %v13941_v42 = vpop.f32.mrf.mxu0 }
 0xb74   : > { %5794 = vmatpush.bf16.msrb.mxu1 %v12690_v26  ;;  %5606 = vmatpush.bf16.msrb.mxu3 %v9401_v47  ;;  %v9445_v47 = vld [vmem:[%s14785_s7 + $0x518] sm:$0xf0] }
 0xb78   : > { %5795 = vmatpush.bf16.msrb.mxu1 %v12675_v32  ;;  %5607 = vmatpush.bf16.msrb.mxu3 %v9393_v35  ;;  %v10582_v35 = vld [vmem:[%s14785_s7 + $0x504] sm:$0xf] }
 0xb79   : > { %v5333_v57 = vpop.f32.mrf.mxu2 }
 0xb7c   : > { %5796 = vmatpush.bf16.msrb.mxu1 %v12634_v49  ;;  %5608 = vmatpush.bf16.msrb.mxu3 %v9385_v5  ;;  %v9440_v5 = vor.u32 %v10582_v35, %v9437_v24 }
 0xb7f   : > { %9329 = vmatmul.msk.bf16.vlgmr.msra.gmra.mxu3 %vm723_vm0, %v10564_v50  ;;  %v9555_v50 = vor.u32 %v10608_v28, %v9554_v25 }
 0xb80   : > { %5609 = vmatpush.bf16.msrb.mxu3 %v9377_v13  ;;  %v10629_v13 = vld [vmem:[%s14785_s7 + $0x664] sm:$0xf0] }
 0xb81   : > { %v5335_v43 = vpop.f32.mrf.mxu2  ;;  %v9658_v55 = vor.u32 %v10629_v13, %v9657_v51  ;;  %v10607_v51 = vld [vmem:[%s14785_s7 + $0x5c4] sm:$0xf] }
 0xb82   : > { %v5338_v19 = vpack.c.bf16 %v5335_v43, %v5333_v57  ;;  %v9448_v57 = vor.u32 %v10584_v46, %v9445_v47  ;;  %v10631_v43 = vld [vmem:[%s14785_s7 + $0x674] sm:$0xf0] }
 0xb83   : > { %v9666_v61 = vor.u32 %v10631_v43, %v9665_v44  ;;  %v9572_v43 = vld [vmem:[%s14785_s7 + $0x5e8] sm:$0xf0] }
 0xb84   : > { %5444 = vmatmul.bf16.vlgmr.msrb.gmra.mxu0 %v5338_v19  ;;  %5458 = vmatmul.bf16.vlgmr.msrb.gmra.mxu2 %v5338_v19  ;;  %v9547_v19 = vor.u32 %v10606_v34, %v9546_v7  ;;  %v10613_v7 = vld [vmem:[%s14785_s7 + $0x5f4] sm:$0xf]  ;;  %v10611_v34 = vld [vmem:[%s14785_s7 + $0x5e4] sm:$0xf] }
 0xb85   : > { %5948 = vmatpush.bf16.msrb.mxu2 %v12698_v33  ;;  %5760 = vmatpush.bf16.msrb.mxu0 %v9496_v63  ;;  %v10604_v63 = vld [vmem:[%s14785_s7 + $0x5a4] sm:$0xf0] }
 0xb86   : > { %5610 = vmatpush.bf16.msrb.mxu3 %v9369_v38  ;;  %v9539_v0 = vor.u32 %v10604_v63, %v9538_v58  ;;  %v10627_v38 = vld [vmem:[%s14785_s7 + $0x654] sm:$0xf0] }
 0xb87   : > { %v9650_v36 = vor.u32 %v10627_v38, %v9649_v3  ;;  %v10598_v3 = vld [vmem:[%s14784_s6 + $0x58] sm:$0xff] }
 0xb89   : > { %5949 = vmatpush.bf16.msrb.mxu2 %v12690_v26  ;;  %5761 = vmatpush.bf16.msrb.mxu0 %v9488_v59  ;;  %v10602_v59 = vld [vmem:[%s14785_s7 + $0x594] sm:$0xf0] }
 0xb8a   : > { %5611 = vmatpush.bf16.msrb.mxu3 %v9361_v60  ;;  %v9531_v6 = vor.u32 %v10602_v59, %v9530_v17  ;;  %v10600_v60 = vld [vmem:[%s14785_s7 + $0x584] sm:$0xf0]  ;;  %v9548_v17 = vld [vmem:[%s14785_s7 + $0x5b8] sm:$0xf0] }
 0xb8d   : > { %5950 = vmatpush.bf16.msrb.mxu2 %v12675_v32  ;;  %5762 = vmatpush.bf16.msrb.mxu0 %v9480_v41  ;;  %v9522_v41 = vld [vmem:[%s14785_s7 + $0x580] sm:$0xf] }
 0xb8e   : > { %5612 = vmatpush.bf16.msrb.mxu3 %v9353_v20  ;;  %v9523_v48 = vor.u32 %v10600_v60, %v9522_v41  ;;  %v9540_v41 = vld [vmem:[%s14785_s7 + $0x5a8] sm:$0xf0] }
 0xb91   : > { %5951 = vmatpush.bf16.msrb.mxu2 %v12634_v49  ;;  %5763 = vmatpush.bf16.msrb.mxu0 %v9472_v56  ;;  %v9634_v56 = vor.u32 %v10623_v10, %v9633_v4  ;;  %v10648_v4 = vld [vmem:[%s14785_s7 + $0x6f4] sm:$0xf0] }
 0xb92   : > { %5901 = vmatpush.bf16.msra.mxu3 %v9579_v37 }
 0xb94   : > { %9416 = vmatmul.msk.bf16.vlgmr.msra.gmra.mxu0 %vm723_vm0, %v10581_v31  ;;  %v9641_v31 = vld [vmem:[%s14785_s7 + $0x640] sm:$0xf] }
 0xb95   : > { %5764 = vmatpush.bf16.msrb.mxu0 %v9464_v22  ;;  %v9642_v20 = vor.u32 %v10625_v15, %v9641_v31  ;;  %v10601_v31 = vld [vmem:[%s14785_s7 + $0x594] sm:$0xf] }
 0xb96   : > { %5902 = vmatpush.bf16.msra.mxu3 %v9571_v29  ;;  %v9618_v29 = vor.u32 %v10619_v39, %v9617_v54  ;;  %v10644_v54 = vld [vmem:[%s14785_s7 + $0x6d4] sm:$0xf0] }
 0xb99   : > { %5765 = vmatpush.bf16.msrb.mxu0 %v9456_v23 }
 0xb9a   : > { %5903 = vmatpush.bf16.msra.mxu3 %v9563_v52 }
 0xb9d   : > { %5766 = vmatpush.bf16.msrb.mxu0 %v9448_v57 }
 0xb9e   : > { %5904 = vmatpush.bf16.msra.mxu3 %v9555_v50 }
 0xba1   : > { %5767 = vmatpush.bf16.msrb.mxu0 %v9440_v5  ;;  %v9575_v5 = vor.u32 %v10611_v34, %v9572_v43  ;;  %v9704_v34 = vld [vmem:[%s14785_s7 + $0x690] sm:$0xf]  ;;  %v10636_v43 = vld [vmem:[%s14785_s7 + $0x694] sm:$0xf0] }
 0xba2   : > { %5905 = vmatpush.bf16.msra.mxu3 %v9547_v19  ;;  %v10609_v19 = vld [vmem:[%s14785_s7 + $0x5d4] sm:$0xf] }
 0xba5   : > { %6056 = vmatpush.bf16.msra.mxu0 %v9666_v61  ;;  %v9564_v61 = vld [vmem:[%s14785_s7 + $0x5d8] sm:$0xf0] }
 0xba6   : > { %5906 = vmatpush.bf16.msra.mxu3 %v9539_v0  ;;  %v9567_v63 = vor.u32 %v10609_v19, %v9564_v61  ;;  %v9556_v0 = vld [vmem:[%s14785_s7 + $0x5c8] sm:$0xf0]  ;;  %v10626_v61 = vld [vmem:[%s14785_s7 + $0x654] sm:$0xf] }
 0xba7   : > { %v9559_v13 = vor.u32 %v10607_v51, %v9556_v0  ;;  %v10634_v0 = vld [vmem:[%s14785_s7 + $0x684] sm:$0xf0] }
 0xba9   : > { %6057 = vmatpush.bf16.msra.mxu0 %v9658_v55  ;;  %v10605_v55 = vld [vmem:[%s14785_s7 + $0x5b4] sm:$0xf] }
 0xbaa   : > { %5907 = vmatpush.bf16.msra.mxu3 %v9531_v6  ;;  %v9551_v38 = vor.u32 %v10605_v55, %v9548_v17  ;;  %v10624_v55 = vld [vmem:[%s14785_s7 + $0x644] sm:$0xf]  ;;  %v9643_v17 = vld [vmem:[%s14785_s7 + $0x648] sm:$0xf0] }
 0xbad   : > { %6058 = vmatpush.bf16.msra.mxu0 %v9650_v36  ;;  %v10603_v36 = vld [vmem:[%s14785_s7 + $0x5a4] sm:$0xf] }
 0xbae   : > { %5908 = vmatpush.bf16.msra.mxu3 %v9523_v48  ;;  %v9543_v60 = vor.u32 %v10603_v36, %v9540_v41  ;;  %v9532_v48 = vld [vmem:[%s14785_s7 + $0x598] sm:$0xf0] }
 0xbaf   : > { %v9535_v15 = vor.u32 %v10601_v31, %v9532_v48  ;;  %v9627_v31 = vld [vmem:[%s14785_s7 + $0x628] sm:$0xf0] }
 0xbb1   : > { %6059 = vmatpush.bf16.msra.mxu0 %v9642_v20  ;;  %v9524_v20 = vld [vmem:[%s14785_s7 + $0x588] sm:$0xf0] }
 0xbb5   : > { %6060 = vmatpush.bf16.msra.mxu0 %v9634_v56  ;;  %v10615_v56 = vld [vmem:[%s14784_s6 + $0x60] sm:$0xff] }
 0xbec   : > { %v5304_v62 = vpop.f32.mrf.mxu1 }
 0xbed   : > { %v5310_v16 = vadd.f32 %v5304_v62, %v13729_v8  ;;  %v10621_v8 = vld [vmem:[%s14785_s7 + $0x624] sm:$0xf0]  ;;  %v10599_v62 = vld [vmem:[%s14785_s7 + $0x584] sm:$0xf] }
 0xbee   : > { %v9626_v22 = vor.u32 %v10621_v8, %v9625_v27  ;;  %v9527_v10 = vor.u32 %v10599_v62, %v9524_v20  ;;  %v9744_v27 = vld [vmem:[%s14785_s7 + $0x6e0] sm:$0xf]  ;;  %v10646_v8 = vld [vmem:[%s14785_s7 + $0x6e4] sm:$0xf0] }
 0xbf0   : > { %6061 = vmatpush.bf16.msra.mxu0 %v9626_v22  ;;  %v9736_v22 = vld [vmem:[%s14785_s7 + $0x6d0] sm:$0xf] }
 0xbf1   : > { %v9737_v39 = vor.u32 %v10644_v54, %v9736_v22 }
 0xbf2   : > { %v5290_v37 = vpop.f32.mrf.mxu3 }
 0xbf3   : > { %v5309_v14 = vadd.f32 %v5290_v37, %v13731_v2  ;;  %v10617_v2 = vld [vmem:[%s14785_s7 + $0x604] sm:$0xf0] }
 0xbf4   : > { %6062 = vmatpush.bf16.msra.mxu0 %v9618_v29  ;;  %v9610_v30 = vor.u32 %v10617_v2, %v9609_v11  ;;  %v9728_v29 = vld [vmem:[%s14785_s7 + $0x6c0] sm:$0xf]  ;;  %v9720_v2 = vld [vmem:[%s14785_s7 + $0x6b0] sm:$0xf]  ;;  %v14074_v19 = vpop.f32.mrf.mxu1 }
 0xbf8   : > { %6063 = vmatpush.bf16.msra.mxu0 %v9610_v30 }
 0xbfa   : > { %v5292_v21 = vpop.f32.mrf.mxu3 }
 0xbfb   : > { %v5311_v23 = vadd.f32 %v5292_v21, %v13734_v12  ;;  %v9580_v12 = vld [vmem:[%s14785_s7 + $0x5f8] sm:$0xf0]  ;;  %v10642_v21 = vld [vmem:[%s14785_s7 + $0x6c4] sm:$0xf0] }
 0xbfc   : > { %v9583_v44 = vor.u32 %v10613_v7, %v9580_v12  ;;  %v9729_v11 = vor.u32 %v10642_v21, %v9728_v29  ;;  %v10628_v7 = vld [vmem:[%s14785_s7 + $0x664] sm:$0xf]  ;;  %v9659_v12 = vld [vmem:[%s14785_s7 + $0x668] sm:$0xf0] }
 0xc01   : > { %v5445_v52 = vpop.f32.mrf.mxu0 }
 0xc02   : > { %v13950_v46 = vadd.f32 %v5445_v52, %v5309_v14  ;;  %v5488_v47 = vpop.f32.mrf.mxu3  ;;  %v9745_v14 = vor.u32 %v10646_v8, %v9744_v27  ;;  %v10630_v52 = vld [vmem:[%s14785_s7 + $0x674] sm:$0xf] }
 0xc07   : > { %v5459_v57 = vpop.f32.mrf.mxu2 }
 0xc08   : > { %v13952_v25 = vadd.f32 %v5459_v57, %v5310_v16  ;;  %v9752_v16 = vld [vmem:[%s14785_s7 + $0x6f0] sm:$0xf]  ;;  %v9712_v57 = vld [vmem:[%s14785_s7 + $0x6a0] sm:$0xf] }
 0xc09   : > { %v5447_v28 = vpop.f32.mrf.mxu0  ;;  %v9753_v37 = vor.u32 %v10648_v4, %v9752_v16  ;;  %v9619_v16 = vld [vmem:[%s14785_s7 + $0x618] sm:$0xf0] }
 0xc0a   : > { %v13954_v50 = vadd.f32 %v5447_v28, %v5311_v23  ;;  %v5490_v35 = vpop.f32.mrf.mxu3  ;;  %v10640_v23 = vld [vmem:[%s14785_s7 + $0x6b4] sm:$0xf0] }
 0xc0b   : > { %v5493_v24 = vpack.c.bf16 %v5490_v35, %v5488_v47  ;;  %v9721_v30 = vor.u32 %v10640_v23, %v9720_v2  ;;  %v9667_v47 = vld [vmem:[%s14785_s7 + $0x678] sm:$0xf0]  ;;  %v10638_v35 = vld [vmem:[%s14785_s7 + $0x6a4] sm:$0xf0] }
 0xc0c   : > { %v9670_v28 = vor.u32 %v10630_v52, %v9667_v47  ;;  %v10632_v23 = vld [vmem:[%s14784_s6 + $0x68] sm:$0xff]  ;;  %v10645_v47 = vld [vmem:[%s14785_s7 + $0x6e4] sm:$0xf] }
 0xc0d   : > { %5599 = vmatmul.bf16.vlgmr.msra.gmra.mxu1 %v5493_v24  ;;  %5613 = vmatmul.bf16.vlgmr.msrb.gmra.mxu3 %v5493_v24  ;;  %v9713_v24 = vor.u32 %v10638_v35, %v9712_v57  ;;  %v9746_v57 = vld [vmem:[%s14785_s7 + $0x6e8] sm:$0xf0]  ;;  %v10643_v35 = vld [vmem:[%s14785_s7 + $0x6d4] sm:$0xf] }
 0xc0e   : > { %6103 = vmatpush.bf16.msrb.mxu3 %v12698_v33  ;;  %5915 = vmatpush.bf16.msra.mxu1 %v9583_v44  ;;  %v9662_v44 = vor.u32 %v10628_v7, %v9659_v12  ;;  %v10641_v12 = vld [vmem:[%s14785_s7 + $0x6c4] sm:$0xf] }
 0xc11   : > { %v5643_v58 = vpop.f32.mrf.mxu0 }
 0xc12   : > { %6104 = vmatpush.bf16.msrb.mxu3 %v12690_v26  ;;  %5916 = vmatpush.bf16.msra.mxu1 %v9575_v5  ;;  %v9705_v5 = vor.u32 %v10636_v43, %v9704_v34  ;;  %v9730_v34 = vld [vmem:[%s14785_s7 + $0x6c8] sm:$0xf0]  ;;  %v10639_v43 = vld [vmem:[%s14785_s7 + $0x6b4] sm:$0xf] }
 0xc16   : > { %6105 = vmatpush.bf16.msrb.mxu3 %v12675_v32  ;;  %5917 = vmatpush.bf16.msra.mxu1 %v9567_v63  ;;  %v9696_v63 = vld [vmem:[%s14785_s7 + $0x680] sm:$0xf] }
 0xc19   : > { %v5645_v59 = vpop.f32.mrf.mxu0 }
 0xc1a   : > { %6106 = vmatpush.bf16.msrb.mxu3 %v12634_v49  ;;  %v5648_v6 = vpack.c.bf16 %v5645_v59, %v5643_v58  ;;  %5918 = vmatpush.bf16.msra.mxu1 %v9559_v13  ;;  %v9651_v58 = vld [vmem:[%s14785_s7 + $0x658] sm:$0xf0]  ;;  %v9697_v13 = vor.u32 %v10634_v0, %v9696_v63  ;;  %v9646_v59 = vor.u32 %v10624_v55, %v9643_v17  ;;  %v10665_v63 = vld [vmem:[%s14785_s7 + $0x774] sm:$0xf0]  ;;  %v10637_v17 = vld [vmem:[%s14785_s7 + $0x6a4] sm:$0xf] }
 0xc1b   : > { %v9654_v51 = vor.u32 %v10626_v61, %v9651_v58  ;;  %v9839_v61 = vld [vmem:[%s14785_s7 + $0x770] sm:$0xf]  ;;  %v9841_v0 = vld [vmem:[%s14785_s7 + $0x778] sm:$0xf0] }
 0xc1c   : > { %5754 = vmatmul.bf16.vlgmr.msra.gmra.mxu2 %v5648_v6  ;;  %5768 = vmatmul.bf16.vlgmr.msrb.gmra.mxu0 %v5648_v6  ;;  %v10622_v6 = vld [vmem:[%s14785_s7 + $0x634] sm:$0xf] }
 0xc1d   : > { %9503 = vmatmul.msk.bf16.vlgmr.msrb.gmra.mxu1 %vm723_vm0, %v10598_v3  ;;  %6258 = vmatpush.bf16.msrb.mxu0 %v12698_v33 }
 0xc1e   : > { %5919 = vmatpush.bf16.msra.mxu1 %v9551_v38  ;;  %6070 = vmatpush.bf16.msra.mxu2 %v9670_v28  ;;  %v9635_v38 = vld [vmem:[%s14785_s7 + $0x638] sm:$0xf0]  ;;  %v9749_v28 = vor.u32 %v10645_v47, %v9746_v57 }
 0xc1f   : > { %v9638_v41 = vor.u32 %v10622_v6, %v9635_v38  ;;  %v10663_v38 = vld [vmem:[%s14785_s7 + $0x764] sm:$0xf0]  ;;  %v9809_v47 = vld [vmem:[%s14785_s7 + $0x738] sm:$0xf0] }
 0xc21   : > { %6259 = vmatpush.bf16.msrb.mxu0 %v12690_v26 }
 0xc22   : > { %5920 = vmatpush.bf16.msra.mxu1 %v9543_v60  ;;  %6071 = vmatpush.bf16.msra.mxu2 %v9662_v44  ;;  %v10620_v60 = vld [vmem:[%s14785_s7 + $0x624] sm:$0xf]  ;;  %v9733_v44 = vor.u32 %v10641_v12, %v9730_v34  ;;  %v9791_v12 = vld [vmem:[%s14785_s7 + $0x710] sm:$0xf]  ;;  %v10653_v34 = vld [vmem:[%s14785_s7 + $0x714] sm:$0xf0] }
 0xc23   : > { %v9630_v48 = vor.u32 %v10620_v60, %v9627_v31 }
 0xc25   : > { %6260 = vmatpush.bf16.msrb.mxu0 %v12675_v32 }
 0xc26   : > { %5921 = vmatpush.bf16.msra.mxu1 %v9535_v15  ;;  %6072 = vmatpush.bf16.msra.mxu2 %v9654_v51  ;;  %v10664_v51 = vld [vmem:[%s14785_s7 + $0x774] sm:$0xf] }
 0xc27   : > { %v9844_v55 = vor.u32 %v10664_v51, %v9841_v0  ;;  %v9783_v0 = vld [vmem:[%s14785_s7 + $0x700] sm:$0xf] }
 0xc29   : > { %6261 = vmatpush.bf16.msrb.mxu0 %v12634_v49 }
 0xc2a   : > { %5922 = vmatpush.bf16.msra.mxu1 %v9527_v10  ;;  %6073 = vmatpush.bf16.msra.mxu2 %v9646_v59  ;;  %v9714_v59 = vld [vmem:[%s14785_s7 + $0x6a8] sm:$0xf0] }
 0xc2b   : > { %v9717_v6 = vor.u32 %v10637_v17, %v9714_v59  ;;  %v9785_v59 = vld [vmem:[%s14785_s7 + $0x708] sm:$0xf0] }
 0xc2c   : > { %9590 = vmatmul.msk.bf16.vlgmr.msrb.gmra.mxu2 %vm723_vm0, %v10615_v56  ;;  %v10616_v56 = vld [vmem:[%s14785_s7 + $0x604] sm:$0xf] }
 0xc2e   : > { %6211 = vmatpush.bf16.msrb.mxu1 %v9753_v37  ;;  %6074 = vmatpush.bf16.msra.mxu2 %v9638_v41  ;;  %v14121_v37 = vpop.f32.mrf.mxu2  ;;  %v9833_v41 = vld [vmem:[%s14785_s7 + $0x768] sm:$0xf0] }
 0xc32   : > { %6212 = vmatpush.bf16.msrb.mxu1 %v9745_v14  ;;  %6075 = vmatpush.bf16.msra.mxu2 %v9630_v48  ;;  %v10635_v48 = vld [vmem:[%s14785_s7 + $0x694] sm:$0xf] }
 0xc36   : > { %6213 = vmatpush.bf16.msrb.mxu1 %v9737_v39 }
 0xc3a   : > { %6214 = vmatpush.bf16.msrb.mxu1 %v9729_v11 }
 0xc3e   : > { %6215 = vmatpush.bf16.msrb.mxu1 %v9721_v30 }
 0xc42   : > { %6216 = vmatpush.bf16.msrb.mxu1 %v9713_v24  ;;  %v9738_v24 = vld [vmem:[%s14785_s7 + $0x6d8] sm:$0xf0] }
 0xc43   : > { %v9741_v7 = vor.u32 %v10643_v35, %v9738_v24  ;;  %v10655_v35 = vld [vmem:[%s14785_s7 + $0x724] sm:$0xf0] }
 0xc46   : > { %6217 = vmatpush.bf16.msrb.mxu1 %v9705_v5  ;;  %v9722_v5 = vld [vmem:[%s14785_s7 + $0x6b8] sm:$0xf0] }
 0xc47   : > { %v9725_v58 = vor.u32 %v10639_v43, %v9722_v5  ;;  %v10652_v5 = vld [vmem:[%s14785_s7 + $0x714] sm:$0xf] }
 0xc4a   : > { %6218 = vmatpush.bf16.msrb.mxu1 %v9697_v13  ;;  %v9840_v13 = vor.u32 %v10665_v63, %v9839_v61  ;;  %v9793_v61 = vld [vmem:[%s14785_s7 + $0x718] sm:$0xf0]  ;;  %v9792_v63 = vor.u32 %v10653_v34, %v9791_v12  ;;  %v9894_v12 = vld [vmem:[%s14785_s7 + $0x7b0] sm:$0xf]  ;;  %v10674_v34 = vld [vmem:[%s14785_s7 + $0x7b4] sm:$0xf0] }
 0xc4b   : > { %v9796_v51 = vor.u32 %v10652_v5, %v9793_v61  ;;  %v9896_v5 = vld [vmem:[%s14785_s7 + $0x7b8] sm:$0xf0] }
 0xc8a   : > { %v5600_v3 = vpop.f32.mrf.mxu1 }
 0xc8b   : > { %v5619_v36 = vadd.f32 %v5600_v3, %v13950_v46  ;;  %v10618_v46 = vld [vmem:[%s14785_s7 + $0x614] sm:$0xf]  ;;  %v9831_v3 = vld [vmem:[%s14785_s7 + $0x760] sm:$0xf] }
 0xc8c   : > { %v9622_v10 = vor.u32 %v10618_v46, %v9619_v16  ;;  %v9832_v60 = vor.u32 %v10663_v38, %v9831_v3  ;;  %v10661_v46 = vld [vmem:[%s14785_s7 + $0x754] sm:$0xf0]  ;;  %v10660_v16 = vld [vmem:[%s14785_s7 + $0x754] sm:$0xf] }
 0xc8e   : > { %6076 = vmatpush.bf16.msra.mxu2 %v9622_v10 }
 0xc90   : > { %v5614_v15 = vpop.f32.mrf.mxu3 }
 0xc91   : > { %v5620_v62 = vadd.f32 %v5614_v15, %v13952_v25  ;;  %v9611_v25 = vld [vmem:[%s14785_s7 + $0x608] sm:$0xf0]  ;;  %v9706_v15 = vld [vmem:[%s14785_s7 + $0x698] sm:$0xf0] }
 0xc92   : > { %v5602_v20 = vpop.f32.mrf.mxu1  ;;  %v9614_v27 = vor.u32 %v10616_v56, %v9611_v25  ;;  %v10633_v25 = vld [vmem:[%s14785_s7 + $0x684] sm:$0xf] }
 0xc93   : > { %v5621_v4 = vadd.f32 %v5602_v20, %v13954_v50  ;;  %v9709_v20 = vor.u32 %v10635_v48, %v9706_v15 }
 0xc94   : > { %6077 = vmatpush.bf16.msra.mxu2 %v9614_v27  ;;  %v9698_v27 = vld [vmem:[%s14785_s7 + $0x688] sm:$0xf0] }
 0xc98   : > { %6366 = vmatpush.bf16.msrb.mxu2 %v9840_v13  ;;  %v10651_v13 = vld [vmem:[%s14785_s7 + $0x704] sm:$0xf0] }
 0xc99   : > { %v5769_v8 = vpop.f32.mrf.mxu0 }
 0xc9a   : > { %v14123_v14 = vadd.f32 %v5769_v8, %v5620_v62  ;;  %v5798_v22 = vpop.f32.mrf.mxu1  ;;  %v9823_v62 = vld [vmem:[%s14785_s7 + $0x750] sm:$0xf]  ;;  %v9815_v8 = vld [vmem:[%s14785_s7 + $0x740] sm:$0xf] }
 0xc9b   : > { %v9824_v10 = vor.u32 %v10661_v46, %v9823_v62  ;;  %v9928_v62 = vld [vmem:[%s14785_s7 + $0x7f8] sm:$0xf0] }
 0xc9c   : > { %6367 = vmatpush.bf16.msrb.mxu2 %v9832_v60 }
 0xc9f   : > { %v5755_v54 = vpop.f32.mrf.mxu2 }
 0xca0   : > { %v14125_v50 = vadd.f32 %v5755_v54, %v5619_v36  ;;  %v10662_v36 = vld [vmem:[%s14785_s7 + $0x764] sm:$0xf]  ;;  %6368 = vmatpush.bf16.msrb.mxu2 %v9824_v10  ;;  %v10659_v54 = vld [vmem:[%s14785_s7 + $0x744] sm:$0xf0] }
 0xca1   : > { %v9836_v31 = vor.u32 %v10662_v36, %v9833_v41  ;;  %v14288_v17 = vpop.f32.mrf.mxu0  ;;  %v9926_v36 = vld [vmem:[%s14785_s7 + $0x7f0] sm:$0xf]  ;;  %v10682_v41 = vld [vmem:[%s14785_s7 + $0x7f4] sm:$0xf0] }
 0xca2   : > { %v5800_v39 = vpop.f32.mrf.mxu1  ;;  %v9927_v60 = vor.u32 %v10682_v41, %v9926_v36  ;;  %v9870_v41 = vld [vmem:[%s14785_s7 + $0x780] sm:$0xf] }
 0xca3   : > { %v5803_v29 = vpack.c.bf16 %v5800_v39, %v5798_v22  ;;  %v9701_v22 = vor.u32 %v10633_v25, %v9698_v27  ;;  %v10658_v39 = vld [vmem:[%s14785_s7 + $0x744] sm:$0xf]  ;;  %v10666_v27 = vld [vmem:[%s14784_s6 + $0x78] sm:$0xff] }
 0xca5   : > { %5909 = vmatmul.bf16.vlgmr.msra.gmra.mxu3 %v5803_v29  ;;  %5923 = vmatmul.bf16.vlgmr.msra.gmra.mxu1 %v5803_v29  ;;  %v9817_v29 = vld [vmem:[%s14785_s7 + $0x748] sm:$0xf0] }
 0xca6   : > { %6413 = vmatpush.bf16.msra.mxu1 %v12698_v33  ;;  %v10649_v33 = vld [vmem:[%s14784_s6 + $0x70] sm:$0xff] }
 0xca7   : > { %v5757_v21 = vpop.f32.mrf.mxu2 }
 0xca8   : > { %v14128_v11 = vadd.f32 %v5757_v21, %v5621_v4  ;;  %v9825_v4 = vld [vmem:[%s14785_s7 + $0x758] sm:$0xf0]  ;;  %v14237_v21 = vpop.f32.mrf.mxu3 }
 0xca9   : > { %v9828_v56 = vor.u32 %v10660_v16, %v9825_v4 }
 0xcaa   : > { %6414 = vmatpush.bf16.msra.mxu1 %v12690_v26 }
 0xcae   : > { %6415 = vmatpush.bf16.msra.mxu1 %v12675_v32  ;;  %v10647_v32 = vld [vmem:[%s14785_s7 + $0x6f4] sm:$0xf] }
 0xcaf   : > { %v5953_v2 = vpop.f32.mrf.mxu2 }
 0xcb2   : > { %6416 = vmatpush.bf16.msra.mxu1 %v12634_v49  ;;  %v9754_v49 = vld [vmem:[%s14785_s7 + $0x6f8] sm:$0xf0] }
 0xcb3   : > { %v9757_v26 = vor.u32 %v10647_v32, %v9754_v49  ;;  %v10656_v32 = vld [vmem:[%s14785_s7 + $0x734] sm:$0xf] }
 0xcb4   : > { %v9812_v57 = vor.u32 %v10656_v32, %v9809_v47 }
 0xcb5   : > { %9677 = vmatmul.msk.bf16.vlgmr.msrb.gmra.mxu3 %vm723_vm0, %v10632_v23  ;;  %v9820_v23 = vor.u32 %v10658_v39, %v9817_v29  ;;  %v10679_v39 = vld [vmem:[%s14785_s7 + $0x7e4] sm:$0xf] }
 0xcb6   : > { %6225 = vmatpush.bf16.msra.mxu3 %v9757_v26 }
 0xcb7   : > { %v5955_v30 = vpop.f32.mrf.mxu2 }
 0xcb8   : > { %v5958_v52 = vpack.c.bf16 %v5955_v30, %v5953_v2  ;;  %v9816_v2 = vor.u32 %v10659_v54, %v9815_v8  ;;  %v10680_v54 = vld [vmem:[%s14785_s7 + $0x7e4] sm:$0xf0] }
 0xcba   : > { %6064 = vmatmul.bf16.vlgmr.msra.gmra.mxu0 %v5958_v52  ;;  %6078 = vmatmul.bf16.vlgmr.msra.gmra.mxu2 %v5958_v52  ;;  %v9807_v52 = vld [vmem:[%s14785_s7 + $0x730] sm:$0xf] }
 0xcbb   : > { %6226 = vmatpush.bf16.msra.mxu3 %v9749_v28  ;;  %6380 = vmatpush.bf16.msra.mxu0 %v9844_v55  ;;  %v9799_v28 = vld [vmem:[%s14785_s7 + $0x720] sm:$0xf]  ;;  %v10650_v55 = vld [vmem:[%s14785_s7 + $0x704] sm:$0xf] }
 0xcbc   : > { %6369 = vmatpush.bf16.msrb.mxu2 %v9816_v2  ;;  %v9800_v24 = vor.u32 %v10655_v35, %v9799_v28  ;;  %v9920_v2 = vld [vmem:[%s14785_s7 + $0x7e8] sm:$0xf0]  ;;  %v10676_v28 = vld [vmem:[%s14785_s7 + $0x7c4] sm:$0xf0]  ;;  %v10675_v35 = vld [vmem:[%s14785_s7 + $0x7c4] sm:$0xf] }
 0xcbf   : > { %6227 = vmatpush.bf16.msra.mxu3 %v9741_v7  ;;  %6381 = vmatpush.bf16.msra.mxu0 %v9836_v31  ;;  %v9801_v7 = vld [vmem:[%s14785_s7 + $0x728] sm:$0xf0] }
 0xcc3   : > { %6228 = vmatpush.bf16.msra.mxu3 %v9733_v44  ;;  %6382 = vmatpush.bf16.msra.mxu0 %v9828_v56 }
 0xcc7   : > { %6229 = vmatpush.bf16.msra.mxu3 %v9725_v58  ;;  %6383 = vmatpush.bf16.msra.mxu0 %v9820_v23  ;;  %v9923_v23 = vor.u32 %v10679_v39, %v9920_v2  ;;  %v10713_v39 = vld [vmem:[%s14789_s11 + $0x70] sm:$0xff]  ;;  %v10704_v2 = vld [vmem:[%s14789_s11 + $0x28] sm:$0xff] }
 0xcca   : > { %9764 = vmatmul.msk.bf16.vlgmr.msrb.gmra.mxu0 %vm723_vm0, %v10649_v33  ;;  %v10657_v33 = vld [vmem:[%s14785_s7 + $0x734] sm:$0xf0] }
 0xccb   : > { %6230 = vmatpush.bf16.msra.mxu3 %v9717_v6  ;;  %v9808_v26 = vor.u32 %v10657_v33, %v9807_v52  ;;  %6384 = vmatpush.bf16.msra.mxu0 %v9812_v57  ;;  %v9788_v6 = vor.u32 %v10650_v55, %v9785_v59  ;;  %v10678_v52 = vld [vmem:[%s14785_s7 + $0x7d4] sm:$0xf0]  ;;  %v10677_v33 = vld [vmem:[%s14785_s7 + $0x7d4] sm:$0xf]  ;;  %v9902_v57 = vld [vmem:[%s14785_s7 + $0x7c0] sm:$0xf] }
 0xccc   : > { %v10670_v59 = vld [vmem:[%s14785_s7 + $0x794] sm:$0xf0] }
 0xccd   : > { %6370 = vmatpush.bf16.msrb.mxu2 %v9808_v26  ;;  %v9912_v26 = vld [vmem:[%s14785_s7 + $0x7d8] sm:$0xf0] }
 0xcce   : > { %v9915_v47 = vor.u32 %v10677_v33, %v9912_v26  ;;  %v10695_v33 = vld [vmem:[%s14787_s9 + $0x60] sm:$0xff] }
 0xccf   : > { %6231 = vmatpush.bf16.msra.mxu3 %v9709_v20  ;;  %v10703_v26 = vld [vmem:[%s14789_s11 + $0x20] sm:$0xff] }
 0xcd1   : > { %6371 = vmatpush.bf16.msrb.mxu2 %v9800_v24  ;;  %v9904_v24 = vld [vmem:[%s14785_s7 + $0x7c8] sm:$0xf0] }
 0xcd3   : > { %6232 = vmatpush.bf16.msra.mxu3 %v9701_v22  ;;  %v9918_v22 = vld [vmem:[%s14785_s7 + $0x7e0] sm:$0xf] }
 0xcd4   : > { %v9919_v29 = vor.u32 %v10680_v54, %v9918_v22  ;;  %v10705_v54 = vld [vmem:[%s14789_s11 + $0x30] sm:$0xff] }
 0xcd5   : > { %6372 = vmatpush.bf16.msrb.mxu2 %v9792_v63  ;;  %v10672_v63 = vld [vmem:[%s14785_s7 + $0x7a4] sm:$0xf0] }
 0xcd7   : > { %6521 = vmatpush.bf16.msrb.mxu3 %v9927_v60  ;;  %v10668_v60 = vld [vmem:[%s14785_s7 + $0x784] sm:$0xf0] }
 0xcdb   : > { %6522 = vmatpush.bf16.msrb.mxu3 %v9919_v29  ;;  %v10688_v29 = vld [vmem:[%s14787_s9 + $0x28] sm:$0xff] }
 0xd22   : > { %v5924_v30 = vpop.f32.mrf.mxu1 }
 0xd23   : > { %v14249_v49 = vadd.f32 %v5924_v30, %v14123_v14  ;;  %v10654_v14 = vld [vmem:[%s14785_s7 + $0x724] sm:$0xf]  ;;  %v9910_v30 = vld [vmem:[%s14785_s7 + $0x7d0] sm:$0xf] }
 0xd24   : > { %v9804_v43 = vor.u32 %v10654_v14, %v9801_v7  ;;  %v9911_v32 = vor.u32 %v10678_v52, %v9910_v30  ;;  %v9903_v14 = vor.u32 %v10676_v28, %v9902_v57  ;;  %v9907_v7 = vor.u32 %v10675_v35, %v9904_v24  ;;  %v10687_v52 = vld [vmem:[%s14787_s9 + $0x20] sm:$0xff]  ;;  %v10702_v24 = vld [vmem:[%s14789_s11 + $0x18] sm:$0xff] }
 0xd26   : > { %6385 = vmatpush.bf16.msra.mxu0 %v9804_v43  ;;  %6523 = vmatpush.bf16.msrb.mxu3 %v9911_v32  ;;  %v9895_v43 = vor.u32 %v10674_v34, %v9894_v12  ;;  %v10685_v12 = vld [vmem:[%s14787_s9 + $0x10] sm:$0xff] }
 0xd27   : > { %v10693_v34 = vld [vmem:[%s14787_s9 + $0x50] sm:$0xff] }
 0xd28   : > { %v5910_v44 = vpop.f32.mrf.mxu3 }
 0xd29   : > { %v5929_v58 = vadd.f32 %v5910_v44, %v14125_v50  ;;  %v9784_v50 = vor.u32 %v10651_v13, %v9783_v0  ;;  %v10673_v44 = vld [vmem:[%s14785_s7 + $0x7b4] sm:$0xf]  ;;  %v9888_v13 = vld [vmem:[%s14785_s7 + $0x7a8] sm:$0xf0] }
 0xd2a   : > { %6386 = vmatpush.bf16.msra.mxu0 %v9796_v51  ;;  %6524 = vmatpush.bf16.msrb.mxu3 %v9903_v14  ;;  %v9899_v61 = vor.u32 %v10673_v44, %v9896_v5  ;;  %v10671_v51 = vld [vmem:[%s14785_s7 + $0x7a4] sm:$0xf]  ;;  %v10694_v14 = vld [vmem:[%s14787_s9 + $0x58] sm:$0xff]  ;;  %v10701_v44 = vld [vmem:[%s14789_s11 + $0x10] sm:$0xff] }
 0xd2b   : > { %6373 = vmatpush.bf16.msrb.mxu2 %v9784_v50  ;;  %v9891_v55 = vor.u32 %v10671_v51, %v9888_v13  ;;  %v9878_v50 = vld [vmem:[%s14785_s7 + $0x790] sm:$0xf]  ;;  %v10684_v5 = vld [vmem:[%s14787_s9 + $0x8] sm:$0xff]  ;;  %v10683_v51 = vld [vmem:[%s14787_s9] sm:$0xff] }
 0xd2c   : > { %v10699_v13 = vld [vmem:[%s14789_s11] sm:$0xff] }
 0xd2e   : > { %6387 = vmatpush.bf16.msra.mxu0 %v9788_v6  ;;  %6525 = vmatpush.bf16.msrb.mxu3 %v9895_v43  ;;  %v9879_v6 = vor.u32 %v10670_v59, %v9878_v50  ;;  %v10709_v43 = vld [vmem:[%s14789_s11 + $0x50] sm:$0xff]  ;;  %v10707_v50 = vld [vmem:[%s14789_s11 + $0x40] sm:$0xff] }
 0xd2f   : > { %v10118_v59 = vld [vmem:[%s14791_s13 + $0x70] sm:$0xf] }
 0xd30   : > { %v5912_v3 = vpop.f32.mrf.mxu3 }
 0xd31   : > { %v5931_v38 = vadd.f32 %v5912_v3, %v14128_v11  ;;  %v10681_v11 = vld [vmem:[%s14785_s7 + $0x7f4] sm:$0xf] }
 0xd32   : > { %v9931_v4 = vor.u32 %v10681_v11, %v9928_v62  ;;  %v10669_v3 = vld [vmem:[%s14785_s7 + $0x794] sm:$0xf]  ;;  %v9872_v11 = vld [vmem:[%s14785_s7 + $0x788] sm:$0xf0]  ;;  %v14398_v62 = vpop.f32.mrf.mxu1 }
 0xd37   : > { %v6065_v31 = vpop.f32.mrf.mxu0 }
 0xd38   : > { %v14300_v48 = vadd.f32 %v6065_v31, %v5929_v58  ;;  %v6108_v15 = vpop.f32.mrf.mxu3  ;;  %v9886_v58 = vld [vmem:[%s14785_s7 + $0x7a0] sm:$0xf]  ;;  %v10667_v31 = vld [vmem:[%s14785_s7 + $0x784] sm:$0xf] }
 0xd39   : > { %v9887_v0 = vor.u32 %v10672_v63, %v9886_v58  ;;  %v10700_v58 = vld [vmem:[%s14789_s11 + $0x8] sm:$0xff] }
 0xd3a   : > { %v10708_v63 = vld [vmem:[%s14789_s11 + $0x48] sm:$0xff] }
 0xd3b   : > { %6526 = vmatpush.bf16.msrb.mxu3 %v9887_v0  ;;  %v10691_v0 = vld [vmem:[%s14787_s9 + $0x40] sm:$0xff] }
 0xd3f   : > { %v6067_v20 = vpop.f32.mrf.mxu0  ;;  %6527 = vmatpush.bf16.msrb.mxu3 %v9879_v6  ;;  %v14510_v6 = vpop.f32.mrf.mxu2 }
 0xd40   : > { %v14308_v46 = vadd.f32 %v6067_v20, %v5931_v38  ;;  %v6110_v16 = vpop.f32.mrf.mxu3  ;;  %v9880_v38 = vld [vmem:[%s14785_s7 + $0x798] sm:$0xf0]  ;;  %v9875_v20 = vor.u32 %v10667_v31, %v9872_v11 }
 0xd41   : > { %v6113_v10 = vpack.c.bf16 %v6110_v16, %v6108_v15  ;;  %v9883_v36 = vor.u32 %v10669_v3, %v9880_v38  ;;  %v9871_v15 = vor.u32 %v10668_v60, %v9870_v41  ;;  %v10690_v16 = vld [vmem:[%s14787_s9 + $0x38] sm:$0xff] }
 0xd42   : > { %6723 = vmatpush.bf16.msra.mxu2 %v10690_v16  ;;  %v10730_v3 = vld [vmem:[%s14791_s13 + $0x74] sm:$0xf0]  ;;  %v10120_v31 = vld [vmem:[%s14791_s13 + $0x78] sm:$0xf0] }
 0xd43   : > { %6219 = vmatmul.bf16.vlgmr.msrb.gmra.mxu1 %v6113_v10  ;;  %6233 = vmatmul.bf16.vlgmr.msra.gmra.mxu3 %v6113_v10  ;;  %v10706_v10 = vld [vmem:[%s14789_s11 + $0x38] sm:$0xff]  ;;  %v10119_v38 = vor.u32 %v10730_v3, %v10118_v59 }
 0xd44   : > { %6535 = vmatpush.bf16.msrb.mxu1 %v9931_v4  ;;  %6528 = vmatpush.bf16.msrb.mxu3 %v9871_v15  ;;  %v10698_v4 = vld [vmem:[%s14787_s9 + $0x78] sm:$0xff]  ;;  %v10745_v15 = vld [vmem:[%s14791_s13 + $0xf4] sm:$0xf] }
 0xd45   : > { %6737 = vmatpush.bf16.msrb.mxu0 %v10698_v4  ;;  %v10184_v11 = vld [vmem:[%s14791_s13 + $0xf8] sm:$0xf0]  ;;  %v10728_v4 = vld [vmem:[%s14791_s13 + $0x64] sm:$0xf0] }
 0xd46   : > { %v10187_v16 = vor.u32 %v10745_v15, %v10184_v11  ;;  %v10088_v15 = vld [vmem:[%s14791_s13 + $0x38] sm:$0xf0] }
 0xd47   : > { %v6263_v56 = vpop.f32.mrf.mxu0 }
 0xd48   : > { %6536 = vmatpush.bf16.msrb.mxu1 %v9923_v23  ;;  %6883 = vmatpush.bf16.msra.mxu3 %v10706_v10  ;;  %v10712_v23 = vld [vmem:[%s14789_s11 + $0x68] sm:$0xff]  ;;  %v10174_v10 = vld [vmem:[%s14791_s13 + $0xe0] sm:$0xf] }
 0xd4c   : > { %6537 = vmatpush.bf16.msrb.mxu1 %v9915_v47  ;;  %6884 = vmatpush.bf16.msra.mxu3 %v10705_v54  ;;  %v10711_v47 = vld [vmem:[%s14789_s11 + $0x60] sm:$0xff]  ;;  %v10112_v54 = vld [vmem:[%s14791_s13 + $0x68] sm:$0xf0] }
 0xd4f   : > { %v6265_v25 = vpop.f32.mrf.mxu0 }
 0xd50   : > { %v6268_v8 = vpack.c.bf16 %v6265_v25, %v6263_v56  ;;  %6538 = vmatpush.bf16.msrb.mxu1 %v9907_v7  ;;  %v10714_v56 = vld [vmem:[%s14789_s11 + $0x78] sm:$0xff]  ;;  %6885 = vmatpush.bf16.msra.mxu3 %v10704_v2 }
 0xd51   : > { %v10710_v7 = vld [vmem:[%s14789_s11 + $0x58] sm:$0xff] }
 0xd52   : > { %6374 = vmatmul.bf16.vlgmr.msrb.gmra.mxu2 %v6268_v8  ;;  %6388 = vmatmul.bf16.vlgmr.msra.gmra.mxu0 %v6268_v8  ;;  %v10697_v8 = vld [vmem:[%s14787_s9 + $0x70] sm:$0xff] }
 0xd53   : > { %9851 = vmatmul.msk.bf16.vlgmr.msra.gmra.mxu1 %vm723_vm0, %v10666_v27  ;;  %v10689_v27 = vld [vmem:[%s14787_s9 + $0x30] sm:$0xff]  ;;  %6738 = vmatpush.bf16.msrb.mxu0 %v10697_v8  ;;  %v10727_v8 = vld [vmem:[%s14791_s13 + $0x64] sm:$0xf] }
 0xd54   : > { %6539 = vmatpush.bf16.msrb.mxu1 %v9899_v61  ;;  %6724 = vmatpush.bf16.msra.mxu2 %v10689_v27  ;;  %v10692_v61 = vld [vmem:[%s14787_s9 + $0x48] sm:$0xff] }
 0xd55   : > { %6886 = vmatpush.bf16.msra.mxu3 %v10703_v26  ;;  %v10744_v27 = vld [vmem:[%s14791_s13 + $0xe4] sm:$0xf0] }
 0xd58   : > { %6540 = vmatpush.bf16.msrb.mxu1 %v9891_v55  ;;  %6725 = vmatpush.bf16.msra.mxu2 %v10688_v29  ;;  %v4381_v55 = vadd.f32 %v13414_v9, %v13384_v53  ;;  %v10182_v53 = vld [vmem:[%s14791_s13 + $0xf0] sm:$0xf]  ;;  %v10746_v9 = vld [vmem:[%s14791_s13 + $0xf4] sm:$0xf0]  ;;  %v10115_v29 = vor.u32 %v10727_v8, %v10112_v54  ;;  %v10142_v8 = vld [vmem:[%s14791_s13 + $0xa0] sm:$0xf] }
 0xd59   : > { %6887 = vmatpush.bf16.msra.mxu3 %v10702_v24  ;;  %v10183_v60 = vor.u32 %v10746_v9, %v10182_v53  ;;  %v10741_v24 = vld [vmem:[%s14791_s13 + $0xd4] sm:$0xf]  ;;  %v10736_v54 = vld [vmem:[%s14791_s13 + $0xa4] sm:$0xf0] }
 0xd5a   : > { %v4537_v41 = vadd.f32 %v13661_v1, %v4381_v55  ;;  %v10110_v1 = vld [vmem:[%s14791_s13 + $0x60] sm:$0xf]  ;;  %v10739_v55 = vld [vmem:[%s14791_s13 + $0xc4] sm:$0xf] }
 0xd5c   : > { %6541 = vmatpush.bf16.msrb.mxu1 %v9883_v36  ;;  %6726 = vmatpush.bf16.msra.mxu2 %v10687_v52  ;;  %v10729_v36 = vld [vmem:[%s14791_s13 + $0x74] sm:$0xf]  ;;  %v10726_v52 = vld [vmem:[%s14791_s13 + $0x54] sm:$0xf0] }
 0xd5d   : > { %6888 = vmatpush.bf16.msra.mxu3 %v10701_v44  ;;  %v10094_v44 = vld [vmem:[%s14791_s13 + $0x40] sm:$0xf] }
 0xd60   : > { %6542 = vmatpush.bf16.msrb.mxu1 %v9875_v20  ;;  %v10123_v20 = vor.u32 %v10729_v36, %v10120_v31  ;;  %v10086_v36 = vld [vmem:[%s14791_s13 + $0x30] sm:$0xf] }
 0xd61   : > { %6889 = vmatpush.bf16.msra.mxu3 %v10700_v58 }
 0xd64   : > { %6897 = vmatpush.bf16.msra.mxu1 %v10714_v56  ;;  %v4692_v56 = vadd.f32 %v13675_v18, %v4537_v41  ;;  %v10743_v18 = vld [vmem:[%s14791_s13 + $0xe4] sm:$0xf]  ;;  %v10722_v41 = vld [vmem:[%s14791_s13 + $0x34] sm:$0xf0] }
 0xd65   : > { %6890 = vmatpush.bf16.msra.mxu3 %v10699_v13  ;;  %v10087_v31 = vor.u32 %v10722_v41, %v10086_v36 }
 0xd66   : > { %v4847_v2 = vadd.f32 %v13721_v45, %v4692_v56  ;;  %v10742_v45 = vld [vmem:[%s14791_s13 + $0xd4] sm:$0xf0] }
 0xd68   : > { %6898 = vmatpush.bf16.msra.mxu1 %v10713_v39  ;;  %v10175_v39 = vor.u32 %v10744_v27, %v10174_v10  ;;  %v5002_v26 = vadd.f32 %v13907_v40, %v4847_v2  ;;  %v10720_v27 = vld [vmem:[%s14791_s13 + $0x24] sm:$0xf0]  ;;  %v10735_v2 = vld [vmem:[%s14791_s13 + $0xa4] sm:$0xf] }
 0xd6c   : > { %6899 = vmatpush.bf16.msra.mxu1 %v10712_v23 }
 0xd70   : > { %6900 = vmatpush.bf16.msra.mxu1 %v10711_v47 }
 0xd74   : > { %6901 = vmatpush.bf16.msra.mxu1 %v10710_v7  ;;  %v10168_v7 = vld [vmem:[%s14791_s13 + $0xd8] sm:$0xf0] }
 0xd78   : > { %6902 = vmatpush.bf16.msra.mxu1 %v10709_v43  ;;  %v10724_v43 = vld [vmem:[%s14791_s13 + $0x44] sm:$0xf0] }
 0xd79   : > { %v10095_v58 = vor.u32 %v10724_v43, %v10094_v44 }
 0xd7c   : > { %6903 = vmatpush.bf16.msra.mxu1 %v10708_v63  ;;  %v10723_v63 = vld [vmem:[%s14791_s13 + $0x44] sm:$0xf] }
 0xd80   : > { %6904 = vmatpush.bf16.msra.mxu1 %v10707_v50  ;;  %v10160_v50 = vld [vmem:[%s14791_s13 + $0xc8] sm:$0xf0] }
 0xd81   : > { %v10163_v3 = vor.u32 %v10739_v55, %v10160_v50  ;;  %v10732_v55 = vld [vmem:[%s14791_s13 + $0x84] sm:$0xf0]  ;;  %v10715_v50 = vld [vmem:[%s14791_s13 + $0x4] sm:$0xf] }
 0xdc0   : > { %v6220_v25 = vpop.f32.mrf.mxu1 }
 0xdc1   : > { %v14419_v22 = vadd.f32 %v6220_v25, %v14300_v48  ;;  %v10696_v48 = vld [vmem:[%s14787_s9 + $0x68] sm:$0xff]  ;;  %v10111_v25 = vor.u32 %v10728_v4, %v10110_v1  ;;  %v10152_v1 = vld [vmem:[%s14791_s13 + $0xb8] sm:$0xf0]  ;;  %v10078_v4 = vld [vmem:[%s14791_s13 + $0x20] sm:$0xf] }
 0xdc2   : > { %6739 = vmatpush.bf16.msrb.mxu0 %v10696_v48  ;;  %v10176_v48 = vld [vmem:[%s14791_s13 + $0xe8] sm:$0xf0] }
 0xdc3   : > { %v10179_v23 = vor.u32 %v10743_v18, %v10176_v48  ;;  %v10079_v18 = vor.u32 %v10720_v27, %v10078_v4  ;;  %v10080_v48 = vld [vmem:[%s14791_s13 + $0x28] sm:$0xf0] }
 0xdc6   : > { %6740 = vmatpush.bf16.msrb.mxu0 %v10695_v33  ;;  %v10166_v33 = vld [vmem:[%s14791_s13 + $0xd0] sm:$0xf]  ;;  %v6234_v47 = vpop.f32.mrf.mxu3 }
 0xdc7   : > { %v10167_v40 = vor.u32 %v10742_v45, %v10166_v33  ;;  %v10144_v33 = vld [vmem:[%s14791_s13 + $0xa8] sm:$0xf0] }
 0xdc8   : > { %v6222_v30 = vpop.f32.mrf.mxu1 }
 0xdc9   : > { %v14446_v32 = vadd.f32 %v6222_v30, %v14308_v46  ;;  %v10686_v46 = vld [vmem:[%s14787_s9 + $0x18] sm:$0xff]  ;;  %v10102_v30 = vld [vmem:[%s14791_s13 + $0x50] sm:$0xf] }
 0xdca   : > { %6727 = vmatpush.bf16.msra.mxu2 %v10686_v46  ;;  %6741 = vmatpush.bf16.msrb.mxu0 %v10694_v14  ;;  %v14579_v46 = vld [vmem:[%s14786_s8] sm:$0x3] }
 0xdcb   : > { %v6556_v9 = vperm.slane %v14579_v46, 1 }
 0xdce   : > { %6728 = vmatpush.bf16.msra.mxu2 %v10685_v12  ;;  %6742 = vmatpush.bf16.msrb.mxu0 %v10693_v34  ;;  %v5157_v12 = vadd.f32 %v13941_v42, %v5002_v26  ;;  %v10171_v34 = vor.u32 %v10741_v24, %v10168_v7  ;;  %v10740_v42 = vld [vmem:[%s14791_s13 + $0xc4] sm:$0xf0]  ;;  %v6236_v56 = vpop.f32.mrf.mxu3  ;;  %v10070_v26 = vld [vmem:[%s14791_s13 + $0x10] sm:$0xf]  ;;  %v10072_v24 = vld [vmem:[%s14791_s13 + $0x18] sm:$0xf0] }
 0xdcf   : > { %v6389_v53 = vpop.f32.mrf.mxu0  ;;  %v10733_v7 = vld [vmem:[%s14791_s13 + $0x94] sm:$0xf] }
 0xdd0   : > { %v6418_v57 = vpop.f32.mrf.mxu1 }
 0xdd2   : > { %6729 = vmatpush.bf16.msra.mxu2 %v10684_v5  ;;  %6743 = vmatpush.bf16.msrb.mxu0 %v10692_v61  ;;  %v10158_v5 = vld [vmem:[%s14791_s13 + $0xc0] sm:$0xf]  ;;  %v14597_v61 = vpop.f32.mrf.mxu2 }
 0xdd3   : > { %v10159_v13 = vor.u32 %v10740_v42, %v10158_v5  ;;  %v10062_v42 = vld [vmem:[%s14791_s13] sm:$0xf] }
 0xdd6   : > { %6730 = vmatpush.bf16.msra.mxu2 %v10683_v51  ;;  %6744 = vmatpush.bf16.msrb.mxu0 %v10691_v0  ;;  %v10096_v51 = vld [vmem:[%s14791_s13 + $0x48] sm:$0xf0]  ;;  %v5312_v0 = vadd.f32 %v14074_v19, %v5157_v12  ;;  %v6085_v19 = vadd.f32 %v14510_v6, %v14249_v49  ;;  %v10738_v49 = vld [vmem:[%s14791_s13 + $0xb4] sm:$0xf0]  ;;  %v10721_v6 = vld [vmem:[%s14791_s13 + $0x34] sm:$0xf] }
 0xdd7   : > { %v10099_v59 = vor.u32 %v10723_v63, %v10096_v51  ;;  %v10136_v12 = vld [vmem:[%s14791_s13 + $0x98] sm:$0xf0]  ;;  %v10716_v63 = vld [vmem:[%s14791_s13 + $0x4] sm:$0xf0]  ;;  %v10126_v51 = vld [vmem:[%s14791_s13 + $0x80] sm:$0xf] }
 0xdd8   : > { %v6420_v28 = vpop.f32.mrf.mxu1  ;;  %v6240_v11 = vadd.f32 %v6234_v47, %v6085_v19  ;;  %v10718_v47 = vld [vmem:[%s14791_s13 + $0x14] sm:$0xf0]  ;;  %v10063_v41 = vor.u32 %v10716_v63, %v10062_v42 }
 0xdd9   : > { %v6423_v35 = vpack.c.bf16 %v6420_v28, %v6418_v57  ;;  %v10103_v57 = vor.u32 %v10726_v52, %v10102_v30  ;;  %v10725_v28 = vld [vmem:[%s14791_s13 + $0x54] sm:$0xf]  ;;  %v10143_v52 = vor.u32 %v10736_v54, %v10142_v8  ;;  %v10071_v44 = vor.u32 %v10718_v47, %v10070_v26 }
 0xdda   : > { %7109 = vmatpush.bf16.msrb.mxu2 %v10119_v38  ;;  %7123 = vmatpush.bf16.msra.mxu0 %v10183_v60  ;;  %v5467_v38 = vadd.f32 %v14121_v37, %v5312_v0  ;;  %v10150_v60 = vld [vmem:[%s14791_s13 + $0xb0] sm:$0xf] }
 0xddb   : > { %6529 = vmatmul.bf16.vlgmr.msrb.gmra.mxu3 %v6423_v35  ;;  %6543 = vmatmul.bf16.vlgmr.msrb.gmra.mxu1 %v6423_v35  ;;  %v10104_v35 = vld [vmem:[%s14791_s13 + $0x58] sm:$0xf0] }
 0xddc   : > { %7137 = vmatpush.bf16.msrb.mxu3 %v10123_v20  ;;  %7151 = vmatpush.bf16.msrb.mxu1 %v10187_v16  ;;  %v10107_v14 = vor.u32 %v10725_v28, %v10104_v35  ;;  %v5622_v37 = vadd.f32 %v14237_v21, %v5467_v38  ;;  %v10151_v20 = vor.u32 %v10738_v49, %v10150_v60  ;;  %v10737_v21 = vld [vmem:[%s14791_s13 + $0xb4] sm:$0xf]  ;;  %v10134_v28 = vld [vmem:[%s14791_s13 + $0x90] sm:$0xf]  ;;  %v10734_v35 = vld [vmem:[%s14791_s13 + $0x94] sm:$0xf0] }
 0xddd   : > { %v10091_v16 = vor.u32 %v10721_v6, %v10088_v15  ;;  %v10731_v38 = vld [vmem:[%s14791_s13 + $0x84] sm:$0xf] }
 0xdde   : > { %7110 = vmatpush.bf16.msrb.mxu2 %v10111_v25  ;;  %7124 = vmatpush.bf16.msra.mxu0 %v10175_v39  ;;  %v5777_v10 = vadd.f32 %v14288_v17, %v5622_v37  ;;  %v10155_v25 = vor.u32 %v10737_v21, %v10152_v1  ;;  %v6395_v39 = vadd.f32 %v6389_v53, %v6240_v11  ;;  %v10719_v17 = vld [vmem:[%s14791_s13 + $0x24] sm:$0xf]  ;;  %v10128_v53 = vld [vmem:[%s14791_s13 + $0x88] sm:$0xf0] }
 0xddf   : > { %v10083_v45 = vor.u32 %v10719_v17, %v10080_v48  ;;  %v10127_v37 = vor.u32 %v10732_v55, %v10126_v51 }
 0xde0   : > { %7138 = vmatpush.bf16.msrb.mxu3 %v10115_v29  ;;  %7152 = vmatpush.bf16.msrb.mxu1 %v10179_v23  ;;  %v6375_v29 = vpop.f32.mrf.mxu2  ;;  %v5932_v23 = vadd.f32 %v14398_v62, %v5777_v10  ;;  %v10147_v62 = vor.u32 %v10735_v2, %v10144_v33 }
 0xde1   : > { %v6394_v5 = vadd.f32 %v6375_v29, %v14419_v22 }
 0xde2   : > { %7111 = vmatpush.bf16.msrb.mxu2 %v10103_v57  ;;  %7125 = vmatpush.bf16.msra.mxu0 %v10167_v40  ;;  %v10717_v40 = vld [vmem:[%s14791_s13 + $0x14] sm:$0xf] }
 0xde3   : > { %v10075_v22 = vor.u32 %v10717_v40, %v10072_v24  ;;  %v10761_v40 = vld [vmem:[%s14788_s10] ss:$0 sm:$0xff] }
 0xde4   : > { %7139 = vmatpush.bf16.msrb.mxu3 %v10107_v14  ;;  %7153 = vmatpush.bf16.msrb.mxu1 %v10171_v34  ;;  %v6087_v14 = vadd.f32 %v14597_v61, %v5932_v23  ;;  %v6555_v34 = vperm.slane %v14579_v46, 0  ;;  %v6391_v61 = vpop.f32.mrf.mxu0 }
 0xde6   : > { %7112 = vmatpush.bf16.msrb.mxu2 %v10095_v58  ;;  %7126 = vmatpush.bf16.msra.mxu0 %v10159_v13  ;;  %v6242_v43 = vadd.f32 %v6236_v56, %v6087_v14  ;;  %v10135_v58 = vor.u32 %v10734_v35, %v10134_v28  ;;  %v10139_v13 = vor.u32 %v10733_v7, %v10136_v12 }
 0xde8   : > { %7140 = vmatpush.bf16.msrb.mxu3 %v10099_v59  ;;  %7154 = vmatpush.bf16.msrb.mxu1 %v10163_v3  ;;  %v10064_v59 = vld [vmem:[%s14791_s13 + $0x8] sm:$0xf0]  ;;  %v6397_v19 = vadd.f32 %v6391_v61, %v6242_v43  ;;  %v6377_v49 = vpop.f32.mrf.mxu2  ;;  %v6943_v61 = vld [vmem:[%s14792_s14] sm:$0x3] }
 0xde9   : > { %v6396_v21 = vadd.f32 %v6377_v49, %v14446_v32  ;;  %v6945_v42 = vperm.slane %v6943_v61, 0  ;;  %v6946_v63 = vperm.slane %v6943_v61, 1 }
 0xdea   : > { %7113 = vmatpush.bf16.msrb.mxu2 %v10087_v31  ;;  %7127 = vmatpush.bf16.msra.mxu0 %v10151_v20  ;;  %v10067_v31 = vor.u32 %v10715_v50, %v10064_v59  ;;  %v10131_v20 = vor.u32 %v10731_v38, %v10128_v53 }
 0xdec   : > { %7141 = vmatpush.bf16.msrb.mxu3 %v10091_v16  ;;  %7155 = vmatpush.bf16.msrb.mxu1 %v10155_v25 }
 0xdee   : > { %7114 = vmatpush.bf16.msrb.mxu2 %v10079_v18  ;;  %7128 = vmatpush.bf16.msra.mxu0 %v10143_v52 }
 0xdf0   : > { %7142 = vmatpush.bf16.msrb.mxu3 %v10083_v45  ;;  %7156 = vmatpush.bf16.msrb.mxu1 %v10147_v62  ;;  %v10762_v45 = vld [vmem:[%s14790_s12] ss:$0 sm:$0xff] }
 0xdf2   : > { %7115 = vmatpush.bf16.msrb.mxu2 %v10071_v44  ;;  %7129 = vmatpush.bf16.msra.mxu0 %v10135_v58 }
 0xdf4   : > { %7143 = vmatpush.bf16.msrb.mxu3 %v10075_v22  ;;  %7157 = vmatpush.bf16.msrb.mxu1 %v10139_v13 }
 0xdf6   : > { %7116 = vmatpush.bf16.msrb.mxu2 %v10063_v41  ;;  %7130 = vmatpush.bf16.msra.mxu0 %v10127_v37 }
 0xdf8   : > { %7144 = vmatpush.bf16.msrb.mxu3 %v10067_v31  ;;  %7158 = vmatpush.bf16.msrb.mxu1 %v10131_v20 }
 0xe58   : > { %v6544_v30 = vpop.f32.mrf.mxu1 }
 0xe59   : > { %v6550_v57 = vadd.f32 %v6544_v30, %v6395_v39 }
 0xe5b   : > { %v6560_v0 = vadd.f32 %v6556_v9, %v6550_v57 }
 0xe5d   : > { %v6568_v6 = vmul.f32 0.1, %v6560_v0  ;;  %vm6564_vm0 = vcmp.ge.f32.partialorder %v6560_v0, 0.0 }
 0xe5e   : > { %v6530_v3 = vpop.f32.mrf.mxu3 }
 0xe5f   : > { %v6549_v36 = vadd.f32 %v6530_v3, %v6394_v5  ;;  %v6572_v1 = vsel %vm6564_vm0, %v6560_v0, %v6568_v6 }
 0xe60   : > { %v6546_v60 = vpop.f32.mrf.mxu1 }
 0xe61   : > { %v6559_v15 = vadd.f32 %v6555_v34, %v6549_v36  ;;  %v6552_v11 = vadd.f32 %v6546_v60, %v6397_v19 }
 0xe63   : > { %vm6563_vm11 = vcmp.ge.f32.partialorder %v6559_v15, 0.0  ;;  %v6567_v16 = vmul.f32 0.1, %v6559_v15  ;;  %v6562_v10 = vadd.f32 %v6556_v9, %v6552_v11 }
 0xe65   : > { %v6571_v4 = vsel %vm6563_vm11, %v6559_v15, %v6567_v16  ;;  %v6570_v8 = vmul.f32 0.1, %v6562_v10  ;;  %vm6566_vm12 = vcmp.ge.f32.partialorder %v6562_v10, 0.0 }
 0xe66   : > { %v14726_v56 = vpack.c.bf16 %v6572_v1, %v6571_v4  ;;  %v6532_v25 = vpop.f32.mrf.mxu3 }
 0xe67   : > { %v6551_v27 = vadd.f32 %v6532_v25, %v6396_v21  ;;  %v6574_v29 = vsel %vm6566_vm12, %v6562_v10, %v6570_v8 }
 0xe68   : > { %v6619_v17 = vunpack.c.l.b16 %v14726_v56  ;;  %v6620_v9 = vunpack.c.h.b16 %v14726_v56  ;;  %v6577_v61 = vunpack.c.l.bf16 %v14726_v56 }
 0xe69   : > { %v6561_v54 = vadd.f32 %v6555_v34, %v6551_v27 }
 0xe6b   : > { %vm6565_vm13 = vcmp.ge.f32.partialorder %v6561_v54, 0.0  ;;  %v6569_v39 = vmul.f32 0.1, %v6561_v54 }
 0xe6d   : > { %v6573_v18 = vsel %vm6565_vm13, %v6561_v54, %v6569_v39 }
 0xe6e   : > { %v14728_v32 = vpack.c.bf16 %v6574_v29, %v6573_v18 }
 0xe70   : > { %v6621_v46 = vunpack.c.l.b16 %v14728_v32  ;;  %v6622_v48 = vunpack.c.h.b16 %v14728_v32 }
 0xe72   : > { %v6623_v2 = vpack.c.b16 %v6621_v46, %v6619_v17  ;;  %v6624_v23 = vpack.c.b16 %v6622_v48, %v6620_v9 }
 0xe74   : > { %6731 = vmatmul.bf16.vlgmr.msra.gmra.mxu2 %v6623_v2  ;;  %6745 = vmatmul.bf16.vlgmr.msrb.gmra.mxu0 %v6624_v23 }
 0xe75   : > { %6891 = vmatmul.bf16.vlgmr.msra.gmra.mxu3 %v6623_v2  ;;  %6905 = vmatmul.bf16.vlgmr.msra.gmra.mxu1 %v6624_v23 }
 0xe84   : > { %7117 = vmatmul.bf16.vlgmr.msrb.gmra.mxu2 %v6623_v2  ;;  %7131 = vmatmul.bf16.vlgmr.msra.gmra.mxu0 %v6624_v23 }
 0xe85   : > { %7145 = vmatmul.bf16.vlgmr.msrb.gmra.mxu3 %v6623_v2  ;;  %7159 = vmatmul.bf16.vlgmr.msrb.gmra.mxu1 %v6624_v23 }
 0xef1   : > { %v6746_v30 = vpop.f32.mrf.mxu0 }
 0xef2   : > { %v6906_v52 = vpop.f32.mrf.mxu1 }
 0xef7   : > { %v6732_v33 = vpop.f32.mrf.mxu2 }
 0xef8   : > { %v6892_v26 = vpop.f32.mrf.mxu3  ;;  %v6733_v7 = vadd.f32 %v10761_v40, %v6732_v33 }
 0xef9   : > { %v6748_v47 = vpop.f32.mrf.mxu0  ;;  %v6893_v14 = vadd.f32 %v10762_v45, %v6892_v26 }
 0xefa   : > { %v6908_v57 = vpop.f32.mrf.mxu1  ;;  %v6747_v58 = vadd.f32 %v6746_v30, %v6733_v7 }
 0xefb   : > { %v6907_v12 = vadd.f32 %v6906_v52, %v6893_v14 }
 0xeff   : > { %v6734_v62 = vpop.f32.mrf.mxu2 }
 0xf00   : > { %v6894_v28 = vpop.f32.mrf.mxu3  ;;  %v6735_v51 = vadd.f32 %v10761_v40, %v6734_v62 }
 0xf01   : > { %v6895_v35 = vadd.f32 %v10762_v45, %v6894_v28  ;;  %v7132_v34 = vpop.f32.mrf.mxu0 }
 0xf02   : > { %v7160_v43 = vpop.f32.mrf.mxu1  ;;  %v6749_v38 = vadd.f32 %v6748_v47, %v6735_v51  ;;  %v7312_v51 = vld [vmem:[%s14793_s15] sm:$0xff] }
 0xf03   : > { %v6909_v24 = vadd.f32 %v6908_v57, %v6895_v35 }
 0xf05   : > { %10188 = vmatpush.xpose.msk.msra.mxu2 %vm7165_vm14, %v6909_v24 }
 0xf07   : > { %v7118_v44 = vpop.f32.mrf.mxu2 }
 0xf08   : > { %v7146_v5 = vpop.f32.mrf.mxu3  ;;  %v7119_v22 = vadd.f32 %v7118_v44, %v6945_v42 }
 0xf09   : > { %10189 = vmatpush.xpose.msk.msra.mxu2 %vm7165_vm14, %v6907_v12  ;;  %v7147_v50 = vadd.f32 %v7146_v5, %v6946_v63  ;;  %v7134_v59 = vpop.f32.mrf.mxu0  ;;  %v7303_v12 = vstv %s7302_s27  ;;  %v6578_v5 = vunpack.c.h.bf16 %v14726_v56  ;;  %v7314_v56 = vld [vmem:[%s14793_s15 + $0x10] sm:$0xff] }
 0xf0a   : > { %v7162_v53 = vpop.f32.mrf.mxu1  ;;  %v7133_v41 = vadd.f32 %v7132_v34, %v7119_v22 }
 0xf0b   : > { %v7161_v60 = vadd.f32 %v7160_v43, %v7147_v50 }
 0xf0c   : > { %10190 = vmatmul.msk.f32.vlgmr.msra.gmra.mxu2 %vm7165_vm14, %v6747_v58 }
 0xf0f   : > { %v7120_v0 = vpop.f32.mrf.mxu2 }
 0xf10   : > { %v7121_v13 = vadd.f32 %v7120_v0, %v6945_v42  ;;  %v7148_v55 = vpop.f32.mrf.mxu3  ;;  %v7313_v42 = vld [vmem:[%s14793_s15 + $0x8] sm:$0xff]  ;;  %v6579_v0 = vunpack.c.l.bf16 %v14728_v32 }
 0xf11   : > { %v7149_v3 = vadd.f32 %v7148_v55, %v6946_v63 }
 0xf12   : > { %v7135_v19 = vadd.f32 %v7134_v59, %v7121_v13  ;;  %v6580_v59 = vunpack.c.h.bf16 %v14728_v32 }
 0xf13   : > { %v7163_v36 = vadd.f32 %v7162_v53, %v7149_v3 }
 0xf14   : > { %10191 = vmatmul.msk.f32.gmra.mxu2 %vm7165_vm14, %v6749_v38  ;;  %7270 = vmatpush.msrb.mxu0 %v7135_v19 }
 0xf15   : > { %10747 = vmatpush.msra.mxu3 %v7135_v19  ;;  %7293 = vmatpush.msrb.mxu2 %v7163_v36  ;;  %v7315_v36 = vld [vmem:[%s14793_s15 + $0x18] sm:$0xff] }
 0xf16   : > { %7271 = vmatpush.msrb.mxu0 %v7133_v41 }
 0xf17   : > { %10748 = vmatpush.msra.mxu3 %v7133_v41  ;;  %7294 = vmatpush.msrb.mxu2 %v7161_v60 }
 0xf8f   : > { %v7195_v37 = vpop.f32.mrf.mxu2 }
 0xf90   : > { %v7202_v31 = vsel %vm7201_vm15, %v7195_v37, -inf }
 0xf91   : > { %7203 = vmax.xlane.f32.xlu0 %v7202_v31 }
 0xf97   : > { %v7198_v49 = vpop.f32.mrf.mxu2 }
 0xf98   : > { %v7205_v6 = vsel %vm7201_vm15, %v7198_v49, -inf }
 0xf99   : > { %7206 = vmax.xlane.f32.xlu0 %v7205_v6 }
0x1004   : > { %v7204_v15 = vpop.xlane.xlu0 %7203 }
0x1005   : > { %v7208_v11 = vsub.f32 %v7195_v37, %v7204_v15 }
0x1007   : > { %v7210_v20 = vmul.f32 1.442695, %v7208_v11 }
0x1009   : > { %10763 = vpow2.f32 %v7210_v20 }
0x100c   : > { %v7207_v16 = vpop.xlane.xlu0 %7206 }
0x100d   : > { %v7209_v21 = vsub.f32 %v7198_v49, %v7207_v16 }
0x100f   : > { %v10764_v1 = vpop.eup %10763  ;;  %v7212_v4 = vmul.f32 1.442695, %v7209_v21 }
0x1010   : > { %v7214_v10 = vsel %vm7201_vm15, %v10764_v1, 0.0 }
0x1011   : > { %10765 = vpow2.f32 %v7212_v4  ;;  %7215 = vadd.xlane.f32.xlu1 %v7214_v10 }
0x1017   : > { %v10766_v25 = vpop.eup %10765 }
0x1018   : > { %v7217_v27 = vsel %vm7201_vm15, %v10766_v25, 0.0 }
0x1019   : > { %7218 = vadd.xlane.f32.xlu1 %v7217_v27 }
0x1084   : > { %v7216_v8 = vpop.xlane.xlu1 %7215 }
0x1085   : > { %10767 = vrcp.f32 %v7216_v8  ;;  %v7231_v17 = vand.u32 2147483648, %v7216_v8  ;;  %v7229_v9 = vand.u32 2147483647, %v7216_v8  ;;  %vm7225_vm2 = vweird.f32 %v7216_v8 }
0x1087   : > { %v7232_v23 = vor.u32 1.1754944e-38, %v7231_v17  ;;  %vm7230_vm4 = vcmp.eq.f32.partialorder %v7229_v9, 8.507059e+37 }
0x108b   : > { %v10768_v54 = vpop.eup %10767 }
0x108c   : > { %v7221_v39 = vmul.f32 %v10768_v54, %v7216_v8  ;;  %v7219_v29 = vpop.xlane.xlu1 %7218  ;;  %vm7226_vm1 = vweird.f32 %v10768_v54 }
0x108d   : > { %10769 = vrcp.f32 %v7219_v29  ;;  %vm7227_vm3 = vmor %vm7225_vm2, %vm7226_vm1  ;;  %v7246_v57 = vand.u32 2147483648, %v7219_v29  ;;  %v7244_v62 = vand.u32 2147483647, %v7219_v29  ;;  %vm7240_vm6 = vweird.f32 %v7219_v29 }
0x108e   : > { %v7222_v18 = vsub.f32 1.0, %v7221_v39 }
0x108f   : > { %v7247_v35 = vor.u32 1.1754944e-38, %v7246_v57  ;;  %vm7245_vm8 = vcmp.eq.f32.partialorder %v7244_v62, 8.507059e+37 }
0x1090   : > { %v7223_v46 = vmul.f32 %v10768_v54, %v7222_v18 }
0x1092   : > { %v7224_v48 = vadd.f32 %v10768_v54, %v7223_v46 }
0x1093   : > { %v10770_v2 = vpop.eup %10769 }
0x1094   : > { %v7228_v30 = vsel %vm7227_vm3, %v10768_v54, %v7224_v48  ;;  %v7236_v52 = vmul.f32 %v10770_v2, %v7219_v29  ;;  %vm7241_vm5 = vweird.f32 %v10770_v2 }
0x1095   : > { %v7233_v33 = vsel %vm7230_vm4, %v7232_v23, %v7228_v30  ;;  %vm7242_vm7 = vmor %vm7240_vm6, %vm7241_vm5 }
0x1096   : > { %v7234_v26 = vmul.f32 %v10764_v1, %v7233_v33  ;;  %v7237_v47 = vsub.f32 1.0, %v7236_v52 }
0x1098   : > { %v7238_v45 = vmul.f32 %v10770_v2, %v7237_v47  ;;  %10192 = vmatmul.msk.f32.vlgmr.msrb.gmra.mxu0 %vm7201_vm15, %v7234_v26  ;;  %10194 = vmatmul.msk.f32.vlgmr.msrb.gmra.mxu2 %vm7201_vm15, %v7234_v26 }
0x109a   : > { %v7239_v28 = vadd.f32 %v10770_v2, %v7238_v45 }
0x109c   : > { %v7243_v40 = vsel %vm7242_vm7, %v10770_v2, %v7239_v28 }
0x109d   : > { %v7248_v14 = vsel %vm7245_vm8, %v7247_v35, %v7243_v40 }
0x109e   : > { %v7249_v24 = vmul.f32 %v10766_v25, %v7248_v14 }
0x10a0   : > { %10193 = vmatmul.msk.f32.vlgmr.msra.gmra.mxu3 %vm7201_vm15, %v7249_v24  ;;  %10195 = vmatmul.msk.f32.gmra.mxu2 %vm7201_vm15, %v7249_v24 }
0x1115   : > { %v7273_v7 = vpop.f32.mrf.mxu0 }
0x1116   : > { %v7304_v43 = vmul.f32 %v7303_v12, %v7273_v7 }
0x1118   : > { %v7308_v63 = vadd.f32 %v7304_v43, %v6577_v61 }
0x111a   : > { %v7316_v38 = vmul.f32 %v7312_v51, %v7308_v63 }
0x111b   : > { %v7296_v34 = vpop.f32.mrf.mxu2 }
0x111c   : > { %v7305_v44 = vmul.f32 %v7303_v12, %v7296_v34 }
0x111e   : > { %v7309_v58 = vadd.f32 %v7305_v44, %v6578_v5 }
0x1120   : > { %v7317_v55 = vmul.f32 %v7313_v42, %v7309_v58 }
0x1122   : > { %v7320_v60 = vadd.f32 %v7317_v55, %v7316_v38 }
0x1123   : > { %v7276_v22 = vpop.f32.mrf.mxu3  ;;  %v7299_v13 = vpop.f32.mrf.mxu2 }
0x1124   : > { %v7306_v50 = vmul.f32 %v7303_v12, %v7276_v22  ;;  %v7307_v3 = vmul.f32 %v7303_v12, %v7299_v13 }
0x1126   : > { %v7310_v53 = vadd.f32 %v7306_v50, %v6579_v0  ;;  %v7311_v19 = vadd.f32 %v7307_v3, %v6580_v59 }
0x1128   : > { %v7318_v41 = vmul.f32 %v7314_v56, %v7310_v53  ;;  %v7319_v37 = vmul.f32 %v7315_v36, %v7311_v19 }
0x112a   : > { %v7321_v31 = vadd.f32 %v7320_v60, %v7318_v41 }
0x112c   : > { %v7322_v49 = vadd.f32 %v7321_v31, %v7319_v37 }
0x112e   : > { %7323 = vadd.xlane.f32.xlu2 %v7322_v49 }
0x11a1   : > { %v7324_v32 = vpop.xlane.xlu2 %7323 }
0x11a2   : > { %v7325_v6 = vrot.slane %v7324_v32, 4 }
0x11a4   : > { %v7326_v15 = vadd.f32 %v7325_v6, %v7324_v32 }
0x11a6   : > { %v7327_v11 = vrot.slane %v7326_v15, 2 }
0x11a8   : > { %v7328_v20 = vadd.f32 %v7327_v11, %v7326_v15 }
0x11aa   : > { %v7329_v16 = vrot.slane %v7328_v20, 1 }
0x11ac   : > { %v7330_v21 = vadd.f32 %v7329_v16, %v7328_v20 }
0x11ae   : > { %10749 = vpush %v7330_v21 }
0x11df   : > { %s10750_s23 = spop %10749 }
0x11e0   : > { %s7333_s27 = sadd.f32 %s10750_s23, %s7332_s2 }
0x11e2   : > { %v7334_v1 = vstv %s7333_s27 }
0x11e3   : > { %7335 = vst [vmem:[%s573_s26] sm:$0x1] %v7334_v1 }
0x11e4 PF: > { %s30_s0 = sadd.s32 1, %s10777_s0  }
0x11e5   : > { %p27_p4 = scmp.ge.s32.totalorder %s30_s0, 4  }
0x11e7   :  { %29 = sbr.rel (!%p27_p4) target bundleno = 6 (0x6), region = 182 }

</bundles_post_ra>
